<compile_context>
chip_gen: v6e
topology: v6e:2x2x1
jax: 0.10.0
libtpu: 0.0.40
codegen_flags: <defaults>
</compile_context>

<pallas_src>
import numpy as np
import jax
import jax.numpy as jnp
from jax.experimental import pallas as pl
from jax.experimental.pallas import tpu as pltpu

# ----------------------------- configuration -----------------------------
B = 2            # batch
DIM = 32         # channels (C)
NUM_HEADS = 4
HEAD_DIM = DIM // NUM_HEADS
H = W = 8        # spatial
WINDOW = 4       # window_size (min(H, W) > WINDOW, so it is kept as-is)
SHIFT = 2        # shift_size (0 < SHIFT < WINDOW -> shifted windows + attention mask)
MLP_RATIO = 4.0
HIDDEN = int(DIM * MLP_RATIO)
N_TOK = WINDOW * WINDOW               # tokens per window (16)
N_WIN = (H // WINDOW) * (W // WINDOW) # windows per image (4)
SCALE = HEAD_DIM ** -0.5
LN_EPS = 1e-5
NEG_INF = -1e9                        # cross-window blocks (exp underflows to exactly 0)


# ------------------- static (pure numpy) precomputations -------------------
def _token_permutation():
    """perm[p] = original token index feeding window-token position p
    (window-major (hb, wb), row-major (r, c) inside the window), i.e. the composition of
    torch.roll(-SHIFT) and window_partition."""
    perm = np.empty(H * W, np.int64)
    p = 0
    for hb in range(H // WINDOW):
        for wb in range(W // WINDOW):
            for r in range(WINDOW):
                for cc in range(WINDOW):
                    hs = (hb * WINDOW + r + SHIFT) % H
                    ws = (wb * WINDOW + cc + SHIFT) % W
                    perm[p] = hs * W + ws
                    p += 1
    return perm


def _np_window_mask():
    """Shift-window attention mask per image-window, identical to the PyTorch construction.
    Returns (N_WIN, N_TOK, N_TOK) float32 with values {0, -100}."""
    if SHIFT == 0:
        return np.zeros((N_WIN, N_TOK, N_TOK), np.float32)
    img = np.zeros((H, W), np.float32)
    cnt = 0
    for hs in (slice(0, H - WINDOW), slice(H - WINDOW, H - SHIFT), slice(H - SHIFT, None)):
        for ws in (slice(0, W - WINDOW), slice(W - WINDOW, W - SHIFT), slice(W - SHIFT, None)):
            img[hs, ws] = cnt
            cnt += 1
    win = img.reshape(H // WINDOW, WINDOW, W // WINDOW, WINDOW)
    win = win.transpose(0, 2, 1, 3).reshape(N_WIN, N_TOK)
    diff = win[:, None, :] - win[:, :, None]
    return np.where(diff != 0, np.float32(-100.0), np.float32(0.0)).astype(np.float32)


def _np_full_mask(batch):
    """Block-diagonal additive mask over all batch*N_WIN windows flattened into one token
    axis: shift-mask on the diagonal window blocks, NEG_INF everywhere else.  Head-independent
    constant -> baked into the jitted graph, no per-call compute."""
    n_bw = batch * N_WIN
    wm = _np_window_mask()
    full = np.full((n_bw, N_TOK, n_bw, N_TOK), NEG_INF, np.float32)
    for g in range(n_bw):
        full[g, :, g, :] = wm[g % N_WIN]
    l_tot = n_bw * N_TOK
    return full.reshape(l_tot, l_tot)


def _np_onehot(batch):
    """onehot[i, i % N_TOK] = 1.  Used inside the kernel to expand the (16,16) rel-pos bias
    to the full (L, L) block-periodic pattern with two MXU matmuls."""
    l_tot = batch * N_WIN * N_TOK
    oh = np.zeros((l_tot, N_TOK), np.float32)
    oh[np.arange(l_tot), np.arange(l_tot) % N_TOK] = 1.0
    return oh


def _np_relative_position_index():
    coords = np.stack(np.meshgrid(np.arange(WINDOW), np.arange(WINDOW), indexing="ij"))
    cf = coords.reshape(2, -1)
    rel = cf[:, :, None] - cf[:, None, :]
    rel = rel.transpose(1, 2, 0).astype(np.int64)
    rel[:, :, 0] += WINDOW - 1
    rel[:, :, 1] += WINDOW - 1
    rel[:, :, 0] *= 2 * WINDOW - 1
    return rel.sum(-1)                                      # (N_TOK, N_TOK)


PERM = _token_permutation()
INV_PERM = np.argsort(PERM)
REL_IDX = _np_relative_position_index()


# ----------------------------- pallas kernel -----------------------------
def _gelu_erf(x):
    """Exact (erf-based) GELU matching nn.GELU(). erf via Abramowitz-Stegun 7.1.26
    (max abs error ~1.5e-7), built only from ops with guaranteed Mosaic lowerings."""
    z = x * 0.7071067811865476
    az = jnp.abs(z)
    t = 1.0 / (1.0 + 0.3275911 * az)
    poly = ((((1.061405429 * t - 1.453152027) * t + 1.421413741) * t
             - 0.284496736) * t + 0.254829592) * t
    erf_abs = 1.0 - poly * jnp.exp(-az * az)
    erf_z = jnp.where(z >= 0, erf_abs, -erf_abs)
    return 0.5 * x * (1.0 + erf_z)


def swin_block_kernel(x_ref, mask_ref, onehot_ref, relb_ref,
                      g1_ref, b1_ref, wqkv_ref, bqkv_ref, wproj_ref, bproj_ref,
                      g2_ref, b2_ref, w1_ref, bb1_ref, w2_ref, bb2_ref,
                      o_ref):
    """Fully fused Swin block on all B*nW windows at once.

    x_ref:      (L, C)      tokens, already in (shifted, window-partitioned) order
    mask_ref:   (L, L)      shift mask on diagonal window blocks, NEG_INF off-diagonal (const)
    onehot_ref: (L, N_TOK)  onehot[i, i % N_TOK] = 1 (const)
    relb_ref:   (heads, N_TOK, N_TOK) relative-position bias (from the learned table)
    Output:     (L, C)      block output in the same permuted token order.
    """
    x = x_ref[...]                                            # (L, C), f32

    # ---- norm1 (per-token LayerNorm over channels) ----
    mu = jnp.mean(x, axis=-1, keepdims=True)
    var = jnp.mean(jnp.square(x - mu), axis=-1, keepdims=True)
    xn = (x - mu) * jax.lax.rsqrt(var + LN_EPS) * g1_ref[0] + b1_ref[0]

    # ---- QKV projection (softmax scale pre-folded into the Q columns) ----
    qkv = jnp.dot(xn, wqkv_ref[...], preferred_element_type=jnp.float32) + bqkv_ref[0]

    onehot = onehot_ref[...]                                  # (L, N_TOK)
    mask = mask_ref[...]                                      # (L, L)

    # ---- per-head dense masked attention; output projection accumulated per head ----
    attn_out = jnp.zeros_like(x)
    for hd in range(NUM_HEADS):                               # static unroll (4 heads)
        o0 = hd * HEAD_DIM
        qh = qkv[:, o0:o0 + HEAD_DIM]                         # (L, hd)
        kh = qkv[:, DIM + o0:DIM + o0 + HEAD_DIM]             # (L, hd)
        vh = qkv[:, 2 * DIM + o0:2 * DIM + o0 + HEAD_DIM]     # (L, hd)

        s = jax.lax.dot_general(qh, kh, (((1,), (1,)), ((), ())),
                                preferred_element_type=jnp.float32)   # (L, L)
        # Relative-position bias expanded to (L, L) on the MXU:
        #   (onehot @ relb_h)[i, :] = relb_h[i % 16, :]  ->  (... @ onehot^T)[i, j] = relb_h[i%16, j%16]
        rel_rows = jnp.dot(onehot, relb_ref[hd],
                           preferred_element_type=jnp.float32)        # (L, N_TOK)
        s = s + jax.lax.dot_general(rel_rows, onehot, (((1,), (1,)), ((), ())),
                                    preferred_element_type=jnp.float32)
        s = s + mask

        # softmax over the full token axis; cross-window entries carry NEG_INF -> exactly 0
        s = s - jnp.max(s, axis=-1, keepdims=True)
        e = jnp.exp(s)
        denom = jnp.sum(e, axis=-1, keepdims=True)            # (L, 1)
        # normalize after the PV matmul: divide (L, hd) instead of (L, L)
        oh = jnp.dot(e, vh, preferred_element_type=jnp.float32) / denom
        attn_out = attn_out + jnp.dot(oh, wproj_ref[o0:o0 + HEAD_DIM, :],
                                      preferred_element_type=jnp.float32)

    y = x + attn_out + bproj_ref[0]                           # residual 1 (+ proj bias)

    # ---- norm2 + MLP (fc1 -> exact GELU -> fc2) + residual 2 ----
    mu2 = jnp.mean(y, axis=-1, keepdims=True)
    var2 = jnp.mean(jnp.square(y - mu2), axis=-1, keepdims=True)
    yn = (y - mu2) * jax.lax.rsqrt(var2 + LN_EPS) * g2_ref[0] + b2_ref[0]

    hid = jnp.dot(yn, w1_ref[...], preferred_element_type=jnp.float32) + bb1_ref[0]
    hid = _gelu_erf(hid)
    mlp = jnp.dot(hid, w2_ref[...], preferred_element_type=jnp.float32) + bb2_ref[0]

    o_ref[...] = (y + mlp).astype(o_ref.dtype)


# ----------------------------- JAX wrapper -----------------------------
def init_params(key):
    ks = jax.random.split(key, 8)
    std = 0.02
    return dict(
        g1=jnp.ones((1, DIM), jnp.float32),
        b1=jnp.zeros((1, DIM), jnp.float32),
        w_qkv=std * jax.random.normal(ks[0], (DIM, 3 * DIM), jnp.float32),
        b_qkv=jnp.zeros((1, 3 * DIM), jnp.float32),
        w_proj=std * jax.random.normal(ks[1], (DIM, DIM), jnp.float32),
        b_proj=jnp.zeros((1, DIM), jnp.float32),
        rel_bias_table=std * jax.random.normal(
            ks[2], ((2 * WINDOW - 1) * (2 * WINDOW - 1), NUM_HEADS), jnp.float32),
        g2=jnp.ones((1, DIM), jnp.float32),
        b2=jnp.zeros((1, DIM), jnp.float32),
        w_fc1=std * jax.random.normal(ks[3], (DIM, HIDDEN), jnp.float32),
        b_fc1=jnp.zeros((1, HIDDEN), jnp.float32),
        w_fc2=std * jax.random.normal(ks[4], (HIDDEN, DIM), jnp.float32),
        b_fc2=jnp.zeros((1, DIM), jnp.float32),
    )


def swin_attention_block(x_nchw, params):
    """x_nchw: (B, C, H, W) float32 -> (B, C, H, W) float32."""
    b, c, h, w = x_nchw.shape
    assert (c, h, w) == (DIM, H, W)
    l_tot = b * h * w

    # b c h w -> b (h w) c, then apply the static shift+window-partition token permutation.
    tokens = jnp.transpose(x_nchw, (0, 2, 3, 1)).reshape(b, h * w, c)
    x_win = jnp.take(tokens, jnp.asarray(PERM, dtype=jnp.int32), axis=1).reshape(l_tot, c)

    # Compact attention-side inputs (the (L, L) fused bias is now built inside the kernel):
    mask_full = jnp.asarray(_np_full_mask(b))                # (L, L) constant
    onehot = jnp.asarray(_np_onehot(b))                      # (L, N_TOK) constant
    rel_bias = params["rel_bias_table"][REL_IDX.reshape(-1)]
    rel_bias = jnp.transpose(rel_bias.reshape(N_TOK, N_TOK, NUM_HEADS), (2, 0, 1))  # (H,16,16)

    # Fold the softmax scale into the Q columns of the QKV projection.
    qscale = jnp.concatenate([jnp.full((DIM,), SCALE, jnp.float32),
                              jnp.ones((2 * DIM,), jnp.float32)])
    w_qkv = params["w_qkv"] * qscale[None, :]
    b_qkv = params["b_qkv"] * qscale[None, :]

    rep2 = lambda i: (0, 0)
    rep3 = lambda i: (0, 0, 0)

    out_flat = pl.pallas_call(
        swin_block_kernel,
        out_shape=jax.ShapeDtypeStruct((l_tot, c), jnp.float32),
        grid=(1,),
        in_specs=[
            pl.BlockSpec((l_tot, c), rep2),                    # tokens (permuted)
            pl.BlockSpec((l_tot, l_tot), rep2),                # shift + block-diag mask
            pl.BlockSpec((l_tot, N_TOK), rep2),                # onehot (i % N_TOK)
            pl.BlockSpec((NUM_HEADS, N_TOK, N_TOK), rep3),     # rel-pos bias per head
            pl.BlockSpec((1, DIM), rep2),                      # g1
            pl.BlockSpec((1, DIM), rep2),                      # b1
            pl.BlockSpec((DIM, 3 * DIM), rep2),                # w_qkv (scaled)
            pl.BlockSpec((1, 3 * DIM), rep2),                  # b_qkv (scaled)
            pl.BlockSpec((DIM, DIM), rep2),                    # w_proj
            pl.BlockSpec((1, DIM), rep2),                      # b_proj
            pl.BlockSpec((1, DIM), rep2),                      # g2
            pl.BlockSpec((1, DIM), rep2),                      # b2
            pl.BlockSpec((DIM, HIDDEN), rep2),                 # w_fc1
            pl.BlockSpec((1, HIDDEN), rep2),                   # b_fc1
            pl.BlockSpec((HIDDEN, DIM), rep2),                 # w_fc2
            pl.BlockSpec((1, DIM), rep2),                      # b_fc2
        ],
        out_specs=pl.BlockSpec((l_tot, c), rep2),
        compiler_params=pltpu.CompilerParams(dimension_semantics=("parallel",)),
    )(x_win, mask_full, onehot, rel_bias, params["g1"], params["b1"], w_qkv, b_qkv,
      params["w_proj"], params["b_proj"], params["g2"], params["b2"],
      params["w_fc1"], params["b_fc1"], params["w_fc2"], params["b_fc2"])

    # Inverse permutation (window reverse + unshift), back to b c h w.
    out_tokens = jnp.take(out_flat.reshape(b, h * w, c),
                          jnp.asarray(INV_PERM, dtype=jnp.int32), axis=1)
    return jnp.transpose(out_tokens.reshape(b, h, w, c), (0, 3, 1, 2))


# ----------------------------- main -----------------------------
if __name__ == "__main__":
    key = jax.random.PRNGKey(0)
    kx, kp = jax.random.split(key)
    x = jax.random.normal(kx, (B, DIM, H, W), jnp.float32)   # NCHW, like PyTorch
    params = init_params(kp)

    out = jax.jit(swin_attention_block)(x, params)
    out = jax.block_until_ready(out)
    assert out.shape == (B, DIM, H, W), out.shape
    assert bool(jnp.all(jnp.isfinite(out)))
    print("KERNEL_OK")
</pallas_src>

<mosaic_0001>
module attributes {stable_mosaic.version = 11 : i64} {
  func.func @swin_block_kernel(%arg0: i32, %arg1: memref<128x32xf32, #tpu.memory_space<vmem>>, %arg2: memref<128x128xf32, #tpu.memory_space<vmem>>, %arg3: memref<128x16xf32, #tpu.memory_space<vmem>>, %arg4: memref<4x16x16xf32, #tpu.memory_space<vmem>>, %arg5: memref<1x32xf32, #tpu.memory_space<vmem>>, %arg6: memref<1x32xf32, #tpu.memory_space<vmem>>, %arg7: memref<32x96xf32, #tpu.memory_space<vmem>>, %arg8: memref<1x96xf32, #tpu.memory_space<vmem>>, %arg9: memref<32x32xf32, #tpu.memory_space<vmem>>, %arg10: memref<1x32xf32, #tpu.memory_space<vmem>>, %arg11: memref<1x32xf32, #tpu.memory_space<vmem>>, %arg12: memref<1x32xf32, #tpu.memory_space<vmem>>, %arg13: memref<32x128xf32, #tpu.memory_space<vmem>>, %arg14: memref<1x128xf32, #tpu.memory_space<vmem>>, %arg15: memref<128x32xf32, #tpu.memory_space<vmem>>, %arg16: memref<1x32xf32, #tpu.memory_space<vmem>>, %arg17: memref<128x32xf32, #tpu.memory_space<vmem>>) attributes {dimension_semantics = [#tpu.dimension_semantics<parallel>], iteration_bounds = array<i64: 1>, scalar_prefetch = 0 : i64, scratch_operands = 0 : i64, tpu.core_type = #tpu.core_type<tc>, window_params = [{pipeline_mode = #tpu.pipeline_mode<synchronous>, transform_indices = @transform_0, window_bounds = array<i64: 128, 32>}, {pipeline_mode = #tpu.pipeline_mode<synchronous>, transform_indices = @transform_1, window_bounds = array<i64: 128, 128>}, {pipeline_mode = #tpu.pipeline_mode<synchronous>, transform_indices = @transform_2, window_bounds = array<i64: 128, 16>}, {pipeline_mode = #tpu.pipeline_mode<synchronous>, transform_indices = @transform_3, window_bounds = array<i64: 4, 16, 16>}, {pipeline_mode = #tpu.pipeline_mode<synchronous>, transform_indices = @transform_4, window_bounds = array<i64: 1, 32>}, {pipeline_mode = #tpu.pipeline_mode<synchronous>, transform_indices = @transform_5, window_bounds = array<i64: 1, 32>}, {pipeline_mode = #tpu.pipeline_mode<synchronous>, transform_indices = @transform_6, window_bounds = array<i64: 32, 96>}, {pipeline_mode = #tpu.pipeline_mode<synchronous>, transform_indices = @transform_7, window_bounds = array<i64: 1, 96>}, {pipeline_mode = #tpu.pipeline_mode<synchronous>, transform_indices = @transform_8, window_bounds = array<i64: 32, 32>}, {pipeline_mode = #tpu.pipeline_mode<synchronous>, transform_indices = @transform_9, window_bounds = array<i64: 1, 32>}, {pipeline_mode = #tpu.pipeline_mode<synchronous>, transform_indices = @transform_10, window_bounds = array<i64: 1, 32>}, {pipeline_mode = #tpu.pipeline_mode<synchronous>, transform_indices = @transform_11, window_bounds = array<i64: 1, 32>}, {pipeline_mode = #tpu.pipeline_mode<synchronous>, transform_indices = @transform_12, window_bounds = array<i64: 32, 128>}, {pipeline_mode = #tpu.pipeline_mode<synchronous>, transform_indices = @transform_13, window_bounds = array<i64: 1, 128>}, {pipeline_mode = #tpu.pipeline_mode<synchronous>, transform_indices = @transform_14, window_bounds = array<i64: 128, 32>}, {pipeline_mode = #tpu.pipeline_mode<synchronous>, transform_indices = @transform_15, window_bounds = array<i64: 1, 32>}, {pipeline_mode = #tpu.pipeline_mode<synchronous>, transform_indices = @transform_16, window_bounds = array<i64: 128, 32>}]} {
    %c0 = arith.constant 0 : index
    %c0_0 = arith.constant 0 : index
    %0 = vector.load %arg1[%c0, %c0_0] : memref<128x32xf32, #tpu.memory_space<vmem>>, vector<128x32xf32>
    %cst = arith.constant dense<0.000000e+00> : vector<128xf32>
    %1 = vector.multi_reduction <add>, %0, %cst [1] : vector<128x32xf32> to vector<128xf32>
    %2 = vector.shape_cast %1 : vector<128xf32> to vector<128x1xf32>
    %cst_1 = arith.constant 3.200000e+01 : f32
    %3 = vector.broadcast %cst_1 : f32 to vector<128x1xf32>
    %4 = arith.divf %2, %3 : vector<128x1xf32>
    %5 = vector.broadcast %4 : vector<128x1xf32> to vector<128x32xf32>
    %6 = arith.subf %0, %5 : vector<128x32xf32>
    %7 = arith.mulf %6, %6 : vector<128x32xf32>
    %cst_2 = arith.constant dense<0.000000e+00> : vector<128xf32>
    %8 = vector.multi_reduction <add>, %7, %cst_2 [1] : vector<128x32xf32> to vector<128xf32>
    %9 = vector.shape_cast %8 : vector<128xf32> to vector<128x1xf32>
    %cst_3 = arith.constant 3.200000e+01 : f32
    %10 = vector.broadcast %cst_3 : f32 to vector<128x1xf32>
    %11 = arith.divf %9, %10 : vector<128x1xf32>
    %12 = vector.broadcast %4 : vector<128x1xf32> to vector<128x32xf32>
    %13 = arith.subf %0, %12 : vector<128x32xf32>
    %cst_4 = arith.constant 9.99999974E-6 : f32
    %14 = vector.broadcast %cst_4 : f32 to vector<128x1xf32>
    %15 = arith.addf %11, %14 : vector<128x1xf32>
    %16 = math.rsqrt %15 : vector<128x1xf32>
    %17 = vector.broadcast %16 : vector<128x1xf32> to vector<128x32xf32>
    %18 = arith.mulf %13, %17 : vector<128x32xf32>
    %c0_5 = arith.constant 0 : index
    %c0_6 = arith.constant 0 : index
    %19 = vector.load %arg5[%c0_5, %c0_6] : memref<1x32xf32, #tpu.memory_space<vmem>>, vector<1x32xf32>
    %20 = vector.shape_cast %19 : vector<1x32xf32> to vector<32xf32>
    %21 = vector.shape_cast %20 : vector<32xf32> to vector<1x32xf32>
    %22 = vector.broadcast %21 : vector<1x32xf32> to vector<128x32xf32>
    %23 = arith.mulf %18, %22 : vector<128x32xf32>
    %c0_7 = arith.constant 0 : index
    %c0_8 = arith.constant 0 : index
    %24 = vector.load %arg6[%c0_7, %c0_8] : memref<1x32xf32, #tpu.memory_space<vmem>>, vector<1x32xf32>
    %25 = vector.shape_cast %24 : vector<1x32xf32> to vector<32xf32>
    %26 = vector.shape_cast %25 : vector<32xf32> to vector<1x32xf32>
    %27 = vector.broadcast %26 : vector<1x32xf32> to vector<128x32xf32>
    %28 = arith.addf %23, %27 : vector<128x32xf32>
    %c0_9 = arith.constant 0 : index
    %c0_10 = arith.constant 0 : index
    %29 = vector.load %arg7[%c0_9, %c0_10] : memref<32x96xf32, #tpu.memory_space<vmem>>, vector<32x96xf32>
    %cst_11 = arith.constant dense<0.000000e+00> : vector<128x96xf32>
    %30 = tpu.matmul %28, %29, %cst_11 {dimension_numbers = #tpu.dot_dimension_numbers<[1], [0], [0], [1], [0, 0, 1, 1], [], []>} : vector<128x32xf32>, vector<32x96xf32>, vector<128x96xf32> -> vector<128x96xf32>
    %c0_12 = arith.constant 0 : index
    %c0_13 = arith.constant 0 : index
    %31 = vector.load %arg8[%c0_12, %c0_13] : memref<1x96xf32, #tpu.memory_space<vmem>>, vector<1x96xf32>
    %32 = vector.shape_cast %31 : vector<1x96xf32> to vector<96xf32>
    %33 = vector.shape_cast %32 : vector<96xf32> to vector<1x96xf32>
    %34 = vector.broadcast %33 : vector<1x96xf32> to vector<128x96xf32>
    %35 = arith.addf %30, %34 : vector<128x96xf32>
    %c0_14 = arith.constant 0 : index
    %c0_15 = arith.constant 0 : index
    %36 = vector.load %arg3[%c0_14, %c0_15] : memref<128x16xf32, #tpu.memory_space<vmem>>, vector<128x16xf32>
    %c0_16 = arith.constant 0 : index
    %c0_17 = arith.constant 0 : index
    %37 = vector.load %arg2[%c0_16, %c0_17] : memref<128x128xf32, #tpu.memory_space<vmem>>, vector<128x128xf32>
    %cst_18 = arith.constant 0.000000e+00 : f32
    %38 = vector.broadcast %cst_18 : f32 to vector<128x32xf32>
    %39 = vector.extract_strided_slice %35 {offsets = [0, 0], sizes = [128, 8], strides = [1, 1]} : vector<128x96xf32> to vector<128x8xf32>
    %40 = vector.extract_strided_slice %35 {offsets = [0, 32], sizes = [128, 8], strides = [1, 1]} : vector<128x96xf32> to vector<128x8xf32>
    %41 = vector.extract_strided_slice %35 {offsets = [0, 64], sizes = [128, 8], strides = [1, 1]} : vector<128x96xf32> to vector<128x8xf32>
    %cst_19 = arith.constant dense<0.000000e+00> : vector<128x128xf32>
    %42 = tpu.matmul %39, %40, %cst_19 {dimension_numbers = #tpu.dot_dimension_numbers<[1], [1], [0], [0], [0, 0, 1, 0], [], []>} : vector<128x8xf32>, vector<128x8xf32>, vector<128x128xf32> -> vector<128x128xf32>
    %c0_20 = arith.constant 0 : index
    %c0_21 = arith.constant 0 : index
    %c0_22 = arith.constant 0 : index
    %43 = vector.load %arg4[%c0_20, %c0_21, %c0_22] : memref<4x16x16xf32, #tpu.memory_space<vmem>>, vector<1x16x16xf32>
    %44 = vector.shape_cast %43 : vector<1x16x16xf32> to vector<16x16xf32>
    %cst_23 = arith.constant dense<0.000000e+00> : vector<128x16xf32>
    %45 = tpu.matmul %36, %44, %cst_23 {dimension_numbers = #tpu.dot_dimension_numbers<[1], [0], [0], [1], [0, 0, 1, 1], [], []>} : vector<128x16xf32>, vector<16x16xf32>, vector<128x16xf32> -> vector<128x16xf32>
    %cst_24 = arith.constant dense<0.000000e+00> : vector<128x128xf32>
    %46 = tpu.matmul %45, %36, %cst_24 {dimension_numbers = #tpu.dot_dimension_numbers<[1], [1], [0], [0], [0, 0, 1, 0], [], []>} : vector<128x16xf32>, vector<128x16xf32>, vector<128x128xf32> -> vector<128x128xf32>
    %47 = arith.addf %42, %46 : vector<128x128xf32>
    %48 = arith.addf %47, %37 : vector<128x128xf32>
    %cst_25 = arith.constant dense<0xFF800000> : vector<128xf32>
    %49 = vector.multi_reduction <maximumf>, %48, %cst_25 [1] : vector<128x128xf32> to vector<128xf32>
    %50 = vector.shape_cast %49 : vector<128xf32> to vector<128x1xf32>
    %51 = vector.broadcast %50 : vector<128x1xf32> to vector<128x128xf32>
    %52 = arith.subf %48, %51 : vector<128x128xf32>
    %53 = math.exp %52 : vector<128x128xf32>
    %cst_26 = arith.constant dense<0.000000e+00> : vector<128xf32>
    %54 = vector.multi_reduction <add>, %53, %cst_26 [1] : vector<128x128xf32> to vector<128xf32>
    %55 = vector.shape_cast %54 : vector<128xf32> to vector<128x1xf32>
    %cst_27 = arith.constant dense<0.000000e+00> : vector<128x8xf32>
    %56 = tpu.matmul %53, %41, %cst_27 {dimension_numbers = #tpu.dot_dimension_numbers<[1], [0], [0], [1], [0, 0, 1, 1], [], []>} : vector<128x128xf32>, vector<128x8xf32>, vector<128x8xf32> -> vector<128x8xf32>
    %57 = vector.broadcast %55 : vector<128x1xf32> to vector<128x8xf32>
    %58 = arith.divf %56, %57 : vector<128x8xf32>
    %c0_28 = arith.constant 0 : index
    %c0_29 = arith.constant 0 : index
    %59 = vector.load %arg9[%c0_28, %c0_29] : memref<32x32xf32, #tpu.memory_space<vmem>>, vector<8x32xf32>
    %cst_30 = arith.constant dense<0.000000e+00> : vector<128x32xf32>
    %60 = tpu.matmul %58, %59, %cst_30 {dimension_numbers = #tpu.dot_dimension_numbers<[1], [0], [0], [1], [0, 0, 1, 1], [], []>} : vector<128x8xf32>, vector<8x32xf32>, vector<128x32xf32> -> vector<128x32xf32>
    %61 = arith.addf %38, %60 : vector<128x32xf32>
    %62 = vector.extract_strided_slice %35 {offsets = [0, 8], sizes = [128, 8], strides = [1, 1]} : vector<128x96xf32> to vector<128x8xf32>
    %63 = vector.extract_strided_slice %35 {offsets = [0, 40], sizes = [128, 8], strides = [1, 1]} : vector<128x96xf32> to vector<128x8xf32>
    %64 = vector.extract_strided_slice %35 {offsets = [0, 72], sizes = [128, 8], strides = [1, 1]} : vector<128x96xf32> to vector<128x8xf32>
    %cst_31 = arith.constant dense<0.000000e+00> : vector<128x128xf32>
    %65 = tpu.matmul %62, %63, %cst_31 {dimension_numbers = #tpu.dot_dimension_numbers<[1], [1], [0], [0], [0, 0, 1, 0], [], []>} : vector<128x8xf32>, vector<128x8xf32>, vector<128x128xf32> -> vector<128x128xf32>
    %c1 = arith.constant 1 : index
    %c0_32 = arith.constant 0 : index
    %c0_33 = arith.constant 0 : index
    %66 = vector.load %arg4[%c1, %c0_32, %c0_33] : memref<4x16x16xf32, #tpu.memory_space<vmem>>, vector<1x16x16xf32>
    %67 = vector.shape_cast %66 : vector<1x16x16xf32> to vector<16x16xf32>
    %cst_34 = arith.constant dense<0.000000e+00> : vector<128x16xf32>
    %68 = tpu.matmul %36, %67, %cst_34 {dimension_numbers = #tpu.dot_dimension_numbers<[1], [0], [0], [1], [0, 0, 1, 1], [], []>} : vector<128x16xf32>, vector<16x16xf32>, vector<128x16xf32> -> vector<128x16xf32>
    %cst_35 = arith.constant dense<0.000000e+00> : vector<128x128xf32>
    %69 = tpu.matmul %68, %36, %cst_35 {dimension_numbers = #tpu.dot_dimension_numbers<[1], [1], [0], [0], [0, 0, 1, 0], [], []>} : vector<128x16xf32>, vector<128x16xf32>, vector<128x128xf32> -> vector<128x128xf32>
    %70 = arith.addf %65, %69 : vector<128x128xf32>
    %71 = arith.addf %70, %37 : vector<128x128xf32>
    %cst_36 = arith.constant dense<0xFF800000> : vector<128xf32>
    %72 = vector.multi_reduction <maximumf>, %71, %cst_36 [1] : vector<128x128xf32> to vector<128xf32>
    %73 = vector.shape_cast %72 : vector<128xf32> to vector<128x1xf32>
    %74 = vector.broadcast %73 : vector<128x1xf32> to vector<128x128xf32>
    %75 = arith.subf %71, %74 : vector<128x128xf32>
    %76 = math.exp %75 : vector<128x128xf32>
    %cst_37 = arith.constant dense<0.000000e+00> : vector<128xf32>
    %77 = vector.multi_reduction <add>, %76, %cst_37 [1] : vector<128x128xf32> to vector<128xf32>
    %78 = vector.shape_cast %77 : vector<128xf32> to vector<128x1xf32>
    %cst_38 = arith.constant dense<0.000000e+00> : vector<128x8xf32>
    %79 = tpu.matmul %76, %64, %cst_38 {dimension_numbers = #tpu.dot_dimension_numbers<[1], [0], [0], [1], [0, 0, 1, 1], [], []>} : vector<128x128xf32>, vector<128x8xf32>, vector<128x8xf32> -> vector<128x8xf32>
    %80 = vector.broadcast %78 : vector<128x1xf32> to vector<128x8xf32>
    %81 = arith.divf %79, %80 : vector<128x8xf32>
    %c8 = arith.constant 8 : index
    %c0_39 = arith.constant 0 : index
    %82 = vector.load %arg9[%c8, %c0_39] : memref<32x32xf32, #tpu.memory_space<vmem>>, vector<8x32xf32>
    %cst_40 = arith.constant dense<0.000000e+00> : vector<128x32xf32>
    %83 = tpu.matmul %81, %82, %cst_40 {dimension_numbers = #tpu.dot_dimension_numbers<[1], [0], [0], [1], [0, 0, 1, 1], [], []>} : vector<128x8xf32>, vector<8x32xf32>, vector<128x32xf32> -> vector<128x32xf32>
    %84 = arith.addf %61, %83 : vector<128x32xf32>
    %85 = vector.extract_strided_slice %35 {offsets = [0, 16], sizes = [128, 8], strides = [1, 1]} : vector<128x96xf32> to vector<128x8xf32>
    %86 = vector.extract_strided_slice %35 {offsets = [0, 48], sizes = [128, 8], strides = [1, 1]} : vector<128x96xf32> to vector<128x8xf32>
    %87 = vector.extract_strided_slice %35 {offsets = [0, 80], sizes = [128, 8], strides = [1, 1]} : vector<128x96xf32> to vector<128x8xf32>
    %cst_41 = arith.constant dense<0.000000e+00> : vector<128x128xf32>
    %88 = tpu.matmul %85, %86, %cst_41 {dimension_numbers = #tpu.dot_dimension_numbers<[1], [1], [0], [0], [0, 0, 1, 0], [], []>} : vector<128x8xf32>, vector<128x8xf32>, vector<128x128xf32> -> vector<128x128xf32>
    %c2 = arith.constant 2 : index
    %c0_42 = arith.constant 0 : index
    %c0_43 = arith.constant 0 : index
    %89 = vector.load %arg4[%c2, %c0_42, %c0_43] : memref<4x16x16xf32, #tpu.memory_space<vmem>>, vector<1x16x16xf32>
    %90 = vector.shape_cast %89 : vector<1x16x16xf32> to vector<16x16xf32>
    %cst_44 = arith.constant dense<0.000000e+00> : vector<128x16xf32>
    %91 = tpu.matmul %36, %90, %cst_44 {dimension_numbers = #tpu.dot_dimension_numbers<[1], [0], [0], [1], [0, 0, 1, 1], [], []>} : vector<128x16xf32>, vector<16x16xf32>, vector<128x16xf32> -> vector<128x16xf32>
    %cst_45 = arith.constant dense<0.000000e+00> : vector<128x128xf32>
    %92 = tpu.matmul %91, %36, %cst_45 {dimension_numbers = #tpu.dot_dimension_numbers<[1], [1], [0], [0], [0, 0, 1, 0], [], []>} : vector<128x16xf32>, vector<128x16xf32>, vector<128x128xf32> -> vector<128x128xf32>
    %93 = arith.addf %88, %92 : vector<128x128xf32>
    %94 = arith.addf %93, %37 : vector<128x128xf32>
    %cst_46 = arith.constant dense<0xFF800000> : vector<128xf32>
    %95 = vector.multi_reduction <maximumf>, %94, %cst_46 [1] : vector<128x128xf32> to vector<128xf32>
    %96 = vector.shape_cast %95 : vector<128xf32> to vector<128x1xf32>
    %97 = vector.broadcast %96 : vector<128x1xf32> to vector<128x128xf32>
    %98 = arith.subf %94, %97 : vector<128x128xf32>
    %99 = math.exp %98 : vector<128x128xf32>
    %cst_47 = arith.constant dense<0.000000e+00> : vector<128xf32>
    %100 = vector.multi_reduction <add>, %99, %cst_47 [1] : vector<128x128xf32> to vector<128xf32>
    %101 = vector.shape_cast %100 : vector<128xf32> to vector<128x1xf32>
    %cst_48 = arith.constant dense<0.000000e+00> : vector<128x8xf32>
    %102 = tpu.matmul %99, %87, %cst_48 {dimension_numbers = #tpu.dot_dimension_numbers<[1], [0], [0], [1], [0, 0, 1, 1], [], []>} : vector<128x128xf32>, vector<128x8xf32>, vector<128x8xf32> -> vector<128x8xf32>
    %103 = vector.broadcast %101 : vector<128x1xf32> to vector<128x8xf32>
    %104 = arith.divf %102, %103 : vector<128x8xf32>
    %c16 = arith.constant 16 : index
    %c0_49 = arith.constant 0 : index
    %105 = vector.load %arg9[%c16, %c0_49] : memref<32x32xf32, #tpu.memory_space<vmem>>, vector<8x32xf32>
    %cst_50 = arith.constant dense<0.000000e+00> : vector<128x32xf32>
    %106 = tpu.matmul %104, %105, %cst_50 {dimension_numbers = #tpu.dot_dimension_numbers<[1], [0], [0], [1], [0, 0, 1, 1], [], []>} : vector<128x8xf32>, vector<8x32xf32>, vector<128x32xf32> -> vector<128x32xf32>
    %107 = arith.addf %84, %106 : vector<128x32xf32>
    %108 = vector.extract_strided_slice %35 {offsets = [0, 24], sizes = [128, 8], strides = [1, 1]} : vector<128x96xf32> to vector<128x8xf32>
    %109 = vector.extract_strided_slice %35 {offsets = [0, 56], sizes = [128, 8], strides = [1, 1]} : vector<128x96xf32> to vector<128x8xf32>
    %110 = vector.extract_strided_slice %35 {offsets = [0, 88], sizes = [128, 8], strides = [1, 1]} : vector<128x96xf32> to vector<128x8xf32>
    %cst_51 = arith.constant dense<0.000000e+00> : vector<128x128xf32>
    %111 = tpu.matmul %108, %109, %cst_51 {dimension_numbers = #tpu.dot_dimension_numbers<[1], [1], [0], [0], [0, 0, 1, 0], [], []>} : vector<128x8xf32>, vector<128x8xf32>, vector<128x128xf32> -> vector<128x128xf32>
    %c3 = arith.constant 3 : index
    %c0_52 = arith.constant 0 : index
    %c0_53 = arith.constant 0 : index
    %112 = vector.load %arg4[%c3, %c0_52, %c0_53] : memref<4x16x16xf32, #tpu.memory_space<vmem>>, vector<1x16x16xf32>
    %113 = vector.shape_cast %112 : vector<1x16x16xf32> to vector<16x16xf32>
    %cst_54 = arith.constant dense<0.000000e+00> : vector<128x16xf32>
    %114 = tpu.matmul %36, %113, %cst_54 {dimension_numbers = #tpu.dot_dimension_numbers<[1], [0], [0], [1], [0, 0, 1, 1], [], []>} : vector<128x16xf32>, vector<16x16xf32>, vector<128x16xf32> -> vector<128x16xf32>
    %cst_55 = arith.constant dense<0.000000e+00> : vector<128x128xf32>
    %115 = tpu.matmul %114, %36, %cst_55 {dimension_numbers = #tpu.dot_dimension_numbers<[1], [1], [0], [0], [0, 0, 1, 0], [], []>} : vector<128x16xf32>, vector<128x16xf32>, vector<128x128xf32> -> vector<128x128xf32>
    %116 = arith.addf %111, %115 : vector<128x128xf32>
    %117 = arith.addf %116, %37 : vector<128x128xf32>
    %cst_56 = arith.constant dense<0xFF800000> : vector<128xf32>
    %118 = vector.multi_reduction <maximumf>, %117, %cst_56 [1] : vector<128x128xf32> to vector<128xf32>
    %119 = vector.shape_cast %118 : vector<128xf32> to vector<128x1xf32>
    %120 = vector.broadcast %119 : vector<128x1xf32> to vector<128x128xf32>
    %121 = arith.subf %117, %120 : vector<128x128xf32>
    %122 = math.exp %121 : vector<128x128xf32>
    %cst_57 = arith.constant dense<0.000000e+00> : vector<128xf32>
    %123 = vector.multi_reduction <add>, %122, %cst_57 [1] : vector<128x128xf32> to vector<128xf32>
    %124 = vector.shape_cast %123 : vector<128xf32> to vector<128x1xf32>
    %cst_58 = arith.constant dense<0.000000e+00> : vector<128x8xf32>
    %125 = tpu.matmul %122, %110, %cst_58 {dimension_numbers = #tpu.dot_dimension_numbers<[1], [0], [0], [1], [0, 0, 1, 1], [], []>} : vector<128x128xf32>, vector<128x8xf32>, vector<128x8xf32> -> vector<128x8xf32>
    %126 = vector.broadcast %124 : vector<128x1xf32> to vector<128x8xf32>
    %127 = arith.divf %125, %126 : vector<128x8xf32>
    %c24 = arith.constant 24 : index
    %c0_59 = arith.constant 0 : index
    %128 = vector.load %arg9[%c24, %c0_59] : memref<32x32xf32, #tpu.memory_space<vmem>>, vector<8x32xf32>
    %cst_60 = arith.constant dense<0.000000e+00> : vector<128x32xf32>
    %129 = tpu.matmul %127, %128, %cst_60 {dimension_numbers = #tpu.dot_dimension_numbers<[1], [0], [0], [1], [0, 0, 1, 1], [], []>} : vector<128x8xf32>, vector<8x32xf32>, vector<128x32xf32> -> vector<128x32xf32>
    %130 = arith.addf %107, %129 : vector<128x32xf32>
    %131 = arith.addf %0, %130 : vector<128x32xf32>
    %c0_61 = arith.constant 0 : index
    %c0_62 = arith.constant 0 : index
    %132 = vector.load %arg10[%c0_61, %c0_62] : memref<1x32xf32, #tpu.memory_space<vmem>>, vector<1x32xf32>
    %133 = vector.shape_cast %132 : vector<1x32xf32> to vector<32xf32>
    %134 = vector.shape_cast %133 : vector<32xf32> to vector<1x32xf32>
    %135 = vector.broadcast %134 : vector<1x32xf32> to vector<128x32xf32>
    %136 = arith.addf %131, %135 : vector<128x32xf32>
    %cst_63 = arith.constant dense<0.000000e+00> : vector<128xf32>
    %137 = vector.multi_reduction <add>, %136, %cst_63 [1] : vector<128x32xf32> to vector<128xf32>
    %138 = vector.shape_cast %137 : vector<128xf32> to vector<128x1xf32>
    %cst_64 = arith.constant 3.200000e+01 : f32
    %139 = vector.broadcast %cst_64 : f32 to vector<128x1xf32>
    %140 = arith.divf %138, %139 : vector<128x1xf32>
    %141 = vector.broadcast %140 : vector<128x1xf32> to vector<128x32xf32>
    %142 = arith.subf %136, %141 : vector<128x32xf32>
    %143 = arith.mulf %142, %142 : vector<128x32xf32>
    %cst_65 = arith.constant dense<0.000000e+00> : vector<128xf32>
    %144 = vector.multi_reduction <add>, %143, %cst_65 [1] : vector<128x32xf32> to vector<128xf32>
    %145 = vector.shape_cast %144 : vector<128xf32> to vector<128x1xf32>
    %cst_66 = arith.constant 3.200000e+01 : f32
    %146 = vector.broadcast %cst_66 : f32 to vector<128x1xf32>
    %147 = arith.divf %145, %146 : vector<128x1xf32>
    %148 = vector.broadcast %140 : vector<128x1xf32> to vector<128x32xf32>
    %149 = arith.subf %136, %148 : vector<128x32xf32>
    %cst_67 = arith.constant 9.99999974E-6 : f32
    %150 = vector.broadcast %cst_67 : f32 to vector<128x1xf32>
    %151 = arith.addf %147, %150 : vector<128x1xf32>
    %152 = math.rsqrt %151 : vector<128x1xf32>
    %153 = vector.broadcast %152 : vector<128x1xf32> to vector<128x32xf32>
    %154 = arith.mulf %149, %153 : vector<128x32xf32>
    %c0_68 = arith.constant 0 : index
    %c0_69 = arith.constant 0 : index
    %155 = vector.load %arg11[%c0_68, %c0_69] : memref<1x32xf32, #tpu.memory_space<vmem>>, vector<1x32xf32>
    %156 = vector.shape_cast %155 : vector<1x32xf32> to vector<32xf32>
    %157 = vector.shape_cast %156 : vector<32xf32> to vector<1x32xf32>
    %158 = vector.broadcast %157 : vector<1x32xf32> to vector<128x32xf32>
    %159 = arith.mulf %154, %158 : vector<128x32xf32>
    %c0_70 = arith.constant 0 : index
    %c0_71 = arith.constant 0 : index
    %160 = vector.load %arg12[%c0_70, %c0_71] : memref<1x32xf32, #tpu.memory_space<vmem>>, vector<1x32xf32>
    %161 = vector.shape_cast %160 : vector<1x32xf32> to vector<32xf32>
    %162 = vector.shape_cast %161 : vector<32xf32> to vector<1x32xf32>
    %163 = vector.broadcast %162 : vector<1x32xf32> to vector<128x32xf32>
    %164 = arith.addf %159, %163 : vector<128x32xf32>
    %c0_72 = arith.constant 0 : index
    %c0_73 = arith.constant 0 : index
    %165 = vector.load %arg13[%c0_72, %c0_73] : memref<32x128xf32, #tpu.memory_space<vmem>>, vector<32x128xf32>
    %cst_74 = arith.constant dense<0.000000e+00> : vector<128x128xf32>
    %166 = tpu.matmul %164, %165, %cst_74 {dimension_numbers = #tpu.dot_dimension_numbers<[1], [0], [0], [1], [0, 0, 1, 1], [], []>} : vector<128x32xf32>, vector<32x128xf32>, vector<128x128xf32> -> vector<128x128xf32>
    %c0_75 = arith.constant 0 : index
    %c0_76 = arith.constant 0 : index
    %167 = vector.load %arg14[%c0_75, %c0_76] : memref<1x128xf32, #tpu.memory_space<vmem>>, vector<1x128xf32>
    %168 = vector.shape_cast %167 : vector<1x128xf32> to vector<128xf32>
    %169 = vector.shape_cast %168 : vector<128xf32> to vector<1x128xf32>
    %170 = vector.broadcast %169 : vector<1x128xf32> to vector<128x128xf32>
    %171 = arith.addf %166, %170 : vector<128x128xf32>
    %cst_77 = arith.constant 0.707106769 : f32
    %172 = vector.broadcast %cst_77 : f32 to vector<128x128xf32>
    %173 = arith.mulf %171, %172 : vector<128x128xf32>
    %174 = math.absf %173 : vector<128x128xf32>
    %cst_78 = arith.constant 0.327591091 : f32
    %175 = vector.broadcast %cst_78 : f32 to vector<128x128xf32>
    %176 = arith.mulf %175, %174 : vector<128x128xf32>
    %cst_79 = arith.constant 1.000000e+00 : f32
    %177 = vector.broadcast %cst_79 : f32 to vector<128x128xf32>
    %178 = arith.addf %177, %176 : vector<128x128xf32>
    %cst_80 = arith.constant 1.000000e+00 : f32
    %179 = vector.broadcast %cst_80 : f32 to vector<128x128xf32>
    %180 = arith.divf %179, %178 : vector<128x128xf32>
    %cst_81 = arith.constant 1.06140542 : f32
    %181 = vector.broadcast %cst_81 : f32 to vector<128x128xf32>
    %182 = arith.mulf %181, %180 : vector<128x128xf32>
    %cst_82 = arith.constant 1.45315206 : f32
    %183 = vector.broadcast %cst_82 : f32 to vector<128x128xf32>
    %184 = arith.subf %182, %183 : vector<128x128xf32>
    %185 = arith.mulf %184, %180 : vector<128x128xf32>
    %cst_83 = arith.constant 1.42141378 : f32
    %186 = vector.broadcast %cst_83 : f32 to vector<128x128xf32>
    %187 = arith.addf %185, %186 : vector<128x128xf32>
    %188 = arith.mulf %187, %180 : vector<128x128xf32>
    %cst_84 = arith.constant 0.284496725 : f32
    %189 = vector.broadcast %cst_84 : f32 to vector<128x128xf32>
    %190 = arith.subf %188, %189 : vector<128x128xf32>
    %191 = arith.mulf %190, %180 : vector<128x128xf32>
    %cst_85 = arith.constant 0.254829586 : f32
    %192 = vector.broadcast %cst_85 : f32 to vector<128x128xf32>
    %193 = arith.addf %191, %192 : vector<128x128xf32>
    %194 = arith.mulf %193, %180 : vector<128x128xf32>
    %cst_86 = arith.constant 0.000000e+00 : f32
    %195 = vector.broadcast %cst_86 : f32 to vector<128x128xf32>
    %196 = arith.subf %195, %174 : vector<128x128xf32>
    %197 = arith.mulf %196, %174 : vector<128x128xf32>
    %198 = math.exp %197 : vector<128x128xf32>
    %199 = arith.mulf %194, %198 : vector<128x128xf32>
    %cst_87 = arith.constant 1.000000e+00 : f32
    %200 = vector.broadcast %cst_87 : f32 to vector<128x128xf32>
    %201 = arith.subf %200, %199 : vector<128x128xf32>
    %cst_88 = arith.constant 0.000000e+00 : f32
    %202 = vector.broadcast %cst_88 : f32 to vector<128x128xf32>
    %203 = arith.cmpf oge, %173, %202 : vector<128x128xf32>
    %cst_89 = arith.constant 0.000000e+00 : f32
    %204 = vector.broadcast %cst_89 : f32 to vector<128x128xf32>
    %205 = arith.subf %204, %201 : vector<128x128xf32>
    %206 = arith.select %203, %201, %205 : vector<128x128xi1>, vector<128x128xf32>
    %cst_90 = arith.constant 5.000000e-01 : f32
    %207 = vector.broadcast %cst_90 : f32 to vector<128x128xf32>
    %208 = arith.mulf %207, %171 : vector<128x128xf32>
    %cst_91 = arith.constant 1.000000e+00 : f32
    %209 = vector.broadcast %cst_91 : f32 to vector<128x128xf32>
    %210 = arith.addf %209, %206 : vector<128x128xf32>
    %211 = arith.mulf %208, %210 : vector<128x128xf32>
    %c0_92 = arith.constant 0 : index
    %c0_93 = arith.constant 0 : index
    %212 = vector.load %arg15[%c0_92, %c0_93] : memref<128x32xf32, #tpu.memory_space<vmem>>, vector<128x32xf32>
    %cst_94 = arith.constant dense<0.000000e+00> : vector<128x32xf32>
    %213 = tpu.matmul %211, %212, %cst_94 {dimension_numbers = #tpu.dot_dimension_numbers<[1], [0], [0], [1], [0, 0, 1, 1], [], []>} : vector<128x128xf32>, vector<128x32xf32>, vector<128x32xf32> -> vector<128x32xf32>
    %c0_95 = arith.constant 0 : index
    %c0_96 = arith.constant 0 : index
    %214 = vector.load %arg16[%c0_95, %c0_96] : memref<1x32xf32, #tpu.memory_space<vmem>>, vector<1x32xf32>
    %215 = vector.shape_cast %214 : vector<1x32xf32> to vector<32xf32>
    %216 = vector.shape_cast %215 : vector<32xf32> to vector<1x32xf32>
    %217 = vector.broadcast %216 : vector<1x32xf32> to vector<128x32xf32>
    %218 = arith.addf %213, %217 : vector<128x32xf32>
    %219 = arith.addf %136, %218 : vector<128x32xf32>
    %c0_97 = arith.constant 0 : index
    %c0_98 = arith.constant 0 : index
    %220 = vector.load %arg17[%c0_97, %c0_98] : memref<128x32xf32, #tpu.memory_space<vmem>>, vector<128x32xf32>
    tpu.vector_store %arg17[%c0_97, %c0_98], %219 {strides = array<i32>} : memref<128x32xf32, #tpu.memory_space<vmem>>, vector<128x32xf32>,
    return
  }
  func.func @transform_0(%arg0: i32) -> (i32, i32) {
    %c0_i32 = arith.constant 0 : i32
    %c0_i32_0 = arith.constant 0 : i32
    %c0_i32_1 = arith.constant 0 : i32
    return %c0_i32, %c0_i32_0 : i32, i32
  }
  func.func @transform_1(%arg0: i32) -> (i32, i32) {
    %c0_i32 = arith.constant 0 : i32
    %c0_i32_0 = arith.constant 0 : i32
    %c0_i32_1 = arith.constant 0 : i32
    return %c0_i32, %c0_i32_0 : i32, i32
  }
  func.func @transform_2(%arg0: i32) -> (i32, i32) {
    %c0_i32 = arith.constant 0 : i32
    %c0_i32_0 = arith.constant 0 : i32
    %c0_i32_1 = arith.constant 0 : i32
    return %c0_i32, %c0_i32_0 : i32, i32
  }
  func.func @transform_3(%arg0: i32) -> (i32, i32, i32) {
    %c0_i32 = arith.constant 0 : i32
    %c0_i32_0 = arith.constant 0 : i32
    %c0_i32_1 = arith.constant 0 : i32
    %c0_i32_2 = arith.constant 0 : i32
    return %c0_i32, %c0_i32_0, %c0_i32_1 : i32, i32, i32
  }
  func.func @transform_4(%arg0: i32) -> (i32, i32) {
    %c0_i32 = arith.constant 0 : i32
    %c0_i32_0 = arith.constant 0 : i32
    %c0_i32_1 = arith.constant 0 : i32
    return %c0_i32, %c0_i32_0 : i32, i32
  }
  func.func @transform_5(%arg0: i32) -> (i32, i32) {
    %c0_i32 = arith.constant 0 : i32
    %c0_i32_0 = arith.constant 0 : i32
    %c0_i32_1 = arith.constant 0 : i32
    return %c0_i32, %c0_i32_0 : i32, i32
  }
  func.func @transform_6(%arg0: i32) -> (i32, i32) {
    %c0_i32 = arith.constant 0 : i32
    %c0_i32_0 = arith.constant 0 : i32
    %c0_i32_1 = arith.constant 0 : i32
    return %c0_i32, %c0_i32_0 : i32, i32
  }
  func.func @transform_7(%arg0: i32) -> (i32, i32) {
    %c0_i32 = arith.constant 0 : i32
    %c0_i32_0 = arith.constant 0 : i32
    %c0_i32_1 = arith.constant 0 : i32
    return %c0_i32, %c0_i32_0 : i32, i32
  }
  func.func @transform_8(%arg0: i32) -> (i32, i32) {
    %c0_i32 = arith.constant 0 : i32
    %c0_i32_0 = arith.constant 0 : i32
    %c0_i32_1 = arith.constant 0 : i32
    return %c0_i32, %c0_i32_0 : i32, i32
  }
  func.func @transform_9(%arg0: i32) -> (i32, i32) {
    %c0_i32 = arith.constant 0 : i32
    %c0_i32_0 = arith.constant 0 : i32
    %c0_i32_1 = arith.constant 0 : i32
    return %c0_i32, %c0_i32_0 : i32, i32
  }
  func.func @transform_10(%arg0: i32) -> (i32, i32) {
    %c0_i32 = arith.constant 0 : i32
    %c0_i32_0 = arith.constant 0 : i32
    %c0_i32_1 = arith.constant 0 : i32
    return %c0_i32, %c0_i32_0 : i32, i32
  }
  func.func @transform_11(%arg0: i32) -> (i32, i32) {
    %c0_i32 = arith.constant 0 : i32
    %c0_i32_0 = arith.constant 0 : i32
    %c0_i32_1 = arith.constant 0 : i32
    return %c0_i32, %c0_i32_0 : i32, i32
  }
  func.func @transform_12(%arg0: i32) -> (i32, i32) {
    %c0_i32 = arith.constant 0 : i32
    %c0_i32_0 = arith.constant 0 : i32
    %c0_i32_1 = arith.constant 0 : i32
    return %c0_i32, %c0_i32_0 : i32, i32
  }
  func.func @transform_13(%arg0: i32) -> (i32, i32) {
    %c0_i32 = arith.constant 0 : i32
    %c0_i32_0 = arith.constant 0 : i32
    %c0_i32_1 = arith.constant 0 : i32
    return %c0_i32, %c0_i32_0 : i32, i32
  }
  func.func @transform_14(%arg0: i32) -> (i32, i32) {
    %c0_i32 = arith.constant 0 : i32
    %c0_i32_0 = arith.constant 0 : i32
    %c0_i32_1 = arith.constant 0 : i32
    return %c0_i32, %c0_i32_0 : i32, i32
  }
  func.func @transform_15(%arg0: i32) -> (i32, i32) {
    %c0_i32 = arith.constant 0 : i32
    %c0_i32_0 = arith.constant 0 : i32
    %c0_i32_1 = arith.constant 0 : i32
    return %c0_i32, %c0_i32_0 : i32, i32
  }
  func.func @transform_16(%arg0: i32) -> (i32, i32) {
    %c0_i32 = arith.constant 0 : i32
    %c0_i32_0 = arith.constant 0 : i32
    %c0_i32_1 = arith.constant 0 : i32
    return %c0_i32, %c0_i32_0 : i32, i32
  }
}

</mosaic_0001>

<bundles_post_ra>
// kernel: mul.9
= control target key start
LH: loop header
LB: loop body
LE: loop exit
PB: predicated region body
PF: predicated region fallthrough
CT: control target
= control target key end

     0   :  { %s34_s0 = inlined_call_operand.vmem [shape: f32[1,96], index: 0, kind: input, shape index: {}]   ;;  %s35_s1 = inlined_call_operand.vmem [shape: f32[1,96], index: 1, kind: input, shape index: {}]   ;;  %s36_s2 = inlined_call_operand.vmem [shape: f32[1,96], index: 2, kind: output, shape index: {}]  }
   0x1   :  { %v3_v0 = vld [vmem:[%s34_s0] sm:$0x1] }
   0x2   :  { %v4_v1 = vld [vmem:[%s35_s1] sm:$0x1] }
   0x3   :  { %v7_v2 = vmul.f32 %v4_v1, %v3_v0 }
   0x5   :  { %9 = vst [vmem:[%s36_s2] sm:$0x1] %v7_v2 }

// kernel: swin_attention_block.1
= control target key start
LH: loop header
LB: loop body
LE: loop exit
PB: predicated region body
PF: predicated region fallthrough
CT: control target
= control target key end

     0   :  { %vm69_vm0 = vcmask 261120   ;;  %vm563_vm1 = vcmask 130048   ;;  %vm998_vm2 = vcmask 64512   ;;  %s8985_s27 = smov 64   ;;  %s8986_s28 = smov 88   ;;  %s12368_s0 = inlined_call_operand.vmem [shape: f32[128,32], index: 0, kind: input, shape index: {}]   ;;  %s12369_s6 = inlined_call_operand.vmem [shape: f32[32,96], index: 6, kind: input, shape index: {}]   ;;  %s12370_s3 = inlined_call_operand.vmem [shape: f32[4,16,16], index: 3, kind: input, shape index: {}]   ;;  %s12371_s2 = inlined_call_operand.vmem [shape: f32[128,16], index: 2, kind: input, shape index: {}]   ;;  %s12372_s4 = inlined_call_operand.vmem [shape: f32[1,32], index: 4, kind: input, shape index: {}]   ;;  %s12373_s5 = inlined_call_operand.vmem [shape: f32[1,32], index: 5, kind: input, shape index: {}]   ;;  %s12374_s7 = inlined_call_operand.vmem [shape: f32[1,96], index: 7, kind: input, shape index: {}]   ;;  %s12375_s1 = inlined_call_operand.vmem [shape: f32[128,128], index: 1, kind: input, shape index: {}]   ;;  %s12376_s8 = inlined_call_operand.vmem [shape: f32[32,32], index: 8, kind: input, shape index: {}]   ;;  %s12377_s9 = inlined_call_operand.vmem [shape: f32[1,32], index: 9, kind: input, shape index: {}]   ;;  %s12378_s12 = inlined_call_operand.vmem [shape: f32[32,128], index: 12, kind: input, shape index: {}]   ;;  %s12379_s10 = inlined_call_operand.vmem [shape: f32[1,32], index: 10, kind: input, shape index: {}]   ;;  %s12380_s11 = inlined_call_operand.vmem [shape: f32[1,32], index: 11, kind: input, shape index: {}]   ;;  %s12381_s14 = inlined_call_operand.vmem [shape: f32[128,32], index: 14, kind: input, shape index: {}]   ;;  %s12382_s13 = inlined_call_operand.vmem [shape: f32[1,128], index: 13, kind: input, shape index: {}]   ;;  %s12383_s15 = inlined_call_operand.vmem [shape: f32[1,32], index: 15, kind: input, shape index: {}]   ;;  %s12384_s16 = inlined_call_operand.vmem [shape: f32[128,32], index: 16, kind: output, shape index: {}]  }
   0x1   :  { %12434 = sst [smem:[#allocation30_spill]] %s12368_s0  ;;  %s8989_s17 = smov 80  }
   0x2   :  { %s12435_s23 = sld [smem:[#allocation30_spill]]  ;;  %s8990_s20 = smov 112  }
   0x3   :  { %s8992_s18 = smov 72  }
   0x8   :  { %v53_v0 = vld [vmem:[%s12435_s23] sm:$0xff]  ;;  %v55_v1 = vld [vmem:[%s12435_s23 + $0x10] sm:$0xff]  ;;  %v54_v2 = vld [vmem:[%s12435_s23 + $0x8] sm:$0xff] }
   0x9   :  { %v70_v3 = vsel %vm69_vm0, %v53_v0, 0.0  ;;  %v76_v4 = vsel %vm69_vm0, %v55_v1, 0.0  ;;  %v56_v5 = vld [vmem:[%s12435_s23 + $0x18] sm:$0xff]  ;;  %v73_v6 = vsel %vm69_vm0, %v54_v2, 0.0  ;;  %v57_v8 = vld [vmem:[%s12435_s23 + $0x20] sm:$0xff]  ;;  %v58_v9 = vld [vmem:[%s12435_s23 + $0x28] sm:$0xff] }
   0xa   :  { %71 = vadd.xlane.f32.xlu0 %v70_v3  ;;  %77 = vadd.xlane.f32.xlu1 %v76_v4  ;;  %v79_v7 = vsel %vm69_vm0, %v56_v5, 0.0  ;;  %v82_v10 = vsel %vm69_vm0, %v57_v8, 0.0  ;;  %v85_v11 = vsel %vm69_vm0, %v58_v9, 0.0  ;;  %v9107_v12 = vld [vmem:[%s12435_s23 + $0x30] sm:$0xff]  ;;  %v9112_v13 = vld [vmem:[%s12435_s23 + $0x38] sm:$0xff]  ;;  %v9121_v16 = vld [vmem:[%s12435_s23 + $0x40] sm:$0xff] }
   0xb   :  { %v88_v14 = vsel %vm69_vm0, %v9107_v12, 0.0  ;;  %v91_v15 = vsel %vm69_vm0, %v9112_v13, 0.0  ;;  %v9126_v17 = vld [vmem:[%s12435_s23 + $0x48] sm:$0xff]  ;;  %v94_v18 = vsel %vm69_vm0, %v9121_v16, 0.0  ;;  %v9135_v20 = vld [vmem:[%s12435_s23 + $0x50] sm:$0xff]  ;;  %v9140_v21 = vld [vmem:[%s12435_s23 + $0x58] sm:$0xff] }
   0xc   :  { %v97_v19 = vsel %vm69_vm0, %v9126_v17, 0.0  ;;  %v100_v22 = vsel %vm69_vm0, %v9135_v20, 0.0  ;;  %v103_v23 = vsel %vm69_vm0, %v9140_v21, 0.0  ;;  %v9149_v24 = vld [vmem:[%s12435_s23 + $0x60] sm:$0xff]  ;;  %v9154_v25 = vld [vmem:[%s12435_s23 + $0x68] sm:$0xff]  ;;  %v9163_v28 = vld [vmem:[%s12435_s23 + $0x70] sm:$0xff] }
   0xd   :  { %v106_v26 = vsel %vm69_vm0, %v9149_v24, 0.0  ;;  %v109_v27 = vsel %vm69_vm0, %v9154_v25, 0.0  ;;  %v9168_v29 = vld [vmem:[%s12435_s23 + $0x78] sm:$0xff]  ;;  %v112_v30 = vsel %vm69_vm0, %v9163_v28, 0.0 }
   0xe   :  { %74 = vadd.xlane.f32.xlu0 %v73_v6  ;;  %80 = vadd.xlane.f32.xlu1 %v79_v7  ;;  %v115_v31 = vsel %vm69_vm0, %v9168_v29, 0.0 }
  0x12   :  { %83 = vadd.xlane.f32.xlu0 %v82_v10  ;;  %86 = vadd.xlane.f32.xlu1 %v85_v11 }
  0x16   :  { %89 = vadd.xlane.f32.xlu0 %v88_v14  ;;  %92 = vadd.xlane.f32.xlu1 %v91_v15 }
  0x1a   :  { %95 = vadd.xlane.f32.xlu0 %v94_v18  ;;  %98 = vadd.xlane.f32.xlu1 %v97_v19 }
  0x1e   :  { %101 = vadd.xlane.f32.xlu0 %v100_v22  ;;  %104 = vadd.xlane.f32.xlu1 %v103_v23 }
  0x22   :  { %107 = vadd.xlane.f32.xlu0 %v106_v26  ;;  %110 = vadd.xlane.f32.xlu1 %v109_v27 }
  0x26   :  { %113 = vadd.xlane.f32.xlu0 %v112_v30  ;;  %116 = vadd.xlane.f32.xlu1 %v115_v31 }
  0x93   :  { %v72_v32 = vpop.xlane.xlu0 %71  ;;  %v78_v33 = vpop.xlane.xlu1 %77 }
  0x94   :  { %v119_v34 = vmul.f32 0.03125, %v72_v32  ;;  %v121_v35 = vmul.f32 0.03125, %v78_v33 }
  0x96   :  { %v9174_v36 = vsub.f32 %v53_v0, %v119_v34  ;;  %v9176_v37 = vsub.f32 %v55_v1, %v121_v35 }
  0x97   :  { %v75_v38 = vpop.xlane.xlu0 %74  ;;  %v81_v39 = vpop.xlane.xlu1 %80 }
  0x98   :  { %v120_v40 = vmul.f32 0.03125, %v75_v38  ;;  %v122_v41 = vmul.f32 0.03125, %v81_v39  ;;  %v151_v42 = vmul.f32 %v9174_v36, %v9174_v36  ;;  %v153_v43 = vmul.f32 %v9176_v37, %v9176_v37 }
  0x9a   :  { %v9182_v44 = vsub.f32 %v54_v2, %v120_v40  ;;  %v9184_v45 = vsub.f32 %v56_v5, %v122_v41  ;;  %v167_v46 = vsel %vm69_vm0, %v151_v42, 0.0  ;;  %v173_v49 = vsel %vm69_vm0, %v153_v43, 0.0 }
  0x9b   :  { %168 = vadd.xlane.f32.xlu0 %v167_v46  ;;  %v84_v47 = vpop.xlane.xlu0 %83  ;;  %v87_v48 = vpop.xlane.xlu1 %86 }
  0x9c   :  { %v123_v50 = vmul.f32 0.03125, %v84_v47  ;;  %v124_v51 = vmul.f32 0.03125, %v87_v48  ;;  %v152_v52 = vmul.f32 %v9182_v44, %v9182_v44  ;;  %v154_v53 = vmul.f32 %v9184_v45, %v9184_v45 }
  0x9e   :  { %v9192_v54 = vsub.f32 %v57_v8, %v123_v50  ;;  %v9194_v55 = vsub.f32 %v58_v9, %v124_v51  ;;  %v170_v56 = vsel %vm69_vm0, %v152_v52, 0.0  ;;  %v176_v59 = vsel %vm69_vm0, %v154_v53, 0.0  ;;  %v327_v53 = vld [vmem:[%s12369_s6 + $0x10] sm:$0xff] }
  0x9f   :  { %174 = vadd.xlane.f32.xlu0 %v173_v49  ;;  %171 = vadd.xlane.f32.xlu1 %v170_v56  ;;  %v90_v57 = vpop.xlane.xlu0 %89  ;;  %v93_v58 = vpop.xlane.xlu1 %92  ;;  %v326_v56 = vld [vmem:[%s12369_s6 + $0x8] sm:$0xff] }
  0xa0   :  { %v125_v60 = vmul.f32 0.03125, %v90_v57  ;;  %v126_v61 = vmul.f32 0.03125, %v93_v58  ;;  %v155_v62 = vmul.f32 %v9192_v54, %v9192_v54  ;;  %v156_v63 = vmul.f32 %v9194_v55, %v9194_v55  ;;  %v325_v57 = vld [vmem:[%s12369_s6] sm:$0xff]  ;;  %v562_v58 = vld [vmem:[%s12370_s3 + $0x8] sm:$0xff] }
  0xa1   :  { %7493 = vmatprep.subr.mxu1 %v562_v58 }
  0xa2   :  { %v9203_v0 = vsub.f32 %v9107_v12, %v125_v60  ;;  %v9206_v1 = vsub.f32 %v9112_v13, %v126_v61  ;;  %v179_v2 = vsel %vm69_vm0, %v155_v62, 0.0  ;;  %v182_v5 = vsel %vm69_vm0, %v156_v63, 0.0  ;;  %v9285_v60 = vld [vmem:[%s12371_s2] sm:$0xff]  ;;  %7494 = vmatpush3.msra.mxu1 %v562_v58  ;;  %v9292_v61 = vld [vmem:[%s12371_s2 + $0x8] sm:$0xff] }
  0xa3   :  { %177 = vadd.xlane.f32.xlu1 %v176_v59  ;;  %180 = vadd.xlane.f32.xlu0 %v179_v2  ;;  %v96_v3 = vpop.xlane.xlu0 %95  ;;  %v99_v4 = vpop.xlane.xlu1 %98  ;;  %v561_v59 = vld [vmem:[%s12370_s3] sm:$0xff] }
  0xa4   :  { %v127_v6 = vmul.f32 0.03125, %v96_v3  ;;  %v128_v7 = vmul.f32 0.03125, %v99_v4  ;;  %v157_v8 = vmul.f32 %v9203_v0, %v9203_v0  ;;  %v158_v9 = vmul.f32 %v9206_v1, %v9206_v1  ;;  %7497 = vmatprep.mubr.msk.f32.mxu1 %vm563_vm1, %v9285_v60  ;;  %7495 = vmatprep.subr.mxu1 %v561_v59 }
  0xa5   :  { %7496 = vmatpush3.msra.mxu1 %v561_v59 }
  0xa6   :  { %v9215_v10 = vsub.f32 %v9121_v16, %v127_v6  ;;  %v9218_v11 = vsub.f32 %v9126_v17, %v128_v7  ;;  %v185_v12 = vsel %vm69_vm0, %v157_v8, 0.0  ;;  %v188_v15 = vsel %vm69_vm0, %v158_v9, 0.0  ;;  %7498 = vmatmul.mubr.msk.f32.vlgmr.msra.gmra.mxu1 %vm563_vm1, %v9292_v61 }
  0xa7   :  { %183 = vadd.xlane.f32.xlu1 %v182_v5  ;;  %186 = vadd.xlane.f32.xlu0 %v185_v12  ;;  %v102_v13 = vpop.xlane.xlu0 %101  ;;  %v105_v14 = vpop.xlane.xlu1 %104 }
  0xa8   :  { %v129_v18 = vmul.f32 0.03125, %v102_v13  ;;  %v130_v19 = vmul.f32 0.03125, %v105_v14  ;;  %v159_v22 = vmul.f32 %v9215_v10, %v9215_v10  ;;  %v160_v16 = vmul.f32 %v9218_v11, %v9218_v11 }
  0xaa   :  { %v9227_v23 = vsub.f32 %v9135_v20, %v129_v18  ;;  %v9230_v17 = vsub.f32 %v9140_v21, %v130_v19  ;;  %v191_v26 = vsel %vm69_vm0, %v159_v22, 0.0  ;;  %v194_v31 = vsel %vm69_vm0, %v160_v16, 0.0 }
  0xab   :  { %189 = vadd.xlane.f32.xlu1 %v188_v15  ;;  %192 = vadd.xlane.f32.xlu0 %v191_v26  ;;  %v108_v27 = vpop.xlane.xlu0 %107  ;;  %v111_v30 = vpop.xlane.xlu1 %110 }
  0xac   :  { %v131_v32 = vmul.f32 0.03125, %v108_v27  ;;  %v132_v33 = vmul.f32 0.03125, %v111_v30  ;;  %v161_v34 = vmul.f32 %v9227_v23, %v9227_v23  ;;  %v162_v20 = vmul.f32 %v9230_v17, %v9230_v17 }
  0xae   :  { %v9239_v35 = vsub.f32 %v9149_v24, %v131_v32  ;;  %v9242_v21 = vsub.f32 %v9154_v25, %v132_v33  ;;  %v197_v38 = vsel %vm69_vm0, %v161_v34, 0.0  ;;  %v200_v41 = vsel %vm69_vm0, %v162_v20, 0.0 }
  0xaf   :  { %195 = vadd.xlane.f32.xlu1 %v194_v31  ;;  %198 = vadd.xlane.f32.xlu0 %v197_v38  ;;  %v114_v39 = vpop.xlane.xlu0 %113  ;;  %v117_v40 = vpop.xlane.xlu1 %116  ;;  %v9299_v38 = vld [vmem:[%s12372_s4] ss:$0 sm:$0xff] }
  0xb0   :  { %v133_v42 = vmul.f32 0.03125, %v114_v39  ;;  %v134_v43 = vmul.f32 0.03125, %v117_v40  ;;  %v163_v46 = vmul.f32 %v9239_v35, %v9239_v35  ;;  %v164_v24 = vmul.f32 %v9242_v21, %v9242_v21 }
  0xb2   :  { %v9251_v47 = vsub.f32 %v9163_v28, %v133_v42  ;;  %v9254_v25 = vsub.f32 %v9168_v29, %v134_v43  ;;  %v203_v48 = vsel %vm69_vm0, %v163_v46, 0.0  ;;  %v206_v49 = vsel %vm69_vm0, %v164_v24, 0.0  ;;  %v328_v29 = vld [vmem:[%s12369_s6 + $0x18] sm:$0xff]  ;;  %v9305_v46 = vld [vmem:[%s12373_s5] ss:$0 sm:$0xff]  ;;  %s8993_s5 = smov 104  }
  0xb3   :  { %201 = vadd.xlane.f32.xlu1 %v200_v41  ;;  %204 = vadd.xlane.f32.xlu0 %v203_v48 }
  0xb4   :  { %v165_v50 = vmul.f32 %v9251_v47, %v9251_v47  ;;  %v166_v51 = vmul.f32 %v9254_v25, %v9254_v25  ;;  %7461 = vmatprep.subr.mxu0 %v328_v29 }
  0xb5   :  { %7462 = vmatpush3.msra.mxu0 %v328_v29 }
  0xb6   :  { %v209_v52 = vsel %vm69_vm0, %v165_v50, 0.0  ;;  %v212_v28 = vsel %vm69_vm0, %v166_v51, 0.0  ;;  %7463 = vmatprep.subr.mxu0 %v327_v53 }
  0xb7   :  { %207 = vadd.xlane.f32.xlu1 %v206_v49  ;;  %210 = vadd.xlane.f32.xlu0 %v209_v52 }
  0xb8   :  { %7464 = vmatpush3.msra.mxu0 %v327_v53 }
  0xb9   :  { %7465 = vmatprep.subr.mxu0 %v326_v56 }
  0xba   :  { %7466 = vmatpush3.msra.mxu0 %v326_v56 }
  0xbb   :  { %213 = vadd.xlane.f32.xlu1 %v212_v28  ;;  %7467 = vmatprep.subr.mxu0 %v325_v57 }
  0xbc   :  { %7468 = vmatpush3.msra.mxu0 %v325_v57 }
 0x124   :  { %v169_v62 = vpop.xlane.xlu0 %168 }
 0x125   :  { %v215_v63 = vmul.f32 0.03125, %v169_v62 }
 0x127   :  { %v231_v2 = vadd.f32 1e-05, %v215_v63 }
 0x128   :  { %v172_v3 = vpop.xlane.xlu1 %171  ;;  %v175_v4 = vpop.xlane.xlu0 %174 }
 0x129   :  { %8512 = vrsqrt.f32 %v231_v2  ;;  %v216_v5 = vmul.f32 0.03125, %v172_v3  ;;  %v217_v6 = vmul.f32 0.03125, %v175_v4 }
 0x12b   :  { %v232_v7 = vadd.f32 1e-05, %v216_v5  ;;  %v233_v8 = vadd.f32 1e-05, %v217_v6 }
 0x12c   :  { %v178_v9 = vpop.xlane.xlu1 %177  ;;  %v181_v12 = vpop.xlane.xlu0 %180 }
 0x12d   :  { %8514 = vrsqrt.f32 %v232_v7  ;;  %v218_v13 = vmul.f32 0.03125, %v178_v9  ;;  %v219_v14 = vmul.f32 0.03125, %v181_v12 }
 0x12e   :  { %8516 = vrsqrt.f32 %v233_v8 }
 0x12f   :  { %v234_v15 = vadd.f32 1e-05, %v218_v13  ;;  %v235_v18 = vadd.f32 1e-05, %v219_v14 }
 0x130   :  { %v184_v19 = vpop.xlane.xlu1 %183  ;;  %v187_v22 = vpop.xlane.xlu0 %186 }
 0x131   :  { %8518 = vrsqrt.f32 %v234_v15  ;;  %v220_v16 = vmul.f32 0.03125, %v184_v19  ;;  %v221_v26 = vmul.f32 0.03125, %v187_v22 }
 0x132   :  { %8520 = vrsqrt.f32 %v235_v18 }
 0x133   :  { %v236_v27 = vadd.f32 1e-05, %v220_v16  ;;  %v237_v30 = vadd.f32 1e-05, %v221_v26 }
 0x134   :  { %v190_v31 = vpop.xlane.xlu1 %189  ;;  %v193_v32 = vpop.xlane.xlu0 %192 }
 0x135   :  { %8522 = vrsqrt.f32 %v236_v27  ;;  %v222_v33 = vmul.f32 0.03125, %v190_v31  ;;  %v223_v34 = vmul.f32 0.03125, %v193_v32 }
 0x136   :  { %v8513_v20 = vpop.eup %8512  ;;  %8524 = vrsqrt.f32 %v237_v30 }
 0x137   :  { %v238_v39 = vadd.f32 1e-05, %v222_v33  ;;  %v239_v40 = vadd.f32 1e-05, %v223_v34  ;;  %v263_v41 = vmul.f32 %v8513_v20, %v9174_v36 }
 0x138   :  { %v196_v42 = vpop.xlane.xlu1 %195  ;;  %v199_v43 = vpop.xlane.xlu0 %198 }
 0x139   :  { %8526 = vrsqrt.f32 %v238_v39  ;;  %v224_v24 = vmul.f32 0.03125, %v196_v42  ;;  %v225_v48 = vmul.f32 0.03125, %v199_v43  ;;  %v286_v49 = vmul.f32 %v9299_v38, %v263_v41 }
 0x13a   :  { %v8515_v50 = vpop.eup %8514  ;;  %8528 = vrsqrt.f32 %v239_v40 }
 0x13b   :  { %v8517_v51 = vpop.eup %8516  ;;  %v240_v52 = vadd.f32 1e-05, %v224_v24  ;;  %v241_v28 = vadd.f32 1e-05, %v225_v48  ;;  %v309_v29 = vadd.f32 %v9305_v46, %v286_v49  ;;  %v264_v36 = vmul.f32 %v8515_v50, %v9182_v44 }
 0x13c   :  { %v202_v53 = vpop.xlane.xlu1 %201  ;;  %v205_v56 = vpop.xlane.xlu0 %204  ;;  %v265_v57 = vmul.f32 %v8517_v51, %v9176_v37 }
 0x13d   :  { %8530 = vrsqrt.f32 %v240_v52  ;;  %v226_v58 = vmul.f32 0.03125, %v202_v53  ;;  %v227_v59 = vmul.f32 0.03125, %v205_v56  ;;  %7469 = vmatprep.mubr.msk.f32.mxu0 %vm69_vm0, %v309_v29  ;;  %v287_v62 = vmul.f32 %v9299_v38, %v264_v36 }
 0x13e   :  { %v8519_v63 = vpop.eup %8518  ;;  %8532 = vrsqrt.f32 %v241_v28  ;;  %v288_v2 = vmul.f32 %v9299_v38, %v265_v57 }
 0x13f   :  { %v8521_v3 = vpop.eup %8520  ;;  %v242_v4 = vadd.f32 1e-05, %v226_v58  ;;  %v243_v5 = vadd.f32 1e-05, %v227_v59  ;;  %v310_v44 = vadd.f32 %v9305_v46, %v287_v62  ;;  %v266_v6 = vmul.f32 %v8519_v63, %v9184_v45 }
 0x140   :  { %v208_v7 = vpop.xlane.xlu1 %207  ;;  %v211_v37 = vpop.xlane.xlu0 %210  ;;  %v311_v8 = vadd.f32 %v9305_v46, %v288_v2  ;;  %v267_v9 = vmul.f32 %v8521_v3, %v9192_v54 }
 0x141   :  { %8534 = vrsqrt.f32 %v242_v4  ;;  %v228_v12 = vmul.f32 0.03125, %v208_v7  ;;  %v229_v13 = vmul.f32 0.03125, %v211_v37  ;;  %7470 = vmatmul.mubr.msk.f32.vlgmr.msra.gmra.mxu0 %vm69_vm0, %v310_v44  ;;  %v289_v14 = vmul.f32 %v9299_v38, %v266_v6  ;;  %v9373_v7 = vld [vmem:[%s12371_s2 + $0x10] sm:$0xff] }
 0x142   :  { %v8523_v15 = vpop.eup %8522  ;;  %8536 = vrsqrt.f32 %v243_v5  ;;  %7472 = vmatprep.mubr.msk.f32.mxu0 %vm69_vm0, %v311_v8  ;;  %v290_v18 = vmul.f32 %v9299_v38, %v267_v9  ;;  %7500 = vmatprep.mubr.msk.f32.mxu1 %vm563_vm1, %v9373_v7  ;;  %v9401_v37 = vld [vmem:[%s12371_s2 + $0x30] sm:$0xff]  ;;  %v9408_v8 = vld [vmem:[%s12371_s2 + $0x38] sm:$0xff]  ;;  %v9415_v9 = vld [vmem:[%s12371_s2 + $0x40] sm:$0xff] }
 0x143   :  { %v8525_v45 = vpop.eup %8524  ;;  %v244_v19 = vadd.f32 1e-05, %v228_v12  ;;  %v245_v22 = vadd.f32 1e-05, %v229_v13  ;;  %v312_v16 = vadd.f32 %v9305_v46, %v289_v14  ;;  %v268_v54 = vmul.f32 %v8523_v15, %v9194_v55  ;;  %v9422_v12 = vld [vmem:[%s12371_s2 + $0x48] sm:$0xff]  ;;  %v9429_v13 = vld [vmem:[%s12371_s2 + $0x50] sm:$0xff] }
 0x144   :  { %v214_v26 = vpop.xlane.xlu1 %213  ;;  %v313_v27 = vadd.f32 %v9305_v46, %v290_v18  ;;  %v269_v30 = vmul.f32 %v8525_v45, %v9203_v0  ;;  %v9436_v14 = vld [vmem:[%s12371_s2 + $0x58] sm:$0xff]  ;;  %v9443_v15 = vld [vmem:[%s12371_s2 + $0x60] sm:$0xff]  ;;  %v9450_v18 = vld [vmem:[%s12371_s2 + $0x68] sm:$0xff] }
 0x145   :  { %8538 = vrsqrt.f32 %v244_v19  ;;  %v230_v31 = vmul.f32 0.03125, %v214_v26  ;;  %7473 = vmatmul.mubr.msk.f32.gmra.mxu0 %vm69_vm0, %v312_v16  ;;  %v291_v32 = vmul.f32 %v9299_v38, %v268_v54  ;;  %v9457_v45 = vld [vmem:[%s12371_s2 + $0x70] sm:$0xff]  ;;  %v9464_v19 = vld [vmem:[%s12371_s2 + $0x78] sm:$0xff]  ;;  %v6405_v16 = vld [vmem:[%s12374_s7] ss:$0 sm:$0xff]  ;;  %s8984_s7 = smov 96  }
 0x146   :  { %v8527_v33 = vpop.eup %8526  ;;  %8540 = vrsqrt.f32 %v245_v22  ;;  %7475 = vmatprep.mubr.msk.f32.mxu0 %vm69_vm0, %v313_v27  ;;  %v292_v34 = vmul.f32 %v9299_v38, %v269_v30  ;;  %7521 = vmatprep.subr.msk.mxu1 %vm563_vm1, %v9464_v19 }
 0x147   :  { %v8529_v20 = vpop.eup %8528  ;;  %v246_v39 = vadd.f32 1e-05, %v230_v31  ;;  %v314_v55 = vadd.f32 %v9305_v46, %v291_v32  ;;  %v270_v40 = vmul.f32 %v8527_v33, %v9206_v1  ;;  %7522 = vmatpush3.xpose.msk.msra.mxu1 %vm563_vm1, %v9464_v19 }
 0x148   :  { %v315_v0 = vadd.f32 %v9305_v46, %v292_v34  ;;  %v271_v41 = vmul.f32 %v8529_v20, %v9215_v10  ;;  %7523 = vmatprep.subr.msk.mxu1 %vm563_vm1, %v9457_v45 }
 0x149   :  { %8542 = vrsqrt.f32 %v246_v39  ;;  %7476 = vmatmul.mubr.msk.f32.gmra.mxu0 %vm69_vm0, %v314_v55  ;;  %v293_v42 = vmul.f32 %v9299_v38, %v270_v40 }
 0x14a   :  { %v8531_v43 = vpop.eup %8530  ;;  %7478 = vmatprep.mubr.msk.f32.mxu0 %vm69_vm0, %v315_v0  ;;  %v294_v24 = vmul.f32 %v9299_v38, %v271_v41 }
 0x14b   :  { %v8533_v48 = vpop.eup %8532  ;;  %v316_v49 = vadd.f32 %v9305_v46, %v293_v42  ;;  %v272_v50 = vmul.f32 %v8531_v43, %v9218_v11  ;;  %7524 = vmatpush3.xpose.msk.msra.mxu1 %vm563_vm1, %v9457_v45 }
 0x14c   :  { %v317_v1 = vadd.f32 %v9305_v46, %v294_v24  ;;  %v273_v51 = vmul.f32 %v8533_v48, %v9227_v23  ;;  %7525 = vmatprep.subr.msk.mxu1 %vm563_vm1, %v9450_v18 }
 0x14d   :  { %7479 = vmatmul.mubr.msk.f32.gmra.mxu0 %vm69_vm0, %v316_v49  ;;  %v295_v10 = vmul.f32 %v9299_v38, %v272_v50 }
 0x14e   :  { %v8535_v52 = vpop.eup %8534  ;;  %7481 = vmatprep.mubr.msk.f32.mxu0 %vm69_vm0, %v317_v1  ;;  %v296_v28 = vmul.f32 %v9299_v38, %v273_v51 }
 0x14f   :  { %v8537_v29 = vpop.eup %8536  ;;  %v318_v36 = vadd.f32 %v9305_v46, %v295_v10  ;;  %v274_v53 = vmul.f32 %v8535_v52, %v9230_v17  ;;  %7526 = vmatpush3.xpose.msk.msra.mxu1 %vm563_vm1, %v9450_v18 }
 0x150   :  { %v319_v11 = vadd.f32 %v9305_v46, %v296_v28  ;;  %v275_v56 = vmul.f32 %v8537_v29, %v9239_v35  ;;  %7527 = vmatprep.subr.msk.mxu1 %vm563_vm1, %v9443_v15 }
 0x151   :  { %7482 = vmatmul.mubr.msk.f32.gmra.mxu0 %vm69_vm0, %v318_v36  ;;  %v297_v23 = vmul.f32 %v9299_v38, %v274_v53 }
 0x152   :  { %v8539_v57 = vpop.eup %8538  ;;  %7484 = vmatprep.mubr.msk.f32.mxu0 %vm69_vm0, %v319_v11  ;;  %v298_v58 = vmul.f32 %v9299_v38, %v275_v56 }
 0x153   :  { %v8541_v59 = vpop.eup %8540  ;;  %v320_v62 = vadd.f32 %v9305_v46, %v297_v23  ;;  %v276_v63 = vmul.f32 %v8539_v57, %v9242_v21  ;;  %7528 = vmatpush3.xpose.msk.msra.mxu1 %vm563_vm1, %v9443_v15 }
 0x154   :  { %v321_v17 = vadd.f32 %v9305_v46, %v298_v58  ;;  %v277_v2 = vmul.f32 %v8541_v59, %v9251_v47  ;;  %7529 = vmatprep.subr.msk.mxu1 %vm563_vm1, %v9436_v14 }
 0x155   :  { %7485 = vmatmul.mubr.msk.f32.gmra.mxu0 %vm69_vm0, %v320_v62  ;;  %v299_v35 = vmul.f32 %v9299_v38, %v276_v63 }
 0x156   :  { %v8543_v3 = vpop.eup %8542  ;;  %7487 = vmatprep.mubr.msk.f32.mxu0 %vm69_vm0, %v321_v17  ;;  %v300_v4 = vmul.f32 %v9299_v38, %v277_v2 }
 0x157   :  { %v322_v5 = vadd.f32 %v9305_v46, %v299_v35  ;;  %v278_v44 = vmul.f32 %v8543_v3, %v9254_v25  ;;  %v9380_v25 = vld [vmem:[%s12371_s2 + $0x18] sm:$0xff]  ;;  %7530 = vmatpush3.xpose.msk.msra.mxu1 %vm563_vm1, %v9436_v14 }
 0x158   :  { %v323_v6 = vadd.f32 %v9305_v46, %v300_v4  ;;  %7501 = vmatmul.mubr.msk.f32.gmra.mxu1 %vm563_vm1, %v9380_v25  ;;  %7531 = vmatprep.subr.msk.mxu1 %vm563_vm1, %v9429_v13 }
 0x159   :  { %7488 = vmatmul.mubr.msk.f32.gmra.mxu0 %vm69_vm0, %v322_v5  ;;  %v301_v21 = vmul.f32 %v9299_v38, %v278_v44  ;;  %v9387_v38 = vld [vmem:[%s12371_s2 + $0x20] sm:$0xff] }
 0x15a   :  { %7490 = vmatprep.mubr.msk.f32.mxu0 %vm69_vm0, %v323_v6  ;;  %7503 = vmatprep.mubr.msk.f32.mxu1 %vm563_vm1, %v9387_v38 }
 0x15b   :  { %v324_v47 = vadd.f32 %v9305_v46, %v301_v21  ;;  %v9394_v46 = vld [vmem:[%s12371_s2 + $0x28] sm:$0xff]  ;;  %7532 = vmatpush3.xpose.msk.msra.mxu1 %vm563_vm1, %v9429_v13 }
 0x15c   :  { %7504 = vmatmul.mubr.msk.f32.gmra.mxu1 %vm563_vm1, %v9394_v46  ;;  %7533 = vmatprep.subr.msk.mxu1 %vm563_vm1, %v9422_v12 }
 0x15d   :  { %7491 = vmatmul.mubr.msk.f32.gmra.mxu0 %vm69_vm0, %v324_v47  ;;  %7506 = vmatprep.mubr.msk.f32.mxu1 %vm563_vm1, %v9401_v37 }
 0x15f   :  { %7534 = vmatpush3.xpose.msk.msra.mxu1 %vm563_vm1, %v9422_v12 }
 0x160   :  { %7507 = vmatmul.mubr.msk.f32.gmra.mxu1 %vm563_vm1, %v9408_v8  ;;  %7535 = vmatprep.subr.msk.mxu1 %vm563_vm1, %v9415_v9 }
 0x161   :  { %7509 = vmatprep.mubr.msk.f32.mxu1 %vm563_vm1, %v9415_v9 }
 0x163   :  { %7536 = vmatpush3.xpose.msk.msra.mxu1 %vm563_vm1, %v9415_v9 }
 0x164   :  { %7510 = vmatmul.mubr.msk.f32.gmra.mxu1 %vm563_vm1, %v9422_v12  ;;  %7537 = vmatprep.subr.msk.mxu1 %vm563_vm1, %v9408_v8 }
 0x165   :  { %7512 = vmatprep.mubr.msk.f32.mxu1 %vm563_vm1, %v9429_v13 }
 0x166   :  { %v7499_v52 = vpop.f32.mrf.mxu1 }
 0x167   :  { %7538 = vmatpush3.xpose.msk.msra.mxu1 %vm563_vm1, %v9408_v8 }
 0x168   :  { %7513 = vmatmul.mubr.msk.f32.gmra.mxu1 %vm563_vm1, %v9436_v14  ;;  %7539 = vmatprep.subr.msk.mxu1 %vm563_vm1, %v9401_v37  ;;  %v678_v29 = vpop.f32.mrf.mxu1 }
 0x169   :  { %7515 = vmatprep.mubr.msk.f32.mxu1 %vm563_vm1, %v9443_v15 }
 0x16b   :  { %7540 = vmatpush3.xpose.msk.msra.mxu1 %vm563_vm1, %v9401_v37 }
 0x16c   :  { %7516 = vmatmul.mubr.msk.f32.gmra.mxu1 %vm563_vm1, %v9450_v18  ;;  %7541 = vmatprep.subr.msk.mxu1 %vm563_vm1, %v9394_v46 }
 0x16d   :  { %7518 = vmatprep.mubr.msk.f32.mxu1 %vm563_vm1, %v9457_v45 }
 0x16f   :  { %7542 = vmatpush3.xpose.msk.msra.mxu1 %vm563_vm1, %v9394_v46 }
 0x170   :  { %7519 = vmatmul.mubr.msk.f32.gmra.mxu1 %vm563_vm1, %v9464_v19  ;;  %7543 = vmatprep.subr.msk.mxu1 %vm563_vm1, %v9387_v38 }
 0x171   :  { %7553 = vmatprep.mubr.msk.f32.mxu1 %vm563_vm1, %v678_v29 }
 0x173   :  { %7544 = vmatpush3.xpose.msk.msra.mxu1 %vm563_vm1, %v9387_v38 }
 0x174   :  { %7545 = vmatprep.subr.msk.mxu1 %vm563_vm1, %v9380_v25 }
 0x177   :  { %7546 = vmatpush3.xpose.msk.msra.mxu1 %vm563_vm1, %v9380_v25 }
 0x178   :  { %7547 = vmatprep.subr.msk.mxu1 %vm563_vm1, %v9373_v7 }
 0x17b   :  { %7548 = vmatpush3.xpose.msk.msra.mxu1 %vm563_vm1, %v9373_v7 }
 0x17c   :  { %7549 = vmatprep.subr.msk.mxu1 %vm563_vm1, %v9292_v61 }
 0x17f   :  { %7550 = vmatpush3.xpose.msk.msra.mxu1 %vm563_vm1, %v9292_v61 }
 0x180   :  { %7551 = vmatprep.subr.msk.mxu1 %vm563_vm1, %v9285_v60 }
 0x183   :  { %7552 = vmatpush3.xpose.msk.msra.mxu1 %vm563_vm1, %v9285_v60 }
 0x186   :  { %7554 = vmatmul.mubr.msk.f32.vlgmr.msra.gmra.mxu1 %vm563_vm1, %v7499_v52 }
 0x201   :  { %v7471_v22 = vpop.f32.mrf.mxu0 }
 0x202   :  { %v9587_v23 = vadd.f32 %v7471_v22, %v6405_v16 }
 0x203   :  { %v450_v54 = vpop.f32.mrf.mxu0 }
 0x204   :  { %v9535_v26 = vadd.f32 %v6405_v16, %v450_v54  ;;  %12442 = vst [vmem:[#allocation8_spill] sm:$0xff] %v9587_v23 }
 0x205   :  { %v7474_v27 = vpop.f32.mrf.mxu0 }
 0x206   :  { %12436 = vst [vmem:[#allocation2_spill] sm:$0xff] %v9535_v26  ;;  %7609 = vmatprep.mubr.msk.f32.mxu0 %vm998_vm2, %v9535_v26  ;;  %v9579_v11 = vadd.f32 %v7474_v27, %v6405_v16 }
 0x207   :  { %v460_v30 = vpop.f32.mrf.mxu0 }
 0x208   :  { %12440 = vst [vmem:[#allocation6_spill] sm:$0xff] %v9579_v11  ;;  %v9597_v58 = vadd.f32 %v6405_v16, %v460_v30 }
 0x209   :  { %v7477_v31 = vpop.f32.mrf.mxu0 }
 0x20a   :  { %v9569_v36 = vadd.f32 %v7477_v31, %v6405_v16  ;;  %12444 = vst [vmem:[#allocation10_spill] sm:$0xff] %v9597_v58 }
 0x20b   :  { %v470_v32 = vpop.f32.mrf.mxu0 }
 0x20c   :  { %12438 = vst [vmem:[#allocation4_spill] sm:$0xff] %v9569_v36  ;;  %v9591_v57 = vadd.f32 %v6405_v16, %v470_v32 }
 0x20d   :  { %v7480_v33 = vpop.f32.mrf.mxu0 }
 0x20e   :  { %v9561_v10 = vadd.f32 %v7480_v33, %v6405_v16  ;;  %12443 = vst [vmem:[#allocation9_spill] sm:$0xff] %v9591_v57 }
 0x20f   :  { %v480_v34 = vpop.f32.mrf.mxu0 }
 0x210   :  { %12437 = vst [vmem:[#allocation3_spill] sm:$0xff] %v9561_v10  ;;  %v9583_v56 = vadd.f32 %v6405_v16, %v480_v34 }
 0x211   :  { %v7483_v20 = vpop.f32.mrf.mxu0 }
 0x212   :  { %v9553_v1 = vadd.f32 %v7483_v20, %v6405_v16  ;;  %12441 = vst [vmem:[#allocation7_spill] sm:$0xff] %v9583_v56 }
 0x213   :  { %v490_v39 = vpop.f32.mrf.mxu0 }
 0x214   :  { %v9575_v53 = vadd.f32 %v6405_v16, %v490_v39 }
 0x215   :  { %v7486_v55 = vpop.f32.mrf.mxu0 }
 0x216   :  { %v9545_v49 = vadd.f32 %v7486_v55, %v6405_v16  ;;  %12439 = vst [vmem:[#allocation5_spill] sm:$0xff] %v9575_v53 }
 0x217   :  { %v500_v40 = vpop.f32.mrf.mxu0 }
 0x218   :  { %v9565_v28 = vadd.f32 %v6405_v16, %v500_v40  ;;  %v7502_v59 = vpop.f32.mrf.mxu1 }
 0x219   :  { %v7489_v0 = vpop.f32.mrf.mxu0 }
 0x21a   :  { %v9549_v50 = vadd.f32 %v7489_v0, %v6405_v16  ;;  %v688_v62 = vpop.f32.mrf.mxu1 }
 0x21b   :  { %v510_v41 = vpop.f32.mrf.mxu0  ;;  %7556 = vmatprep.mubr.msk.f32.mxu1 %vm563_vm1, %v688_v62 }
 0x21c   :  { %v9557_v51 = vadd.f32 %v6405_v16, %v510_v41  ;;  %v7505_v63 = vpop.f32.mrf.mxu1  ;;  %7557 = vmatmul.mubr.msk.f32.gmra.mxu1 %vm563_vm1, %v7502_v59 }
 0x21d   :  { %v7492_v42 = vpop.f32.mrf.mxu0 }
 0x21e   :  { %v9539_v43 = vadd.f32 %v7492_v42, %v6405_v16  ;;  %v698_v17 = vpop.f32.mrf.mxu1 }
 0x21f   :  { %v520_v24 = vpop.f32.mrf.mxu0  ;;  %7559 = vmatprep.mubr.msk.f32.mxu1 %vm563_vm1, %v698_v17 }
 0x220   :  { %v9541_v48 = vadd.f32 %v6405_v16, %v520_v24  ;;  %996 = vrot.lane.b32.xlu0 %v9539_v43, %s8984_s7  ;;  %7560 = vmatmul.mubr.msk.f32.gmra.mxu1 %vm563_vm1, %v7505_v63  ;;  %v7508_v2 = vpop.f32.mrf.mxu1 }
 0x222   :  { %994 = vrot.lane.b32.xlu1 %v9541_v48, %s8984_s7  ;;  %v708_v35 = vpop.f32.mrf.mxu1 }
 0x223   :  { %7562 = vmatprep.mubr.msk.f32.mxu1 %vm563_vm1, %v708_v35 }
 0x224   :  { %988 = vrot.lane.b32.xlu0 %v9545_v49, %s8984_s7  ;;  %v7511_v3 = vpop.f32.mrf.mxu1  ;;  %7563 = vmatmul.mubr.msk.f32.gmra.mxu1 %vm563_vm1, %v7508_v2 }
 0x226   :  { %992 = vrot.lane.b32.xlu1 %v9549_v50, %s8984_s7  ;;  %v718_v4 = vpop.f32.mrf.mxu1 }
 0x227   :  { %7565 = vmatprep.mubr.msk.f32.mxu1 %vm563_vm1, %v718_v4 }
 0x228   :  { %984 = vrot.lane.b32.xlu0 %v9553_v1, %s8984_s7  ;;  %v7514_v5 = vpop.f32.mrf.mxu1  ;;  %7566 = vmatmul.mubr.msk.f32.gmra.mxu1 %vm563_vm1, %v7511_v3 }
 0x22a   :  { %990 = vrot.lane.b32.xlu1 %v9557_v51, %s8984_s7  ;;  %v728_v44 = vpop.f32.mrf.mxu1 }
 0x22b   :  { %7568 = vmatprep.mubr.msk.f32.mxu1 %vm563_vm1, %v728_v44 }
 0x22c   :  { %980 = vrot.lane.b32.xlu0 %v9561_v10, %s8984_s7  ;;  %v7517_v6 = vpop.f32.mrf.mxu1  ;;  %7569 = vmatmul.mubr.msk.f32.gmra.mxu1 %vm563_vm1, %v7514_v5 }
 0x22e   :  { %986 = vrot.lane.b32.xlu1 %v9565_v28, %s8984_s7  ;;  %v738_v21 = vpop.f32.mrf.mxu1 }
 0x22f   :  { %7571 = vmatprep.mubr.msk.f32.mxu1 %vm563_vm1, %v738_v21  ;;  %v6503_v21 = vld [vmem:[%s12370_s3 + $0x18] sm:$0xff] }
 0x230   :  { %976 = vrot.lane.b32.xlu0 %v9569_v36, %s8984_s7  ;;  %v7520_v47 = vpop.f32.mrf.mxu1  ;;  %7572 = vmatmul.mubr.msk.f32.gmra.mxu1 %vm563_vm1, %v7517_v6 }
 0x232   :  { %982 = vrot.lane.b32.xlu1 %v9575_v53, %s8984_s7  ;;  %v748_v22 = vpop.f32.mrf.mxu1 }
 0x233   :  { %7574 = vmatprep.mubr.msk.f32.mxu1 %vm563_vm1, %v748_v22 }
 0x234   :  { %972 = vrot.lane.b32.xlu0 %v9579_v11, %s8984_s7  ;;  %7575 = vmatmul.mubr.msk.f32.gmra.mxu1 %vm563_vm1, %v7520_v47 }
 0x236   :  { %978 = vrot.lane.b32.xlu1 %v9583_v56, %s8984_s7 }
 0x238   :  { %968 = vrot.lane.b32.xlu0 %v9587_v23, %s8984_s7 }
 0x23a   :  { %974 = vrot.lane.b32.xlu1 %v9591_v57, %s8984_s7 }
 0x23c   :  { %1366 = vrot.lane.b32.xlu0 %v9539_v43, %s8985_s27 }
 0x23e   :  { %970 = vrot.lane.b32.xlu1 %v9597_v58, %s8984_s7 }
 0x240   :  { %1362 = vrot.lane.b32.xlu0 %v9549_v50, %s8985_s27 }
 0x242   :  { %966 = vrot.lane.b32.xlu1 %v9535_v26, %s8984_s7  ;;  %s8987_s7 = smov 120  }
 0x244   :  { %1354 = vrot.lane.b32.xlu0 %v9553_v1, %s8985_s27 }
 0x246   :  { %1360 = vrot.lane.b32.xlu1 %v9557_v51, %s8985_s27 }
 0x248   :  { %1350 = vrot.lane.b32.xlu0 %v9561_v10, %s8985_s27 }
 0x24a   :  { %1358 = vrot.lane.b32.xlu1 %v9545_v49, %s8985_s27 }
 0x24c   :  { %1346 = vrot.lane.b32.xlu0 %v9569_v36, %s8985_s27 }
 0x24e   :  { %1356 = vrot.lane.b32.xlu1 %v9565_v28, %s8985_s27 }
 0x250   :  { %1342 = vrot.lane.b32.xlu0 %v9579_v11, %s8985_s27 }
 0x252   :  { %1352 = vrot.lane.b32.xlu1 %v9575_v53, %s8985_s27 }
 0x254   :  { %1338 = vrot.lane.b32.xlu0 %v9587_v23, %s8985_s27 }
 0x256   :  { %1348 = vrot.lane.b32.xlu1 %v9583_v56, %s8985_s27 }
 0x258   :  { %1965 = vrot.lane.b32.xlu0 %v9539_v43, %s8986_s28 }
 0x25a   :  { %1344 = vrot.lane.b32.xlu1 %v9591_v57, %s8985_s27 }
 0x25c   :  { %1961 = vrot.lane.b32.xlu0 %v9549_v50, %s8986_s28 }
 0x25e   :  { %1340 = vrot.lane.b32.xlu1 %v9597_v58, %s8985_s27 }
 0x260   :  { %1957 = vrot.lane.b32.xlu0 %v9545_v49, %s8986_s28 }
 0x262   :  { %1336 = vrot.lane.b32.xlu1 %v9535_v26, %s8985_s27 }
 0x264   :  { %1955 = vrot.lane.b32.xlu0 %v9565_v28, %s8986_s28 }
 0x266   :  { %1959 = vrot.lane.b32.xlu1 %v9557_v51, %s8986_s28 }
 0x268   :  { %1364 = vrot.lane.b32.xlu0 %v9541_v48, %s8985_s27 }
 0x26a   :  { %1953 = vrot.lane.b32.xlu1 %v9553_v1, %s8986_s28 }
 0x26e   :  { %1963 = vrot.lane.b32.xlu1 %v9541_v48, %s8986_s28 }
 0x272   :  { %1949 = vrot.lane.b32.xlu1 %v9561_v10, %s8986_s28 }
 0x276   :  { %1947 = vrot.lane.b32.xlu1 %v9583_v56, %s8986_s28 }
 0x27a   :  { %1945 = vrot.lane.b32.xlu1 %v9569_v36, %s8986_s28 }
 0x27e   :  { %1943 = vrot.lane.b32.xlu1 %v9591_v57, %s8986_s28 }
 0x292   :  { %v997_v16 = vpop.permute.xlu0 %996 }
 0x293   :  { %7577 = vmatprep.subr.msk.mxu0 %vm998_vm2, %v997_v16 }
 0x294   :  { %7578 = vmatpush3.xpose.msk.msra.mxu0 %vm998_vm2, %v997_v16  ;;  %v995_v54 = vpop.permute.xlu1 %994  ;;  %v6502_v16 = vld [vmem:[%s12370_s3 + $0x10] sm:$0xff] }
 0x295   :  { %7579 = vmatprep.subr.msk.mxu0 %vm998_vm2, %v995_v54 }
 0x296   :  { %v989_v27 = vpop.permute.xlu0 %988 }
 0x298   :  { %7580 = vmatpush3.xpose.msk.msra.mxu0 %vm998_vm2, %v995_v54  ;;  %v993_v30 = vpop.permute.xlu1 %992 }
 0x299   :  { %7581 = vmatprep.subr.msk.mxu0 %vm998_vm2, %v993_v30 }
 0x29a   :  { %v985_v31 = vpop.permute.xlu0 %984 }
 0x29c   :  { %7582 = vmatpush3.xpose.msk.msra.mxu0 %vm998_vm2, %v993_v30  ;;  %v991_v32 = vpop.permute.xlu1 %990 }
 0x29d   :  { %7583 = vmatprep.subr.msk.mxu0 %vm998_vm2, %v991_v32 }
 0x29e   :  { %v981_v33 = vpop.permute.xlu0 %980 }
 0x2a0   :  { %7584 = vmatpush3.xpose.msk.msra.mxu0 %vm998_vm2, %v991_v32  ;;  %v987_v34 = vpop.permute.xlu1 %986 }
 0x2a1   :  { %7585 = vmatprep.subr.msk.mxu0 %vm998_vm2, %v989_v27 }
 0x2a2   :  { %v977_v20 = vpop.permute.xlu0 %976 }
 0x2a4   :  { %7586 = vmatpush3.xpose.msk.msra.mxu0 %vm998_vm2, %v989_v27  ;;  %v983_v39 = vpop.permute.xlu1 %982 }
 0x2a5   :  { %7587 = vmatprep.subr.msk.mxu0 %vm998_vm2, %v987_v34 }
 0x2a6   :  { %v973_v55 = vpop.permute.xlu0 %972 }
 0x2a8   :  { %7588 = vmatpush3.xpose.msk.msra.mxu0 %vm998_vm2, %v987_v34  ;;  %v979_v40 = vpop.permute.xlu1 %978 }
 0x2a9   :  { %7589 = vmatprep.subr.msk.mxu0 %vm998_vm2, %v985_v31 }
 0x2aa   :  { %v969_v0 = vpop.permute.xlu0 %968 }
 0x2ac   :  { %7590 = vmatpush3.xpose.msk.msra.mxu0 %vm998_vm2, %v985_v31  ;;  %v975_v41 = vpop.permute.xlu1 %974 }
 0x2ad   :  { %7591 = vmatprep.subr.msk.mxu0 %vm998_vm2, %v983_v39 }
 0x2ae   :  { %v1367_v42 = vpop.permute.xlu0 %1366 }
 0x2af   :  { %7633 = vmatprep.subr.mxu1 %v1367_v42 }
 0x2b0   :  { %7592 = vmatpush3.xpose.msk.msra.mxu0 %vm998_vm2, %v983_v39  ;;  %7634 = vmatpush3.msra.mxu1 %v1367_v42  ;;  %v971_v24 = vpop.permute.xlu1 %970 }
 0x2b1   :  { %7593 = vmatprep.subr.msk.mxu0 %vm998_vm2, %v981_v33 }
 0x2b2   :  { %v1363_v52 = vpop.permute.xlu0 %1362 }
 0x2b4   :  { %7594 = vmatpush3.xpose.msk.msra.mxu0 %vm998_vm2, %v981_v33  ;;  %v967_v29 = vpop.permute.xlu1 %966 }
 0x2b5   :  { %7595 = vmatprep.subr.msk.mxu0 %vm998_vm2, %v979_v40 }
 0x2b6   :  { %v1355_v59 = vpop.permute.xlu0 %1354 }
 0x2b8   :  { %7596 = vmatpush3.xpose.msk.msra.mxu0 %vm998_vm2, %v979_v40  ;;  %v1361_v62 = vpop.permute.xlu1 %1360 }
 0x2b9   :  { %7597 = vmatprep.subr.msk.mxu0 %vm998_vm2, %v977_v20 }
 0x2ba   :  { %v1351_v63 = vpop.permute.xlu0 %1350 }
 0x2bc   :  { %7598 = vmatpush3.xpose.msk.msra.mxu0 %vm998_vm2, %v977_v20  ;;  %v1359_v17 = vpop.permute.xlu1 %1358 }
 0x2bd   :  { %7599 = vmatprep.subr.msk.mxu0 %vm998_vm2, %v975_v41 }
 0x2be   :  { %v9694_v2 = vpop.permute.xlu0 %1346 }
 0x2c0   :  { %7600 = vmatpush3.xpose.msk.msra.mxu0 %vm998_vm2, %v975_v41  ;;  %v1357_v3 = vpop.permute.xlu1 %1356 }
 0x2c1   :  { %7601 = vmatprep.subr.msk.mxu0 %vm998_vm2, %v973_v55 }
 0x2c2   :  { %v9698_v35 = vpop.permute.xlu0 %1342 }
 0x2c4   :  { %7602 = vmatpush3.xpose.msk.msra.mxu0 %vm998_vm2, %v973_v55  ;;  %v1353_v5 = vpop.permute.xlu1 %1352 }
 0x2c5   :  { %7603 = vmatprep.subr.msk.mxu0 %vm998_vm2, %v971_v24 }
 0x2c6   :  { %v9702_v4 = vpop.permute.xlu0 %1338 }
 0x2c8   :  { %7604 = vmatpush3.xpose.msk.msra.mxu0 %vm998_vm2, %v971_v24  ;;  %v1349_v47 = vpop.permute.xlu1 %1348 }
 0x2c9   :  { %7605 = vmatprep.subr.msk.mxu0 %vm998_vm2, %v969_v0 }
 0x2ca   :  { %v9706_v44 = vpop.permute.xlu0 %1965 }
 0x2cc   :  { %7606 = vmatpush3.xpose.msk.msra.mxu0 %vm998_vm2, %v969_v0  ;;  %v1345_v54 = vpop.permute.xlu1 %1344  ;;  %v9825_v0 = vld [vmem:[%s12375_s1] sm:$0xff] }
 0x2cd   :  { %7607 = vmatprep.subr.msk.mxu0 %vm998_vm2, %v967_v29 }
 0x2ce   :  { %v9710_v6 = vpop.permute.xlu0 %1961 }
 0x2d0   :  { %7608 = vmatpush3.xpose.msk.msra.mxu0 %vm998_vm2, %v967_v29  ;;  %v1341_v31 = vpop.permute.xlu1 %1340 }
 0x2d1   :  { %7689 = vmatprep.subr.mxu0 %v6503_v21 }
 0x2d2   :  { %v9716_v22 = vpop.permute.xlu0 %1957 }
 0x2d3   :  { %7610 = vmatmul.mubr.msk.f32.vlgmr.msra.gmra.mxu0 %vm998_vm2, %v9587_v23 }
 0x2d4   :  { %7612 = vmatprep.mubr.msk.f32.mxu0 %vm998_vm2, %v9597_v58  ;;  %7690 = vmatpush3.msra.mxu0 %v6503_v21  ;;  %v1337_v32 = vpop.permute.xlu1 %1336 }
 0x2d5   :  { %7691 = vmatprep.subr.mxu0 %v6502_v16 }
 0x2d6   :  { %v9725_v27 = vpop.permute.xlu0 %1955  ;;  %7692 = vmatpush3.msra.mxu0 %v6502_v16 }
 0x2d7   :  { %7613 = vmatmul.mubr.msk.f32.gmra.mxu0 %vm998_vm2, %v9579_v11  ;;  %7773 = vmatprep.subr.msk.mxu0 %vm998_vm2, %v9706_v44 }
 0x2d8   :  { %7615 = vmatprep.mubr.msk.f32.mxu0 %vm998_vm2, %v9591_v57  ;;  %v1960_v33 = vpop.permute.xlu1 %1959 }
 0x2da   :  { %v1365_v30 = vpop.permute.xlu0 %1364 }
 0x2db   :  { %7616 = vmatmul.mubr.msk.f32.gmra.mxu0 %vm998_vm2, %v9569_v36  ;;  %7635 = vmatprep.subr.mxu1 %v1365_v30 }
 0x2dc   :  { %7618 = vmatprep.mubr.msk.f32.mxu0 %vm998_vm2, %v9583_v56  ;;  %7636 = vmatpush3.msra.mxu1 %v1365_v30  ;;  %v1954_v34 = vpop.permute.xlu1 %1953 }
 0x2dd   :  { %7637 = vmatprep.subr.mxu1 %v1363_v52 }
 0x2de   :  { %7638 = vmatpush3.msra.mxu1 %v1363_v52 }
 0x2df   :  { %7619 = vmatmul.mubr.msk.f32.gmra.mxu0 %vm998_vm2, %v9561_v10  ;;  %7639 = vmatprep.subr.mxu1 %v1361_v62 }
 0x2e0   :  { %7621 = vmatprep.mubr.msk.f32.mxu0 %vm998_vm2, %v9575_v53  ;;  %7640 = vmatpush3.msra.mxu1 %v1361_v62  ;;  %v1964_v20 = vpop.permute.xlu1 %1963 }
 0x2e1   :  { %7641 = vmatprep.subr.mxu1 %v1359_v17 }
 0x2e2   :  { %7642 = vmatpush3.msra.mxu1 %v1359_v17 }
 0x2e3   :  { %7622 = vmatmul.mubr.msk.f32.gmra.mxu0 %vm998_vm2, %v9553_v1  ;;  %7643 = vmatprep.subr.mxu1 %v1357_v3 }
 0x2e4   :  { %7624 = vmatprep.mubr.msk.f32.mxu0 %vm998_vm2, %v9565_v28  ;;  %7644 = vmatpush3.msra.mxu1 %v1357_v3 }
 0x2e5   :  { %7645 = vmatprep.subr.mxu1 %v1355_v59 }
 0x2e6   :  { %7646 = vmatpush3.msra.mxu1 %v1355_v59 }
 0x2e7   :  { %7625 = vmatmul.mubr.msk.f32.gmra.mxu0 %vm998_vm2, %v9545_v49  ;;  %7647 = vmatprep.subr.mxu1 %v1353_v5 }
 0x2e8   :  { %7627 = vmatprep.mubr.msk.f32.mxu0 %vm998_vm2, %v9557_v51  ;;  %7648 = vmatpush3.msra.mxu1 %v1353_v5  ;;  %v9846_v5 = vld [vmem:[%s12375_s1 + $0x28] sm:$0xff] }
 0x2e9   :  { %7649 = vmatprep.subr.mxu1 %v1351_v63 }
 0x2ea   :  { %7650 = vmatpush3.msra.mxu1 %v1351_v63  ;;  %v9837_v63 = vld [vmem:[%s12375_s1 + $0x18] sm:$0xff] }
 0x2eb   :  { %7628 = vmatmul.mubr.msk.f32.gmra.mxu0 %vm998_vm2, %v9549_v50  ;;  %7651 = vmatprep.subr.mxu1 %v1349_v47 }
 0x2ec   :  { %7630 = vmatprep.mubr.msk.f32.mxu0 %vm998_vm2, %v9541_v48  ;;  %7652 = vmatpush3.msra.mxu1 %v1349_v47 }
 0x2ed   :  { %7653 = vmatprep.subr.mxu1 %v9694_v2 }
 0x2ee   :  { %7654 = vmatpush3.msra.mxu1 %v9694_v2 }
 0x2ef   :  { %7631 = vmatmul.mubr.msk.f32.gmra.mxu0 %vm998_vm2, %v9539_v43  ;;  %7655 = vmatprep.subr.mxu1 %v1345_v54 }
 0x2f0   :  { %7656 = vmatpush3.msra.mxu1 %v1345_v54  ;;  %7693 = vmatprep.mubr.msk.f32.mxu0 %vm563_vm1, %v9285_v60  ;;  %v7555_v60 = vpop.f32.mrf.mxu1  ;;  %v9855_v54 = vld [vmem:[%s12375_s1 + $0x20] sm:$0xff] }
 0x2f1   :  { %7657 = vmatprep.subr.mxu1 %v9698_v35 }
 0x2f2   :  { %7658 = vmatpush3.msra.mxu1 %v9698_v35 }
 0x2f3   :  { %7659 = vmatprep.subr.mxu1 %v1341_v31  ;;  %7694 = vmatmul.mubr.msk.f32.vlgmr.msra.gmra.mxu0 %vm563_vm1, %v9292_v61  ;;  %v871_v61 = vpop.f32.mrf.mxu1 }
 0x2f4   :  { %7774 = vmatpush3.xpose.msk.msra.mxu0 %vm998_vm2, %v9706_v44  ;;  %7660 = vmatpush3.msra.mxu1 %v1341_v31 }
 0x2f5   :  { %7775 = vmatprep.subr.msk.mxu0 %vm998_vm2, %v1964_v20  ;;  %7661 = vmatprep.subr.mxu1 %v9702_v4 }
 0x2f6   :  { %7662 = vmatpush3.msra.mxu1 %v9702_v4  ;;  %7696 = vmatprep.mubr.msk.f32.mxu0 %vm563_vm1, %v9373_v7  ;;  %v7558_v7 = vpop.f32.mrf.mxu1 }
 0x2f7   :  { %7663 = vmatprep.subr.mxu1 %v1337_v32  ;;  %7697 = vmatmul.mubr.msk.f32.gmra.mxu0 %vm563_vm1, %v9380_v25 }
 0x2f8   :  { %7776 = vmatpush3.xpose.msk.msra.mxu0 %vm998_vm2, %v1964_v20  ;;  %7664 = vmatpush3.msra.mxu1 %v1337_v32  ;;  %v9815_v25 = vpop.f32.mrf.mxu1 }
 0x2f9   :  { %7777 = vmatprep.subr.msk.mxu0 %vm998_vm2, %v9710_v6  ;;  %7699 = vmatprep.mubr.msk.f32.mxu0 %vm563_vm1, %v9387_v38 }
 0x2fa   :  { %7717 = vmatprep.subr.msk.mxu1 %vm563_vm1, %v9464_v19  ;;  %v7561_v38 = vpop.f32.mrf.mxu1 }
 0x2fb   :  { %7700 = vmatmul.mubr.msk.f32.gmra.mxu0 %vm563_vm1, %v9394_v46 }
 0x2fc   :  { %7778 = vmatpush3.xpose.msk.msra.mxu0 %vm998_vm2, %v9710_v6  ;;  %7702 = vmatprep.mubr.msk.f32.mxu0 %vm563_vm1, %v9401_v37  ;;  %v9820_v37 = vld [vmem:[%s12375_s1 + $0x8] sm:$0xff]  ;;  %v891_v39 = vpop.f32.mrf.mxu1 }
 0x2fd   :  { %7779 = vmatprep.subr.msk.mxu0 %vm998_vm2, %v1960_v33 }
 0x2fe   :  { %v7564_v41 = vpop.f32.mrf.mxu1 }
 0x2ff   :  { %7703 = vmatmul.mubr.msk.f32.gmra.mxu0 %vm563_vm1, %v9408_v8 }
 0x300   :  { %7780 = vmatpush3.xpose.msk.msra.mxu0 %vm998_vm2, %v1960_v33  ;;  %7705 = vmatprep.mubr.msk.f32.mxu0 %vm563_vm1, %v9415_v9  ;;  %v901_v17 = vpop.f32.mrf.mxu1 }
 0x301   :  { %7781 = vmatprep.subr.msk.mxu0 %vm998_vm2, %v9716_v22 }
 0x302   :  { %v7567_v44 = vpop.f32.mrf.mxu1 }
 0x303   :  { %7706 = vmatmul.mubr.msk.f32.gmra.mxu0 %vm563_vm1, %v9422_v12 }
 0x304   :  { %7782 = vmatpush3.xpose.msk.msra.mxu0 %vm998_vm2, %v9716_v22  ;;  %7708 = vmatprep.mubr.msk.f32.mxu0 %vm563_vm1, %v9429_v13  ;;  %v911_v16 = vpop.f32.mrf.mxu1 }
 0x305   :  { %7783 = vmatprep.subr.msk.mxu0 %vm998_vm2, %v9725_v27 }
 0x306   :  { %v7570_v33 = vpop.f32.mrf.mxu1 }
 0x307   :  { %7709 = vmatmul.mubr.msk.f32.gmra.mxu0 %vm563_vm1, %v9436_v14 }
 0x308   :  { %7784 = vmatpush3.xpose.msk.msra.mxu0 %vm998_vm2, %v9725_v27  ;;  %7711 = vmatprep.mubr.msk.f32.mxu0 %vm563_vm1, %v9443_v15 }
 0x309   :  { %7785 = vmatprep.subr.msk.mxu0 %vm998_vm2, %v1954_v34 }
 0x30b   :  { %7712 = vmatmul.mubr.msk.f32.gmra.mxu0 %vm563_vm1, %v9450_v18 }
 0x30c   :  { %7786 = vmatpush3.xpose.msk.msra.mxu0 %vm998_vm2, %v1954_v34  ;;  %7714 = vmatprep.mubr.msk.f32.mxu0 %vm563_vm1, %v9457_v45  ;;  %v9864_v34 = vld [vmem:[%s12375_s1 + $0x38] sm:$0xff] }
 0x30f   :  { %7715 = vmatmul.mubr.msk.f32.gmra.mxu0 %vm563_vm1, %v9464_v19 }
 0x393   :  { %v7611_v46 = vpop.f32.mrf.mxu0 }
 0x394   :  { %v1135_v55 = vadd.f32 %v7611_v46, %v7555_v60  ;;  %v9873_v46 = vld [vmem:[%s12375_s1 + $0x48] sm:$0xff] }
 0x395   :  { %v1129_v40 = vpop.f32.mrf.mxu0 }
 0x396   :  { %v1130_v42 = vadd.f32 %v1129_v40, %v871_v61  ;;  %v9828_v24 = vadd.f32 %v1135_v55, %v9820_v37 }
 0x397   :  { %v7614_v52 = vpop.f32.mrf.mxu0 }
 0x398   :  { %v1145_v29 = vadd.f32 %v7614_v52, %v7558_v7  ;;  %1226 = vmax.xlane.f32.xlu0 %v9828_v24  ;;  %v9832_v59 = vadd.f32 %v1130_v42, %v9825_v0  ;;  %v921_v7 = vpop.f32.mrf.mxu1  ;;  %v9882_v42 = vld [vmem:[%s12375_s1 + $0x40] sm:$0xff] }
 0x399   :  { %v1139_v62 = vpop.f32.mrf.mxu0 }
 0x39a   :  { %1224 = vmax.xlane.f32.xlu1 %v9832_v59  ;;  %v9841_v3 = vadd.f32 %v1145_v29, %v9837_v63  ;;  %v7573_v40 = vpop.f32.mrf.mxu1 }
 0x39b   :  { %v7617_v2 = vpop.f32.mrf.mxu0 }
 0x39c   :  { %v1155_v35 = vadd.f32 %v7617_v2, %v7561_v38  ;;  %v931_v2 = vpop.f32.mrf.mxu1 }
 0x39d   :  { %v1149_v4 = vpop.f32.mrf.mxu0 }
 0x39e   :  { %1230 = vmax.xlane.f32.xlu1 %v9841_v3  ;;  %v1150_v21 = vadd.f32 %v1149_v4, %v891_v39  ;;  %v9850_v47 = vadd.f32 %v1155_v35, %v9846_v5  ;;  %v9893_v4 = vld [vmem:[%s12375_s1 + $0x50] sm:$0xff] }
 0x39f   :  { %v7620_v6 = vpop.f32.mrf.mxu0 }
 0x3a0   :  { %v1165_v30 = vadd.f32 %v7620_v6, %v7564_v41  ;;  %v9859_v31 = vadd.f32 %v1150_v21, %v9855_v54  ;;  %v9902_v21 = vld [vmem:[%s12375_s1 + $0x60] sm:$0xff] }
 0x3a1   :  { %v1159_v22 = vpop.f32.mrf.mxu0  ;;  %12445 = vst [vmem:[#allocation11_spill] sm:$0xff] %v9902_v21 }
 0x3a2   :  { %1234 = vmax.xlane.f32.xlu1 %v9850_v47  ;;  %v9868_v61 = vadd.f32 %v1165_v30, %v9864_v34  ;;  %v9913_v30 = vld [vmem:[%s12375_s1 + $0x10] sm:$0xff] }
 0x3a3   :  { %v7623_v27 = vpop.f32.mrf.mxu0 }
 0x3a4   :  { %v1175_v60 = vadd.f32 %v7623_v27, %v7567_v44  ;;  %v1140_v27 = vadd.f32 %v1139_v62, %v9815_v25 }
 0x3a5   :  { %v1169_v32 = vpop.f32.mrf.mxu0 }
 0x3a6   :  { %1232 = vmax.xlane.f32.xlu1 %v9859_v31  ;;  %v1170_v39 = vadd.f32 %v1169_v32, %v911_v16  ;;  %v9877_v55 = vadd.f32 %v1175_v60, %v9873_v46  ;;  %v1160_v32 = vadd.f32 %v1159_v22, %v901_v17  ;;  %v9918_v60 = vadd.f32 %v1140_v27, %v9913_v30  ;;  %v9934_v17 = vld [vmem:[%s12375_s1 + $0x58] sm:$0xff] }
 0x3a7   :  { %v7626_v20 = vpop.f32.mrf.mxu0 }
 0x3a8   :  { %v9888_v29 = vadd.f32 %v1170_v39, %v9882_v42  ;;  %v1185_v25 = vadd.f32 %v7626_v20, %v7570_v33  ;;  %v7576_v33 = vpop.f32.mrf.mxu1  ;;  %v9945_v39 = vld [vmem:[%s12375_s1 + $0x68] sm:$0xff] }
 0x3a9   :  { %v1179_v38 = vpop.f32.mrf.mxu0 }
 0x3aa   :  { %1238 = vmax.xlane.f32.xlu1 %v9868_v61  ;;  %v1180_v52 = vadd.f32 %v1179_v38, %v921_v7  ;;  %v9923_v7 = vld [vmem:[%s12375_s1 + $0x30] sm:$0xff]  ;;  %v9940_v38 = vadd.f32 %v1185_v25, %v9934_v17 }
 0x3ab   :  { %v7629_v41 = vpop.f32.mrf.mxu0  ;;  %v9929_v62 = vadd.f32 %v1160_v32, %v9923_v7  ;;  %v9968_v32 = vld [vmem:[%s12375_s1 + $0x70] sm:$0xff] }
 0x3ac   :  { %v9897_v6 = vadd.f32 %v1180_v52, %v9893_v4  ;;  %v1195_v22 = vadd.f32 %v7629_v41, %v7573_v40  ;;  %v9956_v41 = vld [vmem:[%s12375_s1 + $0x78] sm:$0xff]  ;;  %12447 = vst [vmem:[#allocation13_spill] sm:$0xff] %v9968_v32 }
 0x3ad   :  { %v1189_v35 = vpop.f32.mrf.mxu0  ;;  %12446 = vst [vmem:[#allocation12_spill] sm:$0xff] %v9956_v41 }
 0x3ae   :  { %1951 = vrot.lane.b32.xlu0 %v9575_v53, %s8986_s28  ;;  %1242 = vmax.xlane.f32.xlu1 %v9877_v55  ;;  %v1190_v44 = vadd.f32 %v1189_v35, %v931_v2  ;;  %v9951_v40 = vadd.f32 %v1195_v22, %v9945_v39  ;;  %v941_v35 = vpop.f32.mrf.mxu1  ;;  %v1950_v22 = vpop.permute.xlu1 %1949 }
 0x3af   :  { %v7632_v20 = vpop.f32.mrf.mxu0 }
 0x3b0   :  { %v9906_v16 = vadd.f32 %v1190_v44, %v9902_v21  ;;  %v1205_v52 = vadd.f32 %v7632_v20, %v7576_v33 }
 0x3b1   :  { %v1199_v44 = vpop.f32.mrf.mxu0 }
 0x3b2   :  { %1240 = vmax.xlane.f32.xlu1 %v9888_v29  ;;  %v9960_v2 = vadd.f32 %v1205_v52, %v9956_v41  ;;  %v1200_v27 = vadd.f32 %v1199_v44, %v941_v35  ;;  %v1948_v33 = vpop.permute.xlu1 %1947 }
 0x3b4   :  { %v9973_v25 = vadd.f32 %v1200_v27, %v9968_v32 }
 0x3b6   :  { %1244 = vmax.xlane.f32.xlu1 %v9897_v6  ;;  %v1946_v20 = vpop.permute.xlu1 %1945 }
 0x3ba   :  { %1248 = vmax.xlane.f32.xlu1 %v9906_v16  ;;  %v1944_v52 = vpop.permute.xlu1 %1943 }
 0x3cb   :  { %1939 = vrot.lane.b32.xlu1 %v9597_v58, %s8986_s28 }
 0x3cd   :  { %1228 = vmax.xlane.f32.xlu0 %v9918_v60 }
 0x3cf   :  { %1937 = vrot.lane.b32.xlu1 %v9587_v23, %s8986_s28 }
 0x3d1   :  { %1236 = vmax.xlane.f32.xlu0 %v9929_v62 }
 0x3d3   :  { %1935 = vrot.lane.b32.xlu1 %v9535_v26, %s8986_s28 }
 0x3d5   :  { %1246 = vmax.xlane.f32.xlu0 %v9940_v38 }
 0x3d7   :  { %1903 = vrot.lane.b32.xlu1 %v9535_v26, %s8987_s7 }
 0x3d9   :  { %1250 = vmax.xlane.f32.xlu0 %v9951_v40 }
 0x3dd   :  { %1254 = vmax.xlane.f32.xlu0 %v9960_v2 }
 0x3f3   :  { %1941 = vrot.lane.b32.xlu0 %v9579_v11, %s8986_s28  ;;  %s8988_s28 = smov 56  }
 0x3f7   :  { %1909 = vrot.lane.b32.xlu0 %v9579_v11, %s8987_s7 }
 0x3fb   :  { %1913 = vrot.lane.b32.xlu0 %v9569_v36, %s8987_s7  ;;  %1252 = vmax.xlane.f32.xlu1 %v9973_v25 }
 0x3ff   :  { %1917 = vrot.lane.b32.xlu0 %v9561_v10, %s8987_s7 }
 0x403   :  { %1921 = vrot.lane.b32.xlu0 %v9553_v1, %s8987_s7 }
 0x407   :  { %1925 = vrot.lane.b32.xlu0 %v9545_v49, %s8987_s7 }
 0x40b   :  { %1929 = vrot.lane.b32.xlu0 %v9549_v50, %s8987_s7 }
 0x40c   :  { %1905 = vrot.lane.b32.xlu1 %v9587_v23, %s8987_s7 }
 0x40f   :  { %1933 = vrot.lane.b32.xlu0 %v9539_v43, %s8987_s7 }
 0x410   :  { %1907 = vrot.lane.b32.xlu1 %v9597_v58, %s8987_s7 }
 0x413   :  { %2332 = vrot.lane.b32.xlu0 %v9541_v48, %s8988_s28 }
 0x414   :  { %1911 = vrot.lane.b32.xlu1 %v9591_v57, %s8987_s7 }
 0x417   :  { %2328 = vrot.lane.b32.xlu0 %v9557_v51, %s8988_s28 }
 0x418   :  { %1915 = vrot.lane.b32.xlu1 %v9583_v56, %s8987_s7 }
 0x41b   :  { %2324 = vrot.lane.b32.xlu0 %v9565_v28, %s8988_s28 }
 0x41c   :  { %1919 = vrot.lane.b32.xlu1 %v9575_v53, %s8987_s7 }
 0x41f   :  { %2320 = vrot.lane.b32.xlu0 %v9575_v53, %s8988_s28 }
 0x420   :  { %1923 = vrot.lane.b32.xlu1 %v9565_v28, %s8987_s7 }
 0x421   :  { %v1227_v35 = vpop.xlane.xlu0 %1226 }
 0x422   :  { %v1257_v44 = vsub.f32 %v9828_v24, %v1227_v35 }
 0x423   :  { %2316 = vrot.lane.b32.xlu0 %v9583_v56, %s8988_s28  ;;  %v1225_v27 = vpop.xlane.xlu1 %1224 }
 0x424   :  { %v1256_v26 = vsub.f32 %v9832_v59, %v1225_v27  ;;  %1927 = vrot.lane.b32.xlu1 %v9557_v51, %s8987_s7  ;;  %v1274_v32 = vmul.f32 1.442695, %v1257_v44 }
 0x425   :  { %v1952_v41 = vpop.permute.xlu0 %1951 }
 0x426   :  { %v1272_v21 = vmul.f32 1.442695, %v1256_v26  ;;  %7787 = vmatprep.subr.msk.mxu0 %vm998_vm2, %v1952_v41 }
 0x427   :  { %2312 = vrot.lane.b32.xlu0 %v9591_v57, %s8988_s28  ;;  %7788 = vmatpush3.xpose.msk.msra.mxu0 %vm998_vm2, %v1952_v41  ;;  %v1231_v24 = vpop.xlane.xlu1 %1230 }
 0x428   :  { %8544 = vpow2.f32 %v1272_v21  ;;  %1931 = vrot.lane.b32.xlu1 %v9541_v48, %s8987_s7  ;;  %7789 = vmatprep.subr.msk.mxu0 %vm998_vm2, %v1950_v22 }
 0x429   :  { %8546 = vpow2.f32 %v1274_v32 }
 0x42b   :  { %2308 = vrot.lane.b32.xlu0 %v9597_v58, %s8988_s28  ;;  %7790 = vmatpush3.xpose.msk.msra.mxu0 %vm998_vm2, %v1950_v22  ;;  %v1235_v26 = vpop.xlane.xlu1 %1234 }
 0x42c   :  { %2334 = vrot.lane.b32.xlu1 %v9539_v43, %s8988_s28  ;;  %7791 = vmatprep.subr.msk.mxu0 %vm998_vm2, %v1948_v33  ;;  %v1261_v27 = vsub.f32 %v9850_v47, %v1235_v26 }
 0x42f   :  { %7792 = vmatpush3.xpose.msk.msra.mxu0 %vm998_vm2, %v1948_v33  ;;  %v1233_v59 = vpop.xlane.xlu1 %1232 }
 0x430   :  { %2330 = vrot.lane.b32.xlu1 %v9549_v50, %s8988_s28  ;;  %7793 = vmatprep.subr.msk.mxu0 %vm998_vm2, %v1946_v20 }
 0x433   :  { %7794 = vmatpush3.xpose.msk.msra.mxu0 %vm998_vm2, %v1946_v20  ;;  %v10032_v21 = vpop.xlane.xlu1 %1238 }
 0x434   :  { %2326 = vrot.lane.b32.xlu1 %v9545_v49, %s8988_s28  ;;  %7795 = vmatprep.subr.msk.mxu0 %vm998_vm2, %v1944_v52  ;;  %v1263_v26 = vsub.f32 %v9868_v61, %v10032_v21 }
 0x435   :  { %v10037_v41 = vpop.eup %8544 }
 0x436   :  { %v10039_v32 = vpop.eup %8546  ;;  %7665 = vmatprep.mubr.f32.mxu1 %v10037_v41 }
 0x437   :  { %7666 = vmatmul.mubr.f32.vlgmr.msra.gmra.mxu1 %v10039_v32  ;;  %7796 = vmatpush3.xpose.msk.msra.mxu0 %vm998_vm2, %v1944_v52  ;;  %v10044_v22 = vpop.xlane.xlu1 %1242  ;;  %v1259_v52 = vsub.f32 %v9841_v3, %v1231_v24  ;;  %v10104_v3 = vld [vmem:[%s12371_s2 + $0x38] sm:$0xff] }
 0x438   :  { %2322 = vrot.lane.b32.xlu1 %v9553_v1, %s8988_s28  ;;  %7718 = vmatpush3.xpose.msk.msra.mxu1 %vm563_vm1, %v9464_v19  ;;  %v1265_v61 = vsub.f32 %v9877_v55, %v10044_v22 }
 0x439   :  { %7719 = vmatprep.subr.msk.mxu1 %vm563_vm1, %v9457_v45 }
 0x43b   :  { %v1241_v33 = vpop.xlane.xlu1 %1240 }
 0x43c   :  { %2318 = vrot.lane.b32.xlu1 %v9561_v10, %s8988_s28  ;;  %7720 = vmatpush3.xpose.msk.msra.mxu1 %vm563_vm1, %v9457_v45 }
 0x43d   :  { %7721 = vmatprep.subr.msk.mxu1 %vm563_vm1, %v9450_v18 }
 0x43f   :  { %v1245_v20 = vpop.xlane.xlu1 %1244 }
 0x440   :  { %2314 = vrot.lane.b32.xlu1 %v9569_v36, %s8988_s28  ;;  %7722 = vmatpush3.xpose.msk.msra.mxu1 %vm563_vm1, %v9450_v18 }
 0x441   :  { %7723 = vmatprep.subr.msk.mxu1 %vm563_vm1, %v9443_v15 }
 0x443   :  { %v10064_v19 = vpop.xlane.xlu1 %1248 }
 0x444   :  { %2310 = vrot.lane.b32.xlu1 %v9579_v11, %s8988_s28  ;;  %7724 = vmatpush3.xpose.msk.msra.mxu1 %vm563_vm1, %v9443_v15 }
 0x445   :  { %7725 = vmatprep.subr.msk.mxu1 %vm563_vm1, %v9436_v14 }
 0x447   :  { %v10072_v45 = vpop.permute.xlu1 %1939 }
 0x448   :  { %2306 = vrot.lane.b32.xlu1 %v9587_v23, %s8988_s28  ;;  %7726 = vmatpush3.xpose.msk.msra.mxu1 %vm563_vm1, %v9436_v14 }
 0x449   :  { %7727 = vmatprep.subr.msk.mxu1 %vm563_vm1, %v9429_v13 }
 0x44b   :  { %v10080_v18 = vpop.permute.xlu1 %1937 }
 0x44c   :  { %7728 = vmatpush3.xpose.msk.msra.mxu1 %vm563_vm1, %v9429_v13  ;;  %v1260_v13 = vsub.f32 %v9859_v31, %v1233_v59  ;;  %v1264_v59 = vsub.f32 %v9888_v29, %v1241_v33  ;;  %v1266_v29 = vsub.f32 %v9897_v6, %v1245_v20  ;;  %v10136_v33 = vld [vmem:[%s12371_s2 + $0x20] sm:$0xff]  ;;  %v1268_v6 = vsub.f32 %v9906_v16, %v10064_v19  ;;  %v10148_v20 = vld [vmem:[%s12371_s2 + $0x18] sm:$0xff] }
 0x44d   :  { %7729 = vmatprep.subr.msk.mxu1 %vm563_vm1, %v9422_v12 }
 0x44e   :  { %v1288_v21 = vmul.f32 1.442695, %v1264_v59  ;;  %v1292_v22 = vmul.f32 1.442695, %v1266_v29  ;;  %v1296_v19 = vmul.f32 1.442695, %v1268_v6 }
 0x44f   :  { %v10086_v15 = vpop.permute.xlu1 %1935 }
 0x450   :  { %7730 = vmatpush3.xpose.msk.msra.mxu1 %vm563_vm1, %v9422_v12  ;;  %v1278_v12 = vmul.f32 1.442695, %v1259_v52  ;;  %v10124_v52 = vld [vmem:[%s12371_s2 + $0x28] sm:$0xff] }
 0x451   :  { %7731 = vmatprep.subr.msk.mxu1 %vm563_vm1, %v9415_v9 }
 0x453   :  { %v1904_v14 = vpop.permute.xlu1 %1903 }
 0x454   :  { %7805 = vmatprep.mubr.msk.f32.mxu0 %vm998_vm2, %v1904_v14  ;;  %7732 = vmatpush3.xpose.msk.msra.mxu1 %vm563_vm1, %v9415_v9  ;;  %v1280_v9 = vmul.f32 1.442695, %v1260_v13  ;;  %v1286_v13 = vmul.f32 1.442695, %v1263_v26  ;;  %v10184_v26 = vld [vmem:[%s12371_s2 + $0x8] sm:$0xff] }
 0x455   :  { %7733 = vmatprep.subr.msk.mxu1 %vm563_vm1, %v9408_v8  ;;  %v10111_v8 = vld [vmem:[%s12371_s2 + $0x30] sm:$0xff] }
 0x456   :  { %v1229_v35 = vpop.xlane.xlu0 %1228 }
 0x457   :  { %v1258_v44 = vsub.f32 %v9918_v60, %v1229_v35  ;;  %v1282_v60 = vmul.f32 1.442695, %v1261_v27 }
 0x458   :  { %7734 = vmatpush3.xpose.msk.msra.mxu1 %vm563_vm1, %v10104_v3 }
 0x459   :  { %v1276_v24 = vmul.f32 1.442695, %v1258_v44  ;;  %7735 = vmatprep.subr.msk.mxu1 %vm563_vm1, %v10111_v8  ;;  %v1290_v44 = vmul.f32 1.442695, %v1265_v61 }
 0x45a   :  { %v1237_v31 = vpop.xlane.xlu0 %1236 }
 0x45b   :  { %8548 = vpow2.f32 %v1276_v24  ;;  %v1262_v47 = vsub.f32 %v9929_v62, %v1237_v31  ;;  %v10165_v24 = vld [vmem:[%s12371_s2 + $0x10] sm:$0xff] }
 0x45c   :  { %8550 = vpow2.f32 %v1278_v12  ;;  %7736 = vmatpush3.xpose.msk.msra.mxu1 %vm563_vm1, %v10111_v8 }
 0x45d   :  { %8552 = vpow2.f32 %v1280_v9  ;;  %v1284_v14 = vmul.f32 1.442695, %v1262_v47  ;;  %7737 = vmatprep.subr.msk.mxu1 %vm563_vm1, %v10124_v52 }
 0x45e   :  { %v1247_v62 = vpop.xlane.xlu0 %1246  ;;  %8554 = vpow2.f32 %v1282_v60 }
 0x45f   :  { %8556 = vpow2.f32 %v1284_v14  ;;  %v1267_v55 = vsub.f32 %v9940_v38, %v1247_v62  ;;  %v10203_v62 = vld [vmem:[%s12371_s2] sm:$0xff] }
 0x460   :  { %7738 = vmatpush3.xpose.msk.msra.mxu1 %vm563_vm1, %v10124_v52  ;;  %8558 = vpow2.f32 %v1286_v13 }
 0x461   :  { %7739 = vmatprep.subr.msk.mxu1 %vm563_vm1, %v10136_v33  ;;  %8560 = vpow2.f32 %v1288_v21  ;;  %v1294_v38 = vmul.f32 1.442695, %v1267_v55 }
 0x462   :  { %v1251_v35 = vpop.xlane.xlu0 %1250  ;;  %8562 = vpow2.f32 %v1290_v44 }
 0x463   :  { %v1269_v9 = vsub.f32 %v9951_v40, %v1251_v35  ;;  %8564 = vpow2.f32 %v1292_v22 }
 0x464   :  { %7740 = vmatpush3.xpose.msk.msra.mxu1 %vm563_vm1, %v10136_v33  ;;  %8566 = vpow2.f32 %v1294_v38 }
 0x465   :  { %7741 = vmatprep.subr.msk.mxu1 %vm563_vm1, %v10148_v20  ;;  %v1298_v47 = vmul.f32 1.442695, %v1269_v9  ;;  %8568 = vpow2.f32 %v1296_v19 }
 0x466   :  { %v10152_v12 = vpop.xlane.xlu0 %1254 }
 0x467   :  { %8570 = vpow2.f32 %v1298_v47  ;;  %v1271_v38 = vsub.f32 %v9960_v2, %v10152_v12 }
 0x468   :  { %v10154_v27 = vpop.eup %8548  ;;  %7742 = vmatpush3.xpose.msk.msra.mxu1 %vm563_vm1, %v10148_v20 }
 0x469   :  { %v10159_v16 = vpop.eup %8550  ;;  %7668 = vmatprep.mubr.f32.mxu1 %v10154_v27  ;;  %7743 = vmatprep.subr.msk.mxu1 %vm563_vm1, %v10165_v24  ;;  %v1302_v47 = vmul.f32 1.442695, %v1271_v38 }
 0x46a   :  { %v10169_v31 = vpop.eup %8552  ;;  %v1942_v40 = vpop.permute.xlu0 %1941  ;;  %7669 = vmatmul.mubr.f32.gmra.mxu1 %v10159_v16 }
 0x46b   :  { %7671 = vmatprep.mubr.f32.mxu1 %v10169_v31  ;;  %7797 = vmatprep.subr.msk.mxu0 %vm998_vm2, %v1942_v40  ;;  %v10177_v60 = vpop.eup %8554 }
 0x46c   :  { %7798 = vmatpush3.xpose.msk.msra.mxu0 %vm998_vm2, %v1942_v40  ;;  %7744 = vmatpush3.xpose.msk.msra.mxu1 %vm563_vm1, %v10165_v24  ;;  %v10188_v59 = vpop.eup %8556 }
 0x46d   :  { %7799 = vmatprep.subr.msk.mxu0 %vm998_vm2, %v10072_v45  ;;  %7745 = vmatprep.subr.msk.mxu1 %vm563_vm1, %v10184_v26  ;;  %v10196_v14 = vpop.eup %8558 }
 0x46e   :  { %7672 = vmatmul.mubr.f32.gmra.mxu1 %v10177_v60  ;;  %v10207_v13 = vpop.eup %8560  ;;  %v1910_v21 = vpop.permute.xlu0 %1909 }
 0x46f   :  { %7674 = vmatprep.mubr.f32.mxu1 %v10188_v59 }
 0x470   :  { %7800 = vmatpush3.xpose.msk.msra.mxu0 %vm998_vm2, %v10072_v45  ;;  %7746 = vmatpush3.xpose.msk.msra.mxu1 %vm563_vm1, %v10184_v26  ;;  %v10215_v45 = vpop.eup %8562 }
 0x471   :  { %7801 = vmatprep.subr.msk.mxu0 %vm998_vm2, %v10080_v18  ;;  %7747 = vmatprep.subr.msk.mxu1 %vm563_vm1, %v10203_v62  ;;  %v10219_v61 = vpop.eup %8564 }
 0x472   :  { %7675 = vmatmul.mubr.f32.gmra.mxu1 %v10196_v14  ;;  %v10225_v29 = vpop.eup %8566  ;;  %v1914_v22 = vpop.permute.xlu0 %1913 }
 0x473   :  { %7677 = vmatprep.mubr.f32.mxu1 %v10207_v13  ;;  %v10227_v35 = vpop.eup %8568 }
 0x474   :  { %7802 = vmatpush3.xpose.msk.msra.mxu0 %vm998_vm2, %v10080_v18  ;;  %7748 = vmatpush3.xpose.msk.msra.mxu1 %vm563_vm1, %v10203_v62  ;;  %v7695_v18 = vpop.f32.mrf.mxu0  ;;  %v10231_v44 = vpop.eup %8570 }
 0x475   :  { %7803 = vmatprep.subr.msk.mxu0 %vm998_vm2, %v10086_v15  ;;  %12448 = vst [vmem:[#allocation14_spill] sm:$0xff] %v10231_v44 }
 0x476   :  { %7678 = vmatmul.mubr.f32.gmra.mxu1 %v10215_v45  ;;  %v1631_v55 = vpop.f32.mrf.mxu0 }
 0x477   :  { %7680 = vmatprep.mubr.f32.mxu1 %v10219_v61 }
 0x478   :  { %7804 = vmatpush3.xpose.msk.msra.mxu0 %vm998_vm2, %v10086_v15  ;;  %v7698_v6 = vpop.f32.mrf.mxu0  ;;  %v1918_v15 = vpop.permute.xlu0 %1917 }
 0x47a   :  { %7681 = vmatmul.mubr.f32.gmra.mxu1 %v10225_v29  ;;  %v1641_v40 = vpop.f32.mrf.mxu0 }
 0x47b   :  { %7683 = vmatprep.mubr.f32.mxu1 %v10227_v35 }
 0x47c   :  { %v7701_v11 = vpop.f32.mrf.mxu0  ;;  %v1922_v57 = vpop.permute.xlu0 %1921 }
 0x47e   :  { %7684 = vmatmul.mubr.f32.gmra.mxu1 %v10231_v44  ;;  %v1651_v56 = vpop.f32.mrf.mxu0 }
 0x480   :  { %v1926_v2 = vpop.permute.xlu0 %1925 }
 0x484   :  { %v1253_v9 = vpop.xlane.xlu1 %1252 }
 0x485   :  { %v1270_v19 = vsub.f32 %v9973_v25, %v1253_v9  ;;  %v7704_v25 = vpop.f32.mrf.mxu0  ;;  %v1930_v9 = vpop.permute.xlu0 %1929 }
 0x487   :  { %v1300_v58 = vmul.f32 1.442695, %v1270_v19 }
 0x488   :  { %v1906_v23 = vpop.permute.xlu1 %1905 }
 0x489   :  { %8572 = vpow2.f32 %v1300_v58  ;;  %7806 = vmatmul.mubr.msk.f32.vlgmr.msra.gmra.mxu0 %vm998_vm2, %v1906_v23  ;;  %v1661_v23 = vpop.f32.mrf.mxu0  ;;  %v1934_v19 = vpop.permute.xlu0 %1933 }
 0x48a   :  { %8574 = vpow2.f32 %v1302_v47 }
 0x48c   :  { %v1908_v36 = vpop.permute.xlu1 %1907 }
 0x48d   :  { %7808 = vmatprep.mubr.msk.f32.mxu0 %vm998_vm2, %v1908_v36 }
 0x48e   :  { %7809 = vmatmul.mubr.msk.f32.gmra.mxu0 %vm998_vm2, %v1910_v21 }
 0x490   :  { %v1912_v12 = vpop.permute.xlu1 %1911 }
 0x491   :  { %7811 = vmatprep.mubr.msk.f32.mxu0 %vm998_vm2, %v1912_v12 }
 0x492   :  { %7812 = vmatmul.mubr.msk.f32.gmra.mxu0 %vm998_vm2, %v1914_v22  ;;  %v7707_v22 = vpop.f32.mrf.mxu0 }
 0x494   :  { %v1916_v38 = vpop.permute.xlu1 %1915 }
 0x495   :  { %7814 = vmatprep.mubr.msk.f32.mxu0 %vm998_vm2, %v1916_v38 }
 0x496   :  { %v10243_v58 = vpop.eup %8572  ;;  %7815 = vmatmul.mubr.msk.f32.gmra.mxu0 %vm998_vm2, %v1918_v15  ;;  %v1671_v15 = vpop.f32.mrf.mxu0 }
 0x497   :  { %v10246_v36 = vpop.eup %8574  ;;  %7686 = vmatprep.mubr.f32.mxu1 %v10243_v58 }
 0x498   :  { %12449 = vst [vmem:[#allocation15_spill] sm:$0xff] %v10246_v36  ;;  %7687 = vmatmul.mubr.f32.gmra.mxu1 %v10246_v36  ;;  %v1920_v21 = vpop.permute.xlu1 %1919 }
 0x499   :  { %7749 = vmatprep.mubr.msk.f32.mxu1 %vm563_vm1, %v1631_v55  ;;  %7817 = vmatprep.mubr.msk.f32.mxu0 %vm998_vm2, %v1920_v21  ;;  %v7710_v55 = vpop.f32.mrf.mxu0 }
 0x49a   :  { %7818 = vmatmul.mubr.msk.f32.gmra.mxu0 %vm998_vm2, %v1922_v57  ;;  %v2333_v57 = vpop.permute.xlu0 %2332 }
 0x49c   :  { %7750 = vmatmul.mubr.msk.f32.vlgmr.msra.gmra.mxu1 %vm563_vm1, %v7695_v18  ;;  %v1924_v47 = vpop.permute.xlu1 %1923 }
 0x49d   :  { %7752 = vmatprep.mubr.msk.f32.mxu1 %vm563_vm1, %v1641_v40  ;;  %7820 = vmatprep.mubr.msk.f32.mxu0 %vm998_vm2, %v1924_v47  ;;  %v1681_v40 = vpop.f32.mrf.mxu0 }
 0x49e   :  { %7821 = vmatmul.mubr.msk.f32.gmra.mxu0 %vm998_vm2, %v1926_v2 }
 0x49f   :  { %v7713_v2 = vpop.f32.mrf.mxu0 }
 0x4a0   :  { %7753 = vmatmul.mubr.msk.f32.gmra.mxu1 %vm563_vm1, %v7698_v6  ;;  %v1928_v12 = vpop.permute.xlu1 %1927  ;;  %v2329_v6 = vpop.permute.xlu0 %2328 }
 0x4a1   :  { %7755 = vmatprep.mubr.msk.f32.mxu1 %vm563_vm1, %v1651_v56  ;;  %7823 = vmatprep.mubr.msk.f32.mxu0 %vm998_vm2, %v1928_v12  ;;  %v1691_v38 = vpop.f32.mrf.mxu0 }
 0x4a2   :  { %7824 = vmatmul.mubr.msk.f32.gmra.mxu0 %vm998_vm2, %v1930_v9 }
 0x4a3   :  { %v7716_v9 = vpop.f32.mrf.mxu0 }
 0x4a4   :  { %7756 = vmatmul.mubr.msk.f32.gmra.mxu1 %vm563_vm1, %v7701_v11  ;;  %v1932_v18 = vpop.permute.xlu1 %1931 }
 0x4a5   :  { %7758 = vmatprep.mubr.msk.f32.mxu1 %vm563_vm1, %v1661_v23  ;;  %7826 = vmatprep.mubr.msk.f32.mxu0 %vm998_vm2, %v1932_v18  ;;  %v2325_v23 = vpop.permute.xlu0 %2324 }
 0x4a6   :  { %7827 = vmatmul.mubr.msk.f32.gmra.mxu0 %vm998_vm2, %v1934_v19  ;;  %v1701_v19 = vpop.f32.mrf.mxu0 }
 0x4a8   :  { %7759 = vmatmul.mubr.msk.f32.gmra.mxu1 %vm563_vm1, %v7704_v25  ;;  %v2335_v56 = vpop.permute.xlu1 %2334 }
 0x4a9   :  { %7761 = vmatprep.mubr.msk.f32.mxu1 %vm563_vm1, %v1671_v15  ;;  %7829 = vmatprep.subr.mxu0 %v2335_v56  ;;  %v2321_v21 = vpop.permute.xlu0 %2320 }
 0x4aa   :  { %8469 = vmatprep.subr.mxu1 %v2335_v56  ;;  %7830 = vmatpush3.msra.mxu0 %v2335_v56 }
 0x4ab   :  { %8485 = vmatpush3.msra.mxu1 %v2335_v56  ;;  %7831 = vmatprep.subr.mxu0 %v2333_v57 }
 0x4ac   :  { %8470 = vmatprep.subr.mxu1 %v2333_v57  ;;  %7762 = vmatmul.mubr.msk.f32.gmra.mxu1 %vm563_vm1, %v7707_v22  ;;  %v2331_v11 = vpop.permute.xlu1 %2330 }
 0x4ad   :  { %7832 = vmatpush3.msra.mxu0 %v2333_v57  ;;  %8486 = vmatpush3.msra.mxu1 %v2333_v57  ;;  %v2317_v15 = vpop.permute.xlu0 %2316 }
 0x4ae   :  { %7764 = vmatprep.mubr.msk.f32.mxu1 %vm563_vm1, %v1681_v40  ;;  %7833 = vmatprep.subr.mxu0 %v2331_v11 }
 0x4af   :  { %8471 = vmatprep.subr.mxu1 %v2331_v11  ;;  %7834 = vmatpush3.msra.mxu0 %v2331_v11 }
 0x4b0   :  { %8487 = vmatpush3.msra.mxu1 %v2331_v11  ;;  %7835 = vmatprep.subr.mxu0 %v2329_v6  ;;  %v2327_v25 = vpop.permute.xlu1 %2326 }
 0x4b1   :  { %8472 = vmatprep.subr.mxu1 %v2329_v6  ;;  %7765 = vmatmul.mubr.msk.f32.gmra.mxu1 %vm563_vm1, %v7710_v55  ;;  %v2313_v55 = vpop.permute.xlu0 %2312 }
 0x4b2   :  { %7836 = vmatpush3.msra.mxu0 %v2329_v6  ;;  %8488 = vmatpush3.msra.mxu1 %v2329_v6 }
 0x4b3   :  { %7767 = vmatprep.mubr.msk.f32.mxu1 %vm563_vm1, %v1691_v38  ;;  %7837 = vmatprep.subr.mxu0 %v2327_v25 }
 0x4b4   :  { %8473 = vmatprep.subr.mxu1 %v2327_v25  ;;  %7838 = vmatpush3.msra.mxu0 %v2327_v25  ;;  %v2323_v22 = vpop.permute.xlu1 %2322 }
 0x4b5   :  { %8489 = vmatpush3.msra.mxu1 %v2327_v25  ;;  %7839 = vmatprep.subr.mxu0 %v2325_v23  ;;  %v2309_v18 = vpop.permute.xlu0 %2308 }
 0x4b6   :  { %8474 = vmatprep.subr.mxu1 %v2325_v23  ;;  %7768 = vmatmul.mubr.msk.f32.gmra.mxu1 %vm563_vm1, %v7713_v2 }
 0x4b7   :  { %7840 = vmatpush3.msra.mxu0 %v2325_v23  ;;  %8490 = vmatpush3.msra.mxu1 %v2325_v23 }
 0x4b8   :  { %7770 = vmatprep.mubr.msk.f32.mxu1 %vm563_vm1, %v1701_v19  ;;  %7841 = vmatprep.subr.mxu0 %v2323_v22  ;;  %v2319_v47 = vpop.permute.xlu1 %2318 }
 0x4b9   :  { %8475 = vmatprep.subr.mxu1 %v2323_v22  ;;  %7842 = vmatpush3.msra.mxu0 %v2323_v22 }
 0x4ba   :  { %8491 = vmatpush3.msra.mxu1 %v2323_v22  ;;  %7843 = vmatprep.subr.mxu0 %v2321_v21 }
 0x4bb   :  { %8476 = vmatprep.subr.mxu1 %v2321_v21  ;;  %7771 = vmatmul.mubr.msk.f32.gmra.mxu1 %vm563_vm1, %v7716_v9 }
 0x4bc   :  { %7844 = vmatpush3.msra.mxu0 %v2321_v21  ;;  %8492 = vmatpush3.msra.mxu1 %v2321_v21  ;;  %v2315_v12 = vpop.permute.xlu1 %2314 }
 0x4bd   :  { %7845 = vmatprep.subr.mxu0 %v2319_v47  ;;  %8477 = vmatprep.subr.mxu1 %v2319_v47 }
 0x4be   :  { %7846 = vmatpush3.msra.mxu0 %v2319_v47  ;;  %8493 = vmatpush3.msra.mxu1 %v2319_v47 }
 0x4bf   :  { %7847 = vmatprep.subr.mxu0 %v2317_v15  ;;  %8478 = vmatprep.subr.mxu1 %v2317_v15 }
 0x4c0   :  { %7848 = vmatpush3.msra.mxu0 %v2317_v15  ;;  %8494 = vmatpush3.msra.mxu1 %v2317_v15  ;;  %v2311_v57 = vpop.permute.xlu1 %2310 }
 0x4c1   :  { %7849 = vmatprep.subr.mxu0 %v2315_v12  ;;  %8479 = vmatprep.subr.mxu1 %v2315_v12 }
 0x4c2   :  { %7850 = vmatpush3.msra.mxu0 %v2315_v12  ;;  %8495 = vmatpush3.msra.mxu1 %v2315_v12 }
 0x4c3   :  { %7851 = vmatprep.subr.mxu0 %v2313_v55  ;;  %8480 = vmatprep.subr.mxu1 %v2313_v55 }
 0x4c4   :  { %7852 = vmatpush3.msra.mxu0 %v2313_v55  ;;  %8496 = vmatpush3.msra.mxu1 %v2313_v55  ;;  %v2307_v40 = vpop.permute.xlu1 %2306 }
 0x4c5   :  { %7853 = vmatprep.subr.mxu0 %v2311_v57  ;;  %8481 = vmatprep.subr.mxu1 %v2311_v57 }
 0x4c6   :  { %7854 = vmatpush3.msra.mxu0 %v2311_v57  ;;  %8497 = vmatpush3.msra.mxu1 %v2311_v57 }
 0x4c7   :  { %7855 = vmatprep.subr.mxu0 %v2309_v18  ;;  %8482 = vmatprep.subr.mxu1 %v2309_v18 }
 0x4c8   :  { %7856 = vmatpush3.msra.mxu0 %v2309_v18  ;;  %8498 = vmatpush3.msra.mxu1 %v2309_v18 }
 0x4c9   :  { %7857 = vmatprep.subr.mxu0 %v2307_v40  ;;  %8483 = vmatprep.subr.mxu1 %v2307_v40 }
 0x4ca   :  { %7858 = vmatpush3.msra.mxu0 %v2307_v40  ;;  %8499 = vmatpush3.msra.mxu1 %v2307_v40 }
 0x4f7   :  { %v10274_v6 = vpop.f32.mrf.mxu1 }
 0x4f9   :  { %v10276_v56 = vpop.f32.mrf.mxu1 }
 0x52a   :  { %v10278_v2 = vpop.f32.mrf.mxu1 }
 0x52b   :  { %12450 = vst [vmem:[#allocation16_spill] sm:$0xff] %v10278_v2 }
 0x52c   :  { %v10280_v11 = vpop.f32.mrf.mxu1 }
 0x52d   :  { %12451 = vst [vmem:[#allocation17_spill] sm:$0xff] %v10280_v11 }
 0x52e   :  { %v10282_v38 = vpop.f32.mrf.mxu1 }
 0x52f   :  { %12452 = vst [vmem:[#allocation18_spill] sm:$0xff] %v10282_v38 }
 0x530   :  { %v10284_v23 = vpop.f32.mrf.mxu1 }
 0x531   :  { %12453 = vst [vmem:[#allocation19_spill] sm:$0xff] %v10284_v23 }
 0x532   :  { %v10286_v25 = vpop.f32.mrf.mxu1 }
 0x533   :  { %12454 = vst [vmem:[#allocation20_spill] sm:$0xff] %v10286_v25 }
 0x534   :  { %v10288_v9 = vpop.f32.mrf.mxu1 }
 0x535   :  { %12455 = vst [vmem:[#allocation21_spill] sm:$0xff] %v10288_v9 }
 0x536   :  { %v10290_v21 = vpop.f32.mrf.mxu1 }
 0x537   :  { %12456 = vst [vmem:[#allocation22_spill] sm:$0xff] %v10290_v21 }
 0x538   :  { %v10292_v22 = vpop.f32.mrf.mxu1 }
 0x539   :  { %12457 = vst [vmem:[#allocation23_spill] sm:$0xff] %v10292_v22 }
 0x53a   :  { %v10294_v47 = vpop.f32.mrf.mxu1 }
 0x53b   :  { %12458 = vst [vmem:[#allocation24_spill] sm:$0xff] %v10294_v47 }
 0x53c   :  { %v10296_v12 = vpop.f32.mrf.mxu1 }
 0x53d   :  { %12459 = vst [vmem:[#allocation25_spill] sm:$0xff] %v10296_v12 }
 0x53e   :  { %v10298_v18 = vpop.f32.mrf.mxu1 }
 0x53f   :  { %12460 = vst [vmem:[#allocation26_spill] sm:$0xff] %v10298_v18 }
 0x540   :  { %v10300_v38 = vpop.f32.mrf.mxu1 }
 0x541   :  { %12461 = vst [vmem:[#allocation27_spill] sm:$0xff] %v10300_v38 }
 0x549   :  { %v7807_v19 = vpop.f32.mrf.mxu0 }
 0x54b   :  { %v2097_v15 = vpop.f32.mrf.mxu0 }
 0x54e   :  { %v7810_v55 = vpop.f32.mrf.mxu0 }
 0x550   :  { %v2107_v57 = vpop.f32.mrf.mxu0 }
 0x552   :  { %v7813_v40 = vpop.f32.mrf.mxu0 }
 0x554   :  { %v2117_v36 = vpop.f32.mrf.mxu0 }
 0x556   :  { %v7816_v9 = vpop.f32.mrf.mxu0 }
 0x558   :  { %v10302_v25 = vpop.f32.mrf.mxu1  ;;  %v2127_v23 = vpop.f32.mrf.mxu0 }
 0x559   :  { %12462 = vst [vmem:[#allocation28_spill] sm:$0xff] %v10302_v25 }
 0x55a   :  { %v10304_v21 = vpop.f32.mrf.mxu1  ;;  %v7819_v53 = vpop.f32.mrf.mxu0 }
 0x55b   :  { %12463 = vst [vmem:[#allocation29_spill] sm:$0xff] %v10304_v21 }
 0x55c   :  { %v7751_v22 = vpop.f32.mrf.mxu1 }
 0x55d   :  { %v2103_v2 = vadd.f32 %v7807_v19, %v7751_v22  ;;  %v2137_v19 = vpop.f32.mrf.mxu0 }
 0x55e   :  { %v1824_v47 = vpop.f32.mrf.mxu1 }
 0x55f   :  { %v10307_v11 = vadd.f32 %v2103_v2, %v9820_v37  ;;  %v2098_v12 = vadd.f32 %v2097_v15, %v1824_v47 }
 0x560   :  { %v7754_v10 = vpop.f32.mrf.mxu1 }
 0x561   :  { %v10310_v18 = vadd.f32 %v2098_v12, %v9825_v0  ;;  %v2113_v44 = vadd.f32 %v7810_v55, %v7754_v10  ;;  %2194 = vmax.xlane.f32.xlu1 %v10307_v11 }
 0x562   :  { %v1834_v25 = vpop.f32.mrf.mxu1 }
 0x563   :  { %v10314_v38 = vadd.f32 %v2113_v44, %v9837_v63  ;;  %v2108_v21 = vadd.f32 %v2107_v57, %v1834_v25  ;;  %2192 = vmax.xlane.f32.xlu0 %v10310_v18  ;;  %v7822_v44 = vpop.f32.mrf.mxu0 }
 0x564   :  { %v7757_v22 = vpop.f32.mrf.mxu1 }
 0x565   :  { %v10318_v37 = vadd.f32 %v2108_v21, %v9913_v30  ;;  %v2123_v2 = vadd.f32 %v7813_v40, %v7757_v22  ;;  %2198 = vmax.xlane.f32.xlu1 %v10314_v38  ;;  %v2147_v55 = vpop.f32.mrf.mxu0 }
 0x566   :  { %v1844_v0 = vpop.f32.mrf.mxu1 }
 0x567   :  { %v10322_v10 = vadd.f32 %v2123_v2, %v9846_v5  ;;  %v2118_v47 = vadd.f32 %v2117_v36, %v1844_v0  ;;  %2196 = vmax.xlane.f32.xlu0 %v10318_v37 }
 0x568   :  { %v7760_v63 = vpop.f32.mrf.mxu1 }
 0x569   :  { %v10326_v25 = vadd.f32 %v2118_v47, %v9855_v54  ;;  %v2133_v15 = vadd.f32 %v7816_v9, %v7760_v63  ;;  %2202 = vmax.xlane.f32.xlu1 %v10322_v10 }
 0x56a   :  { %v1854_v30 = vpop.f32.mrf.mxu1 }
 0x56b   :  { %v10330_v21 = vadd.f32 %v2133_v15, %v9864_v34  ;;  %v2128_v12 = vadd.f32 %v2127_v23, %v1854_v30  ;;  %2200 = vmax.xlane.f32.xlu0 %v10326_v25  ;;  %v7825_v34 = vpop.f32.mrf.mxu0 }
 0x56c   :  { %v7763_v5 = vpop.f32.mrf.mxu1 }
 0x56d   :  { %v10334_v36 = vadd.f32 %v2128_v12, %v9923_v7  ;;  %v2143_v57 = vadd.f32 %v7819_v53, %v7763_v5  ;;  %2206 = vmax.xlane.f32.xlu1 %v10330_v21  ;;  %v12464_v12 = vld [vmem:[#allocation11_spill] sm:$0xff] }
 0x56e   :  { %v1864_v54 = vpop.f32.mrf.mxu1 }
 0x56f   :  { %v10338_v9 = vadd.f32 %v2143_v57, %v9873_v46  ;;  %v2138_v40 = vadd.f32 %v2137_v19, %v1864_v54  ;;  %2204 = vmax.xlane.f32.xlu0 %v10334_v36  ;;  %v2157_v46 = vpop.f32.mrf.mxu0  ;;  %v12465_v54 = vld [vmem:[#allocation12_spill] sm:$0xff] }
 0x571   :  { %v10342_v23 = vadd.f32 %v2138_v40, %v9882_v42  ;;  %v7766_v22 = vpop.f32.mrf.mxu1  ;;  %2210 = vmax.xlane.f32.xlu1 %v10338_v9  ;;  %v7828_v15 = vpop.f32.mrf.mxu0 }
 0x572   :  { %v2153_v2 = vadd.f32 %v7822_v44, %v7766_v22  ;;  %v12466_v22 = vld [vmem:[#allocation13_spill] sm:$0xff] }
 0x573   :  { %v1874_v7 = vpop.f32.mrf.mxu1  ;;  %2208 = vmax.xlane.f32.xlu0 %v10342_v23 }
 0x574   :  { %v10347_v53 = vadd.f32 %v2153_v2, %v9934_v17  ;;  %v2148_v0 = vadd.f32 %v2147_v55, %v1874_v7  ;;  %v2167_v55 = vpop.f32.mrf.mxu0 }
 0x576   :  { %v10350_v19 = vadd.f32 %v2148_v0, %v9893_v4  ;;  %v7769_v47 = vpop.f32.mrf.mxu1  ;;  %2214 = vmax.xlane.f32.xlu1 %v10347_v53 }
 0x577   :  { %v2163_v42 = vadd.f32 %v7825_v34, %v7769_v47 }
 0x578   :  { %v1884_v63 = vpop.f32.mrf.mxu1  ;;  %2212 = vmax.xlane.f32.xlu0 %v10350_v19 }
 0x579   :  { %v10355_v44 = vadd.f32 %v2163_v42, %v9945_v39  ;;  %v2158_v30 = vadd.f32 %v2157_v46, %v1884_v63  ;;  %v12467_v39 = vld [vmem:[#allocation2_spill] sm:$0xff] }
 0x57b   :  { %v10358_v17 = vadd.f32 %v2158_v30, %v12464_v12  ;;  %v7772_v5 = vpop.f32.mrf.mxu1  ;;  %2218 = vmax.xlane.f32.xlu1 %v10355_v44 }
 0x57c   :  { %v2173_v4 = vadd.f32 %v7828_v15, %v7772_v5 }
 0x57d   :  { %v1894_v57 = vpop.f32.mrf.mxu1  ;;  %2216 = vmax.xlane.f32.xlu0 %v10358_v17 }
 0x57e   :  { %v10363_v40 = vadd.f32 %v2173_v4, %v12465_v54  ;;  %v2168_v34 = vadd.f32 %v2167_v55, %v1894_v57 }
 0x580   :  { %v10366_v2 = vadd.f32 %v2168_v34, %v12466_v22  ;;  %2222 = vmax.xlane.f32.xlu1 %v10363_v40 }
 0x582   :  { %2220 = vmax.xlane.f32.xlu0 %v10366_v2 }
 0x584   :  { %1304 = vadd.xlane.f32.xlu1 %v10037_v41 }
 0x598   :  { %2304 = vrot.lane.b32.xlu0 %v12467_v39, %s8988_s28 }
 0x5b7   :  { %1306 = vadd.xlane.f32.xlu0 %v10039_v32 }
 0x5ea   :  { %v2195_v7 = vpop.xlane.xlu1 %2194 }
 0x5eb   :  { %v2225_v0 = vsub.f32 %v10307_v11, %v2195_v7 }
 0x5ec   :  { %v2193_v46 = vpop.xlane.xlu0 %2192 }
 0x5ed   :  { %v2242_v47 = vmul.f32 1.442695, %v2225_v0  ;;  %v2224_v42 = vsub.f32 %v10310_v18, %v2193_v46 }
 0x5ee   :  { %v2199_v63 = vpop.xlane.xlu1 %2198 }
 0x5ef   :  { %8576 = vpow2.f32 %v2242_v47  ;;  %v2240_v15 = vmul.f32 1.442695, %v2224_v42  ;;  %v2227_v30 = vsub.f32 %v10314_v38, %v2199_v63 }
 0x5f0   :  { %v2197_v12 = vpop.xlane.xlu0 %2196 }
 0x5f1   :  { %8578 = vpow2.f32 %v2240_v15  ;;  %v2246_v5 = vmul.f32 1.442695, %v2227_v30  ;;  %v2226_v4 = vsub.f32 %v10318_v37, %v2197_v12 }
 0x5f2   :  { %v2203_v41 = vpop.xlane.xlu1 %2202 }
 0x5f3   :  { %8580 = vpow2.f32 %v2246_v5  ;;  %v2244_v11 = vmul.f32 1.442695, %v2226_v4  ;;  %v2229_v54 = vsub.f32 %v10322_v10, %v2203_v41 }
 0x5f4   :  { %v2201_v55 = vpop.xlane.xlu0 %2200 }
 0x5f5   :  { %v2228_v32 = vsub.f32 %v10326_v25, %v2201_v55  ;;  %v2250_v7 = vmul.f32 1.442695, %v2229_v54 }
 0x5f6   :  { %v2207_v57 = vpop.xlane.xlu1 %2206 }
 0x5f7   :  { %v2248_v18 = vmul.f32 1.442695, %v2228_v32  ;;  %v2231_v37 = vsub.f32 %v10330_v21, %v2207_v57 }
 0x5f8   :  { %v2205_v34 = vpop.xlane.xlu0 %2204 }
 0x5f9   :  { %8582 = vpow2.f32 %v2248_v18  ;;  %v2230_v22 = vsub.f32 %v10334_v36, %v2205_v34  ;;  %v2254_v15 = vmul.f32 1.442695, %v2231_v37 }
 0x5fa   :  { %v2211_v38 = vpop.xlane.xlu1 %2210  ;;  %8584 = vpow2.f32 %v2244_v11 }
 0x5fb   :  { %v2252_v0 = vmul.f32 1.442695, %v2230_v22  ;;  %v2233_v36 = vsub.f32 %v10338_v9, %v2211_v38 }
 0x5fc   :  { %v8577_v46 = vpop.eup %8576  ;;  %v2209_v47 = vpop.xlane.xlu0 %2208 }
 0x5fd   :  { %8586 = vpow2.f32 %v2252_v0  ;;  %v2232_v25 = vsub.f32 %v10342_v23, %v2209_v47  ;;  %2274 = vadd.xlane.f32.xlu1 %v8577_v46  ;;  %v2258_v21 = vmul.f32 1.442695, %v2233_v36 }
 0x5fe   :  { %v8579_v42 = vpop.eup %8578  ;;  %8588 = vpow2.f32 %v2250_v7 }
 0x5ff   :  { %v2256_v10 = vmul.f32 1.442695, %v2232_v25  ;;  %v2215_v63 = vpop.xlane.xlu1 %2214  ;;  %7861 = vmatprep.mubr.f32.mxu0 %v8579_v42 }
 0x600   :  { %v8581_v41 = vpop.eup %8580  ;;  %v2235_v5 = vsub.f32 %v10347_v53, %v2215_v63 }
 0x601   :  { %v2213_v30 = vpop.xlane.xlu0 %2212  ;;  %2272 = vadd.xlane.f32.xlu1 %v8579_v42  ;;  %8590 = vpow2.f32 %v2256_v10 }
 0x602   :  { %v2234_v12 = vsub.f32 %v10350_v19, %v2213_v30  ;;  %8592 = vpow2.f32 %v2254_v15  ;;  %v2262_v19 = vmul.f32 1.442695, %v2235_v5  ;;  %v2529_v5 = vld [vmem:[%s12376_s8 + $0x8] sm:$0xff] }
 0x604   :  { %v2260_v23 = vmul.f32 1.442695, %v2234_v12  ;;  %v2219_v4 = vpop.xlane.xlu1 %2218 }
 0x605   :  { %v2237_v55 = vsub.f32 %v10355_v44, %v2219_v4  ;;  %2278 = vadd.xlane.f32.xlu1 %v8581_v41 }
 0x606   :  { %v8583_v32 = vpop.eup %8582  ;;  %v2217_v57 = vpop.xlane.xlu0 %2216  ;;  %8594 = vpow2.f32 %v2260_v23 }
 0x607   :  { %v2266_v11 = vmul.f32 1.442695, %v2237_v55  ;;  %v2236_v9 = vsub.f32 %v10358_v17, %v2217_v57  ;;  %2280 = vadd.xlane.f32.xlu0 %v8583_v32  ;;  %v8585_v54 = vpop.eup %8584  ;;  %8596 = vpow2.f32 %v2258_v21  ;;  %v10417_v55 = vld [vmem:[%s12371_s2 + $0x70] sm:$0xff]  ;;  %v10471_v57 = vld [vmem:[%s12371_s2 + $0x48] sm:$0xff] }
 0x609   :  { %8598 = vpow2.f32 %v2266_v11  ;;  %v2264_v18 = vmul.f32 1.442695, %v2236_v9  ;;  %v2223_v34 = vpop.xlane.xlu1 %2222  ;;  %2276 = vadd.xlane.f32.xlu1 %v8585_v54  ;;  %v10480_v11 = vld [vmem:[%s12371_s2 + $0x40] sm:$0xff] }
 0x60a   :  { %v8587_v53 = vpop.eup %8586  ;;  %v2239_v22 = vsub.f32 %v10363_v40, %v2223_v34  ;;  %v1561_v40 = vld [vmem:[%s12376_s8] sm:$0xff] }
 0x60b   :  { %8600 = vpow2.f32 %v2264_v18  ;;  %v2221_v44 = vpop.xlane.xlu0 %2220  ;;  %7870 = vmatprep.mubr.f32.mxu1 %v8587_v53  ;;  %v8589_v38 = vpop.eup %8588 }
 0x60c   :  { %8602 = vpow2.f32 %v2262_v19  ;;  %v2270_v7 = vmul.f32 1.442695, %v2239_v22  ;;  %v2238_v0 = vsub.f32 %v10366_v2, %v2221_v44 }
 0x60d   :  { %2282 = vadd.xlane.f32.xlu1 %v8589_v38  ;;  %v1305_v37 = vpop.xlane.xlu1 %1304 }
 0x60e   :  { %8604 = vpow2.f32 %v2270_v7  ;;  %v2268_v17 = vmul.f32 1.442695, %v2238_v0  ;;  %v8591_v25 = vpop.eup %8590  ;;  %v12468_v0 = vld [vmem:[#allocation14_spill] sm:$0xff] }
 0x60f   :  { %v2305_v47 = vpop.permute.xlu0 %2304  ;;  %v8593_v42 = vpop.eup %8592 }
 0x610   :  { %8606 = vpow2.f32 %v2268_v17  ;;  %7859 = vmatprep.subr.mxu0 %v2305_v47  ;;  %8484 = vmatprep.subr.mxu1 %v2305_v47 }
 0x611   :  { %8608 = vrcp.f32 %v1305_v37  ;;  %7860 = vmatpush3.msra.mxu0 %v2305_v47  ;;  %8500 = vmatpush3.msra.mxu1 %v2305_v47 }
 0x612   :  { %7862 = vmatmul.mubr.f32.vlgmr.msra.gmra.mxu0 %v8577_v46  ;;  %7871 = vmatmul.mubr.f32.vlgmr.msra.gmra.mxu1 %v8593_v42  ;;  %v10396_v46 = vld [vmem:[%s12371_s2 + $0x78] sm:$0xff] }
 0x613   :  { %7864 = vmatprep.mubr.f32.mxu0 %v8585_v54  ;;  %7873 = vmatprep.mubr.f32.mxu1 %v8591_v25  ;;  %v8595_v2 = vpop.eup %8594 }
 0x614   :  { %2286 = vadd.xlane.f32.xlu1 %v8593_v42  ;;  %7911 = vmatprep.subr.mxu1 %v1561_v40  ;;  %v8597_v10 = vpop.eup %8596 }
 0x615   :  { %7912 = vmatpush3.msra.mxu1 %v1561_v40  ;;  %7885 = vmatprep.subr.mxu0 %v2529_v5 }
 0x616   :  { %v8599_v63 = vpop.eup %8598  ;;  %7865 = vmatmul.mubr.f32.gmra.mxu0 %v8581_v41  ;;  %7874 = vmatmul.mubr.f32.gmra.mxu1 %v8597_v10 }
 0x617   :  { %7867 = vmatprep.mubr.f32.mxu0 %v8583_v32  ;;  %7876 = vmatprep.mubr.f32.mxu1 %v8595_v2  ;;  %v10452_v32 = vld [vmem:[%s12371_s2 + $0x58] sm:$0xff] }
 0x618   :  { %v8601_v15 = vpop.eup %8600  ;;  %2284 = vadd.xlane.f32.xlu1 %v8587_v53  ;;  %2298 = vadd.xlane.f32.xlu0 %v8599_v63 }
 0x619   :  { %v8603_v36 = vpop.eup %8602  ;;  %7965 = vmatprep.subr.msk.mxu1 %vm563_vm1, %v10396_v46  ;;  %7886 = vmatpush3.msra.mxu0 %v2529_v5 }
 0x61a   :  { %7868 = vmatmul.mubr.f32.gmra.mxu0 %v8589_v38  ;;  %7877 = vmatmul.mubr.f32.gmra.mxu1 %v8603_v36 }
 0x61b   :  { %v8605_v30 = vpop.eup %8604  ;;  %7879 = vmatprep.mubr.f32.mxu1 %v8601_v15 }
 0x61c   :  { %2290 = vadd.xlane.f32.xlu1 %v8597_v10  ;;  %2302 = vadd.xlane.f32.xlu0 %v8605_v30 }
 0x61d   :  { %v8607_v12 = vpop.eup %8606 }
 0x61e   :  { %v8609_v41 = vpop.eup %8608  ;;  %7880 = vmatmul.mubr.f32.gmra.mxu1 %v8599_v63 }
 0x61f   :  { %7882 = vmatprep.mubr.f32.mxu1 %v8607_v12  ;;  %v1530_v21 = vmul.f32 %v8609_v41, %v10276_v56 }
 0x620   :  { %2288 = vadd.xlane.f32.xlu1 %v8591_v25 }
 0x622   :  { %7883 = vmatmul.mubr.f32.gmra.mxu1 %v8605_v30 }
 0x623   :  { %7913 = vmatprep.mubr.msk.f32.mxu1 %vm998_vm2, %v1530_v21 }
 0x624   :  { %2294 = vadd.xlane.f32.xlu1 %v8603_v36 }
 0x628   :  { %2292 = vadd.xlane.f32.xlu1 %v8595_v2 }
 0x62c   :  { %2296 = vadd.xlane.f32.xlu1 %v8601_v15 }
 0x630   :  { %2300 = vadd.xlane.f32.xlu1 %v8607_v12 }
 0x632   :  { %3317 = vrot.lane.b32.xlu0 %v9541_v48, %s8989_s17 }
 0x640   :  { %v1307_v23 = vpop.xlane.xlu0 %1306 }
 0x641   :  { %8610 = vrcp.f32 %v1307_v23  ;;  %3319 = vrot.lane.b32.xlu1 %v9539_v43, %s8989_s17 }
 0x64e   :  { %v8611_v56 = vpop.eup %8610 }
 0x64f   :  { %v1532_v4 = vmul.f32 %v8611_v56, %v10274_v6  ;;  %v10432_v6 = vld [vmem:[%s12371_s2 + $0x68] sm:$0xff] }
 0x651   :  { %1310 = vadd.xlane.f32.xlu0 %v10159_v16  ;;  %7914 = vmatmul.mubr.msk.f32.vlgmr.msra.gmra.mxu1 %vm998_vm2, %v1532_v4  ;;  %v10427_v16 = vld [vmem:[%s12370_s3 + $0x28] sm:$0xff] }
 0x652   :  { %7966 = vmatpush3.xpose.msk.msra.mxu1 %vm563_vm1, %v10396_v46  ;;  %7937 = vmatprep.subr.mxu0 %v10427_v16 }
 0x653   :  { %7967 = vmatprep.subr.msk.mxu1 %vm563_vm1, %v10417_v55 }
 0x655   :  { %1312 = vadd.xlane.f32.xlu0 %v10169_v31  ;;  %v10443_v31 = vld [vmem:[%s12371_s2 + $0x60] sm:$0xff] }
 0x656   :  { %7968 = vmatpush3.xpose.msk.msra.mxu1 %vm563_vm1, %v10417_v55 }
 0x657   :  { %7969 = vmatprep.subr.msk.mxu1 %vm563_vm1, %v10432_v6 }
 0x659   :  { %1314 = vadd.xlane.f32.xlu0 %v10177_v60  ;;  %v10461_v60 = vld [vmem:[%s12371_s2 + $0x50] sm:$0xff] }
 0x65a   :  { %7970 = vmatpush3.xpose.msk.msra.mxu1 %vm563_vm1, %v10432_v6 }
 0x65b   :  { %7971 = vmatprep.subr.msk.mxu1 %vm563_vm1, %v10443_v31 }
 0x65e   :  { %7972 = vmatpush3.xpose.msk.msra.mxu1 %vm563_vm1, %v10443_v31 }
 0x65f   :  { %7973 = vmatprep.subr.msk.mxu1 %vm563_vm1, %v10452_v32 }
 0x662   :  { %7974 = vmatpush3.xpose.msk.msra.mxu1 %vm563_vm1, %v10452_v32 }
 0x663   :  { %7975 = vmatprep.subr.msk.mxu1 %vm563_vm1, %v10461_v60 }
 0x665   :  { %1308 = vadd.xlane.f32.xlu1 %v10154_v27 }
 0x666   :  { %7976 = vmatpush3.xpose.msk.msra.mxu1 %vm563_vm1, %v10461_v60 }
 0x667   :  { %7977 = vmatprep.subr.msk.mxu1 %vm563_vm1, %v10471_v57 }
 0x66a   :  { %7978 = vmatpush3.xpose.msk.msra.mxu1 %vm563_vm1, %v10471_v57 }
 0x66b   :  { %7979 = vmatprep.subr.msk.mxu1 %vm563_vm1, %v10480_v11 }
 0x66e   :  { %7980 = vmatpush3.xpose.msk.msra.mxu1 %vm563_vm1, %v10480_v11 }
 0x66f   :  { %3313 = vrot.lane.b32.xlu0 %v9557_v51, %s8989_s17  ;;  %7981 = vmatprep.subr.msk.mxu1 %vm563_vm1, %v10104_v3 }
 0x672   :  { %7982 = vmatpush3.xpose.msk.msra.mxu1 %vm563_vm1, %v10104_v3 }
 0x673   :  { %7983 = vmatprep.subr.msk.mxu1 %vm563_vm1, %v10111_v8 }
 0x676   :  { %3315 = vrot.lane.b32.xlu1 %v9549_v50, %s8989_s17  ;;  %7984 = vmatpush3.xpose.msk.msra.mxu1 %vm563_vm1, %v10111_v8 }
 0x677   :  { %7985 = vmatprep.subr.msk.mxu1 %vm563_vm1, %v10124_v52 }
 0x67a   :  { %7986 = vmatpush3.xpose.msk.msra.mxu1 %vm563_vm1, %v10124_v52 }
 0x67b   :  { %7987 = vmatprep.subr.msk.mxu1 %vm563_vm1, %v10136_v33 }
 0x67e   :  { %7988 = vmatpush3.xpose.msk.msra.mxu1 %vm563_vm1, %v10136_v33 }
 0x67f   :  { %7989 = vmatprep.subr.msk.mxu1 %vm563_vm1, %v10148_v20 }
 0x682   :  { %7990 = vmatpush3.xpose.msk.msra.mxu1 %vm563_vm1, %v10148_v20 }
 0x683   :  { %7991 = vmatprep.subr.msk.mxu1 %vm563_vm1, %v10165_v24 }
 0x686   :  { %7992 = vmatpush3.xpose.msk.msra.mxu1 %vm563_vm1, %v10165_v24  ;;  %v2275_v3 = vpop.xlane.xlu1 %2274 }
 0x687   :  { %7993 = vmatprep.subr.msk.mxu1 %vm563_vm1, %v10184_v26 }
 0x68a   :  { %7994 = vmatpush3.xpose.msk.msra.mxu1 %vm563_vm1, %v10184_v26  ;;  %v2273_v8 = vpop.xlane.xlu1 %2272 }
 0x68b   :  { %7995 = vmatprep.subr.msk.mxu1 %vm563_vm1, %v10203_v62  ;;  %8612 = vrcp.f32 %v2273_v8 }
 0x68c   :  { %8614 = vrcp.f32 %v2275_v3 }
 0x68e   :  { %1318 = vadd.xlane.f32.xlu0 %v10196_v14  ;;  %7996 = vmatpush3.xpose.msk.msra.mxu1 %vm563_vm1, %v10203_v62  ;;  %v2279_v52 = vpop.xlane.xlu1 %2278 }
 0x692   :  { %1320 = vadd.xlane.f32.xlu0 %v10207_v13  ;;  %v2277_v33 = vpop.xlane.xlu1 %2276  ;;  %v2281_v13 = vpop.xlane.xlu0 %2280 }
 0x693   :  { %8616 = vrcp.f32 %v2277_v33 }
 0x694   :  { %8618 = vrcp.f32 %v2279_v52 }
 0x695   :  { %8620 = vrcp.f32 %v2281_v13 }
 0x696   :  { %1322 = vadd.xlane.f32.xlu0 %v10215_v45  ;;  %v2283_v20 = vpop.xlane.xlu1 %2282 }
 0x697   :  { %8622 = vrcp.f32 %v2283_v20 }
 0x698   :  { %v8613_v19 = vpop.eup %8612 }
 0x699   :  { %v8615_v53 = vpop.eup %8614 }
 0x69a   :  { %1316 = vadd.xlane.f32.xlu1 %v10188_v59  ;;  %1324 = vadd.xlane.f32.xlu0 %v10219_v61 }
 0x69d   :  { %v2287_v27 = vpop.xlane.xlu1 %2286 }
 0x6a1   :  { %v2285_v24 = vpop.xlane.xlu1 %2284  ;;  %v2299_v54 = vpop.xlane.xlu0 %2298 }
 0x6a2   :  { %8624 = vrcp.f32 %v2285_v24 }
 0x6a3   :  { %8626 = vrcp.f32 %v2287_v27 }
 0x6a5   :  { %v2291_v26 = vpop.xlane.xlu1 %2290  ;;  %v2303_v25 = vpop.xlane.xlu0 %2302 }
 0x6a9   :  { %v2289_v14 = vpop.xlane.xlu1 %2288  ;;  %v10549_v23 = vpop.permute.xlu0 %3317 }
 0x6aa   :  { %8628 = vrcp.f32 %v2289_v14 }
 0x6ab   :  { %3311 = vrot.lane.b32.xlu1 %v9545_v49, %s8989_s17  ;;  %8630 = vrcp.f32 %v2291_v26 }
 0x6ad   :  { %v2295_v62 = vpop.xlane.xlu1 %2294 }
 0x6af   :  { %3309 = vrot.lane.b32.xlu1 %v9565_v28, %s8989_s17 }
 0x6b0   :  { %3307 = vrot.lane.b32.xlu0 %v9553_v1, %s8989_s17 }
 0x6b1   :  { %v2293_v59 = vpop.xlane.xlu1 %2292 }
 0x6b2   :  { %8632 = vrcp.f32 %v2293_v59  ;;  %v12469_v59 = vld [vmem:[#allocation5_spill] sm:$0xff] }
 0x6b3   :  { %8634 = vrcp.f32 %v2295_v62 }
 0x6b5   :  { %v2297_v45 = vpop.xlane.xlu1 %2296 }
 0x6b6   :  { %8636 = vrcp.f32 %v2297_v45 }
 0x6b7   :  { %8638 = vrcp.f32 %v2299_v54 }
 0x6b9   :  { %v2301_v22 = vpop.xlane.xlu1 %2300 }
 0x6ba   :  { %8640 = vrcp.f32 %v2301_v22 }
 0x6bb   :  { %8642 = vrcp.f32 %v2303_v25  ;;  %v12474_v25 = vld [vmem:[#allocation6_spill] sm:$0xff] }
 0x6bd   :  { %v10543_v63 = vpop.permute.xlu1 %3319 }
 0x6cf   :  { %1328 = vadd.xlane.f32.xlu0 %v10227_v35 }
 0x6d2   :  { %v7863_v61 = vpop.f32.mrf.mxu0  ;;  %v7872_v9 = vpop.f32.mrf.mxu1 }
 0x6d3   :  { %1326 = vadd.xlane.f32.xlu1 %v10225_v29  ;;  %1332 = vadd.xlane.f32.xlu0 %v10243_v58  ;;  %v2500_v38 = vmul.f32 %v8615_v53, %v7863_v61  ;;  %v6616_v29 = vld [vmem:[%s12370_s3 + $0x20] sm:$0xff]  ;;  %v8617_v58 = vpop.eup %8616  ;;  %v12470_v61 = vld [vmem:[#allocation3_spill] sm:$0xff] }
 0x6d4   :  { %v2418_v18 = vpop.f32.mrf.mxu0  ;;  %v2448_v34 = vpop.f32.mrf.mxu1  ;;  %v12471_v53 = vld [vmem:[#allocation7_spill] sm:$0xff] }
 0x6d5   :  { %v2498_v44 = vmul.f32 %v8613_v19, %v2418_v18  ;;  %v8619_v47 = vpop.eup %8618 }
 0x6d6   :  { %v7866_v7 = vpop.f32.mrf.mxu0  ;;  %v7875_v35 = vpop.f32.mrf.mxu1 }
 0x6d7   :  { %1330 = vadd.xlane.f32.xlu1 %v12468_v0  ;;  %7887 = vmatprep.mubr.msk.f32.mxu0 %vm998_vm2, %v2498_v44  ;;  %v2504_v40 = vmul.f32 %v8619_v47, %v7866_v7  ;;  %v8621_v15 = vpop.eup %8620  ;;  %v8913_v47 = vld [vmem:[%s12371_s2 + $0x8] sm:$0xff] }
 0x6d8   :  { %v2428_v17 = vpop.f32.mrf.mxu0  ;;  %v2458_v37 = vpop.f32.mrf.mxu1  ;;  %7888 = vmatmul.mubr.msk.f32.vlgmr.msra.gmra.mxu0 %vm998_vm2, %v2500_v38 }
 0x6d9   :  { %v2502_v42 = vmul.f32 %v8617_v58, %v2428_v17  ;;  %7938 = vmatpush3.msra.mxu0 %v10427_v16  ;;  %v8623_v12 = vpop.eup %8622  ;;  %v12473_v17 = vld [vmem:[#allocation9_spill] sm:$0xff] }
 0x6da   :  { %7939 = vmatprep.subr.mxu0 %v6616_v29  ;;  %v7869_v2 = vpop.f32.mrf.mxu0  ;;  %v7878_v10 = vpop.f32.mrf.mxu1 }
 0x6db   :  { %7940 = vmatpush3.msra.mxu0 %v6616_v29  ;;  %7890 = vmatprep.mubr.msk.f32.mxu0 %vm998_vm2, %v2502_v42  ;;  %v8625_v21 = vpop.eup %8624  ;;  %v2508_v5 = vmul.f32 %v8623_v12, %v7869_v2  ;;  %v1311_v33 = vpop.xlane.xlu0 %1310  ;;  %v12472_v29 = vld [vmem:[#allocation4_spill] sm:$0xff] }
 0x6dc   :  { %8021 = vmatprep.subr.msk.mxu0 %vm998_vm2, %v10543_v63  ;;  %v2438_v36 = vpop.f32.mrf.mxu0  ;;  %v2468_v30 = vpop.f32.mrf.mxu1  ;;  %7891 = vmatmul.mubr.msk.f32.gmra.mxu0 %vm998_vm2, %v2504_v40  ;;  %v2510_v56 = vmul.f32 %v8625_v21, %v2448_v34  ;;  %8644 = vrcp.f32 %v1311_v33  ;;  %v8914_v42 = vld [vmem:[%s12371_s2 + $0x10] sm:$0xff] }
 0x6dd   :  { %v2506_v41 = vmul.f32 %v8621_v15, %v2438_v36  ;;  %v8627_v16 = vpop.eup %8626  ;;  %v12475_v36 = vld [vmem:[#allocation8_spill] sm:$0xff] }
 0x6de   :  { %v7881_v4 = vpop.f32.mrf.mxu1  ;;  %v8629_v3 = vpop.eup %8628  ;;  %v2512_v8 = vmul.f32 %v8627_v16, %v7872_v9  ;;  %v12477_v21 = vld [vmem:[#allocation16_spill] sm:$0xff] }
 0x6df   :  { %7893 = vmatprep.mubr.msk.f32.mxu0 %vm998_vm2, %v2506_v41  ;;  %v2514_v52 = vmul.f32 %v8629_v3, %v2458_v37  ;;  %v8631_v27 = vpop.eup %8630  ;;  %v1313_v45 = vpop.xlane.xlu0 %1312  ;;  %v8912_v37 = vld [vmem:[%s12371_s2] sm:$0xff]  ;;  %v10622_v33 = vld [vmem:[%s12371_s2 + $0x30] sm:$0xff] }
 0x6e0   :  { %7894 = vmatmul.mubr.msk.f32.gmra.mxu0 %vm998_vm2, %v2508_v5  ;;  %v2478_v20 = vpop.f32.mrf.mxu1  ;;  %v8633_v24 = vpop.eup %8632  ;;  %v2516_v26 = vmul.f32 %v8631_v27, %v7875_v35  ;;  %v8916_v41 = vld [vmem:[%s12371_s2 + $0x20] sm:$0xff]  ;;  %v12480_v27 = vld [vmem:[#allocation15_spill] sm:$0xff] }
 0x6e1   :  { %7896 = vmatprep.mubr.msk.f32.mxu0 %vm998_vm2, %v2510_v56  ;;  %v2518_v14 = vmul.f32 %v8633_v24, %v2468_v30  ;;  %v8635_v13 = vpop.eup %8634  ;;  %v12476_v30 = vld [vmem:[#allocation17_spill] sm:$0xff] }
 0x6e2   :  { %v7884_v62 = vpop.f32.mrf.mxu1  ;;  %v8637_v9 = vpop.eup %8636  ;;  %v2520_v54 = vmul.f32 %v8635_v13, %v7878_v10  ;;  %v8915_v10 = vld [vmem:[%s12371_s2 + $0x18] sm:$0xff] }
 0x6e3   :  { %v2522_v19 = vmul.f32 %v8637_v9, %v2478_v20  ;;  %v8639_v34 = vpop.eup %8638  ;;  %v1315_v7 = vpop.xlane.xlu0 %1314  ;;  %v10630_v20 = vld [vmem:[%s12371_s2 + $0x38] sm:$0xff]  ;;  %v12483_v9 = vld [vmem:[#allocation20_spill] sm:$0xff] }
 0x6e4   :  { %7897 = vmatmul.mubr.msk.f32.gmra.mxu0 %vm998_vm2, %v2512_v8  ;;  %v2488_v18 = vpop.f32.mrf.mxu1  ;;  %v8641_v22 = vpop.eup %8640  ;;  %v2524_v44 = vmul.f32 %v8639_v34, %v7881_v4  ;;  %v12478_v4 = vld [vmem:[#allocation19_spill] sm:$0xff]  ;;  %v12479_v8 = vld [vmem:[#allocation18_spill] sm:$0xff]  ;;  %v12482_v13 = vld [vmem:[#allocation21_spill] sm:$0xff] }
 0x6e5   :  { %7899 = vmatprep.mubr.msk.f32.mxu0 %vm998_vm2, %v2514_v52  ;;  %v2526_v35 = vmul.f32 %v8641_v22, %v2488_v18  ;;  %v8643_v0 = vpop.eup %8642  ;;  %v12484_v18 = vld [vmem:[#allocation23_spill] sm:$0xff] }
 0x6e6   :  { %v2528_v58 = vmul.f32 %v8643_v0, %v7884_v62 }
 0x6e7   :  { %v3314_v3 = vpop.permute.xlu0 %3313 }
 0x6e8   :  { %3305 = vrot.lane.b32.xlu1 %v12469_v59, %s8989_s17  ;;  %7900 = vmatmul.mubr.msk.f32.gmra.mxu0 %vm998_vm2, %v2516_v26 }
 0x6e9   :  { %3303 = vrot.lane.b32.xlu0 %v12470_v61, %s8989_s17  ;;  %7902 = vmatprep.mubr.msk.f32.mxu0 %vm998_vm2, %v2518_v14  ;;  %v8645_v40 = vpop.eup %8644 }
 0x6ea   :  { %v1536_v5 = vmul.f32 %v8645_v40, %v12477_v21 }
 0x6ec   :  { %7903 = vmatmul.mubr.msk.f32.gmra.mxu0 %vm998_vm2, %v2520_v54 }
 0x6ed   :  { %3301 = vrot.lane.b32.xlu0 %v12471_v53, %s8989_s17  ;;  %7905 = vmatprep.mubr.msk.f32.mxu0 %vm998_vm2, %v2522_v19 }
 0x6ee   :  { %v1309_v38 = vpop.xlane.xlu1 %1308 }
 0x6ef   :  { %8646 = vrcp.f32 %v1309_v38 }
 0x6f0   :  { %8648 = vrcp.f32 %v1313_v45  ;;  %7906 = vmatmul.mubr.msk.f32.gmra.mxu0 %vm998_vm2, %v2524_v44  ;;  %v12485_v44 = vld [vmem:[#allocation22_spill] sm:$0xff] }
 0x6f1   :  { %3299 = vrot.lane.b32.xlu0 %v12472_v29, %s8989_s17  ;;  %7908 = vmatprep.mubr.msk.f32.mxu0 %vm998_vm2, %v2526_v35  ;;  %8650 = vrcp.f32 %v1315_v7  ;;  %v12486_v7 = vld [vmem:[#allocation25_spill] sm:$0xff] }
 0x6f2   :  { %v3316_v15 = vpop.permute.xlu1 %3315 }
 0x6f4   :  { %7909 = vmatmul.mubr.msk.f32.gmra.mxu0 %vm998_vm2, %v2528_v58 }
 0x6f5   :  { %3297 = vrot.lane.b32.xlu0 %v12473_v17, %s8989_s17  ;;  %7941 = vmatprep.mubr.msk.f32.mxu0 %vm563_vm1, %v8912_v37 }
 0x6f8   :  { %7942 = vmatmul.mubr.msk.f32.vlgmr.msra.gmra.mxu0 %vm563_vm1, %v8913_v47 }
 0x6f9   :  { %8022 = vmatpush3.xpose.msk.msra.mxu0 %vm998_vm2, %v10543_v63  ;;  %3295 = vrot.lane.b32.xlu0 %v12474_v25, %s8989_s17 }
 0x6fa   :  { %8023 = vmatprep.subr.msk.mxu0 %vm998_vm2, %v10549_v23  ;;  %7944 = vmatprep.mubr.msk.f32.mxu0 %vm563_vm1, %v8914_v42 }
 0x6fc   :  { %v8647_v2 = vpop.eup %8646  ;;  %7945 = vmatmul.mubr.msk.f32.gmra.mxu0 %vm563_vm1, %v8915_v10 }
 0x6fd   :  { %v8649_v63 = vpop.eup %8648  ;;  %8024 = vmatpush3.xpose.msk.msra.mxu0 %vm998_vm2, %v10549_v23  ;;  %3291 = vrot.lane.b32.xlu0 %v12475_v36, %s8989_s17  ;;  %v1534_v12 = vmul.f32 %v8647_v2, %v12476_v30  ;;  %v8917_v23 = vld [vmem:[%s12371_s2 + $0x28] sm:$0xff] }
 0x6fe   :  { %8025 = vmatprep.subr.msk.mxu0 %vm998_vm2, %v3316_v15  ;;  %7947 = vmatprep.mubr.msk.f32.mxu0 %vm563_vm1, %v8916_v41  ;;  %v8651_v56 = vpop.eup %8650  ;;  %v1538_v16 = vmul.f32 %v8649_v63, %v12478_v4  ;;  %v12489_v4 = vld [vmem:[#allocation26_spill] sm:$0xff] }
 0x6ff   :  { %7916 = vmatprep.mubr.msk.f32.mxu1 %vm998_vm2, %v1534_v12  ;;  %v1540_v52 = vmul.f32 %v8651_v56, %v12479_v8  ;;  %v12487_v12 = vld [vmem:[#allocation24_spill] sm:$0xff]  ;;  %v12490_v8 = vld [vmem:[#allocation29_spill] sm:$0xff] }
 0x700   :  { %7917 = vmatmul.mubr.msk.f32.gmra.mxu1 %vm998_vm2, %v1536_v5  ;;  %7948 = vmatmul.mubr.msk.f32.gmra.mxu0 %vm563_vm1, %v8917_v23  ;;  %v12488_v5 = vld [vmem:[#allocation27_spill] sm:$0xff] }
 0x701   :  { %8026 = vmatpush3.xpose.msk.msra.mxu0 %vm998_vm2, %v3316_v15  ;;  %3289 = vrot.lane.b32.xlu0 %v12467_v39, %s8989_s17 }
 0x702   :  { %7919 = vmatprep.mubr.msk.f32.mxu1 %vm998_vm2, %v1538_v16  ;;  %8027 = vmatprep.subr.msk.mxu0 %vm998_vm2, %v3314_v3 }
 0x703   :  { %7950 = vmatprep.mubr.msk.f32.mxu0 %vm563_vm1, %v10622_v33 }
 0x704   :  { %7920 = vmatmul.mubr.msk.f32.gmra.mxu1 %vm998_vm2, %v1540_v52  ;;  %7951 = vmatmul.mubr.msk.f32.gmra.mxu0 %vm563_vm1, %v10630_v20 }
 0x705   :  { %8028 = vmatpush3.xpose.msk.msra.mxu0 %vm998_vm2, %v3314_v3  ;;  %3257 = vrot.lane.b32.xlu0 %v12467_v39, %s8990_s20 }
 0x706   :  { %7953 = vmatprep.mubr.msk.f32.mxu0 %vm563_vm1, %v10480_v11 }
 0x708   :  { %7954 = vmatmul.mubr.msk.f32.gmra.mxu0 %vm563_vm1, %v10471_v57 }
 0x709   :  { %3259 = vrot.lane.b32.xlu0 %v12475_v36, %s8990_s20  ;;  %7956 = vmatprep.mubr.msk.f32.mxu0 %vm563_vm1, %v10461_v60  ;;  %v12481_v60 = vld [vmem:[#allocation10_spill] sm:$0xff] }
 0x70c   :  { %1334 = vadd.xlane.f32.xlu1 %v12480_v27  ;;  %7957 = vmatmul.mubr.msk.f32.gmra.mxu0 %vm563_vm1, %v10452_v32 }
 0x70d   :  { %3263 = vrot.lane.b32.xlu0 %v12474_v25, %s8990_s20  ;;  %7959 = vmatprep.mubr.msk.f32.mxu0 %vm563_vm1, %v10443_v31 }
 0x710   :  { %7960 = vmatmul.mubr.msk.f32.gmra.mxu0 %vm563_vm1, %v10432_v6 }
 0x711   :  { %3267 = vrot.lane.b32.xlu0 %v12472_v29, %s8990_s20  ;;  %7962 = vmatprep.mubr.msk.f32.mxu0 %vm563_vm1, %v10417_v55 }
 0x714   :  { %7963 = vmatmul.mubr.msk.f32.gmra.mxu0 %vm563_vm1, %v10396_v46 }
 0x715   :  { %3271 = vrot.lane.b32.xlu0 %v12470_v61, %s8990_s20 }
 0x717   :  { %v1319_v32 = vpop.xlane.xlu0 %1318 }
 0x718   :  { %8652 = vrcp.f32 %v1319_v32 }
 0x719   :  { %3275 = vrot.lane.b32.xlu0 %v9553_v1, %s8990_s20 }
 0x71b   :  { %v1321_v31 = vpop.xlane.xlu0 %1320 }
 0x71c   :  { %8654 = vrcp.f32 %v1321_v31 }
 0x71d   :  { %3293 = vrot.lane.b32.xlu1 %v12481_v60, %s8989_s17  ;;  %3279 = vrot.lane.b32.xlu0 %v9545_v49, %s8990_s20  ;;  %s8991_s17 = smov 48  }
 0x71f   :  { %v1323_v6 = vpop.xlane.xlu0 %1322 }
 0x721   :  { %3261 = vrot.lane.b32.xlu1 %v12481_v60, %s8990_s20  ;;  %3283 = vrot.lane.b32.xlu0 %v9549_v50, %s8990_s20 }
 0x723   :  { %v1317_v46 = vpop.xlane.xlu1 %1316  ;;  %v1325_v55 = vpop.xlane.xlu0 %1324 }
 0x724   :  { %8656 = vrcp.f32 %v1317_v46 }
 0x725   :  { %3265 = vrot.lane.b32.xlu1 %v12473_v17, %s8990_s20  ;;  %3287 = vrot.lane.b32.xlu0 %v9539_v43, %s8990_s20  ;;  %8658 = vrcp.f32 %v1323_v6  ;;  %v8653_v26 = vpop.eup %8652 }
 0x726   :  { %8660 = vrcp.f32 %v1325_v55  ;;  %v1544_v54 = vmul.f32 %v8653_v26, %v12483_v9 }
 0x727   :  { %v3312_v57 = vpop.permute.xlu1 %3311  ;;  %v3308_v24 = vpop.permute.xlu0 %3307 }
 0x728   :  { %8029 = vmatprep.subr.msk.mxu0 %vm998_vm2, %v3312_v57 }
 0x729   :  { %3269 = vrot.lane.b32.xlu1 %v12471_v53, %s8990_s20  ;;  %3686 = vrot.lane.b32.xlu0 %v9541_v48, %s8991_s17  ;;  %v8655_v14 = vpop.eup %8654 }
 0x72a   :  { %8030 = vmatpush3.xpose.msk.msra.mxu0 %vm998_vm2, %v3312_v57  ;;  %v1546_v34 = vmul.f32 %v8655_v14, %v12484_v18 }
 0x72b   :  { %v3310_v11 = vpop.permute.xlu1 %3309 }
 0x72c   :  { %8031 = vmatprep.subr.msk.mxu0 %vm998_vm2, %v3310_v11 }
 0x72d   :  { %3273 = vrot.lane.b32.xlu1 %v12469_v59, %s8990_s20  ;;  %3682 = vrot.lane.b32.xlu0 %v9557_v51, %s8991_s17 }
 0x72e   :  { %8032 = vmatpush3.xpose.msk.msra.mxu0 %vm998_vm2, %v3310_v11 }
 0x72f   :  { %8033 = vmatprep.subr.msk.mxu0 %vm998_vm2, %v3308_v24 }
 0x731   :  { %3277 = vrot.lane.b32.xlu1 %v9565_v28, %s8990_s20  ;;  %3678 = vrot.lane.b32.xlu0 %v9565_v28, %s8991_s17  ;;  %v8657_v62 = vpop.eup %8656 }
 0x732   :  { %8034 = vmatpush3.xpose.msk.msra.mxu0 %vm998_vm2, %v3308_v24  ;;  %v1542_v45 = vmul.f32 %v8657_v62, %v12482_v13  ;;  %v8659_v19 = vpop.eup %8658  ;;  %v10751_v24 = vpop.f32.mrf.mxu1 }
 0x733   :  { %v8661_v22 = vpop.eup %8660  ;;  %v1548_v38 = vmul.f32 %v8659_v19, %v12485_v44 }
 0x734   :  { %7922 = vmatprep.mubr.msk.f32.mxu1 %vm998_vm2, %v1542_v45  ;;  %v1550_v35 = vmul.f32 %v8661_v22, %v12486_v7  ;;  %v2837_v13 = vpop.f32.mrf.mxu1 }
 0x735   :  { %3281 = vrot.lane.b32.xlu1 %v9557_v51, %s8990_s20  ;;  %3674 = vrot.lane.b32.xlu0 %v12469_v59, %s8991_s17 }
 0x736   :  { %7923 = vmatmul.mubr.msk.f32.gmra.mxu1 %vm998_vm2, %v1544_v54 }
 0x737   :  { %7925 = vmatprep.mubr.msk.f32.mxu1 %vm998_vm2, %v1546_v34 }
 0x739   :  { %3285 = vrot.lane.b32.xlu1 %v9541_v48, %s8990_s20  ;;  %3670 = vrot.lane.b32.xlu0 %v12471_v53, %s8991_s17 }
 0x73a   :  { %7926 = vmatmul.mubr.msk.f32.gmra.mxu1 %vm998_vm2, %v1548_v38 }
 0x73b   :  { %7928 = vmatprep.mubr.msk.f32.mxu1 %vm998_vm2, %v1550_v35 }
 0x73d   :  { %3688 = vrot.lane.b32.xlu1 %v9539_v43, %s8991_s17  ;;  %3666 = vrot.lane.b32.xlu0 %v12473_v17, %s8991_s17 }
 0x741   :  { %3684 = vrot.lane.b32.xlu1 %v9549_v50, %s8991_s17  ;;  %3662 = vrot.lane.b32.xlu0 %v12481_v60, %s8991_s17 }
 0x745   :  { %3680 = vrot.lane.b32.xlu1 %v9545_v49, %s8991_s17 }
 0x749   :  { %3676 = vrot.lane.b32.xlu1 %v9553_v1, %s8991_s17 }
 0x74d   :  { %3672 = vrot.lane.b32.xlu1 %v12470_v61, %s8991_s17 }
 0x751   :  { %3668 = vrot.lane.b32.xlu1 %v12472_v29, %s8991_s17 }
 0x755   :  { %3664 = vrot.lane.b32.xlu1 %v12474_v25, %s8991_s17 }
 0x758   :  { %v1329_v0 = vpop.xlane.xlu0 %1328 }
 0x759   :  { %8662 = vrcp.f32 %v1329_v0  ;;  %v12491_v0 = vld [vmem:[#allocation28_spill] sm:$0xff] }
 0x75c   :  { %v1333_v58 = vpop.xlane.xlu0 %1332  ;;  %v1327_v37 = vpop.xlane.xlu1 %1326 }
 0x75d   :  { %8664 = vrcp.f32 %v1327_v37 }
 0x75e   :  { %8666 = vrcp.f32 %v1333_v58 }
 0x760   :  { %v3304_v47 = vpop.permute.xlu0 %3303  ;;  %v1331_v42 = vpop.xlane.xlu1 %1330 }
 0x761   :  { %8668 = vrcp.f32 %v1331_v42 }
 0x764   :  { %v3302_v40 = vpop.permute.xlu0 %3301  ;;  %v3306_v2 = vpop.permute.xlu1 %3305 }
 0x765   :  { %8035 = vmatprep.subr.msk.mxu0 %vm998_vm2, %v3306_v2 }
 0x766   :  { %8036 = vmatpush3.xpose.msk.msra.mxu0 %vm998_vm2, %v3306_v2  ;;  %v8663_v63 = vpop.eup %8662 }
 0x767   :  { %8037 = vmatprep.subr.msk.mxu0 %vm998_vm2, %v3304_v47  ;;  %v1554_v56 = vmul.f32 %v8663_v63, %v12488_v5 }
 0x768   :  { %v3300_v10 = vpop.permute.xlu0 %3299 }
 0x76a   :  { %8038 = vmatpush3.xpose.msk.msra.mxu0 %vm998_vm2, %v3304_v47  ;;  %v8665_v15 = vpop.eup %8664 }
 0x76b   :  { %8039 = vmatprep.subr.msk.mxu0 %vm998_vm2, %v3302_v40  ;;  %v1552_v41 = vmul.f32 %v8665_v15, %v12487_v12  ;;  %v8667_v21 = vpop.eup %8666 }
 0x76c   :  { %v3298_v30 = vpop.permute.xlu0 %3297  ;;  %v1558_v52 = vmul.f32 %v8667_v21, %v12490_v8 }
 0x76d   :  { %7929 = vmatmul.mubr.msk.f32.gmra.mxu1 %vm998_vm2, %v1552_v41 }
 0x76e   :  { %v8669_v23 = vpop.eup %8668  ;;  %8040 = vmatpush3.xpose.msk.msra.mxu0 %vm998_vm2, %v3302_v40  ;;  %7931 = vmatprep.mubr.msk.f32.mxu1 %vm998_vm2, %v1554_v56 }
 0x76f   :  { %8041 = vmatprep.subr.msk.mxu0 %vm998_vm2, %v3300_v10  ;;  %v1556_v16 = vmul.f32 %v8669_v23, %v12489_v4 }
 0x770   :  { %v3296_v3 = vpop.permute.xlu0 %3295 }
 0x771   :  { %7932 = vmatmul.mubr.msk.f32.gmra.mxu1 %vm998_vm2, %v1556_v16 }
 0x772   :  { %8042 = vmatpush3.xpose.msk.msra.mxu0 %vm998_vm2, %v3300_v10  ;;  %7934 = vmatprep.mubr.msk.f32.mxu1 %vm998_vm2, %v1558_v52 }
 0x773   :  { %8043 = vmatprep.subr.msk.mxu0 %vm998_vm2, %v3298_v30 }
 0x774   :  { %v3292_v27 = vpop.permute.xlu0 %3291 }
 0x776   :  { %8044 = vmatpush3.xpose.msk.msra.mxu0 %vm998_vm2, %v3298_v30 }
 0x777   :  { %8045 = vmatprep.subr.msk.mxu0 %vm998_vm2, %v3296_v3 }
 0x778   :  { %v3290_v32 = vpop.permute.xlu0 %3289 }
 0x77a   :  { %8046 = vmatpush3.xpose.msk.msra.mxu0 %vm998_vm2, %v3296_v3 }
 0x77c   :  { %v3258_v31 = vpop.permute.xlu0 %3257 }
 0x77d   :  { %8053 = vmatprep.mubr.msk.f32.mxu0 %vm998_vm2, %v3258_v31 }
 0x780   :  { %v3260_v6 = vpop.permute.xlu0 %3259 }
 0x784   :  { %v3264_v46 = vpop.permute.xlu0 %3263 }
 0x788   :  { %v3268_v55 = vpop.permute.xlu0 %3267 }
 0x78c   :  { %v3272_v57 = vpop.permute.xlu0 %3271 }
 0x790   :  { %v3276_v14 = vpop.permute.xlu0 %3275 }
 0x794   :  { %v3280_v34 = vpop.permute.xlu0 %3279 }
 0x795   :  { %v1335_v11 = vpop.xlane.xlu1 %1334 }
 0x796   :  { %8670 = vrcp.f32 %v1335_v11 }
 0x798   :  { %v10753_v26 = vpop.f32.mrf.mxu0  ;;  %v3284_v37 = vpop.permute.xlu0 %3283 }
 0x799   :  { %v3294_v62 = vpop.permute.xlu1 %3293 }
 0x79a   :  { %v2644_v45 = vpop.f32.mrf.mxu0  ;;  %8047 = vmatprep.subr.msk.mxu0 %vm998_vm2, %v3294_v62 }
 0x79b   :  { %v10756_v9 = vadd.f32 %v2837_v13, %v2644_v45  ;;  %8048 = vmatpush3.xpose.msk.msra.mxu0 %vm998_vm2, %v3294_v62 }
 0x79c   :  { %v10759_v54 = vpop.f32.mrf.mxu0  ;;  %8049 = vmatprep.subr.msk.mxu0 %vm998_vm2, %v3292_v27  ;;  %v3288_v63 = vpop.permute.xlu0 %3287 }
 0x79d   :  { %v3262_v19 = vpop.permute.xlu1 %3261 }
 0x79e   :  { %v10762_v18 = vpop.f32.mrf.mxu0 }
 0x79f   :  { %8050 = vmatpush3.xpose.msk.msra.mxu0 %vm998_vm2, %v3292_v27 }
 0x7a0   :  { %v10765_v22 = vpop.f32.mrf.mxu0  ;;  %8051 = vmatprep.subr.msk.mxu0 %vm998_vm2, %v3290_v32  ;;  %v3687_v21 = vpop.permute.xlu0 %3686 }
 0x7a1   :  { %v3266_v44 = vpop.permute.xlu1 %3265 }
 0x7a2   :  { %v10768_v38 = vpop.f32.mrf.mxu0 }
 0x7a3   :  { %v8671_v7 = vpop.eup %8670  ;;  %8052 = vmatpush3.xpose.msk.msra.mxu0 %vm998_vm2, %v3290_v32 }
 0x7a4   :  { %v10771_v35 = vpop.f32.mrf.mxu0  ;;  %v1560_v58 = vmul.f32 %v8671_v7, %v12491_v0  ;;  %v3683_v3 = vpop.permute.xlu0 %3682 }
 0x7a5   :  { %v3270_v47 = vpop.permute.xlu1 %3269 }
 0x7a6   :  { %v10774_v42 = vpop.f32.mrf.mxu0  ;;  %7935 = vmatmul.mubr.msk.f32.gmra.mxu1 %vm998_vm2, %v1560_v58  ;;  %8054 = vmatmul.mubr.msk.f32.vlgmr.msra.gmra.mxu0 %vm998_vm2, %v3260_v6 }
 0x7a7   :  { %8056 = vmatprep.mubr.msk.f32.mxu0 %vm998_vm2, %v3262_v19 }
 0x7a8   :  { %v10779_v40 = vpop.f32.mrf.mxu0  ;;  %v3679_v31 = vpop.permute.xlu0 %3678 }
 0x7a9   :  { %v3274_v2 = vpop.permute.xlu1 %3273 }
 0x7aa   :  { %v10781_v10 = vpop.f32.mrf.mxu0  ;;  %8057 = vmatmul.mubr.msk.f32.gmra.mxu0 %vm998_vm2, %v3264_v46 }
 0x7ab   :  { %8059 = vmatprep.mubr.msk.f32.mxu0 %vm998_vm2, %v3266_v44 }
 0x7ac   :  { %v10785_v15 = vpop.f32.mrf.mxu0  ;;  %v3675_v45 = vpop.permute.xlu0 %3674 }
 0x7ad   :  { %v3278_v30 = vpop.permute.xlu1 %3277 }
 0x7ae   :  { %v10787_v12 = vpop.f32.mrf.mxu0  ;;  %8060 = vmatmul.mubr.msk.f32.gmra.mxu0 %vm998_vm2, %v3268_v55 }
 0x7af   :  { %8062 = vmatprep.mubr.msk.f32.mxu0 %vm998_vm2, %v3270_v47 }
 0x7b0   :  { %v10791_v41 = vpop.f32.mrf.mxu0 }
 0x7b1   :  { %12492 = vst [vmem:[#allocation11_spill] sm:$0xff] %v10791_v41  ;;  %v3282_v5 = vpop.permute.xlu1 %3281 }
 0x7b2   :  { %v10793_v56 = vpop.f32.mrf.mxu0  ;;  %8063 = vmatmul.mubr.msk.f32.gmra.mxu0 %vm998_vm2, %v3272_v57 }
 0x7b3   :  { %12493 = vst [vmem:[#allocation12_spill] sm:$0xff] %v10793_v56  ;;  %8065 = vmatprep.mubr.msk.f32.mxu0 %vm998_vm2, %v3274_v2 }
 0x7b4   :  { %v10797_v23 = vpop.f32.mrf.mxu0 }
 0x7b5   :  { %12494 = vst [vmem:[#allocation13_spill] sm:$0xff] %v10797_v23  ;;  %v3286_v4 = vpop.permute.xlu1 %3285 }
 0x7b6   :  { %v10799_v16 = vpop.f32.mrf.mxu0  ;;  %8066 = vmatmul.mubr.msk.f32.gmra.mxu0 %vm998_vm2, %v3276_v14 }
 0x7b7   :  { %12495 = vst [vmem:[#allocation2_spill] sm:$0xff] %v10799_v16  ;;  %8068 = vmatprep.mubr.msk.f32.mxu0 %vm998_vm2, %v3278_v30 }
 0x7b8   :  { %v7943_v8 = vpop.f32.mrf.mxu0 }
 0x7b9   :  { %v3689_v52 = vpop.permute.xlu1 %3688 }
 0x7ba   :  { %v2985_v27 = vpop.f32.mrf.mxu0  ;;  %8069 = vmatmul.mubr.msk.f32.gmra.mxu0 %vm998_vm2, %v3280_v34  ;;  %8077 = vmatprep.subr.mxu1 %v3689_v52 }
 0x7bb   :  { %7997 = vmatprep.mubr.msk.f32.mxu1 %vm563_vm1, %v2985_v27  ;;  %8071 = vmatprep.mubr.msk.f32.mxu0 %vm998_vm2, %v3282_v5 }
 0x7bc   :  { %v7946_v32 = vpop.f32.mrf.mxu0  ;;  %7998 = vmatmul.mubr.msk.f32.vlgmr.msra.gmra.mxu1 %vm563_vm1, %v7943_v8 }
 0x7bd   :  { %8078 = vmatpush3.msra.mxu1 %v3689_v52  ;;  %v3685_v6 = vpop.permute.xlu1 %3684 }
 0x7be   :  { %8079 = vmatprep.subr.mxu1 %v3687_v21  ;;  %v2995_v46 = vpop.f32.mrf.mxu0  ;;  %8072 = vmatmul.mubr.msk.f32.gmra.mxu0 %vm998_vm2, %v3284_v37 }
 0x7bf   :  { %8080 = vmatpush3.msra.mxu1 %v3687_v21  ;;  %8000 = vmatprep.mubr.msk.f32.mxu1 %vm563_vm1, %v2995_v46 }
 0x7c0   :  { %8074 = vmatprep.mubr.msk.f32.mxu0 %vm998_vm2, %v3286_v4  ;;  %8081 = vmatprep.subr.mxu1 %v3685_v6  ;;  %v7918_v55 = vpop.f32.mrf.mxu1  ;;  %v7949_v57 = vpop.f32.mrf.mxu0 }
 0x7c1   :  { %v10811_v11 = vadd.f32 %v7918_v55, %v10759_v54  ;;  %8001 = vmatmul.mubr.msk.f32.gmra.mxu1 %vm563_vm1, %v7946_v32  ;;  %v3681_v14 = vpop.permute.xlu1 %3680 }
 0x7c2   :  { %8082 = vmatpush3.msra.mxu1 %v3685_v6  ;;  %v2847_v62 = vpop.f32.mrf.mxu1  ;;  %v3005_v13 = vpop.f32.mrf.mxu0  ;;  %8075 = vmatmul.mubr.msk.f32.gmra.mxu0 %vm998_vm2, %v3288_v63 }
 0x7c3   :  { %8083 = vmatprep.subr.mxu1 %v3683_v3  ;;  %v10816_v19 = vadd.f32 %v2847_v62, %v10762_v18  ;;  %8003 = vmatprep.mubr.msk.f32.mxu1 %vm563_vm1, %v3005_v13 }
 0x7c4   :  { %8084 = vmatpush3.msra.mxu1 %v3683_v3  ;;  %v7921_v34 = vpop.f32.mrf.mxu1  ;;  %v7952_v44 = vpop.f32.mrf.mxu0 }
 0x7c5   :  { %8085 = vmatprep.subr.mxu1 %v3681_v14  ;;  %v10820_v54 = vadd.f32 %v7921_v34, %v10765_v22  ;;  %8004 = vmatmul.mubr.msk.f32.gmra.mxu1 %vm563_vm1, %v7949_v57  ;;  %v3677_v7 = vpop.permute.xlu1 %3676  ;;  %v3671_v22 = vpop.permute.xlu0 %3670 }
 0x7c6   :  { %8086 = vmatpush3.msra.mxu1 %v3681_v14  ;;  %v2857_v0 = vpop.f32.mrf.mxu1  ;;  %v3015_v58 = vpop.f32.mrf.mxu0 }
 0x7c7   :  { %8087 = vmatprep.subr.mxu1 %v3679_v31  ;;  %v10824_v37 = vadd.f32 %v2857_v0, %v10768_v38  ;;  %8006 = vmatprep.mubr.msk.f32.mxu1 %vm563_vm1, %v3015_v58 }
 0x7c8   :  { %8088 = vmatpush3.msra.mxu1 %v3679_v31  ;;  %v7955_v18 = vpop.f32.mrf.mxu0 }
 0x7c9   :  { %8089 = vmatprep.subr.mxu1 %v3677_v7  ;;  %8007 = vmatmul.mubr.msk.f32.gmra.mxu1 %vm563_vm1, %v7952_v44  ;;  %v3673_v47 = vpop.permute.xlu1 %3672  ;;  %v3667_v21 = vpop.permute.xlu0 %3666 }
 0x7ca   :  { %8090 = vmatpush3.msra.mxu1 %v3677_v7  ;;  %v3025_v2 = vpop.f32.mrf.mxu0 }
 0x7cb   :  { %8091 = vmatprep.subr.mxu1 %v3675_v45  ;;  %8009 = vmatprep.mubr.msk.f32.mxu1 %vm563_vm1, %v3025_v2  ;;  %v8921_v2 = vld [vmem:[%s12375_s1] sm:$0xff] }
 0x7cc   :  { %8092 = vmatpush3.msra.mxu1 %v3675_v45  ;;  %v7958_v63 = vpop.f32.mrf.mxu0 }
 0x7cd   :  { %8093 = vmatprep.subr.mxu1 %v3673_v47  ;;  %8010 = vmatmul.mubr.msk.f32.gmra.mxu1 %vm563_vm1, %v7955_v18  ;;  %v3669_v38 = vpop.permute.xlu1 %3668  ;;  %v3663_v52 = vpop.permute.xlu0 %3662  ;;  %v8920_v18 = vld [vmem:[%s12375_s1 + $0x8] sm:$0xff] }
 0x7ce   :  { %8094 = vmatpush3.msra.mxu1 %v3673_v47  ;;  %v3035_v30 = vpop.f32.mrf.mxu0 }
 0x7cf   :  { %8095 = vmatprep.subr.mxu1 %v3671_v22  ;;  %8012 = vmatprep.mubr.msk.f32.mxu1 %vm563_vm1, %v3035_v30 }
 0x7d0   :  { %8096 = vmatpush3.msra.mxu1 %v3671_v22  ;;  %v7961_v5 = vpop.f32.mrf.mxu0 }
 0x7d1   :  { %8097 = vmatprep.subr.mxu1 %v3669_v38  ;;  %8013 = vmatmul.mubr.msk.f32.gmra.mxu1 %vm563_vm1, %v7958_v63  ;;  %v3665_v4 = vpop.permute.xlu1 %3664 }
 0x7d2   :  { %8098 = vmatpush3.msra.mxu1 %v3669_v38  ;;  %v3045_v3 = vpop.f32.mrf.mxu0 }
 0x7d3   :  { %8099 = vmatprep.subr.mxu1 %v3667_v21  ;;  %8015 = vmatprep.mubr.msk.f32.mxu1 %vm563_vm1, %v3045_v3 }
 0x7d4   :  { %8100 = vmatpush3.msra.mxu1 %v3667_v21  ;;  %v7964_v8 = vpop.f32.mrf.mxu0 }
 0x7d5   :  { %8101 = vmatprep.subr.mxu1 %v3665_v4  ;;  %8016 = vmatmul.mubr.msk.f32.gmra.mxu1 %vm563_vm1, %v7961_v5 }
 0x7d6   :  { %8102 = vmatpush3.msra.mxu1 %v3665_v4  ;;  %v3055_v27 = vpop.f32.mrf.mxu0 }
 0x7d7   :  { %8103 = vmatprep.subr.mxu1 %v3663_v52  ;;  %8018 = vmatprep.mubr.msk.f32.mxu1 %vm563_vm1, %v3055_v27 }
 0x7d8   :  { %8104 = vmatpush3.msra.mxu1 %v3663_v52 }
 0x7d9   :  { %8019 = vmatmul.mubr.msk.f32.gmra.mxu1 %vm563_vm1, %v7964_v8 }
 0x7f6   :  { %v10836_v32 = vpop.f32.mrf.mxu1 }
 0x7f8   :  { %v10838_v31 = vpop.f32.mrf.mxu1 }
 0x7fa   :  { %v10840_v6 = vpop.f32.mrf.mxu1 }
 0x7fc   :  { %v10842_v46 = vpop.f32.mrf.mxu1 }
 0x82d   :  { %v10844_v55 = vpop.f32.mrf.mxu1 }
 0x82f   :  { %v10846_v57 = vpop.f32.mrf.mxu1 }
 0x830   :  { %12496 = vst [vmem:[#allocation14_spill] sm:$0xff] %v10846_v57 }
 0x831   :  { %v10848_v14 = vpop.f32.mrf.mxu1 }
 0x832   :  { %12497 = vst [vmem:[#allocation5_spill] sm:$0xff] %v10848_v14  ;;  %v8923_v14 = vld [vmem:[%s12375_s1 + $0x18] sm:$0xff] }
 0x833   :  { %v10850_v62 = vpop.f32.mrf.mxu1 }
 0x834   :  { %12498 = vst [vmem:[#allocation3_spill] sm:$0xff] %v10850_v62 }
 0x866   :  { %v10852_v13 = vpop.f32.mrf.mxu1  ;;  %v8055_v45 = vpop.f32.mrf.mxu0 }
 0x867   :  { %12499 = vst [vmem:[#allocation7_spill] sm:$0xff] %v10852_v13  ;;  %v8922_v13 = vld [vmem:[%s12375_s1 + $0x10] sm:$0xff] }
 0x868   :  { %v10854_v34 = vpop.f32.mrf.mxu1  ;;  %v3451_v0 = vpop.f32.mrf.mxu0 }
 0x869   :  { %12500 = vst [vmem:[#allocation4_spill] sm:$0xff] %v10854_v34 }
 0x86a   :  { %v8058_v30 = vpop.f32.mrf.mxu0 }
 0x86c   :  { %v3461_v5 = vpop.f32.mrf.mxu0 }
 0x86e   :  { %v8061_v3 = vpop.f32.mrf.mxu0 }
 0x870   :  { %v3471_v52 = vpop.f32.mrf.mxu0 }
 0x87c   :  { %v7999_v44 = vpop.f32.mrf.mxu1 }
 0x87d   :  { %v3457_v7 = vadd.f32 %v8055_v45, %v7999_v44  ;;  %v8064_v45 = vpop.f32.mrf.mxu0 }
 0x87e   :  { %v3178_v58 = vpop.f32.mrf.mxu1 }
 0x87f   :  { %v10859_v47 = vadd.f32 %v8920_v18, %v3457_v7  ;;  %v3452_v22 = vadd.f32 %v3451_v0, %v3178_v58  ;;  %v3481_v7 = vpop.f32.mrf.mxu0 }
 0x881   :  { %v10864_v63 = vadd.f32 %v8921_v2, %v3452_v22  ;;  %3548 = vmax.xlane.f32.xlu1 %v10859_v47  ;;  %v8002_v38 = vpop.f32.mrf.mxu1  ;;  %v8067_v58 = vpop.f32.mrf.mxu0 }
 0x882   :  { %v3467_v34 = vadd.f32 %v8058_v30, %v8002_v38  ;;  %v8924_v38 = vld [vmem:[%s12375_s1 + $0x28] sm:$0xff] }
 0x883   :  { %3546 = vmax.xlane.f32.xlu0 %v10864_v63  ;;  %v3188_v21 = vpop.f32.mrf.mxu1  ;;  %v3491_v2 = vpop.f32.mrf.mxu0 }
 0x884   :  { %v3462_v22 = vadd.f32 %v3461_v5, %v3188_v21  ;;  %v10880_v41 = vadd.f32 %v8923_v14, %v3467_v34 }
 0x885   :  { %v8005_v4 = vpop.f32.mrf.mxu1  ;;  %v8070_v56 = vpop.f32.mrf.mxu0 }
 0x886   :  { %v10875_v23 = vadd.f32 %v8922_v13, %v3462_v22  ;;  %v3477_v62 = vadd.f32 %v8061_v3, %v8005_v4  ;;  %v8925_v4 = vld [vmem:[%s12375_s1 + $0x20] sm:$0xff]  ;;  %v8928_v22 = vld [vmem:[%s12375_s1 + $0x48] sm:$0xff] }
 0x887   :  { %v3198_v8 = vpop.f32.mrf.mxu1  ;;  %v3501_v5 = vpop.f32.mrf.mxu0 }
 0x888   :  { %v3472_v57 = vadd.f32 %v3471_v52, %v3198_v8  ;;  %v10886_v30 = vadd.f32 %v8924_v38, %v3477_v62  ;;  %v8926_v8 = vld [vmem:[%s12375_s1 + $0x38] sm:$0xff] }
 0x889   :  { %v8008_v27 = vpop.f32.mrf.mxu1 }
 0x88a   :  { %v3487_v13 = vadd.f32 %v8064_v45, %v8008_v27  ;;  %v10892_v14 = vadd.f32 %v8925_v4, %v3472_v57  ;;  %v8073_v27 = vpop.f32.mrf.mxu0  ;;  %v8927_v45 = vld [vmem:[%s12375_s1 + $0x30] sm:$0xff] }
 0x88b   :  { %v3208_v44 = vpop.f32.mrf.mxu1 }
 0x88c   :  { %v3482_v34 = vadd.f32 %v3481_v7, %v3208_v44  ;;  %v10898_v62 = vadd.f32 %v8926_v8, %v3487_v13  ;;  %v8929_v13 = vld [vmem:[%s12375_s1 + $0x40] sm:$0xff] }
 0x88d   :  { %v8011_v0 = vpop.f32.mrf.mxu1 }
 0x88e   :  { %v3497_v52 = vadd.f32 %v8067_v58, %v8011_v0  ;;  %v10904_v57 = vadd.f32 %v8927_v45, %v3482_v34  ;;  %v3511_v58 = vpop.f32.mrf.mxu0  ;;  %v8930_v34 = vld [vmem:[%s12375_s1 + $0x58] sm:$0xff] }
 0x88f   :  { %v3218_v18 = vpop.f32.mrf.mxu1 }
 0x890   :  { %v3492_v44 = vadd.f32 %v3491_v2, %v3218_v18  ;;  %v10910_v38 = vadd.f32 %v8928_v22, %v3497_v52  ;;  %v8931_v52 = vld [vmem:[%s12375_s1 + $0x50] sm:$0xff] }
 0x891   :  { %v8014_v16 = vpop.f32.mrf.mxu1 }
 0x892   :  { %3660 = vrot.lane.b32.xlu1 %v12475_v36, %s8991_s17  ;;  %v3507_v0 = vadd.f32 %v8070_v56, %v8014_v16  ;;  %v10916_v4 = vadd.f32 %v8929_v13, %v3492_v44  ;;  %v8076_v16 = vpop.f32.mrf.mxu0  ;;  %v8932_v44 = vld [vmem:[%s12375_s1 + $0x68] sm:$0xff] }
 0x893   :  { %v3228_v21 = vpop.f32.mrf.mxu1 }
 0x894   :  { %v3502_v18 = vadd.f32 %v3501_v5, %v3228_v21  ;;  %v10922_v8 = vadd.f32 %v8930_v34, %v3507_v0  ;;  %v8933_v0 = vld [vmem:[%s12375_s1 + $0x60] sm:$0xff] }
 0x895   :  { %v8017_v3 = vpop.f32.mrf.mxu1 }
 0x896   :  { %v3517_v56 = vadd.f32 %v8073_v27, %v8017_v3  ;;  %v10928_v45 = vadd.f32 %v8931_v52, %v3502_v18  ;;  %v3521_v27 = vpop.f32.mrf.mxu0 }
 0x897   :  { %v3238_v7 = vpop.f32.mrf.mxu1 }
 0x898   :  { %v3512_v21 = vadd.f32 %v3511_v58, %v3238_v7  ;;  %v10934_v22 = vadd.f32 %v8932_v44, %v3517_v56  ;;  %v8934_v58 = vld [vmem:[%s12375_s1 + $0x78] sm:$0xff] }
 0x899   :  { %3658 = vrot.lane.b32.xlu0 %v12467_v39, %s8991_s17  ;;  %v8020_v2 = vpop.f32.mrf.mxu1 }
 0x89a   :  { %v3527_v3 = vadd.f32 %v8076_v16, %v8020_v2  ;;  %v10940_v13 = vadd.f32 %v8933_v0, %v3512_v21  ;;  %v8935_v2 = vld [vmem:[%s12375_s1 + $0x70] sm:$0xff]  ;;  %v6715_v0 = vld [vmem:[%s12370_s3 + $0x38] sm:$0xff] }
 0x89b   :  { %v3248_v5 = vpop.f32.mrf.mxu1 }
 0x89c   :  { %v3522_v7 = vadd.f32 %v3521_v27, %v3248_v5  ;;  %v10946_v18 = vadd.f32 %v8934_v58, %v3527_v3 }
 0x89e   :  { %v10952_v34 = vadd.f32 %v8935_v2, %v3522_v7 }
 0x8b6   :  { %3550 = vmax.xlane.f32.xlu1 %v10875_v23 }
 0x8b8   :  { %3552 = vmax.xlane.f32.xlu0 %v10880_v41 }
 0x8ba   :  { %3556 = vmax.xlane.f32.xlu1 %v10886_v30 }
 0x8bc   :  { %3554 = vmax.xlane.f32.xlu0 %v10892_v14 }
 0x8be   :  { %3560 = vmax.xlane.f32.xlu1 %v10898_v62 }
 0x8c0   :  { %3558 = vmax.xlane.f32.xlu0 %v10904_v57 }
 0x8c2   :  { %3564 = vmax.xlane.f32.xlu1 %v10910_v38 }
 0x8c4   :  { %3562 = vmax.xlane.f32.xlu0 %v10916_v4 }
 0x8c6   :  { %3568 = vmax.xlane.f32.xlu1 %v10922_v8 }
 0x8c8   :  { %3566 = vmax.xlane.f32.xlu0 %v10928_v45 }
 0x8ca   :  { %3572 = vmax.xlane.f32.xlu1 %v10934_v22 }
 0x8cc   :  { %3570 = vmax.xlane.f32.xlu0 %v10940_v13 }
 0x8ce   :  { %3576 = vmax.xlane.f32.xlu1 %v10946_v18 }
 0x8d0   :  { %3574 = vmax.xlane.f32.xlu0 %v10952_v34 }
 0x8df   :  { %4494 = vrot.lane.b32.xlu1 %v9541_v48, %s8992_s18 }
 0x8e3   :  { %4490 = vrot.lane.b32.xlu1 %v9557_v51, %s8992_s18 }
 0x8e6   :  { %4496 = vrot.lane.b32.xlu0 %v9539_v43, %s8992_s18 }
 0x8e7   :  { %4486 = vrot.lane.b32.xlu1 %v9565_v28, %s8992_s18 }
 0x8ea   :  { %4492 = vrot.lane.b32.xlu0 %v9549_v50, %s8992_s18 }
 0x8eb   :  { %4482 = vrot.lane.b32.xlu1 %v12469_v59, %s8992_s18 }
 0x8ee   :  { %4488 = vrot.lane.b32.xlu0 %v9545_v49, %s8992_s18 }
 0x8ef   :  { %4478 = vrot.lane.b32.xlu1 %v12471_v53, %s8992_s18 }
 0x8f2   :  { %4484 = vrot.lane.b32.xlu0 %v9553_v1, %s8992_s18 }
 0x8f6   :  { %4480 = vrot.lane.b32.xlu0 %v12470_v61, %s8992_s18 }
 0x8fa   :  { %4476 = vrot.lane.b32.xlu0 %v12472_v29, %s8992_s18 }
 0x8fe   :  { %4474 = vrot.lane.b32.xlu0 %v12473_v17, %s8992_s18 }
 0x902   :  { %4472 = vrot.lane.b32.xlu0 %v12474_v25, %s8992_s18 }
 0x90a   :  { %v3549_v56 = vpop.xlane.xlu1 %3548 }
 0x90b   :  { %v3579_v16 = vsub.f32 %v10859_v47, %v3549_v56 }
 0x90c   :  { %v3547_v52 = vpop.xlane.xlu0 %3546 }
 0x90d   :  { %v3596_v21 = vmul.f32 1.442695, %v3579_v16  ;;  %v3578_v5 = vsub.f32 %v10864_v63, %v3547_v52  ;;  %v6714_v63 = vld [vmem:[%s12370_s3 + $0x30] sm:$0xff] }
 0x90e   :  { %v3661_v44 = vpop.permute.xlu1 %3660 }
 0x90f   :  { %8672 = vpow2.f32 %v3596_v21  ;;  %v3594_v3 = vmul.f32 1.442695, %v3578_v5  ;;  %8105 = vmatprep.subr.mxu1 %v3661_v44 }
 0x910   :  { %v3659_v27 = vpop.permute.xlu0 %3658  ;;  %8106 = vmatpush3.msra.mxu1 %v3661_v44 }
 0x911   :  { %8674 = vpow2.f32 %v3594_v3  ;;  %8107 = vmatprep.subr.mxu1 %v3659_v27 }
 0x912   :  { %8108 = vmatpush3.msra.mxu1 %v3659_v27 }
 0x913   :  { %8159 = vmatprep.subr.mxu1 %v6715_v0 }
 0x91c   :  { %v8673_v7 = vpop.eup %8672 }
 0x91d   :  { %3628 = vadd.xlane.f32.xlu1 %v8673_v7 }
 0x91e   :  { %v8675_v47 = vpop.eup %8674 }
 0x91f   :  { %8109 = vmatprep.mubr.f32.mxu1 %v8675_v47 }
 0x920   :  { %8110 = vmatmul.mubr.f32.vlgmr.msra.gmra.mxu1 %v8673_v7 }
 0x921   :  { %3626 = vadd.xlane.f32.xlu0 %v8675_v47  ;;  %8160 = vmatpush3.msra.mxu1 %v6715_v0 }
 0x922   :  { %8161 = vmatprep.subr.mxu1 %v6714_v63 }
 0x923   :  { %8162 = vmatpush3.msra.mxu1 %v6714_v63 }
 0x93f   :  { %v3551_v58 = vpop.xlane.xlu1 %3550 }
 0x940   :  { %v3580_v2 = vsub.f32 %v10875_v23, %v3551_v58 }
 0x941   :  { %v3553_v56 = vpop.xlane.xlu0 %3552 }
 0x942   :  { %v3598_v16 = vmul.f32 1.442695, %v3580_v2  ;;  %v3581_v52 = vsub.f32 %v10880_v41, %v3553_v56 }
 0x943   :  { %v3557_v21 = vpop.xlane.xlu1 %3556 }
 0x944   :  { %8676 = vpow2.f32 %v3598_v16  ;;  %v3600_v5 = vmul.f32 1.442695, %v3581_v52  ;;  %v3583_v44 = vsub.f32 %v10886_v30, %v3557_v21 }
 0x945   :  { %v3555_v3 = vpop.xlane.xlu0 %3554 }
 0x946   :  { %8678 = vpow2.f32 %v3600_v5  ;;  %v3604_v27 = vmul.f32 1.442695, %v3583_v44  ;;  %v3582_v7 = vsub.f32 %v10892_v14, %v3555_v3 }
 0x947   :  { %v3561_v0 = vpop.xlane.xlu1 %3560 }
 0x948   :  { %8680 = vpow2.f32 %v3604_v27  ;;  %v3602_v47 = vmul.f32 1.442695, %v3582_v7  ;;  %v3585_v63 = vsub.f32 %v10898_v62, %v3561_v0 }
 0x949   :  { %v3559_v23 = vpop.xlane.xlu0 %3558 }
 0x94a   :  { %8682 = vpow2.f32 %v3602_v47  ;;  %v3584_v58 = vsub.f32 %v10904_v57, %v3559_v23  ;;  %v3608_v41 = vmul.f32 1.442695, %v3585_v63 }
 0x94b   :  { %v3565_v2 = vpop.xlane.xlu1 %3564 }
 0x94c   :  { %v3606_v56 = vmul.f32 1.442695, %v3584_v58  ;;  %v3587_v16 = vsub.f32 %v10910_v38, %v3565_v2 }
 0x94d   :  { %v3563_v30 = vpop.xlane.xlu0 %3562 }
 0x94e   :  { %8684 = vpow2.f32 %v3606_v56  ;;  %v3586_v52 = vsub.f32 %v10916_v4, %v3563_v30  ;;  %v3612_v14 = vmul.f32 1.442695, %v3587_v16 }
 0x94f   :  { %8686 = vpow2.f32 %v3608_v41  ;;  %v3569_v21 = vpop.xlane.xlu1 %3568 }
 0x950   :  { %v3610_v5 = vmul.f32 1.442695, %v3586_v52  ;;  %v3589_v44 = vsub.f32 %v10922_v8, %v3569_v21 }
 0x951   :  { %v8677_v62 = vpop.eup %8676  ;;  %v3567_v3 = vpop.xlane.xlu0 %3566 }
 0x952   :  { %8688 = vpow2.f32 %v3610_v5  ;;  %v3588_v57 = vsub.f32 %v10928_v45, %v3567_v3  ;;  %3630 = vadd.xlane.f32.xlu1 %v8677_v62  ;;  %8112 = vmatprep.mubr.f32.mxu1 %v8677_v62  ;;  %v3616_v38 = vmul.f32 1.442695, %v3589_v44  ;;  %v3883_v44 = vld [vmem:[%s12376_s8 + $0x10] sm:$0xff]  ;;  %v11025_v3 = vld [vmem:[%s12371_s2 + $0x78] sm:$0xff] }
 0x953   :  { %v8679_v27 = vpop.eup %8678  ;;  %8690 = vpow2.f32 %v3612_v14  ;;  %v3573_v7 = vpop.xlane.xlu1 %3572  ;;  %8133 = vmatprep.subr.mxu0 %v3883_v44 }
 0x954   :  { %v3614_v0 = vmul.f32 1.442695, %v3588_v57  ;;  %v3591_v4 = vsub.f32 %v10934_v22, %v3573_v7  ;;  %3632 = vadd.xlane.f32.xlu0 %v8679_v27  ;;  %8113 = vmatmul.mubr.f32.gmra.mxu1 %v8679_v27  ;;  %v11042_v7 = vld [vmem:[%s12371_s2] sm:$0xff] }
 0x955   :  { %v8681_v47 = vpop.eup %8680  ;;  %v3571_v63 = vpop.xlane.xlu0 %3570  ;;  %8134 = vmatpush3.msra.mxu0 %v3883_v44 }
 0x956   :  { %8692 = vpow2.f32 %v3614_v0  ;;  %v3590_v8 = vsub.f32 %v10940_v13, %v3571_v63  ;;  %3636 = vadd.xlane.f32.xlu1 %v8681_v47  ;;  %v3620_v45 = vmul.f32 1.442695, %v3591_v4  ;;  %8187 = vmatprep.subr.msk.mxu0 %vm563_vm1, %v11025_v3  ;;  %v11051_v0 = vld [vmem:[%s12371_s2 + $0x8] sm:$0xff]  ;;  %v11069_v63 = vld [vmem:[%s12371_s2 + $0x18] sm:$0xff] }
 0x957   :  { %v8683_v23 = vpop.eup %8682  ;;  %8694 = vpow2.f32 %v3616_v38  ;;  %v3577_v58 = vpop.xlane.xlu1 %3576 }
 0x958   :  { %v3618_v41 = vmul.f32 1.442695, %v3590_v8  ;;  %v3593_v2 = vsub.f32 %v10946_v18, %v3577_v58  ;;  %8115 = vmatprep.mubr.f32.mxu1 %v8683_v23 }
 0x959   :  { %v3575_v56 = vpop.xlane.xlu0 %3574  ;;  %8116 = vmatmul.mubr.f32.gmra.mxu1 %v8681_v47  ;;  %v11062_v47 = vld [vmem:[%s12371_s2 + $0x10] sm:$0xff] }
 0x95a   :  { %8696 = vpow2.f32 %v3618_v41  ;;  %v3592_v22 = vsub.f32 %v10952_v34, %v3575_v56  ;;  %3634 = vadd.xlane.f32.xlu1 %v8683_v23  ;;  %v3624_v30 = vmul.f32 1.442695, %v3593_v2  ;;  %v11077_v23 = vld [vmem:[%s12371_s2 + $0x20] sm:$0xff]  ;;  %v11115_v56 = vld [vmem:[%s12371_s2 + $0x50] sm:$0xff] }
 0x95b   :  { %v8685_v16 = vpop.eup %8684  ;;  %8698 = vpow2.f32 %v3620_v45  ;;  %v4495_v4 = vpop.permute.xlu1 %4494  ;;  %v11085_v45 = vld [vmem:[%s12371_s2 + $0x28] sm:$0xff]  ;;  %v11099_v2 = vld [vmem:[%s12371_s2 + $0x40] sm:$0xff] }
 0x95c   :  { %v8687_v52 = vpop.eup %8686  ;;  %v3622_v13 = vmul.f32 1.442695, %v3592_v22  ;;  %3638 = vadd.xlane.f32.xlu0 %v8685_v16  ;;  %8118 = vmatprep.mubr.f32.mxu1 %v8685_v16  ;;  %v11123_v22 = vld [vmem:[%s12371_s2 + $0x58] sm:$0xff] }
 0x95d   :  { %v4497_v14 = vpop.permute.xlu0 %4496  ;;  %8119 = vmatmul.mubr.f32.gmra.mxu1 %v8687_v52 }
 0x95e   :  { %8700 = vpow2.f32 %v3622_v13  ;;  %8243 = vmatprep.subr.msk.mxu1 %vm998_vm2, %v4497_v14  ;;  %3640 = vadd.xlane.f32.xlu1 %v8687_v52  ;;  %v11139_v52 = vld [vmem:[%s12371_s2 + $0x68] sm:$0xff] }
 0x95f   :  { %v11005_v18 = vpop.eup %8688  ;;  %8702 = vpow2.f32 %v3624_v30  ;;  %v4491_v58 = vpop.permute.xlu1 %4490  ;;  %v11131_v30 = vld [vmem:[%s12371_s2 + $0x60] sm:$0xff] }
 0x960   :  { %v11007_v21 = vpop.eup %8690  ;;  %8121 = vmatprep.mubr.f32.mxu1 %v11005_v18 }
 0x961   :  { %8122 = vmatmul.mubr.f32.gmra.mxu1 %v11007_v21  ;;  %v4493_v8 = vpop.permute.xlu0 %4492 }
 0x963   :  { %v11011_v34 = vpop.eup %8692 }
 0x964   :  { %v11013_v5 = vpop.eup %8694  ;;  %8124 = vmatprep.mubr.f32.mxu1 %v11011_v34 }
 0x965   :  { %8125 = vmatmul.mubr.f32.gmra.mxu1 %v11013_v5  ;;  %v4489_v41 = vpop.permute.xlu0 %4488 }
 0x967   :  { %v11020_v62 = vpop.eup %8696 }
 0x968   :  { %v11029_v57 = vpop.eup %8698  ;;  %8127 = vmatprep.mubr.f32.mxu1 %v11020_v62 }
 0x969   :  { %8128 = vmatmul.mubr.f32.gmra.mxu1 %v11029_v57  ;;  %v4485_v16 = vpop.permute.xlu0 %4484 }
 0x96b   :  { %v11033_v27 = vpop.eup %8700 }
 0x96c   :  { %v11035_v38 = vpop.eup %8702  ;;  %8130 = vmatprep.mubr.f32.mxu1 %v11033_v27 }
 0x96d   :  { %8131 = vmatmul.mubr.f32.gmra.mxu1 %v11035_v38  ;;  %v4481_v44 = vpop.permute.xlu0 %4480 }
 0x96e   :  { %8163 = vmatprep.mubr.msk.f32.mxu1 %vm563_vm1, %v11042_v7 }
 0x96f   :  { %4468 = vrot.lane.b32.xlu1 %v12475_v36, %s8992_s18 }
 0x971   :  { %8164 = vmatmul.mubr.msk.f32.vlgmr.msra.gmra.mxu1 %vm563_vm1, %v11051_v0 }
 0x972   :  { %8244 = vmatpush3.xpose.msk.msra.mxu1 %vm998_vm2, %v4497_v14  ;;  %4470 = vrot.lane.b32.xlu0 %v12481_v60, %s8992_s18  ;;  %v11147_v14 = vld [vmem:[%s12371_s2 + $0x70] sm:$0xff] }
 0x973   :  { %8245 = vmatprep.subr.msk.mxu1 %vm998_vm2, %v4495_v4  ;;  %8166 = vmatprep.mubr.msk.f32.mxu1 %vm563_vm1, %v11062_v47 }
 0x975   :  { %8167 = vmatmul.mubr.msk.f32.gmra.mxu1 %vm563_vm1, %v11069_v63 }
 0x976   :  { %8246 = vmatpush3.xpose.msk.msra.mxu1 %vm998_vm2, %v4495_v4  ;;  %8169 = vmatprep.mubr.msk.f32.mxu1 %vm563_vm1, %v11077_v23 }
 0x977   :  { %8247 = vmatprep.subr.msk.mxu1 %vm998_vm2, %v4493_v8 }
 0x979   :  { %8170 = vmatmul.mubr.msk.f32.gmra.mxu1 %vm563_vm1, %v11085_v45 }
 0x97a   :  { %8248 = vmatpush3.xpose.msk.msra.mxu1 %vm998_vm2, %v4493_v8  ;;  %8172 = vmatprep.mubr.msk.f32.mxu1 %vm563_vm1, %v10622_v33  ;;  %v11107_v33 = vld [vmem:[%s12371_s2 + $0x48] sm:$0xff]  ;;  %v4477_v8 = vpop.permute.xlu0 %4476 }
 0x97b   :  { %8249 = vmatprep.subr.msk.mxu1 %vm998_vm2, %v4491_v58 }
 0x97d   :  { %8173 = vmatmul.mubr.msk.f32.gmra.mxu1 %vm563_vm1, %v10630_v20  ;;  %v4487_v20 = vpop.permute.xlu1 %4486 }
 0x97e   :  { %8250 = vmatpush3.xpose.msk.msra.mxu1 %vm998_vm2, %v4491_v58  ;;  %8175 = vmatprep.mubr.msk.f32.mxu1 %vm563_vm1, %v11099_v2  ;;  %v4475_v58 = vpop.permute.xlu0 %4474 }
 0x97f   :  { %8251 = vmatprep.subr.msk.mxu1 %vm998_vm2, %v4489_v41 }
 0x981   :  { %8176 = vmatmul.mubr.msk.f32.gmra.mxu1 %vm563_vm1, %v11107_v33  ;;  %v4483_v13 = vpop.permute.xlu1 %4482 }
 0x982   :  { %8252 = vmatpush3.xpose.msk.msra.mxu1 %vm998_vm2, %v4489_v41  ;;  %8178 = vmatprep.mubr.msk.f32.mxu1 %vm563_vm1, %v11115_v56 }
 0x983   :  { %8253 = vmatprep.subr.msk.mxu1 %vm998_vm2, %v4487_v20 }
 0x985   :  { %8179 = vmatmul.mubr.msk.f32.gmra.mxu1 %vm563_vm1, %v11123_v22  ;;  %v4479_v4 = vpop.permute.xlu1 %4478 }
 0x986   :  { %8254 = vmatpush3.xpose.msk.msra.mxu1 %vm998_vm2, %v4487_v20  ;;  %8181 = vmatprep.mubr.msk.f32.mxu1 %vm563_vm1, %v11131_v30 }
 0x987   :  { %8255 = vmatprep.subr.msk.mxu1 %vm998_vm2, %v4485_v16 }
 0x989   :  { %8182 = vmatmul.mubr.msk.f32.gmra.mxu1 %vm563_vm1, %v11139_v52 }
 0x98a   :  { %8256 = vmatpush3.xpose.msk.msra.mxu1 %vm998_vm2, %v4485_v16  ;;  %8184 = vmatprep.mubr.msk.f32.mxu1 %vm563_vm1, %v11147_v14 }
 0x98b   :  { %8257 = vmatprep.subr.msk.mxu1 %vm998_vm2, %v4483_v13 }
 0x98d   :  { %8185 = vmatmul.mubr.msk.f32.gmra.mxu1 %vm563_vm1, %v11025_v3 }
 0x98e   :  { %8258 = vmatpush3.xpose.msk.msra.mxu1 %vm998_vm2, %v4483_v13 }
 0x98f   :  { %8259 = vmatprep.subr.msk.mxu1 %vm998_vm2, %v4481_v44 }
 0x991   :  { %3646 = vadd.xlane.f32.xlu0 %v11011_v34  ;;  %v4473_v34 = vpop.permute.xlu0 %4472 }
 0x992   :  { %8260 = vmatpush3.xpose.msk.msra.mxu1 %vm998_vm2, %v4481_v44 }
 0x993   :  { %8261 = vmatprep.subr.msk.mxu1 %vm998_vm2, %v4479_v4  ;;  %3644 = vadd.xlane.f32.xlu1 %v11007_v21 }
 0x995   :  { %3652 = vadd.xlane.f32.xlu0 %v11029_v57 }
 0x996   :  { %8262 = vmatpush3.xpose.msk.msra.mxu1 %vm998_vm2, %v4479_v4 }
 0x997   :  { %8263 = vmatprep.subr.msk.mxu1 %vm998_vm2, %v4477_v8  ;;  %3642 = vadd.xlane.f32.xlu1 %v11005_v18 }
 0x999   :  { %3656 = vadd.xlane.f32.xlu0 %v11035_v38 }
 0x99a   :  { %8264 = vmatpush3.xpose.msk.msra.mxu1 %vm998_vm2, %v4477_v8 }
 0x99b   :  { %8265 = vmatprep.subr.msk.mxu1 %vm998_vm2, %v4475_v58  ;;  %3648 = vadd.xlane.f32.xlu1 %v11013_v5 }
 0x99e   :  { %8266 = vmatpush3.xpose.msk.msra.mxu1 %vm998_vm2, %v4475_v58 }
 0x99f   :  { %8267 = vmatprep.subr.msk.mxu1 %vm998_vm2, %v4473_v34  ;;  %3650 = vadd.xlane.f32.xlu1 %v11020_v62 }
 0x9a2   :  { %8268 = vmatpush3.xpose.msk.msra.mxu1 %vm998_vm2, %v4473_v34 }
 0x9a6   :  { %v3629_v21 = vpop.xlane.xlu1 %3628 }
 0x9aa   :  { %v3627_v18 = vpop.xlane.xlu0 %3626 }
 0x9ab   :  { %8704 = vrcp.f32 %v3627_v18 }
 0x9ac   :  { %8706 = vrcp.f32 %v3629_v21 }
 0x9af   :  { %4466 = vrot.lane.b32.xlu0 %v12467_v39, %s8992_s18  ;;  %s8994_s18 = smov 40  }
 0x9b0   :  { %4434 = vrot.lane.b32.xlu1 %v12467_v39, %s8993_s5 }
 0x9b3   :  { %4436 = vrot.lane.b32.xlu0 %v12475_v36, %s8993_s5 }
 0x9b7   :  { %4440 = vrot.lane.b32.xlu0 %v12474_v25, %s8993_s5 }
 0x9b8   :  { %v8705_v41 = vpop.eup %8704 }
 0x9b9   :  { %v8707_v16 = vpop.eup %8706 }
 0x9bb   :  { %4444 = vrot.lane.b32.xlu0 %v12472_v29, %s8993_s5 }
 0x9bf   :  { %4448 = vrot.lane.b32.xlu0 %v12470_v61, %s8993_s5 }
 0x9c3   :  { %4452 = vrot.lane.b32.xlu0 %v9553_v1, %s8993_s5 }
 0x9c7   :  { %4456 = vrot.lane.b32.xlu0 %v9545_v49, %s8993_s5 }
 0x9cb   :  { %4460 = vrot.lane.b32.xlu0 %v9549_v50, %s8993_s5 }
 0x9cf   :  { %4464 = vrot.lane.b32.xlu0 %v9539_v43, %s8993_s5 }
 0x9d3   :  { %4863 = vrot.lane.b32.xlu0 %v9541_v48, %s8994_s18 }
 0x9d4   :  { %3654 = vadd.xlane.f32.xlu1 %v11033_v27 }
 0x9d7   :  { %4859 = vrot.lane.b32.xlu0 %v9557_v51, %s8994_s18 }
 0x9db   :  { %4855 = vrot.lane.b32.xlu0 %v9565_v28, %s8994_s18  ;;  %v3631_v5 = vpop.xlane.xlu1 %3630 }
 0x9dc   :  { %8708 = vrcp.f32 %v3631_v5 }
 0x9dd   :  { %v3633_v38 = vpop.xlane.xlu0 %3632 }
 0x9de   :  { %8710 = vrcp.f32 %v3633_v38 }
 0x9df   :  { %4851 = vrot.lane.b32.xlu0 %v12469_v59, %s8994_s18  ;;  %v3637_v62 = vpop.xlane.xlu1 %3636 }
 0x9e0   :  { %v8111_v57 = vpop.f32.mrf.mxu1 }
 0x9e1   :  { %v3854_v44 = vmul.f32 %v8707_v16, %v8111_v57 }
 0x9e2   :  { %v3772_v20 = vpop.f32.mrf.mxu1 }
 0x9e3   :  { %v3852_v13 = vmul.f32 %v8705_v41, %v3772_v20  ;;  %4847 = vrot.lane.b32.xlu0 %v12471_v53, %s8994_s18  ;;  %v3635_v27 = vpop.xlane.xlu1 %3634 }
 0x9e4   :  { %8712 = vrcp.f32 %v3635_v27 }
 0x9e5   :  { %v3639_v4 = vpop.xlane.xlu0 %3638  ;;  %8135 = vmatprep.mubr.msk.f32.mxu0 %vm998_vm2, %v3852_v13  ;;  %4438 = vrot.lane.b32.xlu1 %v12481_v60, %s8993_s5  ;;  %8714 = vrcp.f32 %v3637_v62 }
 0x9e6   :  { %8136 = vmatmul.mubr.msk.f32.vlgmr.msra.gmra.mxu0 %vm998_vm2, %v3854_v44  ;;  %8716 = vrcp.f32 %v3639_v4 }
 0x9e7   :  { %4843 = vrot.lane.b32.xlu0 %v12473_v17, %s8994_s18  ;;  %v3641_v8 = vpop.xlane.xlu1 %3640  ;;  %8188 = vmatpush3.xpose.msk.msra.mxu0 %vm563_vm1, %v11025_v3 }
 0x9e8   :  { %8189 = vmatprep.subr.msk.mxu0 %vm563_vm1, %v11147_v14  ;;  %8718 = vrcp.f32 %v3641_v8 }
 0x9e9   :  { %v4471_v58 = vpop.permute.xlu0 %4470  ;;  %4442 = vrot.lane.b32.xlu1 %v12473_v17, %s8993_s5 }
 0x9ea   :  { %8269 = vmatprep.subr.msk.mxu1 %vm998_vm2, %v4471_v58 }
 0x9eb   :  { %4839 = vrot.lane.b32.xlu0 %v12481_v60, %s8994_s18  ;;  %8270 = vmatpush3.xpose.msk.msra.mxu1 %vm998_vm2, %v4471_v58  ;;  %v4469_v34 = vpop.permute.xlu1 %4468 }
 0x9ec   :  { %8271 = vmatprep.subr.msk.mxu1 %vm998_vm2, %v4469_v34  ;;  %8190 = vmatpush3.xpose.msk.msra.mxu0 %vm563_vm1, %v11147_v14 }
 0x9ed   :  { %4446 = vrot.lane.b32.xlu1 %v12471_v53, %s8993_s5  ;;  %8191 = vmatprep.subr.msk.mxu0 %vm563_vm1, %v11139_v52 }
 0x9ef   :  { %8272 = vmatpush3.xpose.msk.msra.mxu1 %vm998_vm2, %v4469_v34 }
 0x9f0   :  { %8192 = vmatpush3.xpose.msk.msra.mxu0 %vm563_vm1, %v11139_v52 }
 0x9f1   :  { %4450 = vrot.lane.b32.xlu1 %v12469_v59, %s8993_s5  ;;  %8193 = vmatprep.subr.msk.mxu0 %vm563_vm1, %v11131_v30 }
 0x9f4   :  { %8194 = vmatpush3.xpose.msk.msra.mxu0 %vm563_vm1, %v11131_v30 }
 0x9f5   :  { %4454 = vrot.lane.b32.xlu1 %v9565_v28, %s8993_s5  ;;  %8195 = vmatprep.subr.msk.mxu0 %vm563_vm1, %v11123_v22 }
 0x9f8   :  { %8196 = vmatpush3.xpose.msk.msra.mxu0 %vm563_vm1, %v11123_v22 }
 0x9f9   :  { %4458 = vrot.lane.b32.xlu1 %v9557_v51, %s8993_s5  ;;  %8197 = vmatprep.subr.msk.mxu0 %vm563_vm1, %v11115_v56 }
 0x9fc   :  { %8198 = vmatpush3.xpose.msk.msra.mxu0 %vm563_vm1, %v11115_v56 }
 0x9fd   :  { %4462 = vrot.lane.b32.xlu1 %v9541_v48, %s8993_s5  ;;  %8199 = vmatprep.subr.msk.mxu0 %vm563_vm1, %v11107_v33  ;;  %v8950_v48 = vld [vmem:[%s12371_s2 + $0x38] sm:$0xff] }
 0xa00   :  { %8200 = vmatpush3.xpose.msk.msra.mxu0 %vm563_vm1, %v11107_v33 }
 0xa01   :  { %4865 = vrot.lane.b32.xlu1 %v9539_v43, %s8994_s18  ;;  %8201 = vmatprep.subr.msk.mxu0 %vm563_vm1, %v11099_v2  ;;  %v8951_v43 = vld [vmem:[%s12371_s2 + $0x30] sm:$0xff] }
 0xa04   :  { %8202 = vmatpush3.xpose.msk.msra.mxu0 %vm563_vm1, %v11099_v2 }
 0xa05   :  { %4861 = vrot.lane.b32.xlu1 %v9549_v50, %s8994_s18  ;;  %8203 = vmatprep.subr.msk.mxu0 %vm563_vm1, %v8950_v48  ;;  %v8709_v50 = vpop.eup %8708 }
 0xa06   :  { %v8711_v51 = vpop.eup %8710 }
 0xa08   :  { %8204 = vmatpush3.xpose.msk.msra.mxu0 %vm563_vm1, %v8950_v48 }
 0xa09   :  { %4857 = vrot.lane.b32.xlu1 %v9545_v49, %s8994_s18  ;;  %8205 = vmatprep.subr.msk.mxu0 %vm563_vm1, %v8951_v43 }
 0xa0c   :  { %8206 = vmatpush3.xpose.msk.msra.mxu0 %vm563_vm1, %v8951_v43 }
 0xa0d   :  { %4853 = vrot.lane.b32.xlu1 %v9553_v1, %s8994_s18  ;;  %8207 = vmatprep.subr.msk.mxu0 %vm563_vm1, %v11085_v45 }
 0xa10   :  { %8208 = vmatpush3.xpose.msk.msra.mxu0 %vm563_vm1, %v11085_v45 }
 0xa11   :  { %4849 = vrot.lane.b32.xlu1 %v12470_v61, %s8994_s18  ;;  %8209 = vmatprep.subr.msk.mxu0 %vm563_vm1, %v11077_v23 }
 0xa14   :  { %v8114_v49 = vpop.f32.mrf.mxu1  ;;  %8210 = vmatpush3.xpose.msk.msra.mxu0 %vm563_vm1, %v11077_v23 }
 0xa15   :  { %4845 = vrot.lane.b32.xlu1 %v12472_v29, %s8994_s18  ;;  %8211 = vmatprep.subr.msk.mxu0 %vm563_vm1, %v11069_v63  ;;  %v3858_v59 = vmul.f32 %v8711_v51, %v8114_v49  ;;  %v8713_v29 = vpop.eup %8712 }
 0xa16   :  { %v3782_v1 = vpop.f32.mrf.mxu1  ;;  %v8715_v60 = vpop.eup %8714 }
 0xa17   :  { %v3856_v28 = vmul.f32 %v8709_v50, %v3782_v1  ;;  %v8717_v2 = vpop.eup %8716 }
 0xa18   :  { %8212 = vmatpush3.xpose.msk.msra.mxu0 %vm563_vm1, %v11069_v63  ;;  %v8719_v56 = vpop.eup %8718 }
 0xa19   :  { %v8117_v61 = vpop.f32.mrf.mxu1  ;;  %4841 = vrot.lane.b32.xlu1 %v12474_v25, %s8994_s18  ;;  %8138 = vmatprep.mubr.msk.f32.mxu0 %vm998_vm2, %v3856_v28 }
 0xa1a   :  { %v3647_v53 = vpop.xlane.xlu0 %3646  ;;  %8139 = vmatmul.mubr.msk.f32.gmra.mxu0 %vm998_vm2, %v3858_v59  ;;  %8213 = vmatprep.subr.msk.mxu0 %vm563_vm1, %v11062_v47  ;;  %v3862_v63 = vmul.f32 %v8715_v60, %v8117_v61 }
 0xa1b   :  { %v3792_v17 = vpop.f32.mrf.mxu1  ;;  %8720 = vrcp.f32 %v3647_v53 }
 0xa1c   :  { %v3860_v3 = vmul.f32 %v8713_v29, %v3792_v17  ;;  %v3645_v23 = vpop.xlane.xlu1 %3644  ;;  %8214 = vmatpush3.xpose.msk.msra.mxu0 %vm563_vm1, %v11062_v47 }
 0xa1d   :  { %v8120_v45 = vpop.f32.mrf.mxu1  ;;  %4837 = vrot.lane.b32.xlu1 %v12475_v36, %s8994_s18  ;;  %8215 = vmatprep.subr.msk.mxu0 %vm563_vm1, %v11051_v0  ;;  %8722 = vrcp.f32 %v3645_v23 }
 0xa1e   :  { %v3653_v25 = vpop.xlane.xlu0 %3652  ;;  %8141 = vmatprep.mubr.msk.f32.mxu0 %vm998_vm2, %v3860_v3  ;;  %v3866_v30 = vmul.f32 %v8719_v56, %v8120_v45 }
 0xa1f   :  { %v3802_v33 = vpop.f32.mrf.mxu1  ;;  %8142 = vmatmul.mubr.msk.f32.gmra.mxu0 %vm998_vm2, %v3862_v63 }
 0xa20   :  { %v3864_v22 = vmul.f32 %v8717_v2, %v3802_v33  ;;  %v3643_v47 = vpop.xlane.xlu1 %3642  ;;  %8216 = vmatpush3.xpose.msk.msra.mxu0 %vm563_vm1, %v11051_v0 }
 0xa21   :  { %8724 = vrcp.f32 %v3643_v47  ;;  %8217 = vmatprep.subr.msk.mxu0 %vm563_vm1, %v11042_v7  ;;  %v8123_v36 = vpop.f32.mrf.mxu1 }
 0xa22   :  { %v3657_v52 = vpop.xlane.xlu0 %3656  ;;  %8144 = vmatprep.mubr.msk.f32.mxu0 %vm998_vm2, %v3864_v22 }
 0xa23   :  { %8145 = vmatmul.mubr.msk.f32.gmra.mxu0 %vm998_vm2, %v3866_v30  ;;  %v3812_v18 = vpop.f32.mrf.mxu1 }
 0xa24   :  { %v3649_v14 = vpop.xlane.xlu1 %3648  ;;  %8218 = vmatpush3.xpose.msk.msra.mxu0 %vm563_vm1, %v11042_v7 }
 0xa25   :  { %8726 = vrcp.f32 %v3649_v14  ;;  %v8126_v5 = vpop.f32.mrf.mxu1 }
 0xa26   :  { %v4467_v21 = vpop.permute.xlu0 %4466  ;;  %8728 = vrcp.f32 %v3653_v25 }
 0xa27   :  { %8273 = vmatprep.subr.msk.mxu1 %vm998_vm2, %v4467_v21  ;;  %v3822_v16 = vpop.f32.mrf.mxu1 }
 0xa28   :  { %8274 = vmatpush3.xpose.msk.msra.mxu1 %vm998_vm2, %v4467_v21  ;;  %v3651_v0 = vpop.xlane.xlu1 %3650  ;;  %v8721_v62 = vpop.eup %8720 }
 0xa29   :  { %8730 = vrcp.f32 %v3651_v0  ;;  %v3872_v27 = vmul.f32 %v8721_v62, %v3822_v16  ;;  %v8129_v4 = vpop.f32.mrf.mxu1 }
 0xa2a   :  { %v8723_v38 = vpop.eup %8722  ;;  %v4437_v41 = vpop.permute.xlu0 %4436  ;;  %8732 = vrcp.f32 %v3657_v52 }
 0xa2b   :  { %v3870_v13 = vmul.f32 %v8723_v38, %v8123_v36  ;;  %v3832_v48 = vpop.f32.mrf.mxu1 }
 0xa2c   :  { %v4435_v57 = vpop.permute.xlu1 %4434 }
 0xa2d   :  { %8275 = vmatprep.mubr.msk.f32.mxu1 %vm998_vm2, %v4435_v57  ;;  %v8132_v50 = vpop.f32.mrf.mxu1 }
 0xa2e   :  { %v8725_v20 = vpop.eup %8724  ;;  %8276 = vmatmul.mubr.msk.f32.vlgmr.msra.gmra.mxu1 %vm998_vm2, %v4437_v41  ;;  %v4441_v1 = vpop.permute.xlu0 %4440 }
 0xa2f   :  { %v3868_v7 = vmul.f32 %v8725_v20, %v3812_v18  ;;  %v3842_v51 = vpop.f32.mrf.mxu1 }
 0xa31   :  { %8147 = vmatprep.mubr.msk.f32.mxu0 %vm998_vm2, %v3868_v7  ;;  %v8165_v28 = vpop.f32.mrf.mxu1 }
 0xa32   :  { %v8727_v44 = vpop.eup %8726  ;;  %8148 = vmatmul.mubr.msk.f32.gmra.mxu0 %vm998_vm2, %v3870_v13  ;;  %v4445_v59 = vpop.permute.xlu0 %4444 }
 0xa33   :  { %v3874_v8 = vmul.f32 %v8727_v44, %v8126_v5  ;;  %8150 = vmatprep.mubr.msk.f32.mxu0 %vm998_vm2, %v3872_v27  ;;  %v8729_v58 = vpop.eup %8728  ;;  %v4162_v61 = vpop.f32.mrf.mxu1 }
 0xa34   :  { %v3878_v49 = vmul.f32 %v8729_v58, %v8129_v4 }
 0xa35   :  { %v8168_v53 = vpop.f32.mrf.mxu1 }
 0xa36   :  { %v8731_v34 = vpop.eup %8730  ;;  %8151 = vmatmul.mubr.msk.f32.gmra.mxu0 %vm998_vm2, %v3874_v8  ;;  %v4449_v29 = vpop.permute.xlu0 %4448 }
 0xa37   :  { %v3876_v43 = vmul.f32 %v8731_v34, %v3832_v48  ;;  %v4172_v17 = vpop.f32.mrf.mxu1  ;;  %v8733_v30 = vpop.eup %8732 }
 0xa38   :  { %v3882_v14 = vmul.f32 %v8733_v30, %v8132_v50 }
 0xa39   :  { %8153 = vmatprep.mubr.msk.f32.mxu0 %vm998_vm2, %v3876_v43  ;;  %v8171_v23 = vpop.f32.mrf.mxu1 }
 0xa3a   :  { %8154 = vmatmul.mubr.msk.f32.gmra.mxu0 %vm998_vm2, %v3878_v49  ;;  %v4453_v60 = vpop.permute.xlu0 %4452 }
 0xa3b   :  { %v4182_v45 = vpop.f32.mrf.mxu1 }
 0xa3d   :  { %v8174_v33 = vpop.f32.mrf.mxu1 }
 0xa3e   :  { %v4457_v25 = vpop.permute.xlu0 %4456 }
 0xa3f   :  { %v4192_v47 = vpop.f32.mrf.mxu1 }
 0xa41   :  { %v8177_v21 = vpop.f32.mrf.mxu1 }
 0xa42   :  { %v4461_v56 = vpop.permute.xlu0 %4460 }
 0xa43   :  { %v4202_v62 = vpop.f32.mrf.mxu1 }
 0xa45   :  { %v8180_v41 = vpop.f32.mrf.mxu1 }
 0xa46   :  { %v4465_v0 = vpop.permute.xlu0 %4464 }
 0xa47   :  { %v4212_v16 = vpop.f32.mrf.mxu1 }
 0xa49   :  { %v8183_v27 = vpop.f32.mrf.mxu1 }
 0xa4a   :  { %v4864_v57 = vpop.permute.xlu0 %4863 }
 0xa4b   :  { %v4222_v8 = vpop.f32.mrf.mxu1 }
 0xa4d   :  { %v8186_v34 = vpop.f32.mrf.mxu1 }
 0xa4e   :  { %v4860_v7 = vpop.permute.xlu0 %4859 }
 0xa4f   :  { %v4232_v49 = vpop.f32.mrf.mxu1 }
 0xa52   :  { %v4856_v44 = vpop.permute.xlu0 %4855 }
 0xa56   :  { %v4852_v48 = vpop.permute.xlu0 %4851 }
 0xa5a   :  { %v4848_v50 = vpop.permute.xlu0 %4847 }
 0xa5d   :  { %v3655_v3 = vpop.xlane.xlu1 %3654 }
 0xa5e   :  { %8734 = vrcp.f32 %v3655_v3 }
 0xa61   :  { %v4439_v63 = vpop.permute.xlu1 %4438 }
 0xa62   :  { %8278 = vmatprep.mubr.msk.f32.mxu1 %vm998_vm2, %v4439_v63 }
 0xa63   :  { %8279 = vmatmul.mubr.msk.f32.gmra.mxu1 %vm998_vm2, %v4441_v1 }
 0xa65   :  { %v4443_v2 = vpop.permute.xlu1 %4442 }
 0xa66   :  { %8281 = vmatprep.mubr.msk.f32.mxu1 %vm998_vm2, %v4443_v2 }
 0xa67   :  { %8282 = vmatmul.mubr.msk.f32.gmra.mxu1 %vm998_vm2, %v4445_v59 }
 0xa69   :  { %v4447_v22 = vpop.permute.xlu1 %4446 }
 0xa6a   :  { %8284 = vmatprep.mubr.msk.f32.mxu1 %vm998_vm2, %v4447_v22 }
 0xa6b   :  { %v8735_v36 = vpop.eup %8734  ;;  %8285 = vmatmul.mubr.msk.f32.gmra.mxu1 %vm998_vm2, %v4449_v29  ;;  %v2843_v29 = vadd.f32 %v10751_v24, %v10753_v26  ;;  %v2873_v26 = vadd.f32 %v10836_v32, %v10771_v35  ;;  %v2893_v32 = vadd.f32 %v10844_v55, %v10785_v15 }
 0xa6c   :  { %v3880_v52 = vmul.f32 %v8735_v36, %v3842_v51 }
 0xa6d   :  { %v4451_v18 = vpop.permute.xlu1 %4450 }
 0xa6e   :  { %8156 = vmatprep.mubr.msk.f32.mxu0 %vm998_vm2, %v3880_v52  ;;  %8287 = vmatprep.mubr.msk.f32.mxu1 %vm998_vm2, %v4451_v18  ;;  %v2878_v52 = vadd.f32 %v10842_v46, %v10781_v10  ;;  %v12504_v46 = vld [vmem:[#allocation12_spill] sm:$0xff] }
 0xa6f   :  { %8157 = vmatmul.mubr.msk.f32.gmra.mxu0 %vm998_vm2, %v3882_v14  ;;  %8288 = vmatmul.mubr.msk.f32.gmra.mxu1 %vm998_vm2, %v4453_v60 }
 0xa70   :  { %8219 = vmatprep.mubr.msk.f32.mxu0 %vm563_vm1, %v4162_v61 }
 0xa71   :  { %v4455_v5 = vpop.permute.xlu1 %4454 }
 0xa72   :  { %8290 = vmatprep.mubr.msk.f32.mxu1 %vm998_vm2, %v4455_v5 }
 0xa73   :  { %8220 = vmatmul.mubr.msk.f32.vlgmr.msra.gmra.mxu0 %vm563_vm1, %v8165_v28  ;;  %8291 = vmatmul.mubr.msk.f32.gmra.mxu1 %vm998_vm2, %v4457_v25  ;;  %v4844_v28 = vpop.permute.xlu0 %4843 }
 0xa74   :  { %8222 = vmatprep.mubr.msk.f32.mxu0 %vm563_vm1, %v4172_v17 }
 0xa75   :  { %v4459_v38 = vpop.permute.xlu1 %4458 }
 0xa76   :  { %8293 = vmatprep.mubr.msk.f32.mxu1 %vm998_vm2, %v4459_v38 }
 0xa77   :  { %8223 = vmatmul.mubr.msk.f32.gmra.mxu0 %vm563_vm1, %v8168_v53  ;;  %8294 = vmatmul.mubr.msk.f32.gmra.mxu1 %vm998_vm2, %v4461_v56  ;;  %v4840_v61 = vpop.permute.xlu0 %4839 }
 0xa78   :  { %8225 = vmatprep.mubr.msk.f32.mxu0 %vm563_vm1, %v4182_v45 }
 0xa79   :  { %v4463_v20 = vpop.permute.xlu1 %4462 }
 0xa7a   :  { %8296 = vmatprep.mubr.msk.f32.mxu1 %vm998_vm2, %v4463_v20 }
 0xa7b   :  { %8226 = vmatmul.mubr.msk.f32.gmra.mxu0 %vm563_vm1, %v8171_v23  ;;  %8297 = vmatmul.mubr.msk.f32.gmra.mxu1 %vm998_vm2, %v4465_v0 }
 0xa7c   :  { %8228 = vmatprep.mubr.msk.f32.mxu0 %vm563_vm1, %v4192_v47 }
 0xa7d   :  { %v4866_v13 = vpop.permute.xlu1 %4865 }
 0xa7e   :  { %8299 = vmatprep.subr.mxu0 %v4866_v13 }
 0xa7f   :  { %8229 = vmatmul.mubr.msk.f32.gmra.mxu0 %vm563_vm1, %v8174_v33 }
 0xa80   :  { %8300 = vmatpush3.msra.mxu0 %v4866_v13  ;;  %8231 = vmatprep.mubr.msk.f32.mxu0 %vm563_vm1, %v4202_v62 }
 0xa81   :  { %8301 = vmatprep.subr.mxu0 %v4864_v57  ;;  %v4862_v4 = vpop.permute.xlu1 %4861 }
 0xa82   :  { %8302 = vmatpush3.msra.mxu0 %v4864_v57  ;;  %v12505_v57 = vld [vmem:[#allocation3_spill] sm:$0xff] }
 0xa83   :  { %8303 = vmatprep.subr.mxu0 %v4862_v4  ;;  %8232 = vmatmul.mubr.msk.f32.gmra.mxu0 %vm563_vm1, %v8177_v21  ;;  %v2898_v38 = vadd.f32 %v12505_v57, %v12504_v46 }
 0xa84   :  { %8304 = vmatpush3.msra.mxu0 %v4862_v4  ;;  %8234 = vmatprep.mubr.msk.f32.mxu0 %vm563_vm1, %v4212_v16  ;;  %v12506_v4 = vld [vmem:[#allocation13_spill] sm:$0xff] }
 0xa85   :  { %8305 = vmatprep.subr.mxu0 %v4860_v7  ;;  %v4858_v58 = vpop.permute.xlu1 %4857 }
 0xa86   :  { %8306 = vmatpush3.msra.mxu0 %v4860_v7 }
 0xa87   :  { %8307 = vmatprep.subr.mxu0 %v4858_v58  ;;  %8235 = vmatmul.mubr.msk.f32.gmra.mxu0 %vm563_vm1, %v8180_v41 }
 0xa88   :  { %8308 = vmatpush3.msra.mxu0 %v4858_v58  ;;  %8237 = vmatprep.mubr.msk.f32.mxu0 %vm563_vm1, %v4222_v8  ;;  %v12507_v8 = vld [vmem:[#allocation7_spill] sm:$0xff] }
 0xa89   :  { %8309 = vmatprep.subr.mxu0 %v4856_v44  ;;  %v4854_v43 = vpop.permute.xlu1 %4853  ;;  %v2913_v58 = vadd.f32 %v12507_v8, %v12506_v4 }
 0xa8a   :  { %8310 = vmatpush3.msra.mxu0 %v4856_v44 }
 0xa8b   :  { %8311 = vmatprep.subr.mxu0 %v4854_v43  ;;  %8238 = vmatmul.mubr.msk.f32.gmra.mxu0 %vm563_vm1, %v8183_v27 }
 0xa8c   :  { %8312 = vmatpush3.msra.mxu0 %v4854_v43  ;;  %8240 = vmatprep.mubr.msk.f32.mxu0 %vm563_vm1, %v4232_v49  ;;  %v12509_v43 = vld [vmem:[#allocation4_spill] sm:$0xff] }
 0xa8d   :  { %8313 = vmatprep.subr.mxu0 %v4852_v48  ;;  %v4850_v1 = vpop.permute.xlu1 %4849 }
 0xa8e   :  { %8314 = vmatpush3.msra.mxu0 %v4852_v48  ;;  %v12508_v48 = vld [vmem:[#allocation2_spill] sm:$0xff] }
 0xa8f   :  { %8315 = vmatprep.subr.mxu0 %v4850_v1  ;;  %8241 = vmatmul.mubr.msk.f32.gmra.mxu0 %vm563_vm1, %v8186_v34  ;;  %v2908_v49 = vadd.f32 %v12509_v43, %v12508_v48 }
 0xa90   :  { %8316 = vmatpush3.msra.mxu0 %v4850_v1 }
 0xa91   :  { %8317 = vmatprep.subr.mxu0 %v4848_v50  ;;  %v4846_v51 = vpop.permute.xlu1 %4845 }
 0xa92   :  { %8318 = vmatpush3.msra.mxu0 %v4848_v50 }
 0xa93   :  { %8319 = vmatprep.subr.mxu0 %v4846_v51 }
 0xa94   :  { %8320 = vmatpush3.msra.mxu0 %v4846_v51 }
 0xa95   :  { %8321 = vmatprep.subr.mxu0 %v4844_v28  ;;  %v4842_v59 = vpop.permute.xlu1 %4841 }
 0xa96   :  { %8322 = vmatpush3.msra.mxu0 %v4844_v28 }
 0xa97   :  { %8323 = vmatprep.subr.mxu0 %v4842_v59 }
 0xa98   :  { %8324 = vmatpush3.msra.mxu0 %v4842_v59 }
 0xa99   :  { %8325 = vmatprep.subr.mxu0 %v4840_v61  ;;  %v4838_v53 = vpop.permute.xlu1 %4837 }
 0xa9a   :  { %8326 = vmatpush3.msra.mxu0 %v4840_v61 }
 0xa9b   :  { %8327 = vmatprep.subr.mxu0 %v4838_v53 }
 0xa9c   :  { %8328 = vmatpush3.msra.mxu0 %v4838_v53 }
 0xaa6   :  { %v8137_v17 = vpop.f32.mrf.mxu0 }
 0xaa7   :  { %v11357_v60 = vadd.f32 %v8137_v17, %v2843_v29  ;;  %v8952_v17 = vld [vmem:[%s12375_s1 + $0x8] sm:$0xff] }
 0xaa8   :  { %v3998_v3 = vpop.f32.mrf.mxu0 }
 0xaa9   :  { %v11360_v23 = vadd.f32 %v3998_v3, %v10756_v9 }
 0xada   :  { %v8140_v63 = vpop.f32.mrf.mxu0 }
 0xadb   :  { %v11363_v45 = vadd.f32 %v8140_v63, %v10811_v11  ;;  %v2868_v11 = vadd.f32 %v10838_v31, %v10774_v42  ;;  %v12501_v31 = vld [vmem:[#allocation14_spill] sm:$0xff] }
 0xadc   :  { %v4008_v25 = vpop.f32.mrf.mxu0  ;;  %v2888_v18 = vadd.f32 %v12501_v31, %v10787_v12 }
 0xadd   :  { %v11366_v2 = vadd.f32 %v4008_v25, %v10816_v19 }
 0xadf   :  { %v8143_v33 = vpop.f32.mrf.mxu0 }
 0xae0   :  { %v11369_v56 = vadd.f32 %v8143_v33, %v10820_v54  ;;  %v2883_v54 = vadd.f32 %v10840_v6, %v10779_v40  ;;  %v12502_v40 = vld [vmem:[#allocation11_spill] sm:$0xff]  ;;  %v12503_v6 = vld [vmem:[#allocation5_spill] sm:$0xff]  ;;  %v8953_v33 = vld [vmem:[%s12375_s1] sm:$0xff] }
 0xae1   :  { %v4018_v24 = vpop.f32.mrf.mxu0  ;;  %v2903_v5 = vadd.f32 %v12503_v6, %v12502_v40 }
 0xae2   :  { %v11374_v22 = vadd.f32 %v4018_v24, %v10824_v37 }
 0xae3   :  { %v8146_v9 = vpop.f32.mrf.mxu0 }
 0xae4   :  { %v11378_v47 = vadd.f32 %v8146_v9, %v2873_v26 }
 0xae5   :  { %v4028_v30 = vpop.f32.mrf.mxu0 }
 0xae6   :  { %v11380_v19 = vadd.f32 %v4028_v30, %v2868_v11  ;;  %v8954_v30 = vld [vmem:[%s12375_s1 + $0x18] sm:$0xff] }
 0xaee   :  { %v8277_v20 = vpop.f32.mrf.mxu1 }
 0xaf0   :  { %v4628_v16 = vpop.f32.mrf.mxu1 }
 0xaf2   :  { %v8149_v36 = vpop.f32.mrf.mxu0 }
 0xaf3   :  { %v11386_v35 = vadd.f32 %v8149_v36, %v2883_v54 }
 0xaf4   :  { %v4038_v37 = vpop.f32.mrf.mxu0 }
 0xaf5   :  { %v11390_v14 = vadd.f32 %v4038_v37, %v2878_v52  ;;  %v8955_v37 = vld [vmem:[%s12375_s1 + $0x10] sm:$0xff] }
 0xaf6   :  { %v8152_v42 = vpop.f32.mrf.mxu0 }
 0xaf7   :  { %v11394_v21 = vadd.f32 %v8152_v42, %v2893_v32 }
 0xaf8   :  { %v4048_v0 = vpop.f32.mrf.mxu0 }
 0xaf9   :  { %v11398_v62 = vadd.f32 %v4048_v0, %v2888_v18  ;;  %v8956_v0 = vld [vmem:[%s12375_s1 + $0x28] sm:$0xff] }
 0xafa   :  { %v8155_v10 = vpop.f32.mrf.mxu0 }
 0xafb   :  { %v11402_v41 = vadd.f32 %v8155_v10, %v2903_v5  ;;  %v8957_v10 = vld [vmem:[%s12375_s1 + $0x20] sm:$0xff] }
 0xafc   :  { %v4058_v15 = vpop.f32.mrf.mxu0 }
 0xafd   :  { %v11404_v55 = vadd.f32 %v4058_v15, %v2898_v38 }
 0xb23   :  { %v8280_v12 = vpop.f32.mrf.mxu1 }
 0xb25   :  { %v4638_v7 = vpop.f32.mrf.mxu1 }
 0xb27   :  { %v8283_v13 = vpop.f32.mrf.mxu1 }
 0xb29   :  { %v4648_v27 = vpop.f32.mrf.mxu1 }
 0xb2b   :  { %v8286_v44 = vpop.f32.mrf.mxu1 }
 0xb2d   :  { %v4658_v1 = vpop.f32.mrf.mxu1 }
 0xb2f   :  { %v8158_v34 = vpop.f32.mrf.mxu0  ;;  %v8289_v53 = vpop.f32.mrf.mxu1 }
 0xb30   :  { %v11410_v50 = vadd.f32 %v8158_v34, %v2913_v58  ;;  %v8960_v58 = vld [vmem:[%s12375_s1 + $0x48] sm:$0xff] }
 0xb31   :  { %v4068_v51 = vpop.f32.mrf.mxu0  ;;  %v4668_v9 = vpop.f32.mrf.mxu1 }
 0xb32   :  { %v11412_v28 = vadd.f32 %v4068_v51, %v2908_v49  ;;  %v8961_v49 = vld [vmem:[%s12375_s1 + $0x40] sm:$0xff] }
 0xb33   :  { %v8221_v59 = vpop.f32.mrf.mxu0  ;;  %v8292_v31 = vpop.f32.mrf.mxu1 }
 0xb34   :  { %v4634_v61 = vadd.f32 %v8277_v20, %v8221_v59  ;;  %v8958_v20 = vld [vmem:[%s12375_s1 + $0x38] sm:$0xff] }
 0xb35   :  { %v4355_v29 = vpop.f32.mrf.mxu0  ;;  %v4678_v38 = vpop.f32.mrf.mxu1 }
 0xb36   :  { %v11417_v3 = vadd.f32 %v8952_v17, %v4634_v61  ;;  %v4629_v63 = vadd.f32 %v4628_v16, %v4355_v29 }
 0xb37   :  { %v8224_v25 = vpop.f32.mrf.mxu0  ;;  %v8295_v4 = vpop.f32.mrf.mxu1 }
 0xb38   :  { %v11422_v24 = vadd.f32 %v8953_v33, %v4629_v63  ;;  %v4644_v26 = vadd.f32 %v8280_v12, %v8224_v25  ;;  %4725 = vmax.xlane.f32.xlu1 %v11417_v3  ;;  %v8963_v25 = vld [vmem:[%s12375_s1 + $0x50] sm:$0xff] }
 0xb39   :  { %v4365_v11 = vpop.f32.mrf.mxu0  ;;  %v4688_v59 = vpop.f32.mrf.mxu1 }
 0xb3a   :  { %v11428_v54 = vadd.f32 %v8954_v30, %v4644_v26  ;;  %v4639_v36 = vadd.f32 %v4638_v7, %v4365_v11  ;;  %4723 = vmax.xlane.f32.xlu0 %v11422_v24  ;;  %v8964_v30 = vld [vmem:[%s12375_s1 + $0x68] sm:$0xff] }
 0xb3b   :  { %v8227_v52 = vpop.f32.mrf.mxu0 }
 0xb3c   :  { %v11434_v32 = vadd.f32 %v8955_v37, %v4639_v36  ;;  %v4654_v42 = vadd.f32 %v8283_v13, %v8227_v52  ;;  %4729 = vmax.xlane.f32.xlu1 %v11428_v54  ;;  %v8959_v13 = vld [vmem:[%s12375_s1 + $0x30] sm:$0xff] }
 0xb3d   :  { %v4375_v18 = vpop.f32.mrf.mxu0 }
 0xb3e   :  { %v11440_v40 = vadd.f32 %v8956_v0, %v4654_v42  ;;  %v4649_v6 = vadd.f32 %v4648_v27, %v4375_v18  ;;  %4727 = vmax.xlane.f32.xlu0 %v11434_v32  ;;  %v8965_v42 = vld [vmem:[%s12375_s1 + $0x60] sm:$0xff] }
 0xb3f   :  { %v8230_v5 = vpop.f32.mrf.mxu0 }
 0xb40   :  { %v11446_v46 = vadd.f32 %v8957_v10, %v4649_v6  ;;  %v4664_v57 = vadd.f32 %v8286_v44, %v8230_v5  ;;  %4733 = vmax.xlane.f32.xlu1 %v11440_v40  ;;  %v8966_v5 = vld [vmem:[%s12375_s1 + $0x78] sm:$0xff] }
 0xb41   :  { %v4385_v15 = vpop.f32.mrf.mxu0 }
 0xb42   :  { %v11452_v16 = vadd.f32 %v8958_v20, %v4664_v57  ;;  %v4659_v12 = vadd.f32 %v4658_v1, %v4385_v15  ;;  %4731 = vmax.xlane.f32.xlu0 %v11446_v46 }
 0xb43   :  { %v8233_v7 = vpop.f32.mrf.mxu0 }
 0xb44   :  { %v11458_v27 = vadd.f32 %v8959_v13, %v4659_v12  ;;  %v4674_v44 = vadd.f32 %v8289_v53, %v8233_v7  ;;  %4737 = vmax.xlane.f32.xlu1 %v11452_v16  ;;  %v8962_v53 = vld [vmem:[%s12375_s1 + $0x58] sm:$0xff] }
 0xb45   :  { %v4395_v8 = vpop.f32.mrf.mxu0 }
 0xb46   :  { %v11464_v34 = vadd.f32 %v8960_v58, %v4674_v44  ;;  %v4669_v48 = vadd.f32 %v4668_v9, %v4395_v8  ;;  %4735 = vmax.xlane.f32.xlu0 %v11458_v27  ;;  %v8298_v9 = vpop.f32.mrf.mxu1 }
 0xb47   :  { %v8236_v43 = vpop.f32.mrf.mxu0 }
 0xb48   :  { %v11470_v1 = vadd.f32 %v8961_v49, %v4669_v48  ;;  %v4684_v51 = vadd.f32 %v8292_v31, %v8236_v43  ;;  %4741 = vmax.xlane.f32.xlu1 %v11464_v34  ;;  %v4698_v0 = vpop.f32.mrf.mxu1 }
 0xb49   :  { %v4405_v61 = vpop.f32.mrf.mxu0 }
 0xb4a   :  { %v11476_v29 = vadd.f32 %v8962_v53, %v4684_v51  ;;  %v4679_v17 = vadd.f32 %v4678_v38, %v4405_v61  ;;  %4739 = vmax.xlane.f32.xlu0 %v11470_v1  ;;  %v8967_v38 = vld [vmem:[%s12375_s1 + $0x70] sm:$0xff] }
 0xb4b   :  { %v8239_v63 = vpop.f32.mrf.mxu0 }
 0xb4c   :  { %v11482_v33 = vadd.f32 %v8963_v25, %v4679_v17  ;;  %v4694_v26 = vadd.f32 %v8295_v4, %v8239_v63  ;;  %4745 = vmax.xlane.f32.xlu1 %v11476_v29 }
 0xb4d   :  { %v4415_v11 = vpop.f32.mrf.mxu0 }
 0xb4e   :  { %v11488_v36 = vadd.f32 %v8964_v30, %v4694_v26  ;;  %v4689_v52 = vadd.f32 %v4688_v59, %v4415_v11  ;;  %4743 = vmax.xlane.f32.xlu0 %v11482_v33 }
 0xb4f   :  { %v8242_v37 = vpop.f32.mrf.mxu0 }
 0xb50   :  { %v11494_v31 = vadd.f32 %v8965_v42, %v4689_v52  ;;  %v4704_v18 = vadd.f32 %v8298_v9, %v8242_v37  ;;  %4749 = vmax.xlane.f32.xlu1 %v11488_v36 }
 0xb51   :  { %v4425_v6 = vpop.f32.mrf.mxu0 }
 0xb52   :  { %v11500_v10 = vadd.f32 %v8966_v5, %v4704_v18  ;;  %v4699_v57 = vadd.f32 %v4698_v0, %v4425_v6  ;;  %4747 = vmax.xlane.f32.xlu0 %v11494_v31 }
 0xb54   :  { %v11506_v15 = vadd.f32 %v8967_v38, %v4699_v57  ;;  %4753 = vmax.xlane.f32.xlu1 %v11500_v10 }
 0xb56   :  { %4751 = vmax.xlane.f32.xlu0 %v11506_v15 }
 0xb6c   :  { %4835 = vrot.lane.b32.xlu0 %v12467_v39, %s8994_s18 }
 0xbc1   :  { %v4726_v20 = vpop.xlane.xlu1 %4725 }
 0xbc2   :  { %v4756_v12 = vsub.f32 %v11417_v3, %v4726_v20 }
 0xbc3   :  { %v4724_v7 = vpop.xlane.xlu0 %4723 }
 0xbc4   :  { %v4773_v13 = vmul.f32 1.442695, %v4756_v12  ;;  %v4755_v44 = vsub.f32 %v11422_v24, %v4724_v7 }
 0xbc5   :  { %v4730_v4 = vpop.xlane.xlu1 %4729 }
 0xbc6   :  { %8736 = vpow2.f32 %v4773_v13  ;;  %v4771_v8 = vmul.f32 1.442695, %v4755_v44  ;;  %v4758_v58 = vsub.f32 %v11428_v54, %v4730_v4 }
 0xbc7   :  { %v4728_v48 = vpop.xlane.xlu0 %4727 }
 0xbc8   :  { %8738 = vpow2.f32 %v4771_v8  ;;  %v4777_v49 = vmul.f32 1.442695, %v4758_v58  ;;  %v4757_v51 = vsub.f32 %v11434_v32, %v4728_v48 }
 0xbc9   :  { %v4734_v43 = vpop.xlane.xlu1 %4733 }
 0xbca   :  { %8740 = vpow2.f32 %v4777_v49  ;;  %v4775_v3 = vmul.f32 1.442695, %v4757_v51  ;;  %v4760_v53 = vsub.f32 %v11440_v40, %v4734_v43 }
 0xbcb   :  { %v4732_v59 = vpop.xlane.xlu0 %4731 }
 0xbcc   :  { %v4759_v39 = vsub.f32 %v11446_v46, %v4732_v59  ;;  %v4781_v54 = vmul.f32 1.442695, %v4760_v53 }
 0xbcd   :  { %v4738_v61 = vpop.xlane.xlu1 %4737 }
 0xbce   :  { %v4779_v24 = vmul.f32 1.442695, %v4759_v39  ;;  %v4762_v25 = vsub.f32 %v11452_v16, %v4738_v61 }
 0xbcf   :  { %v4736_v17 = vpop.xlane.xlu0 %4735 }
 0xbd0   :  { %8742 = vpow2.f32 %v4779_v24  ;;  %v4761_v11 = vsub.f32 %v11458_v27, %v4736_v17  ;;  %v4785_v30 = vmul.f32 1.442695, %v4762_v25  ;;  %v5060_v24 = vld [vmem:[%s12376_s8 + $0x18] sm:$0xff] }
 0xbd1   :  { %v4742_v63 = vpop.xlane.xlu1 %4741  ;;  %8744 = vpow2.f32 %v4775_v3  ;;  %8355 = vmatprep.subr.mxu1 %v5060_v24 }
 0xbd2   :  { %8746 = vpow2.f32 %v4781_v54  ;;  %v4783_v40 = vmul.f32 1.442695, %v4761_v11  ;;  %v4764_v37 = vsub.f32 %v11464_v34, %v4742_v63  ;;  %8356 = vmatpush3.msra.mxu1 %v5060_v24 }
 0xbd3   :  { %v8737_v26 = vpop.eup %8736  ;;  %v4740_v9 = vpop.xlane.xlu0 %4739  ;;  %8748 = vpow2.f32 %v4785_v30 }
 0xbd4   :  { %4805 = vadd.xlane.f32.xlu1 %v8737_v26  ;;  %8750 = vpow2.f32 %v4783_v40  ;;  %v4789_v27 = vmul.f32 1.442695, %v4764_v37  ;;  %v4763_v57 = vsub.f32 %v11470_v1, %v4740_v9 }
 0xbd5   :  { %v8739_v32 = vpop.eup %8738  ;;  %v4746_v46 = vpop.xlane.xlu1 %4745 }
 0xbd6   :  { %8331 = vmatprep.mubr.f32.mxu0 %v8739_v32  ;;  %v4766_v44 = vsub.f32 %v11476_v29, %v4746_v46 }
 0xbd7   :  { %v4744_v52 = vpop.xlane.xlu0 %4743  ;;  %v8741_v16 = vpop.eup %8740 }
 0xbd8   :  { %4803 = vadd.xlane.f32.xlu1 %v8739_v32  ;;  %v4765_v13 = vsub.f32 %v11482_v33, %v4744_v52  ;;  %v4793_v58 = vmul.f32 1.442695, %v4766_v44 }
 0xbd9   :  { %v4750_v42 = vpop.xlane.xlu1 %4749 }
 0xbda   :  { %v4768_v18 = vsub.f32 %v11488_v36, %v4750_v42  ;;  %v4787_v36 = vmul.f32 1.442695, %v4763_v57  ;;  %v4791_v1 = vmul.f32 1.442695, %v4765_v13 }
 0xbdb   :  { %v4748_v0 = vpop.xlane.xlu0 %4747 }
 0xbdc   :  { %v4797_v6 = vmul.f32 1.442695, %v4768_v18  ;;  %4809 = vadd.xlane.f32.xlu1 %v8741_v16 }
 0xbdd   :  { %v8743_v5 = vpop.eup %8742  ;;  %v4754_v38 = vpop.xlane.xlu1 %4753 }
 0xbde   :  { %8752 = vpow2.f32 %v4797_v6  ;;  %v4770_v20 = vsub.f32 %v11500_v10, %v4754_v38  ;;  %4811 = vadd.xlane.f32.xlu0 %v8743_v5  ;;  %v8745_v12 = vpop.eup %8744  ;;  %v4767_v10 = vsub.f32 %v11494_v31, %v4748_v0 }
 0xbdf   :  { %v4752_v34 = vpop.xlane.xlu0 %4751  ;;  %8754 = vpow2.f32 %v4789_v27  ;;  %v8747_v4 = vpop.eup %8746 }
 0xbe0   :  { %v4801_v7 = vmul.f32 1.442695, %v4770_v20  ;;  %4807 = vadd.xlane.f32.xlu1 %v8745_v12  ;;  %v8749_v48 = vpop.eup %8748  ;;  %v4795_v43 = vmul.f32 1.442695, %v4767_v10  ;;  %v4769_v33 = vsub.f32 %v11506_v15, %v4752_v34 }
 0xbe1   :  { %v8751_v29 = vpop.eup %8750 }
 0xbe2   :  { %8756 = vpow2.f32 %v4801_v7  ;;  %v4799_v51 = vmul.f32 1.442695, %v4769_v33 }
 0xbe3   :  { %v4836_v8 = vpop.permute.xlu0 %4835  ;;  %8758 = vpow2.f32 %v4787_v36 }
 0xbe4   :  { %8329 = vmatprep.subr.mxu0 %v4836_v8  ;;  %4813 = vadd.xlane.f32.xlu1 %v8747_v4  ;;  %8760 = vpow2.f32 %v4791_v1 }
 0xbe5   :  { %8330 = vmatpush3.msra.mxu0 %v4836_v8  ;;  %8762 = vpow2.f32 %v4793_v58 }
 0xbe6   :  { %8332 = vmatmul.mubr.f32.vlgmr.msra.gmra.mxu0 %v8737_v26  ;;  %8764 = vpow2.f32 %v4795_v43 }
 0xbe7   :  { %8334 = vmatprep.mubr.f32.mxu0 %v8745_v12  ;;  %8766 = vpow2.f32 %v4799_v51 }
 0xbe8   :  { %4817 = vadd.xlane.f32.xlu1 %v8749_v48 }
 0xbea   :  { %8335 = vmatmul.mubr.f32.gmra.mxu0 %v8741_v16 }
 0xbeb   :  { %v8753_v49 = vpop.eup %8752  ;;  %8337 = vmatprep.mubr.f32.mxu0 %v8743_v5 }
 0xbec   :  { %4815 = vadd.xlane.f32.xlu1 %v8751_v29  ;;  %4829 = vadd.xlane.f32.xlu0 %v8753_v49  ;;  %v8755_v31 = vpop.eup %8754 }
 0xbee   :  { %8338 = vmatmul.mubr.f32.gmra.mxu0 %v8747_v4 }
 0xbef   :  { %v8757_v59 = vpop.eup %8756  ;;  %8340 = vmatprep.mubr.f32.mxu0 %v8751_v29 }
 0xbf0   :  { %4821 = vadd.xlane.f32.xlu1 %v8755_v31  ;;  %4833 = vadd.xlane.f32.xlu0 %v8757_v59  ;;  %v8759_v39 = vpop.eup %8758 }
 0xbf1   :  { %v8761_v15 = vpop.eup %8760 }
 0xbf2   :  { %8341 = vmatmul.mubr.f32.gmra.mxu0 %v8749_v48  ;;  %v8763_v61 = vpop.eup %8762 }
 0xbf3   :  { %8343 = vmatprep.mubr.f32.mxu0 %v8759_v39  ;;  %v8765_v3 = vpop.eup %8764 }
 0xbf4   :  { %4819 = vadd.xlane.f32.xlu1 %v8759_v39  ;;  %v8767_v53 = vpop.eup %8766 }
 0xbf6   :  { %8344 = vmatmul.mubr.f32.gmra.mxu0 %v8755_v31 }
 0xbf7   :  { %8346 = vmatprep.mubr.f32.mxu0 %v8761_v15 }
 0xbf8   :  { %4825 = vadd.xlane.f32.xlu1 %v8763_v61 }
 0xbfa   :  { %8347 = vmatmul.mubr.f32.gmra.mxu0 %v8763_v61 }
 0xbfb   :  { %8349 = vmatprep.mubr.f32.mxu0 %v8765_v3 }
 0xbfc   :  { %4823 = vadd.xlane.f32.xlu1 %v8761_v15 }
 0xbfe   :  { %8350 = vmatmul.mubr.f32.gmra.mxu0 %v8753_v49 }
 0xbff   :  { %8352 = vmatprep.mubr.f32.mxu0 %v8767_v53 }
 0xc00   :  { %4827 = vadd.xlane.f32.xlu1 %v8765_v3 }
 0xc02   :  { %8353 = vmatmul.mubr.f32.gmra.mxu0 %v8757_v59 }
 0xc04   :  { %4831 = vadd.xlane.f32.xlu1 %v8767_v53 }
 0xc5d   :  { %v4806_v17 = vpop.xlane.xlu1 %4805 }
 0xc61   :  { %v4804_v63 = vpop.xlane.xlu1 %4803 }
 0xc62   :  { %8768 = vrcp.f32 %v4804_v63 }
 0xc63   :  { %8770 = vrcp.f32 %v4806_v17 }
 0xc65   :  { %v4810_v54 = vpop.xlane.xlu1 %4809 }
 0xc67   :  { %v4812_v30 = vpop.xlane.xlu0 %4811 }
 0xc69   :  { %v4808_v25 = vpop.xlane.xlu1 %4807 }
 0xc6a   :  { %8772 = vrcp.f32 %v4808_v25 }
 0xc6b   :  { %8774 = vrcp.f32 %v4810_v54 }
 0xc6c   :  { %8776 = vrcp.f32 %v4812_v30 }
 0xc6d   :  { %v4814_v26 = vpop.xlane.xlu1 %4813 }
 0xc6e   :  { %8778 = vrcp.f32 %v4814_v26 }
 0xc6f   :  { %v8769_v37 = vpop.eup %8768 }
 0xc70   :  { %v8771_v16 = vpop.eup %8770 }
 0xc71   :  { %v4818_v9 = vpop.xlane.xlu1 %4817 }
 0xc75   :  { %v4816_v32 = vpop.xlane.xlu1 %4815  ;;  %v4830_v36 = vpop.xlane.xlu0 %4829 }
 0xc76   :  { %8780 = vrcp.f32 %v4816_v32 }
 0xc77   :  { %8782 = vrcp.f32 %v4818_v9  ;;  %v8773_v27 = vpop.eup %8772 }
 0xc78   :  { %v8775_v38 = vpop.eup %8774 }
 0xc79   :  { %v4822_v11 = vpop.xlane.xlu1 %4821  ;;  %v8777_v13 = vpop.eup %8776 }
 0xc7a   :  { %v4834_v29 = vpop.xlane.xlu0 %4833 }
 0xc7b   :  { %v8779_v4 = vpop.eup %8778 }
 0xc7d   :  { %v4820_v46 = vpop.xlane.xlu1 %4819 }
 0xc7e   :  { %8784 = vrcp.f32 %v4820_v46 }
 0xc7f   :  { %8786 = vrcp.f32 %v4822_v11 }
 0xc81   :  { %v4826_v52 = vpop.xlane.xlu1 %4825 }
 0xc83   :  { %v8781_v58 = vpop.eup %8780 }
 0xc84   :  { %v8783_v33 = vpop.eup %8782 }
 0xc85   :  { %v4824_v42 = vpop.xlane.xlu1 %4823 }
 0xc86   :  { %8788 = vrcp.f32 %v4824_v42 }
 0xc87   :  { %8790 = vrcp.f32 %v4826_v52 }
 0xc89   :  { %v4828_v12 = vpop.xlane.xlu1 %4827 }
 0xc8a   :  { %8792 = vrcp.f32 %v4828_v12 }
 0xc8b   :  { %8794 = vrcp.f32 %v4830_v36  ;;  %v8785_v59 = vpop.eup %8784 }
 0xc8c   :  { %v8787_v15 = vpop.eup %8786 }
 0xc8d   :  { %v4832_v48 = vpop.xlane.xlu1 %4831 }
 0xc8e   :  { %8796 = vrcp.f32 %v4832_v48 }
 0xc8f   :  { %8798 = vrcp.f32 %v4834_v29 }
 0xc93   :  { %v8789_v24 = vpop.eup %8788 }
 0xc94   :  { %v8791_v63 = vpop.eup %8790 }
 0xc97   :  { %v8793_v9 = vpop.eup %8792 }
 0xc98   :  { %v8795_v11 = vpop.eup %8794 }
 0xca6   :  { %v8333_v40 = vpop.f32.mrf.mxu0 }
 0xca7   :  { %v5031_v6 = vmul.f32 %v8771_v16, %v8333_v40  ;;  %v8797_v40 = vpop.eup %8796 }
 0xca8   :  { %v4949_v18 = vpop.f32.mrf.mxu0  ;;  %v8799_v42 = vpop.eup %8798 }
 0xca9   :  { %v5029_v0 = vmul.f32 %v8769_v37, %v4949_v18 }
 0xcaa   :  { %v8336_v5 = vpop.f32.mrf.mxu0 }
 0xcab   :  { %8357 = vmatprep.mubr.msk.f32.mxu1 %vm998_vm2, %v5029_v0  ;;  %v5035_v34 = vmul.f32 %v8775_v38, %v8336_v5  ;;  %v11551_v5 = vld [vmem:[%s12377_s9] ss:$0 sm:$0xff] }
 0xcac   :  { %v4959_v57 = vpop.f32.mrf.mxu0  ;;  %8358 = vmatmul.mubr.msk.f32.vlgmr.msra.gmra.mxu1 %vm998_vm2, %v5031_v6 }
 0xcad   :  { %v5033_v20 = vmul.f32 %v8773_v27, %v4959_v57  ;;  %v8968_v57 = vld [vmem:[%s12435_s23 + $0x8] sm:$0xff] }
 0xcae   :  { %v8339_v7 = vpop.f32.mrf.mxu0 }
 0xcaf   :  { %8360 = vmatprep.mubr.msk.f32.mxu1 %vm998_vm2, %v5033_v20  ;;  %v5039_v1 = vmul.f32 %v8779_v4, %v8339_v7  ;;  %v8970_v4 = vld [vmem:[%s12435_s23 + $0x18] sm:$0xff] }
 0xcb0   :  { %v4969_v44 = vpop.f32.mrf.mxu0  ;;  %8361 = vmatmul.mubr.msk.f32.gmra.mxu1 %vm998_vm2, %v5035_v34 }
 0xcb1   :  { %v5037_v8 = vmul.f32 %v8777_v13, %v4969_v44 }
 0xcb2   :  { %v8342_v10 = vpop.f32.mrf.mxu0 }
 0xcb3   :  { %8363 = vmatprep.mubr.msk.f32.mxu1 %vm998_vm2, %v5037_v8  ;;  %v5043_v51 = vmul.f32 %v8783_v33, %v8342_v10 }
 0xcb4   :  { %v4979_v43 = vpop.f32.mrf.mxu0  ;;  %8364 = vmatmul.mubr.msk.f32.gmra.mxu1 %vm998_vm2, %v5039_v1 }
 0xcb5   :  { %v5041_v49 = vmul.f32 %v8781_v58, %v4979_v43 }
 0xcb6   :  { %v8345_v31 = vpop.f32.mrf.mxu0 }
 0xcb7   :  { %8366 = vmatprep.mubr.msk.f32.mxu1 %vm998_vm2, %v5041_v49  ;;  %v5047_v3 = vmul.f32 %v8787_v15, %v8345_v31  ;;  %v8972_v49 = vld [vmem:[%s12435_s23 + $0x28] sm:$0xff]  ;;  %v8973_v15 = vld [vmem:[%s12435_s23 + $0x20] sm:$0xff] }
 0xcb8   :  { %v4989_v39 = vpop.f32.mrf.mxu0  ;;  %8367 = vmatmul.mubr.msk.f32.gmra.mxu1 %vm998_vm2, %v5043_v51 }
 0xcb9   :  { %v5045_v61 = vmul.f32 %v8785_v59, %v4989_v39 }
 0xcba   :  { %v8348_v53 = vpop.f32.mrf.mxu0 }
 0xcbb   :  { %8369 = vmatprep.mubr.msk.f32.mxu1 %vm998_vm2, %v5045_v61  ;;  %v5051_v25 = vmul.f32 %v8791_v63, %v8348_v53 }
 0xcbc   :  { %v4999_v17 = vpop.f32.mrf.mxu0  ;;  %8370 = vmatmul.mubr.msk.f32.gmra.mxu1 %vm998_vm2, %v5047_v3 }
 0xcbd   :  { %v5049_v54 = vmul.f32 %v8789_v24, %v4999_v17  ;;  %v8974_v17 = vld [vmem:[%s12435_s23 + $0x38] sm:$0xff] }
 0xcbe   :  { %v8351_v26 = vpop.f32.mrf.mxu0 }
 0xcbf   :  { %8372 = vmatprep.mubr.msk.f32.mxu1 %vm998_vm2, %v5049_v54  ;;  %v5055_v30 = vmul.f32 %v8795_v11, %v8351_v26 }
 0xcc0   :  { %v5009_v32 = vpop.f32.mrf.mxu0  ;;  %8373 = vmatmul.mubr.msk.f32.gmra.mxu1 %vm998_vm2, %v5051_v25 }
 0xcc1   :  { %v5053_v46 = vmul.f32 %v8793_v9, %v5009_v32  ;;  %v8975_v9 = vld [vmem:[%s12435_s23 + $0x30] sm:$0xff] }
 0xcc2   :  { %v8354_v52 = vpop.f32.mrf.mxu0 }
 0xcc3   :  { %8375 = vmatprep.mubr.msk.f32.mxu1 %vm998_vm2, %v5053_v46  ;;  %v5059_v16 = vmul.f32 %v8799_v42, %v8354_v52  ;;  %v8976_v52 = vld [vmem:[%s12435_s23 + $0x48] sm:$0xff] }
 0xcc4   :  { %v5019_v37 = vpop.f32.mrf.mxu0  ;;  %8376 = vmatmul.mubr.msk.f32.gmra.mxu1 %vm998_vm2, %v5055_v30 }
 0xcc5   :  { %v5057_v18 = vmul.f32 %v8797_v40, %v5019_v37 }
 0xcc7   :  { %8378 = vmatprep.mubr.msk.f32.mxu1 %vm998_vm2, %v5057_v18 }
 0xcc8   :  { %8379 = vmatmul.mubr.msk.f32.gmra.mxu1 %vm998_vm2, %v5059_v16  ;;  %v8977_v16 = vld [vmem:[%s12435_s23 + $0x40] sm:$0xff] }
 0xd6c   :  { %v8359_v0 = vpop.f32.mrf.mxu1 }
 0xd6d   :  { %v5255_v6 = vadd.f32 %v8359_v0, %v11357_v60  ;;  %v8969_v60 = vld [vmem:[%s12435_s23] sm:$0xff] }
 0xd6e   :  { %v5175_v27 = vpop.f32.mrf.mxu1 }
 0xd6f   :  { %v5271_v38 = vadd.f32 %v8968_v57, %v5255_v6  ;;  %v5254_v20 = vadd.f32 %v5175_v27, %v11360_v23 }
 0xd70   :  { %v8362_v12 = vpop.f32.mrf.mxu1 }
 0xd71   :  { %v11558_v34 = vadd.f32 %v11551_v5, %v5271_v38  ;;  %v5270_v7 = vadd.f32 %v8969_v60, %v5254_v20  ;;  %v5257_v36 = vadd.f32 %v8362_v12, %v11363_v45  ;;  %v8971_v45 = vld [vmem:[%s12435_s23 + $0x10] sm:$0xff]  ;;  %v8978_v38 = vld [vmem:[%s12435_s23 + $0x58] sm:$0xff] }
 0xd72   :  { %v5185_v13 = vpop.f32.mrf.mxu1 }
 0xd73   :  { %12510 = vst [vmem:[#allocation9_spill] sm:$0xff] %v11558_v34  ;;  %v11565_v44 = vadd.f32 %v11551_v5, %v5270_v7  ;;  %v5273_v23 = vadd.f32 %v8970_v4, %v5257_v36  ;;  %v5256_v8 = vadd.f32 %v5185_v13, %v11366_v2  ;;  %v5312_v1 = vsel %vm69_vm0, %v11558_v34, 0.0  ;;  %v8979_v36 = vld [vmem:[%s12435_s23 + $0x50] sm:$0xff] }
 0xd74   :  { %5313 = vadd.xlane.f32.xlu0 %v5312_v1  ;;  %v8365_v10 = vpop.f32.mrf.mxu1  ;;  %v8980_v1 = vld [vmem:[%s12435_s23 + $0x68] sm:$0xff] }
 0xd75   :  { %12511 = vst [vmem:[#allocation6_spill] sm:$0xff] %v11565_v44  ;;  %v11574_v58 = vadd.f32 %v11551_v5, %v5273_v23  ;;  %v5272_v48 = vadd.f32 %v8971_v45, %v5256_v8  ;;  %v5259_v43 = vadd.f32 %v8365_v10, %v11369_v56  ;;  %v5309_v33 = vsel %vm69_vm0, %v11565_v44, 0.0 }
 0xd76   :  { %5310 = vadd.xlane.f32.xlu1 %v5309_v33  ;;  %v5195_v2 = vpop.f32.mrf.mxu1  ;;  %v8981_v33 = vld [vmem:[%s12435_s23 + $0x60] sm:$0xff] }
 0xd77   :  { %12512 = vst [vmem:[#allocation8_spill] sm:$0xff] %v11574_v58  ;;  %v11583_v29 = vadd.f32 %v11551_v5, %v5272_v48  ;;  %v5275_v51 = vadd.f32 %v8972_v49, %v5259_v43  ;;  %v5258_v31 = vadd.f32 %v5195_v2, %v11374_v22  ;;  %v5318_v59 = vsel %vm69_vm0, %v11574_v58, 0.0 }
 0xd78   :  { %5319 = vadd.xlane.f32.xlu0 %v5318_v59  ;;  %v8368_v56 = vpop.f32.mrf.mxu1  ;;  %v8982_v59 = vld [vmem:[%s12435_s23 + $0x78] sm:$0xff] }
 0xd79   :  { %12513 = vst [vmem:[#allocation17_spill] sm:$0xff] %v11583_v29  ;;  %v11592_v39 = vadd.f32 %v11551_v5, %v5275_v51  ;;  %v5274_v61 = vadd.f32 %v8973_v15, %v5258_v31  ;;  %v5261_v3 = vadd.f32 %v8368_v56, %v11378_v47  ;;  %v5315_v53 = vsel %vm69_vm0, %v11583_v29, 0.0 }
 0xd7a   :  { %5316 = vadd.xlane.f32.xlu1 %v5315_v53  ;;  %v5205_v22 = vpop.f32.mrf.mxu1 }
 0xd7b   :  { %12514 = vst [vmem:[#allocation16_spill] sm:$0xff] %v11592_v39  ;;  %v11601_v24 = vadd.f32 %v11551_v5, %v5274_v61  ;;  %v5277_v63 = vadd.f32 %v8974_v17, %v5261_v3  ;;  %v5260_v54 = vadd.f32 %v5205_v22, %v11380_v19  ;;  %v5324_v25 = vsel %vm69_vm0, %v11592_v39, 0.0  ;;  %v8983_v3 = vld [vmem:[%s12435_s23 + $0x70] sm:$0xff] }
 0xd7c   :  { %5325 = vadd.xlane.f32.xlu0 %v5324_v25  ;;  %v8371_v47 = vpop.f32.mrf.mxu1 }
 0xd7d   :  { %12515 = vst [vmem:[#allocation19_spill] sm:$0xff] %v11601_v24  ;;  %v11610_v26 = vadd.f32 %v11551_v5, %v5277_v63  ;;  %v5276_v32 = vadd.f32 %v8975_v9, %v5260_v54  ;;  %v5263_v11 = vadd.f32 %v8371_v47, %v11386_v35  ;;  %v5321_v46 = vsel %vm69_vm0, %v11601_v24, 0.0  ;;  %v5566_v54 = vld [vmem:[%s12378_s12 + $0x18] sm:$0xff] }
 0xd7e   :  { %5322 = vadd.xlane.f32.xlu1 %v5321_v46  ;;  %v5215_v19 = vpop.f32.mrf.mxu1  ;;  %8381 = vmatprep.subr.mxu0 %v5566_v54 }
 0xd7f   :  { %12516 = vst [vmem:[#allocation18_spill] sm:$0xff] %v11610_v26  ;;  %v11619_v30 = vadd.f32 %v11551_v5, %v5276_v32  ;;  %v5279_v40 = vadd.f32 %v8976_v52, %v5263_v11  ;;  %v5262_v37 = vadd.f32 %v5215_v19, %v11390_v14  ;;  %v5330_v42 = vsel %vm69_vm0, %v11610_v26, 0.0  ;;  %8382 = vmatpush3.msra.mxu0 %v5566_v54 }
 0xd80   :  { %5331 = vadd.xlane.f32.xlu0 %v5330_v42  ;;  %v8374_v35 = vpop.f32.mrf.mxu1 }
 0xd81   :  { %12517 = vst [vmem:[#allocation15_spill] sm:$0xff] %v11619_v30  ;;  %v11628_v18 = vadd.f32 %v11551_v5, %v5279_v40  ;;  %v5278_v0 = vadd.f32 %v8977_v16, %v5262_v37  ;;  %v5265_v6 = vadd.f32 %v8374_v35, %v11394_v21  ;;  %v5327_v27 = vsel %vm69_vm0, %v11619_v30, 0.0 }
 0xd82   :  { %5328 = vadd.xlane.f32.xlu1 %v5327_v27  ;;  %v5225_v14 = vpop.f32.mrf.mxu1 }
 0xd83   :  { %12518 = vst [vmem:[#allocation10_spill] sm:$0xff] %v11628_v18  ;;  %v11637_v57 = vadd.f32 %v11551_v5, %v5278_v0  ;;  %v5281_v20 = vadd.f32 %v8978_v38, %v5265_v6  ;;  %v5264_v12 = vadd.f32 %v5225_v14, %v11398_v62  ;;  %v5336_v60 = vsel %vm69_vm0, %v11628_v18, 0.0 }
 0xd84   :  { %5337 = vadd.xlane.f32.xlu0 %v5336_v60  ;;  %v8377_v21 = vpop.f32.mrf.mxu1 }
 0xd85   :  { %12519 = vst [vmem:[#allocation21_spill] sm:$0xff] %v11637_v57  ;;  %v11646_v7 = vadd.f32 %v11551_v5, %v5281_v20  ;;  %v5280_v13 = vadd.f32 %v8979_v36, %v5264_v12  ;;  %v5267_v4 = vadd.f32 %v8377_v21, %v11402_v41  ;;  %v5333_v23 = vsel %vm69_vm0, %v11637_v57, 0.0 }
 0xd86   :  { %5334 = vadd.xlane.f32.xlu1 %v5333_v23  ;;  %v5235_v62 = vpop.f32.mrf.mxu1 }
 0xd87   :  { %12520 = vst [vmem:[#allocation20_spill] sm:$0xff] %v11646_v7  ;;  %v11655_v8 = vadd.f32 %v11551_v5, %v5280_v13  ;;  %v5283_v10 = vadd.f32 %v8980_v1, %v5267_v4  ;;  %v5266_v45 = vadd.f32 %v5235_v62, %v11404_v55  ;;  %v5342_v48 = vsel %vm69_vm0, %v11646_v7, 0.0 }
 0xd88   :  { %5343 = vadd.xlane.f32.xlu0 %v5342_v48  ;;  %v8380_v41 = vpop.f32.mrf.mxu1 }
 0xd89   :  { %12521 = vst [vmem:[#allocation23_spill] sm:$0xff] %v11655_v8  ;;  %v11664_v43 = vadd.f32 %v11551_v5, %v5283_v10  ;;  %v5282_v2 = vadd.f32 %v8981_v33, %v5266_v45  ;;  %v5269_v49 = vadd.f32 %v8380_v41, %v11410_v50  ;;  %v5339_v51 = vsel %vm69_vm0, %v11655_v8, 0.0 }
 0xd8a   :  { %5340 = vadd.xlane.f32.xlu1 %v5339_v51  ;;  %v5245_v55 = vpop.f32.mrf.mxu1 }
 0xd8b   :  { %12522 = vst [vmem:[#allocation22_spill] sm:$0xff] %v11664_v43  ;;  %v11673_v31 = vadd.f32 %v11551_v5, %v5282_v2  ;;  %v5285_v56 = vadd.f32 %v8982_v59, %v5269_v49  ;;  %v5268_v15 = vadd.f32 %v5245_v55, %v11412_v28  ;;  %v5348_v61 = vsel %vm69_vm0, %v11664_v43, 0.0 }
 0xd8c   :  { %5349 = vadd.xlane.f32.xlu0 %v5348_v61 }
 0xd8d   :  { %12523 = vst [vmem:[#allocation25_spill] sm:$0xff] %v11673_v31  ;;  %v11682_v50 = vadd.f32 %v11551_v5, %v5285_v56  ;;  %v5284_v53 = vadd.f32 %v8983_v3, %v5268_v15  ;;  %v5345_v22 = vsel %vm69_vm0, %v11673_v31, 0.0 }
 0xd8e   :  { %5346 = vadd.xlane.f32.xlu1 %v5345_v22 }
 0xd8f   :  { %12524 = vst [vmem:[#allocation24_spill] sm:$0xff] %v11682_v50  ;;  %v11690_v17 = vadd.f32 %v11551_v5, %v5284_v53  ;;  %v5354_v28 = vsel %vm69_vm0, %v11682_v50, 0.0 }
 0xd90   :  { %5355 = vadd.xlane.f32.xlu0 %v5354_v28 }
 0xd91   :  { %12525 = vst [vmem:[#allocation27_spill] sm:$0xff] %v11690_v17  ;;  %v5351_v63 = vsel %vm69_vm0, %v11690_v17, 0.0 }
 0xd92   :  { %5352 = vadd.xlane.f32.xlu1 %v5351_v63 }
 0xdfd   :  { %v5314_v25 = vpop.xlane.xlu0 %5313 }
 0xdfe   :  { %v5358_v47 = vmul.f32 0.03125, %v5314_v25 }
 0xdff   :  { %v5311_v9 = vpop.xlane.xlu1 %5310 }
 0xe00   :  { %v11700_v5 = vsub.f32 %v11558_v34, %v5358_v47  ;;  %v5357_v32 = vmul.f32 0.03125, %v5311_v9 }
 0xe01   :  { %v5320_v11 = vpop.xlane.xlu0 %5319 }
 0xe02   :  { %v11703_v46 = vsub.f32 %v11565_v44, %v5357_v32  ;;  %v5360_v19 = vmul.f32 0.03125, %v5320_v11  ;;  %v5390_v52 = vmul.f32 %v11700_v5, %v11700_v5 }
 0xe03   :  { %v5317_v40 = vpop.xlane.xlu1 %5316 }
 0xe04   :  { %v11708_v37 = vsub.f32 %v11574_v58, %v5360_v19  ;;  %v5359_v42 = vmul.f32 0.03125, %v5317_v40  ;;  %v5408_v35 = vsel %vm69_vm0, %v5390_v52, 0.0  ;;  %v5389_v16 = vmul.f32 %v11703_v46, %v11703_v46 }
 0xe05   :  { %v5326_v0 = vpop.xlane.xlu0 %5325  ;;  %5409 = vadd.xlane.f32.xlu0 %v5408_v35 }
 0xe06   :  { %v11714_v6 = vsub.f32 %v11583_v29, %v5359_v42  ;;  %v5362_v27 = vmul.f32 0.03125, %v5326_v0  ;;  %v5405_v14 = vsel %vm69_vm0, %v5389_v16, 0.0  ;;  %v5392_v38 = vmul.f32 %v11708_v37, %v11708_v37 }
 0xe07   :  { %5406 = vadd.xlane.f32.xlu1 %v5405_v14  ;;  %v5323_v20 = vpop.xlane.xlu1 %5322 }
 0xe08   :  { %v11720_v12 = vsub.f32 %v11592_v39, %v5362_v27  ;;  %v5361_v60 = vmul.f32 0.03125, %v5323_v20  ;;  %v5414_v21 = vsel %vm69_vm0, %v5392_v38, 0.0  ;;  %v5391_v36 = vmul.f32 %v11714_v6, %v11714_v6 }
 0xe09   :  { %v5332_v13 = vpop.xlane.xlu0 %5331  ;;  %5415 = vadd.xlane.f32.xlu0 %v5414_v21 }
 0xe0a   :  { %v11726_v4 = vsub.f32 %v11601_v24, %v5361_v60  ;;  %v5364_v23 = vmul.f32 0.03125, %v5332_v13  ;;  %v5411_v62 = vsel %vm69_vm0, %v5391_v36, 0.0  ;;  %v5394_v1 = vmul.f32 %v11720_v12, %v11720_v12 }
 0xe0b   :  { %5412 = vadd.xlane.f32.xlu1 %v5411_v62  ;;  %v5329_v10 = vpop.xlane.xlu1 %5328 }
 0xe0c   :  { %v11732_v45 = vsub.f32 %v11610_v26, %v5364_v23  ;;  %v5363_v48 = vmul.f32 0.03125, %v5329_v10  ;;  %v5420_v41 = vsel %vm69_vm0, %v5394_v1, 0.0  ;;  %v5393_v33 = vmul.f32 %v11726_v4, %v11726_v4 }
 0xe0d   :  { %v5338_v2 = vpop.xlane.xlu0 %5337  ;;  %5421 = vadd.xlane.f32.xlu0 %v5420_v41 }
 0xe0e   :  { %v11738_v49 = vsub.f32 %v11619_v30, %v5363_v48  ;;  %v5366_v51 = vmul.f32 0.03125, %v5338_v2  ;;  %v5417_v55 = vsel %vm69_vm0, %v5393_v33, 0.0  ;;  %v5396_v59 = vmul.f32 %v11732_v45, %v11732_v45 }
 0xe0f   :  { %5418 = vadd.xlane.f32.xlu1 %v5417_v55  ;;  %v5335_v56 = vpop.xlane.xlu1 %5334 }
 0xe10   :  { %v11744_v15 = vsub.f32 %v11628_v18, %v5366_v51  ;;  %v5365_v61 = vmul.f32 0.03125, %v5335_v56  ;;  %v5426_v3 = vsel %vm69_vm0, %v5396_v59, 0.0  ;;  %v5395_v53 = vmul.f32 %v11738_v49, %v11738_v49 }
 0xe11   :  { %v5344_v22 = vpop.xlane.xlu0 %5343  ;;  %5427 = vadd.xlane.f32.xlu0 %v5426_v3  ;;  %v5564_v3 = vld [vmem:[%s12378_s12 + $0x8] sm:$0xff] }
 0xe12   :  { %v11750_v28 = vsub.f32 %v11637_v57, %v5365_v61  ;;  %v5368_v63 = vmul.f32 0.03125, %v5344_v22  ;;  %v5423_v54 = vsel %vm69_vm0, %v5395_v53, 0.0  ;;  %v5398_v25 = vmul.f32 %v11744_v15, %v11744_v15  ;;  %v5565_v61 = vld [vmem:[%s12378_s12 + $0x10] sm:$0xff]  ;;  %v5563_v53 = vld [vmem:[%s12378_s12] sm:$0xff] }
 0xe13   :  { %5424 = vadd.xlane.f32.xlu1 %v5423_v54  ;;  %v5341_v47 = vpop.xlane.xlu1 %5340  ;;  %8383 = vmatprep.subr.mxu0 %v5565_v61 }
 0xe14   :  { %v11756_v9 = vsub.f32 %v11646_v7, %v5368_v63  ;;  %v5367_v32 = vmul.f32 0.03125, %v5341_v47  ;;  %v5432_v11 = vsel %vm69_vm0, %v5398_v25, 0.0  ;;  %v5397_v19 = vmul.f32 %v11750_v28, %v11750_v28  ;;  %8384 = vmatpush3.msra.mxu0 %v5565_v61 }
 0xe15   :  { %v5350_v52 = vpop.xlane.xlu0 %5349  ;;  %5433 = vadd.xlane.f32.xlu0 %v5432_v11  ;;  %8385 = vmatprep.subr.mxu0 %v5564_v3 }
 0xe16   :  { %v11762_v40 = vsub.f32 %v11655_v8, %v5367_v32  ;;  %v5370_v42 = vmul.f32 0.03125, %v5350_v52  ;;  %v5429_v35 = vsel %vm69_vm0, %v5397_v19, 0.0  ;;  %v5400_v16 = vmul.f32 %v11756_v9, %v11756_v9  ;;  %8386 = vmatpush3.msra.mxu0 %v5564_v3 }
 0xe17   :  { %5430 = vadd.xlane.f32.xlu1 %v5429_v35  ;;  %v5347_v0 = vpop.xlane.xlu1 %5346  ;;  %8387 = vmatprep.subr.mxu0 %v5563_v53 }
 0xe18   :  { %v11768_v27 = vsub.f32 %v11664_v43, %v5370_v42  ;;  %v5369_v14 = vmul.f32 0.03125, %v5347_v0  ;;  %v5438_v38 = vsel %vm69_vm0, %v5400_v16, 0.0  ;;  %v5399_v20 = vmul.f32 %v11762_v40, %v11762_v40  ;;  %8388 = vmatpush3.msra.mxu0 %v5563_v53 }
 0xe19   :  { %5439 = vadd.xlane.f32.xlu0 %v5438_v38  ;;  %v5356_v60 = vpop.xlane.xlu0 %5355 }
 0xe1a   :  { %v11774_v21 = vsub.f32 %v11673_v31, %v5369_v14  ;;  %v5372_v36 = vmul.f32 0.03125, %v5356_v60  ;;  %v5435_v13 = vsel %vm69_vm0, %v5399_v20, 0.0  ;;  %v5402_v23 = vmul.f32 %v11768_v27, %v11768_v27 }
 0xe1b   :  { %5436 = vadd.xlane.f32.xlu1 %v5435_v13  ;;  %v5353_v62 = vpop.xlane.xlu1 %5352 }
 0xe1c   :  { %v11780_v1 = vsub.f32 %v11682_v50, %v5372_v36  ;;  %v5371_v10 = vmul.f32 0.03125, %v5353_v62  ;;  %v5444_v48 = vsel %vm69_vm0, %v5402_v23, 0.0  ;;  %v5401_v41 = vmul.f32 %v11774_v21, %v11774_v21 }
 0xe1d   :  { %5445 = vadd.xlane.f32.xlu0 %v5444_v48 }
 0xe1e   :  { %v11786_v33 = vsub.f32 %v11690_v17, %v5371_v10  ;;  %v5441_v2 = vsel %vm69_vm0, %v5401_v41, 0.0  ;;  %v5404_v51 = vmul.f32 %v11780_v1, %v11780_v1 }
 0xe1f   :  { %5442 = vadd.xlane.f32.xlu1 %v5441_v2 }
 0xe20   :  { %v5450_v55 = vsel %vm69_vm0, %v5404_v51, 0.0  ;;  %v5403_v59 = vmul.f32 %v11786_v33, %v11786_v33 }
 0xe21   :  { %5451 = vadd.xlane.f32.xlu0 %v5450_v55 }
 0xe22   :  { %v5447_v56 = vsel %vm69_vm0, %v5403_v59, 0.0 }
 0xe23   :  { %5448 = vadd.xlane.f32.xlu1 %v5447_v56  ;;  %v11807_v56 = vld [vmem:[%s12379_s10] ss:$0 sm:$0xff] }
 0xe8e   :  { %v5410_v22 = vpop.xlane.xlu0 %5409 }
 0xe8f   :  { %v5454_v63 = vmul.f32 0.03125, %v5410_v22 }
 0xe90   :  { %v5407_v54 = vpop.xlane.xlu1 %5406 }
 0xe91   :  { %v5470_v25 = vadd.f32 1e-05, %v5454_v63  ;;  %v5453_v47 = vmul.f32 0.03125, %v5407_v54 }
 0xe92   :  { %v5416_v32 = vpop.xlane.xlu0 %5415 }
 0xe93   :  { %8800 = vrsqrt.f32 %v5470_v25  ;;  %v5469_v11 = vadd.f32 1e-05, %v5453_v47  ;;  %v5456_v19 = vmul.f32 0.03125, %v5416_v32 }
 0xe94   :  { %v5413_v52 = vpop.xlane.xlu1 %5412 }
 0xe95   :  { %8802 = vrsqrt.f32 %v5469_v11  ;;  %v5472_v42 = vadd.f32 1e-05, %v5456_v19  ;;  %v5455_v35 = vmul.f32 0.03125, %v5413_v52  ;;  %v11815_v52 = vld [vmem:[%s12380_s11] ss:$0 sm:$0xff] }
 0xe96   :  { %v5422_v16 = vpop.xlane.xlu0 %5421 }
 0xe97   :  { %8804 = vrsqrt.f32 %v5472_v42  ;;  %v5471_v0 = vadd.f32 1e-05, %v5455_v35  ;;  %v5458_v14 = vmul.f32 0.03125, %v5422_v16 }
 0xe98   :  { %v5419_v38 = vpop.xlane.xlu1 %5418 }
 0xe99   :  { %8806 = vrsqrt.f32 %v5471_v0  ;;  %v5474_v20 = vadd.f32 1e-05, %v5458_v14  ;;  %v5457_v60 = vmul.f32 0.03125, %v5419_v38 }
 0xe9a   :  { %v5428_v36 = vpop.xlane.xlu0 %5427 }
 0xe9b   :  { %8808 = vrsqrt.f32 %v5474_v20  ;;  %v5473_v13 = vadd.f32 1e-05, %v5457_v60  ;;  %v5460_v23 = vmul.f32 0.03125, %v5428_v36 }
 0xe9c   :  { %v5425_v62 = vpop.xlane.xlu1 %5424 }
 0xe9d   :  { %8810 = vrsqrt.f32 %v5473_v13  ;;  %v5476_v10 = vadd.f32 1e-05, %v5460_v23  ;;  %v5459_v48 = vmul.f32 0.03125, %v5425_v62 }
 0xe9e   :  { %v5434_v41 = vpop.xlane.xlu0 %5433 }
 0xe9f   :  { %8812 = vrsqrt.f32 %v5476_v10  ;;  %v5475_v2 = vadd.f32 1e-05, %v5459_v48  ;;  %v5462_v51 = vmul.f32 0.03125, %v5434_v41 }
 0xea0   :  { %v8801_v55 = vpop.eup %8800  ;;  %v5431_v59 = vpop.xlane.xlu1 %5430 }
 0xea1   :  { %v5502_v61 = vmul.f32 %v8801_v55, %v11700_v5  ;;  %8814 = vrsqrt.f32 %v5475_v2  ;;  %v5478_v3 = vadd.f32 1e-05, %v5462_v51  ;;  %v5461_v53 = vmul.f32 0.03125, %v5431_v59 }
 0xea2   :  { %v8803_v22 = vpop.eup %8802  ;;  %v5440_v63 = vpop.xlane.xlu0 %5439 }
 0xea3   :  { %8816 = vrsqrt.f32 %v5478_v3  ;;  %v5477_v54 = vadd.f32 1e-05, %v5461_v53  ;;  %v5464_v25 = vmul.f32 0.03125, %v5440_v63  ;;  %v5525_v32 = vmul.f32 %v11807_v56, %v5502_v61 }
 0xea4   :  { %v8805_v47 = vpop.eup %8804  ;;  %v5437_v11 = vpop.xlane.xlu1 %5436  ;;  %v5501_v19 = vmul.f32 %v8803_v22, %v11703_v46 }
 0xea5   :  { %v5504_v5 = vmul.f32 %v8805_v47, %v11708_v37  ;;  %8818 = vrsqrt.f32 %v5477_v54  ;;  %v5480_v42 = vadd.f32 1e-05, %v5464_v25  ;;  %v5463_v16 = vmul.f32 0.03125, %v5437_v11 }
 0xea6   :  { %v8807_v35 = vpop.eup %8806  ;;  %v5446_v0 = vpop.xlane.xlu0 %5445  ;;  %v5524_v14 = vmul.f32 %v11807_v56, %v5501_v19  ;;  %v5548_v46 = vadd.f32 %v11815_v52, %v5525_v32 }
 0xea7   :  { %8820 = vrsqrt.f32 %v5480_v42  ;;  %v5466_v38 = vmul.f32 0.03125, %v5446_v0  ;;  %v5503_v20 = vmul.f32 %v8807_v35, %v11714_v6  ;;  %v5479_v36 = vadd.f32 1e-05, %v5463_v16 }
 0xea8   :  { %v8809_v60 = vpop.eup %8808  ;;  %v5443_v13 = vpop.xlane.xlu1 %5442  ;;  %v5547_v23 = vadd.f32 %v11815_v52, %v5524_v14  ;;  %v5527_v37 = vmul.f32 %v11807_v56, %v5504_v5 }
 0xea9   :  { %v5506_v62 = vmul.f32 %v8809_v60, %v11720_v12  ;;  %v5482_v10 = vadd.f32 1e-05, %v5466_v38  ;;  %v5465_v48 = vmul.f32 0.03125, %v5443_v13  ;;  %v5526_v41 = vmul.f32 %v11807_v56, %v5503_v20 }
 0xeaa   :  { %v8811_v2 = vpop.eup %8810  ;;  %8822 = vrsqrt.f32 %v5479_v36  ;;  %8389 = vmatprep.mubr.msk.f32.mxu0 %vm69_vm0, %v5547_v23  ;;  %v5452_v6 = vpop.xlane.xlu0 %5451  ;;  %v5550_v12 = vadd.f32 %v11815_v52, %v5527_v37 }
 0xeab   :  { %8824 = vrsqrt.f32 %v5482_v10  ;;  %v5481_v51 = vadd.f32 1e-05, %v5465_v48  ;;  %v5468_v55 = vmul.f32 0.03125, %v5452_v6  ;;  %8390 = vmatmul.mubr.msk.f32.vlgmr.msra.gmra.mxu0 %vm69_vm0, %v5548_v46  ;;  %v5549_v59 = vadd.f32 %v11815_v52, %v5526_v41 }
 0xeac   :  { %v8813_v61 = vpop.eup %8812  ;;  %v5449_v3 = vpop.xlane.xlu1 %5448  ;;  %v5505_v53 = vmul.f32 %v8811_v2, %v11726_v4  ;;  %v5529_v22 = vmul.f32 %v11807_v56, %v5506_v62 }
 0xead   :  { %v5508_v63 = vmul.f32 %v8813_v61, %v11732_v45  ;;  %8826 = vrsqrt.f32 %v5481_v51  ;;  %v5484_v54 = vadd.f32 1e-05, %v5468_v55  ;;  %v5467_v25 = vmul.f32 0.03125, %v5449_v3  ;;  %8392 = vmatprep.mubr.msk.f32.mxu0 %vm69_vm0, %v5549_v59 }
 0xeae   :  { %v8815_v47 = vpop.eup %8814  ;;  %v5528_v32 = vmul.f32 %v11807_v56, %v5505_v53  ;;  %v5552_v42 = vadd.f32 %v11815_v52, %v5529_v22 }
 0xeaf   :  { %8828 = vrsqrt.f32 %v5484_v54  ;;  %v5483_v11 = vadd.f32 1e-05, %v5467_v25  ;;  %8393 = vmatmul.mubr.msk.f32.gmra.mxu0 %vm69_vm0, %v5550_v12  ;;  %v5507_v19 = vmul.f32 %v8815_v47, %v11738_v49  ;;  %v5531_v16 = vmul.f32 %v11807_v56, %v5508_v63  ;;  %v6212_v63 = vld [vmem:[%s12381_s14 + $0x68] sm:$0xff]  ;;  %v6210_v54 = vld [vmem:[%s12381_s14 + $0x58] sm:$0xff]  ;;  %v6209_v25 = vld [vmem:[%s12381_s14 + $0x50] sm:$0xff] }
 0xeb0   :  { %v8817_v5 = vpop.eup %8816  ;;  %v5551_v4 = vadd.f32 %v11815_v52, %v5528_v32  ;;  %v6208_v47 = vld [vmem:[%s12381_s14 + $0x48] sm:$0xff]  ;;  %v6207_v32 = vld [vmem:[%s12381_s14 + $0x40] sm:$0xff] }
 0xeb1   :  { %v5510_v45 = vmul.f32 %v8817_v5, %v11744_v15  ;;  %8830 = vrsqrt.f32 %v5483_v11  ;;  %v5530_v35 = vmul.f32 %v11807_v56, %v5507_v19  ;;  %v5554_v15 = vadd.f32 %v11815_v52, %v5531_v16  ;;  %v6206_v11 = vld [vmem:[%s12381_s14 + $0x38] sm:$0xff]  ;;  %v6205_v19 = vld [vmem:[%s12381_s14 + $0x30] sm:$0xff]  ;;  %v6204_v5 = vld [vmem:[%s12381_s14 + $0x28] sm:$0xff] }
 0xeb2   :  { %v8819_v0 = vpop.eup %8818  ;;  %8395 = vmatprep.mubr.msk.f32.mxu0 %vm69_vm0, %v5551_v4  ;;  %v6203_v4 = vld [vmem:[%s12381_s14 + $0x20] sm:$0xff] }
 0xeb3   :  { %8396 = vmatmul.mubr.msk.f32.gmra.mxu0 %vm69_vm0, %v5552_v42  ;;  %v5553_v14 = vadd.f32 %v11815_v52, %v5530_v35  ;;  %v5509_v49 = vmul.f32 %v8819_v0, %v11750_v28  ;;  %v5533_v46 = vmul.f32 %v11807_v56, %v5510_v45  ;;  %v6202_v42 = vld [vmem:[%s12381_s14 + $0x18] sm:$0xff]  ;;  %v6201_v45 = vld [vmem:[%s12381_s14 + $0x10] sm:$0xff]  ;;  %v6200_v35 = vld [vmem:[%s12381_s14 + $0x8] sm:$0xff] }
 0xeb4   :  { %v8821_v38 = vpop.eup %8820  ;;  %v6199_v16 = vld [vmem:[%s12381_s14] sm:$0xff] }
 0xeb5   :  { %v5512_v20 = vmul.f32 %v8821_v38, %v11756_v9  ;;  %8398 = vmatprep.mubr.msk.f32.mxu0 %vm69_vm0, %v5553_v14  ;;  %v5532_v60 = vmul.f32 %v11807_v56, %v5509_v49  ;;  %v5556_v9 = vadd.f32 %v11815_v52, %v5533_v46  ;;  %v11929_v0 = vld [vmem:[%s12382_s13] ss:$0 sm:$0xff] }
 0xeb7   :  { %v8823_v36 = vpop.eup %8822  ;;  %8399 = vmatmul.mubr.msk.f32.gmra.mxu0 %vm69_vm0, %v5554_v15  ;;  %v5555_v13 = vadd.f32 %v11815_v52, %v5532_v60  ;;  %v5535_v62 = vmul.f32 %v11807_v56, %v5512_v20 }
 0xeb8   :  { %v8825_v23 = vpop.eup %8824  ;;  %v5511_v37 = vmul.f32 %v8823_v36, %v11762_v40 }
 0xeb9   :  { %v5514_v28 = vmul.f32 %v8825_v23, %v11768_v27  ;;  %8401 = vmatprep.mubr.msk.f32.mxu0 %vm69_vm0, %v5555_v13  ;;  %v5558_v27 = vadd.f32 %v11815_v52, %v5535_v62 }
 0xeba   :  { %v8827_v10 = vpop.eup %8826  ;;  %v5534_v48 = vmul.f32 %v11807_v56, %v5511_v37 }
 0xebb   :  { %8402 = vmatmul.mubr.msk.f32.gmra.mxu0 %vm69_vm0, %v5556_v9  ;;  %v5513_v41 = vmul.f32 %v8827_v10, %v11774_v21  ;;  %v5537_v55 = vmul.f32 %v11807_v56, %v5514_v28 }
 0xebc   :  { %v8829_v2 = vpop.eup %8828  ;;  %v5557_v6 = vadd.f32 %v11815_v52, %v5534_v48 }
 0xebd   :  { %v5516_v40 = vmul.f32 %v8829_v2, %v11780_v1  ;;  %v5536_v51 = vmul.f32 %v11807_v56, %v5513_v41  ;;  %v5560_v3 = vadd.f32 %v11815_v52, %v5537_v55 }
 0xebe   :  { %v8831_v59 = vpop.eup %8830  ;;  %8404 = vmatprep.mubr.msk.f32.mxu0 %vm69_vm0, %v5557_v6 }
 0xebf   :  { %8405 = vmatmul.mubr.msk.f32.gmra.mxu0 %vm69_vm0, %v5558_v27  ;;  %v5559_v61 = vadd.f32 %v11815_v52, %v5536_v51  ;;  %v5515_v21 = vmul.f32 %v8831_v59, %v11786_v33  ;;  %v5539_v12 = vmul.f32 %v11807_v56, %v5516_v40  ;;  %v6214_v33 = vld [vmem:[%s12381_s14 + $0x78] sm:$0xff] }
 0xec0   :  { %8413 = vmatprep.subr.mxu1 %v6214_v33 }
 0xec1   :  { %8407 = vmatprep.mubr.msk.f32.mxu0 %vm69_vm0, %v5559_v61  ;;  %v5538_v1 = vmul.f32 %v11807_v56, %v5515_v21  ;;  %v5562_v22 = vadd.f32 %v11815_v52, %v5539_v12  ;;  %8414 = vmatpush3.msra.mxu1 %v6214_v33  ;;  %v6213_v56 = vld [vmem:[%s12381_s14 + $0x70] sm:$0xff] }
 0xec2   :  { %8415 = vmatprep.subr.mxu1 %v6213_v56 }
 0xec3   :  { %8408 = vmatmul.mubr.msk.f32.gmra.mxu0 %vm69_vm0, %v5560_v3  ;;  %v5561_v53 = vadd.f32 %v11815_v52, %v5538_v1  ;;  %8416 = vmatpush3.msra.mxu1 %v6213_v56  ;;  %v6211_v52 = vld [vmem:[%s12381_s14 + $0x60] sm:$0xff] }
 0xec4   :  { %8417 = vmatprep.subr.mxu1 %v6212_v63 }
 0xec5   :  { %8410 = vmatprep.mubr.msk.f32.mxu0 %vm69_vm0, %v5561_v53  ;;  %8418 = vmatpush3.msra.mxu1 %v6212_v63 }
 0xec6   :  { %8419 = vmatprep.subr.mxu1 %v6211_v52 }
 0xec7   :  { %8411 = vmatmul.mubr.msk.f32.gmra.mxu0 %vm69_vm0, %v5562_v22  ;;  %8420 = vmatpush3.msra.mxu1 %v6211_v52 }
 0xec8   :  { %8421 = vmatprep.subr.mxu1 %v6210_v54 }
 0xec9   :  { %8422 = vmatpush3.msra.mxu1 %v6210_v54 }
 0xeca   :  { %8423 = vmatprep.subr.mxu1 %v6209_v25 }
 0xecb   :  { %8424 = vmatpush3.msra.mxu1 %v6209_v25 }
 0xecc   :  { %8425 = vmatprep.subr.mxu1 %v6208_v47 }
 0xecd   :  { %8426 = vmatpush3.msra.mxu1 %v6208_v47 }
 0xece   :  { %8427 = vmatprep.subr.mxu1 %v6207_v32 }
 0xecf   :  { %8428 = vmatpush3.msra.mxu1 %v6207_v32 }
 0xed0   :  { %8429 = vmatprep.subr.mxu1 %v6206_v11 }
 0xed1   :  { %8430 = vmatpush3.msra.mxu1 %v6206_v11 }
 0xed2   :  { %8431 = vmatprep.subr.mxu1 %v6205_v19 }
 0xed3   :  { %8432 = vmatpush3.msra.mxu1 %v6205_v19 }
 0xed4   :  { %8433 = vmatprep.subr.mxu1 %v6204_v5 }
 0xed5   :  { %8434 = vmatpush3.msra.mxu1 %v6204_v5 }
 0xed6   :  { %8435 = vmatprep.subr.mxu1 %v6203_v4 }
 0xed7   :  { %8436 = vmatpush3.msra.mxu1 %v6203_v4 }
 0xed8   :  { %8437 = vmatprep.subr.mxu1 %v6202_v42 }
 0xed9   :  { %8438 = vmatpush3.msra.mxu1 %v6202_v42 }
 0xeda   :  { %8439 = vmatprep.subr.mxu1 %v6201_v45 }
 0xedb   :  { %8440 = vmatpush3.msra.mxu1 %v6201_v45 }
 0xedc   :  { %8441 = vmatprep.subr.mxu1 %v6200_v35 }
 0xedd   :  { %8442 = vmatpush3.msra.mxu1 %v6200_v35 }
 0xede   :  { %8443 = vmatprep.subr.mxu1 %v6199_v16 }
 0xedf   :  { %8444 = vmatpush3.msra.mxu1 %v6199_v16 }
 0xf6b   :  { %v8391_v14 = vpop.f32.mrf.mxu0 }
 0xf6c   :  { %v5694_v49 = vadd.f32 %v8391_v14, %v11929_v0 }
 0xf6d   :  { %v5688_v38 = vpop.f32.mrf.mxu0 }
 0xf6e   :  { %v11932_v20 = vmul.f32 0.70710677, %v5694_v49  ;;  %v5689_v23 = vadd.f32 %v11929_v0, %v5688_v38 }
 0xf6f   :  { %v8394_v15 = vpop.f32.mrf.mxu0 }
 0xf70   :  { %v5784_v60 = vand.u32 2147483647, %v11932_v20  ;;  %v11936_v46 = vadd.f32 %v8394_v15, %v11929_v0  ;;  %v11943_v48 = vmul.f32 0.70710677, %v5689_v23  ;;  %vm6104_vm3 = vcmp.ge.f32.partialorder %v11932_v20, 0.0 }
 0xf71   :  { %v5698_v36 = vpop.f32.mrf.mxu0 }
 0xf72   :  { %v5800_v13 = vmul.f32 0.3275911, %v5784_v60  ;;  %v11940_v37 = vmul.f32 0.70710677, %v11936_v46  ;;  %v5699_v40 = vadd.f32 %v11929_v0, %v5698_v36  ;;  %v6008_v27 = vsub.f32 0.0, %v5784_v60 }
 0xf73   :  { %v8397_v28 = vpop.f32.mrf.mxu0  ;;  %v5783_v59 = vand.u32 2147483647, %v11943_v48  ;;  %vm6103_vm7 = vcmp.ge.f32.partialorder %v11943_v48, 0.0 }
 0xf74   :  { %v5816_v9 = vadd.f32 1.0, %v5800_v13  ;;  %v5786_v62 = vand.u32 2147483647, %v11940_v37  ;;  %v11946_v2 = vadd.f32 %v8397_v28, %v11929_v0  ;;  %v11954_v21 = vmul.f32 0.70710677, %v5699_v40 }
 0xf75   :  { %v5708_v10 = vpop.f32.mrf.mxu0  ;;  %v6024_v1 = vmul.f32 %v6008_v27, %v5784_v60  ;;  %v6007_v22 = vsub.f32 0.0, %v5783_v59  ;;  %v5799_v32 = vmul.f32 0.3275911, %v5783_v59  ;;  %v11979_v60 = vmul.f32 0.5, %v5694_v49 }
 0xf76   :  { %8832 = vrcp.f32 %v5816_v9  ;;  %v5802_v41 = vmul.f32 0.3275911, %v5786_v62  ;;  %v11950_v51 = vmul.f32 0.70710677, %v11946_v2  ;;  %v11963_v63 = vadd.f32 %v11929_v0, %v5708_v10 }
 0xf77   :  { %v8400_v55 = vpop.f32.mrf.mxu0  ;;  %v6010_v52 = vsub.f32 0.0, %v5786_v62  ;;  %v5785_v54 = vand.u32 2147483647, %v11954_v21  ;;  %v6041_v47 = vmul.f32 1.442695, %v6024_v1  ;;  %v6023_v5 = vmul.f32 %v6007_v22, %v5783_v59 }
 0xf78   :  { %v5818_v6 = vadd.f32 1.0, %v5802_v41  ;;  %v5788_v61 = vand.u32 2147483647, %v11950_v51  ;;  %v11957_v3 = vadd.f32 %v8400_v55, %v11929_v0  ;;  %v11974_v45 = vmul.f32 0.70710677, %v11963_v63 }
 0xf79   :  { %v5718_v53 = vpop.f32.mrf.mxu0  ;;  %v6026_v35 = vmul.f32 %v6010_v52, %v5786_v62  ;;  %v6009_v16 = vsub.f32 0.0, %v5785_v54  ;;  %v5815_v36 = vadd.f32 1.0, %v5799_v32  ;;  %v6039_v13 = vmul.f32 1.442695, %v6023_v5 }
 0xf7a   :  { %8834 = vrcp.f32 %v5818_v6  ;;  %v5804_v12 = vmul.f32 0.3275911, %v5788_v61  ;;  %v11960_v33 = vmul.f32 0.70710677, %v11957_v3  ;;  %v11981_v28 = vmul.f32 0.5, %v5689_v23 }
 0xf7b   :  { %v8403_v11 = vpop.f32.mrf.mxu0  ;;  %v5801_v6 = vmul.f32 0.3275911, %v5785_v54  ;;  %v5787_v27 = vand.u32 2147483647, %v11974_v45  ;;  %v11991_v55 = vadd.f32 %v11929_v0, %v5718_v53  ;;  %v6045_v59 = vmul.f32 1.442695, %v6026_v35 }
 0xf7c   :  { %v5820_v56 = vadd.f32 1.0, %v5804_v12  ;;  %v11967_v25 = vand.u32 2147483647, %v11960_v33  ;;  %v11977_v38 = vadd.f32 %v8403_v11, %v11929_v0  ;;  %v6025_v23 = vmul.f32 %v6009_v16, %v5785_v54 }
 0xf7d   :  { %v5728_v10 = vpop.f32.mrf.mxu0  ;;  %v11998_v22 = vmul.f32 0.5, %v11936_v46  ;;  %v5817_v5 = vadd.f32 1.0, %v5801_v6  ;;  %v5803_v54 = vmul.f32 0.3275911, %v5787_v27  ;;  %vm6106_vm4 = vcmp.ge.f32.partialorder %v11940_v37, 0.0 }
 0xf7e   :  { %8836 = vrcp.f32 %v5820_v56  ;;  %v5806_v4 = vmul.f32 0.3275911, %v11967_v25  ;;  %v11984_v9 = vmul.f32 0.70710677, %v11977_v38  ;;  %v6012_v56 = vsub.f32 0.0, %v5788_v61 }
 0xf7f   :  { %8838 = vpow2.f32 %v6041_v47  ;;  %v12000_v47 = vmul.f32 0.5, %v5699_v40  ;;  %v8406_v32 = vpop.f32.mrf.mxu0  ;;  %v6043_v46 = vmul.f32 1.442695, %v6025_v23  ;;  %v6014_v6 = vsub.f32 0.0, %v11967_v25 }
 0xf80   :  { %v5822_v14 = vadd.f32 1.0, %v5806_v4  ;;  %v11995_v1 = vand.u32 2147483647, %v11984_v9  ;;  %v12005_v4 = vmul.f32 0.70710677, %v11991_v55  ;;  %v12009_v40 = vadd.f32 %v8406_v32, %v11929_v0 }
 0xf81   :  { %v5819_v23 = vadd.f32 1.0, %v5803_v54  ;;  %v6030_v54 = vmul.f32 %v6014_v6, %v11967_v25  ;;  %vm6108_vm5 = vcmp.ge.f32.partialorder %v11950_v51, 0.0  ;;  %vm6110_vm6 = vcmp.ge.f32.partialorder %v11960_v33, 0.0 }
 0xf82   :  { %8840 = vrcp.f32 %v5822_v14  ;;  %v5808_v53 = vmul.f32 0.3275911, %v11995_v1  ;;  %v6028_v14 = vmul.f32 %v6012_v56, %v5788_v61  ;;  %12526 = vst [vmem:[#allocation26_spill] sm:$0xff] %v12009_v40  ;;  %v5789_v61 = vand.u32 2147483647, %v12005_v4 }
 0xf83   :  { %v11969_v19 = vpop.eup %8832  ;;  %8842 = vrcp.f32 %v5815_v36  ;;  %v12022_v56 = vadd.f32 %v11929_v0, %v5728_v10  ;;  %vm6105_vm8 = vcmp.ge.f32.partialorder %v11954_v21, 0.0  ;;  %vm6107_vm9 = vcmp.ge.f32.partialorder %v11974_v45, 0.0 }
 0xf84   :  { %v5864_v42 = vmul.f32 1.0614054, %v11969_v19  ;;  %8844 = vpow2.f32 %v6039_v13  ;;  %v5824_v35 = vadd.f32 1.0, %v5808_v53  ;;  %v6049_v53 = vmul.f32 1.442695, %v6028_v14 }
 0xf85   :  { %8846 = vpow2.f32 %v6045_v59  ;;  %v5805_v17 = vmul.f32 0.3275911, %v5789_v61  ;;  %v6013_v50 = vsub.f32 0.0, %v5789_v61  ;;  %v12037_v14 = vmul.f32 0.70710677, %v12022_v56 }
 0xf86   :  { %v6833_v15 = vadd.f32 -1.4531521, %v5864_v42  ;;  %8848 = vrcp.f32 %v5824_v35  ;;  %vm6109_vm10 = vcmp.ge.f32.partialorder %v12005_v4, 0.0  ;;  %vm6112_vm11 = vcmp.ge.f32.partialorder %v11984_v9, 0.0 }
 0xf87   :  { %v11986_v41 = vpop.eup %8834  ;;  %8850 = vrcp.f32 %v5817_v5  ;;  %v5821_v7 = vadd.f32 1.0, %v5805_v17  ;;  %v6029_v57 = vmul.f32 %v6013_v50, %v5789_v61  ;;  %vm6111_vm12 = vcmp.ge.f32.partialorder %v12037_v14, 0.0 }
 0xf88   :  { %v5896_v62 = vmul.f32 %v11969_v19, %v6833_v15  ;;  %v5866_v49 = vmul.f32 1.0614054, %v11986_v41  ;;  %v6011_v15 = vsub.f32 0.0, %v5787_v27  ;;  %8852 = vpow2.f32 %v6043_v46 }
 0xf89   :  { %8854 = vrcp.f32 %v5819_v23 }
 0xf8a   :  { %v5912_v12 = vadd.f32 1.4214138, %v5896_v62  ;;  %v6835_v52 = vadd.f32 -1.4531521, %v5866_v49  ;;  %v12014_v62 = vmul.f32 0.5, %v11946_v2  ;;  %v6027_v32 = vmul.f32 %v6011_v15, %v5787_v27 }
 0xf8b   :  { %v12011_v36 = vpop.eup %8836  ;;  %8856 = vpow2.f32 %v6049_v53  ;;  %v12050_v53 = vmul.f32 0.5, %v11963_v63 }
 0xf8c   :  { %v5928_v11 = vmul.f32 %v11969_v19, %v5912_v12  ;;  %v5898_v42 = vmul.f32 %v11986_v41, %v6835_v52  ;;  %v5868_v59 = vmul.f32 1.0614054, %v12011_v36  ;;  %v12025_v52 = vmul.f32 0.70710677, %v12009_v40 }
 0xf8d   :  { %v6047_v6 = vmul.f32 1.442695, %v6027_v32 }
 0xf8e   :  { %v6849_v16 = vadd.f32 -0.28449672, %v5928_v11  ;;  %v5914_v13 = vadd.f32 1.4214138, %v5898_v42  ;;  %v6837_v2 = vadd.f32 -1.4531521, %v5868_v59  ;;  %v8839_v11 = vpop.eup %8838 }
 0xf8f   :  { %v12031_v5 = vpop.eup %8840  ;;  %vm6114_vm13 = vcmp.ge.f32.partialorder %v12025_v52, 0.0 }
 0xf90   :  { %v5960_v49 = vmul.f32 %v11969_v19, %v6849_v16  ;;  %v5930_v12 = vmul.f32 %v11986_v41, %v5914_v13  ;;  %v12029_v16 = vand.u32 2147483647, %v12025_v52  ;;  %v5738_v13 = vpop.f32.mrf.mxu0  ;;  %v5900_v10 = vmul.f32 %v12011_v36, %v6837_v2  ;;  %v12043_v59 = vpop.eup %8842 }
 0xf91   :  { %v5870_v27 = vmul.f32 1.0614054, %v12031_v5  ;;  %v6053_v2 = vmul.f32 1.442695, %v6030_v54  ;;  %v12046_v31 = vpop.eup %8844  ;;  %v6016_v54 = vsub.f32 0.0, %v11995_v1  ;;  %v6160_v52 = vmul.f32 0.5, %v11977_v38 }
 0xf92   :  { %v5976_v42 = vadd.f32 0.2548296, %v5960_v49  ;;  %v6851_v35 = vadd.f32 -0.28449672, %v5930_v12  ;;  %v5810_v25 = vmul.f32 0.3275911, %v12029_v16  ;;  %v12041_v49 = vadd.f32 %v11929_v0, %v5738_v13 }
 0xf93   :  { %v5916_v15 = vadd.f32 1.4214138, %v5900_v10  ;;  %v6839_v12 = vadd.f32 -1.4531521, %v5870_v27  ;;  %v8409_v10 = vpop.f32.mrf.mxu0  ;;  %v5791_v13 = vand.u32 2147483647, %v12037_v14 }
 0xf94   :  { %v5962_v46 = vmul.f32 %v11986_v41, %v6851_v35  ;;  %v5992_v23 = vmul.f32 %v11969_v19, %v5976_v42  ;;  %v5826_v35 = vadd.f32 1.0, %v5810_v25  ;;  %v8847_v19 = vpop.eup %8846  ;;  %v12061_v17 = vadd.f32 %v8409_v10, %v11929_v0  ;;  %v12537_v38 = vld [vmem:[#allocation26_spill] sm:$0xff] }
 0xf95   :  { %v5932_v8 = vmul.f32 %v12011_v36, %v5916_v15  ;;  %v5902_v32 = vmul.f32 %v12031_v5, %v6839_v12  ;;  %v12063_v63 = vpop.eup %8848  ;;  %v5807_v12 = vmul.f32 0.3275911, %v5791_v13  ;;  %v6032_v10 = vmul.f32 %v6016_v54, %v11995_v1 }
 0xf96   :  { %v5978_v43 = vadd.f32 0.2548296, %v5962_v46  ;;  %8858 = vrcp.f32 %v5826_v35  ;;  %v12056_v46 = vmul.f32 0.70710677, %v12041_v49  ;;  %v12058_v27 = vmul.f32 %v8839_v11, %v5992_v23  ;;  %12527 = vst [vmem:[#allocation29_spill] sm:$0xff] %v12061_v17  ;;  %v5748_v23 = vpop.f32.mrf.mxu0  ;;  %v12069_v35 = vpop.eup %8850 }
 0xf97   :  { %v6853_v42 = vadd.f32 -0.28449672, %v5932_v8  ;;  %8860 = vpow2.f32 %v6047_v6  ;;  %v5918_v50 = vadd.f32 1.4214138, %v5902_v32  ;;  %v6051_v8 = vmul.f32 1.442695, %v6029_v57 }
 0xf98   :  { %8862 = vpow2.f32 %v6053_v2  ;;  %v5994_v61 = vmul.f32 %v11986_v41, %v5978_v43  ;;  %v5872_v6 = vmul.f32 1.0614054, %v12063_v63  ;;  %v6015_v11 = vsub.f32 0.0, %v5791_v13  ;;  %v12076_v41 = vpop.eup %8852 }
 0xf99   :  { %v5964_v25 = vmul.f32 %v12011_v36, %v6853_v42  ;;  %8864 = vrcp.f32 %v5821_v7  ;;  %v5934_v15 = vmul.f32 %v12031_v5, %v5918_v50  ;;  %v5793_v32 = vand.u32 2147483647, %v12056_v46  ;;  %v12083_v54 = vpop.eup %8854 }
 0xf9a   :  { %v12074_v43 = vmul.f32 0.70710677, %v12061_v17  ;;  %v6088_v57 = vsub.f32 1.0, %v12058_v27  ;;  %v6841_v42 = vadd.f32 -1.4531521, %v5872_v6  ;;  %v6018_v50 = vsub.f32 0.0, %v12029_v16 }
 0xf9b   :  { %v5980_v2 = vadd.f32 0.2548296, %v5964_v25  ;;  %v6855_v7 = vadd.f32 -0.28449672, %v5934_v15  ;;  %v6074_v18 = vmul.f32 %v8847_v19, %v5994_v61  ;;  %8866 = vpow2.f32 %v6051_v8  ;;  %v8412_v15 = vpop.f32.mrf.mxu0  ;;  %v8857_v61 = vpop.eup %8856 }
 0xf9c   :  { %12528 = vst [vmem:[#allocation28_spill] sm:$0xff] %v12074_v43  ;;  %v5796_v1 = vand.u32 2147483647, %v12074_v43  ;;  %v5904_v26 = vmul.f32 %v12063_v63, %v6841_v42  ;;  %v5823_v24 = vadd.f32 1.0, %v5807_v12  ;;  %v12088_v27 = vadd.f32 %v11929_v0, %v5748_v23 }
 0xf9d   :  { %v5996_v25 = vmul.f32 %v12011_v36, %v5980_v2  ;;  %v5966_v30 = vmul.f32 %v12031_v5, %v6855_v7  ;;  %v6031_v6 = vmul.f32 %v6015_v11, %v5791_v13  ;;  %v5809_v39 = vmul.f32 0.3275911, %v5793_v32 }
 0xf9e   :  { %12529 = vst [vmem:[#allocation14_spill] sm:$0xff] %v12088_v27  ;;  %v6017_v29 = vsub.f32 0.0, %v5793_v32  ;;  %v5812_v19 = vmul.f32 0.3275911, %v5796_v1  ;;  %v6120_v36 = vsub.f32 0.0, %v6088_v57  ;;  %v6034_v58 = vmul.f32 %v6018_v50, %v12029_v16 }
 0xf9f   :  { %v5920_v8 = vadd.f32 1.4214138, %v5904_v26  ;;  %v6057_v2 = vmul.f32 1.442695, %v6032_v10  ;;  %v6090_v7 = vsub.f32 1.0, %v6074_v18  ;;  %v6076_v44 = vmul.f32 %v8857_v61, %v5996_v25 }
 0xfa0   :  { %v5828_v42 = vadd.f32 1.0, %v5812_v19  ;;  %v12093_v12 = vadd.f32 %v8412_v15, %v11929_v0  ;;  %v5982_v23 = vadd.f32 0.2548296, %v5966_v30  ;;  %v6020_v11 = vsub.f32 0.0, %v5796_v1 }
 0xfa1   :  { %v5936_v13 = vmul.f32 %v12063_v63, %v5920_v8  ;;  %v12097_v34 = vmul.f32 0.70710677, %v12088_v27  ;;  %v6055_v43 = vmul.f32 1.442695, %v6031_v6  ;;  %v5825_v26 = vadd.f32 1.0, %v5809_v39 }
 0xfa2   :  { %12530 = vst [vmem:[#allocation11_spill] sm:$0xff] %v12093_v12  ;;  %v6033_v10 = vmul.f32 %v6017_v29, %v5793_v32  ;;  %8868 = vrcp.f32 %v5828_v42  ;;  %v6061_v50 = vmul.f32 1.442695, %v6034_v58  ;;  %v6136_v15 = vsel %vm6104_vm3, %v6088_v57, %v6120_v36  ;;  %v5758_v29 = vpop.f32.mrf.mxu0 }
 0xfa3   :  { %12531 = vst [vmem:[#allocation5_spill] sm:$0xff] %v12097_v34  ;;  %v12099_v17 = vpop.eup %8858  ;;  %v6857_v18 = vadd.f32 -0.28449672, %v5936_v13  ;;  %8870 = vpow2.f32 %v6057_v2  ;;  %v6122_v19 = vsub.f32 0.0, %v6090_v7  ;;  %v6092_v61 = vsub.f32 1.0, %v6076_v44 }
 0xfa4   :  { %v12101_v16 = vpop.eup %8860  ;;  %v5874_v30 = vmul.f32 1.0614054, %v12099_v17  ;;  %v12108_v6 = vmul.f32 0.70710677, %v12093_v12  ;;  %v5998_v32 = vmul.f32 %v12031_v5, %v5982_v23  ;;  %8872 = vrcp.f32 %v5823_v24 }
 0xfa5   :  { %v8863_v25 = vpop.eup %8862  ;;  %v6036_v8 = vmul.f32 %v6020_v11, %v5796_v1  ;;  %v5795_v2 = vand.u32 2147483647, %v12097_v34  ;;  %v5968_v58 = vmul.f32 %v12063_v63, %v6857_v18  ;;  %8874 = vpow2.f32 %v6055_v43 }
 0xfa6   :  { %12532 = vst [vmem:[#allocation12_spill] sm:$0xff] %v12108_v6  ;;  %v12110_v39 = vpop.eup %8864  ;;  %v6059_v42 = vmul.f32 1.442695, %v6033_v10  ;;  %v5798_v20 = vand.u32 2147483647, %v12108_v6  ;;  %v6168_v57 = vadd.f32 1.0, %v6136_v15  ;;  %8876 = vrcp.f32 %v5825_v26 }
 0xfa7   :  { %v6843_v44 = vadd.f32 -1.4531521, %v5874_v30  ;;  %v12117_v36 = vadd.f32 %v11929_v0, %v5758_v29  ;;  %v6138_v13 = vsel %vm6106_vm4, %v6090_v7, %v6122_v19  ;;  %v6124_v5 = vsub.f32 0.0, %v6092_v61 }
 0xfa8   :  { %8878 = vpow2.f32 %v6061_v50  ;;  %v5814_v24 = vmul.f32 0.3275911, %v5798_v20  ;;  %v12121_v1 = vpop.eup %8866  ;;  %v6078_v23 = vmul.f32 %v8863_v25, %v5998_v32  ;;  %v6065_v11 = vmul.f32 1.442695, %v6036_v8 }
 0xfa9   :  { %12533 = vst [vmem:[#allocation3_spill] sm:$0xff] %v12117_v36  ;;  %v5811_v43 = vmul.f32 0.3275911, %v5795_v2  ;;  %v6019_v10 = vsub.f32 0.0, %v5795_v2  ;;  %v12124_v18 = vmul.f32 0.5, %v11991_v55  ;;  %8880 = vpow2.f32 %v6059_v42 }
 0xfaa   :  { %v5984_v30 = vadd.f32 0.2548296, %v5968_v58  ;;  %v5830_v26 = vadd.f32 1.0, %v5814_v24  ;;  %v12127_v0 = vmul.f32 %v6168_v57, %v11979_v60  ;;  %v5906_v37 = vmul.f32 %v12099_v17, %v6843_v44 }
 0xfab   :  { %v6022_v7 = vsub.f32 0.0, %v5798_v20  ;;  %v12131_v50 = vmul.f32 0.70710677, %v12117_v36  ;;  %v6170_v15 = vadd.f32 1.0, %v6138_v13  ;;  %v6140_v25 = vsel %vm6108_vm5, %v6092_v61, %v6124_v5 }
 0xfac   :  { %8882 = vrcp.f32 %v5830_v26  ;;  %v5863_v55 = vmul.f32 1.0614054, %v12043_v59  ;;  %v6094_v19 = vsub.f32 1.0, %v6078_v23  ;;  %v5827_v29 = vadd.f32 1.0, %v5811_v43 }
 0xfad   :  { %12534 = vst [vmem:[#allocation13_spill] sm:$0xff] %v12131_v50  ;;  %8884 = vpow2.f32 %v6065_v11  ;;  %v6035_v60 = vmul.f32 %v6019_v10, %v5795_v2  ;;  %v6000_v32 = vmul.f32 %v12063_v63, %v5984_v30  ;;  %v5865_v58 = vmul.f32 1.0614054, %v12069_v35 }
 0xfae   :  { %v6832_v8 = vadd.f32 -1.4531521, %v5863_v55  ;;  %v5867_v42 = vmul.f32 1.0614054, %v12083_v54  ;;  %v6172_v51 = vadd.f32 1.0, %v6140_v25  ;;  %v6038_v44 = vmul.f32 %v6022_v7, %v5798_v20 }
 0xfaf   :  { %v12140_v57 = vpop.eup %8868  ;;  %v5922_v61 = vadd.f32 1.4214138, %v5906_v37  ;;  %v12143_v13 = vand.u32 2147483647, %v12131_v50  ;;  %v6834_v23 = vadd.f32 -1.4531521, %v5865_v58  ;;  %v12148_v11 = vmul.f32 %v6170_v15, %v11998_v22 }
 0xfb0   :  { %v8871_v5 = vpop.eup %8870  ;;  %v5876_v24 = vmul.f32 1.0614054, %v12140_v57  ;;  %v5895_v2 = vmul.f32 %v12043_v59, %v6832_v8  ;;  %v6836_v63 = vadd.f32 -1.4531521, %v5867_v42  ;;  %v6126_v43 = vsub.f32 0.0, %v6094_v19 }
 0xfb1   :  { %8886 = vrcp.f32 %v5827_v29  ;;  %v12150_v10 = vmul.f32 1.442695, %v6035_v60  ;;  %v12152_v30 = vpop.eup %8872  ;;  %v12154_v20 = vmul.f32 %v8871_v5, %v6000_v32  ;;  %v5897_v7 = vmul.f32 %v12069_v35, %v6834_v23 }
 0xfb2   :  { %v6845_v26 = vadd.f32 -1.4531521, %v5876_v24  ;;  %v5911_v37 = vadd.f32 1.4214138, %v5895_v2  ;;  %v12157_v25 = vpop.eup %8874  ;;  %v12160_v55 = vmul.f32 %v6172_v51, %v12014_v62  ;;  %v5938_v22 = vmul.f32 %v12099_v17, %v5922_v61 }
 0xfb3   :  { %v5899_v15 = vmul.f32 %v12083_v54, %v6836_v63  ;;  %v5869_v29 = vmul.f32 1.0614054, %v12110_v39  ;;  %v12165_v60 = vpop.eup %8876  ;;  %v6069_v8 = vmul.f32 1.442695, %v6038_v44  ;;  %v5813_v32 = vmul.f32 0.3275911, %v12143_v13 }
 0xfb4   :  { %v5927_v58 = vmul.f32 %v12043_v59, %v5911_v37  ;;  %v5913_v42 = vadd.f32 1.4214138, %v5897_v7  ;;  %v12173_v62 = vsel %vm6110_vm6, %v6094_v19, %v6126_v43  ;;  %v5871_v24 = vmul.f32 1.0614054, %v12152_v30 }
 0xfb5   :  { %v12169_v5 = vpop.eup %8878  ;;  %v5915_v51 = vadd.f32 1.4214138, %v5899_v15  ;;  %v6838_v61 = vadd.f32 -1.4531521, %v5869_v29  ;;  %v5908_v23 = vmul.f32 %v12140_v57, %v6845_v26  ;;  %v6859_v37 = vadd.f32 -0.28449672, %v5938_v22 }
 0xfb6   :  { %v6848_v44 = vadd.f32 -0.28449672, %v5927_v58  ;;  %v5929_v63 = vmul.f32 %v12069_v35, %v5913_v42  ;;  %v12179_v12 = vpop.eup %8880  ;;  %v6840_v19 = vadd.f32 -1.4531521, %v5871_v24  ;;  %v5829_v43 = vadd.f32 1.0, %v5813_v32 }
 0xfb7   :  { %v5931_v7 = vmul.f32 %v12083_v54, %v5915_v51  ;;  %v5901_v33 = vmul.f32 %v12110_v39, %v6838_v61  ;;  %v5873_v36 = vmul.f32 1.0614054, %v12165_v60  ;;  %v6021_v26 = vsub.f32 0.0, %v12143_v13 }
 0xfb8   :  { %v5959_v15 = vmul.f32 %v12043_v59, %v6848_v44  ;;  %v6850_v29 = vadd.f32 -0.28449672, %v5929_v63  ;;  %v5903_v50 = vmul.f32 %v12152_v30, %v6840_v19  ;;  %v5924_v51 = vadd.f32 1.4214138, %v5908_v23 }
 0xfb9   :  { %v12185_v2 = vpop.eup %8882  ;;  %v6852_v58 = vadd.f32 -0.28449672, %v5931_v7  ;;  %v5917_v42 = vadd.f32 1.4214138, %v5901_v33  ;;  %v5970_v44 = vmul.f32 %v12099_v17, %v6859_v37  ;;  %8888 = vrcp.f32 %v5829_v43 }
 0xfba   :  { %v12189_v22 = vpop.eup %8884  ;;  %v5878_v61 = vmul.f32 1.0614054, %v12185_v2  ;;  %v5975_v24 = vadd.f32 0.2548296, %v5959_v15  ;;  %v5961_v32 = vmul.f32 %v12069_v35, %v6850_v29  ;;  %v5919_v7 = vadd.f32 1.4214138, %v5903_v50 }
 0xfbb   :  { %v5963_v63 = vmul.f32 %v12083_v54, %v6852_v58  ;;  %v5933_v27 = vmul.f32 %v12110_v39, %v5917_v42  ;;  %v6842_v6 = vadd.f32 -1.4531521, %v5873_v36  ;;  %v5940_v37 = vmul.f32 %v12140_v57, %v5924_v51 }
 0xfbc   :  { %v6847_v33 = vadd.f32 -1.4531521, %v5878_v61  ;;  %v5991_v19 = vmul.f32 %v12043_v59, %v5975_v24  ;;  %v5977_v23 = vadd.f32 0.2548296, %v5961_v32  ;;  %v5935_v15 = vmul.f32 %v12152_v30, %v5919_v7 }
 0xfbd   :  { %v5979_v34 = vadd.f32 0.2548296, %v5963_v63  ;;  %v6854_v40 = vadd.f32 -0.28449672, %v5933_v27  ;;  %8890 = vpow2.f32 %v6069_v8  ;;  %v5986_v42 = vadd.f32 0.2548296, %v5970_v44 }
 0xfbe   :  { %v12199_v29 = vpop.eup %8886  ;;  %v5910_v50 = vmul.f32 %v12185_v2, %v6847_v33  ;;  %v6071_v43 = vmul.f32 %v12046_v31, %v5991_v19  ;;  %v5993_v59 = vmul.f32 %v12069_v35, %v5977_v23  ;;  %v6856_v58 = vadd.f32 -0.28449672, %v5935_v15 }
 0xfbf   :  { %v5995_v36 = vmul.f32 %v12083_v54, %v5979_v34  ;;  %v5965_v27 = vmul.f32 %v12110_v39, %v6854_v40  ;;  %v5905_v32 = vmul.f32 %v12165_v60, %v6842_v6  ;;  %v6861_v31 = vadd.f32 -0.28449672, %v5940_v37 }
 0xfc0   :  { %v5926_v61 = vadd.f32 1.4214138, %v5910_v50  ;;  %v6087_v24 = vsub.f32 1.0, %v6071_v43  ;;  %v6073_v63 = vmul.f32 %v12076_v41, %v5993_v59  ;;  %v5967_v8 = vmul.f32 %v12152_v30, %v6856_v58 }
 0xfc1   :  { %v6075_v51 = vmul.f32 %v12101_v16, %v5995_v36  ;;  %v5981_v7 = vadd.f32 0.2548296, %v5965_v27  ;;  %v5921_v40 = vadd.f32 1.4214138, %v5905_v32  ;;  %v6002_v6 = vmul.f32 %v12099_v17, %v5986_v42 }
 0xfc2   :  { %v5942_v34 = vmul.f32 %v12185_v2, %v5926_v61  ;;  %v6119_v35 = vsub.f32 0.0, %v6087_v24  ;;  %v6089_v54 = vsub.f32 1.0, %v6073_v63  ;;  %v5983_v19 = vadd.f32 0.2548296, %v5967_v8 }
 0xfc3   :  { %v6091_v44 = vsub.f32 1.0, %v6075_v51  ;;  %v5997_v33 = vmul.f32 %v12110_v39, %v5981_v7  ;;  %v6037_v41 = vmul.f32 %v6021_v26, %v12143_v13  ;;  %v5937_v23 = vmul.f32 %v12165_v60, %v5921_v40 }
 0xfc4   :  { %v6135_v16 = vsel %vm6103_vm7, %v6087_v24, %v6119_v35  ;;  %v6121_v37 = vsub.f32 0.0, %v6089_v54  ;;  %v5972_v39 = vmul.f32 %v12140_v57, %v6861_v31  ;;  %v6863_v59 = vadd.f32 -0.28449672, %v5942_v34 }
 0xfc5   :  { %v6167_v15 = vadd.f32 1.0, %v6135_v16  ;;  %v6123_v50 = vsub.f32 0.0, %v6091_v44  ;;  %v6077_v43 = vmul.f32 %v12121_v1, %v5997_v33  ;;  %v5999_v17 = vmul.f32 %v12152_v30, %v5983_v19 }
 0xfc6   :  { %v6858_v13 = vadd.f32 -0.28449672, %v5937_v23  ;;  %v6137_v26 = vsel %vm6105_vm8, %v6089_v54, %v6121_v37  ;;  %v12535_v58 = vsub.f32 1.0, %v12154_v20  ;;  %v6067_v42 = vmul.f32 1.442695, %v6037_v41  ;;  %v12233_v32 = vpop.eup %8888 }
 0xfc7   :  { %v6183_v48 = vmul.f32 %v6167_v15, %v11981_v28  ;;  %v6139_v36 = vsel %vm6107_vm9, %v6091_v44, %v6123_v50  ;;  %v6093_v27 = vsub.f32 1.0, %v6077_v43  ;;  %v6169_v61 = vadd.f32 1.0, %v6137_v26 }
 0xfc8   :  { %v6128_v1 = vsub.f32 0.0, %v12535_v58  ;;  %v6171_v24 = vadd.f32 1.0, %v6139_v36  ;;  %v6082_v30 = vmul.f32 %v12169_v5, %v6002_v6  ;;  %v6079_v28 = vmul.f32 %v12157_v25, %v5999_v17 }
 0xfc9   :  { %8445 = vmatprep.mubr.f32.mxu1 %v6183_v48  ;;  %v6125_v63 = vsub.f32 0.0, %v6093_v27  ;;  %v5969_v21 = vmul.f32 %v12165_v60, %v6858_v13  ;;  %v5988_v51 = vadd.f32 0.2548296, %v5972_v39  ;;  %v5974_v45 = vmul.f32 %v12185_v2, %v6863_v59 }
 0xfca   :  { %8446 = vmatmul.mubr.f32.vlgmr.msra.gmra.mxu1 %v12127_v0  ;;  %v6185_v7 = vmul.f32 %v6169_v61, %v12000_v47  ;;  %v5875_v8 = vmul.f32 1.0614054, %v12199_v29  ;;  %v8891_v31 = vpop.eup %8890  ;;  %v6187_v34 = vmul.f32 %v6171_v24, %v12050_v53  ;;  %v6095_v35 = vsub.f32 1.0, %v6079_v28 }
 0xfcb   :  { %v6141_v5 = vsel %vm6109_vm10, %v6093_v27, %v6125_v63  ;;  %v5985_v40 = vadd.f32 0.2548296, %v5969_v21  ;;  %8892 = vpow2.f32 %v12150_v10  ;;  %v5877_v44 = vmul.f32 1.0614054, %v12233_v32 }
 0xfcc   :  { %8448 = vmatprep.mubr.f32.mxu1 %v6185_v7  ;;  %v6173_v25 = vadd.f32 1.0, %v6141_v5  ;;  %v6844_v54 = vadd.f32 -1.4531521, %v5875_v8  ;;  %v6174_v0 = vadd.f32 1.0, %v12173_v62  ;;  %v6098_v47 = vsub.f32 1.0, %v6082_v30 }
 0xfcd   :  { %v6127_v33 = vsub.f32 0.0, %v6095_v35  ;;  %v6001_v19 = vmul.f32 %v12165_v60, %v5985_v40  ;;  %v12536_v53 = vmov %v12535_v58  ;;  %v6004_v6 = vmul.f32 %v12140_v57, %v5988_v51 }
 0xfce   :  { %v6144_v4 = vsel %vm6112_vm11, %v12536_v53, %v6128_v1  ;;  %8449 = vmatmul.mubr.f32.gmra.mxu1 %v12148_v11  ;;  %v5907_v10 = vmul.f32 %v12199_v29, %v6844_v54  ;;  %v6846_v41 = vadd.f32 -1.4531521, %v5877_v44  ;;  %v5990_v16 = vadd.f32 0.2548296, %v5974_v45  ;;  %v12541_v53 = vld [vmem:[#allocation14_spill] sm:$0xff] }
 0xfcf   :  { %8451 = vmatprep.mubr.f32.mxu1 %v6187_v34  ;;  %v6189_v62 = vmul.f32 %v6173_v25, %v12124_v18  ;;  %v6143_v23 = vsel %vm6111_vm12, %v6095_v35, %v6127_v33  ;;  %v6081_v60 = vmul.f32 %v12179_v12, %v6001_v19  ;;  %8894 = vpow2.f32 %v6067_v42  ;;  %v12538_v34 = vld [vmem:[#allocation28_spill] sm:$0xff] }
 0xfd0   :  { %v6175_v20 = vadd.f32 1.0, %v6143_v23  ;;  %v5923_v9 = vadd.f32 1.4214138, %v5907_v10  ;;  %v5909_v15 = vmul.f32 %v12233_v32, %v6846_v41  ;;  %v6158_v57 = vmul.f32 0.5, %v11957_v3  ;;  %v12543_v41 = vld [vmem:[#allocation29_spill] sm:$0xff]  ;;  %v12544_v23 = vld [vmem:[#allocation3_spill] sm:$0xff] }
 0xfd1   :  { %v6159_v11 = vmul.f32 0.5, %v12022_v56  ;;  %v6130_v37 = vsub.f32 0.0, %v6098_v47  ;;  %v6097_v50 = vsub.f32 1.0, %v6081_v60  ;;  %v6176_v43 = vadd.f32 1.0, %v6144_v4 }
 0xfd2   :  { %8452 = vmatmul.mubr.f32.gmra.mxu1 %v12160_v55  ;;  %v5939_v14 = vmul.f32 %v12199_v29, %v5923_v9  ;;  %v5925_v18 = vadd.f32 1.4214138, %v5909_v15  ;;  %v6084_v12 = vmul.f32 %v12189_v22, %v6004_v6  ;;  %v6006_v39 = vmul.f32 %v12185_v2, %v5990_v16  ;;  %v12542_v6 = vld [vmem:[#allocation13_spill] sm:$0xff] }
 0xfd3   :  { %8454 = vmatprep.mubr.f32.mxu1 %v6189_v62  ;;  %v6191_v59 = vmul.f32 %v6175_v20, %v6159_v11  ;;  %v6129_v17 = vsub.f32 0.0, %v6097_v50  ;;  %v6190_v3 = vmul.f32 %v6174_v0, %v6158_v57  ;;  %vm6113_vm14 = vcmp.ge.f32.partialorder %v12056_v46, 0.0  ;;  %v12539_v0 = vld [vmem:[#allocation5_spill] sm:$0xff] }
 0xfd4   :  { %v6860_v56 = vadd.f32 -0.28449672, %v5939_v14  ;;  %v5941_v13 = vmul.f32 %v12233_v32, %v5925_v18  ;;  %v6146_v48 = vsel %vm6114_vm13, %v6098_v47, %v6130_v37  ;;  %v6161_v26 = vmul.f32 0.5, %v12041_v49  ;;  %v12540_v47 = vld [vmem:[#allocation12_spill] sm:$0xff]  ;;  %v12545_v37 = vld [vmem:[#allocation11_spill] sm:$0xff] }
 0xfd5   :  { %v6145_v55 = vsel %vm6113_vm14, %v6097_v50, %v6129_v17  ;;  %v6192_v27 = vmul.f32 %v6176_v43, %v6160_v52  ;;  %v6100_v58 = vsub.f32 1.0, %v6084_v12  ;;  %v6086_v1 = vmul.f32 %v8891_v31, %v6006_v39  ;;  %v6864_v14 = vld [vmem:[%s12383_s15] ss:$0 sm:$0xff] }
 0xfd6   :  { %8455 = vmatmul.mubr.f32.gmra.mxu1 %v6190_v3  ;;  %v6177_v36 = vadd.f32 1.0, %v6145_v55  ;;  %v5971_v22 = vmul.f32 %v12199_v29, %v6860_v56  ;;  %v6862_v2 = vadd.f32 -0.28449672, %v5941_v13  ;;  %v6178_v42 = vadd.f32 1.0, %v6146_v48  ;;  %v12547_v13 = vld [vmem:[#allocation6_spill] sm:$0xff] }
 0xfd7   :  { %8457 = vmatprep.mubr.f32.mxu1 %v6191_v59  ;;  %v6162_v63 = vmul.f32 0.5, %v12537_v38  ;;  %v6132_v21 = vsub.f32 0.0, %v6100_v58  ;;  %v6102_v51 = vsub.f32 1.0, %v6086_v1  ;;  %vm6116_vm15 = vcmp.ge.f32.partialorder %v12538_v34, 0.0  ;;  %v12546_v59 = vld [vmem:[#allocation9_spill] sm:$0xff]  ;;  %v12551_v38 = vld [vmem:[#allocation19_spill] sm:$0xff] }
 0xfd8   :  { %v6193_v46 = vmul.f32 %v6177_v36, %v6161_v26  ;;  %v5987_v61 = vadd.f32 0.2548296, %v5971_v22  ;;  %v5973_v24 = vmul.f32 %v12233_v32, %v6862_v2  ;;  %v8893_v30 = vpop.eup %8892  ;;  %vm6115_vm1 = vcmp.ge.f32.partialorder %v12539_v0, 0.0  ;;  %v12548_v26 = vld [vmem:[#allocation8_spill] sm:$0xff] }
 0xfd9   :  { %v6194_v45 = vmul.f32 %v6178_v42, %v6162_v63  ;;  %v6148_v40 = vsel %vm6116_vm15, %v6100_v58, %v6132_v21  ;;  %v6134_v25 = vsub.f32 0.0, %v6102_v51  ;;  %vm6118_vm2 = vcmp.ge.f32.partialorder %v12540_v47, 0.0  ;;  %v12552_v21 = vld [vmem:[#allocation18_spill] sm:$0xff] }
 0xfda   :  { %8458 = vmatmul.mubr.f32.gmra.mxu1 %v6192_v27  ;;  %v6003_v49 = vmul.f32 %v12199_v29, %v5987_v61  ;;  %v5989_v28 = vadd.f32 0.2548296, %v5973_v24  ;;  %v6180_v29 = vadd.f32 1.0, %v6148_v40  ;;  %v6163_v4 = vmul.f32 0.5, %v12541_v53  ;;  %v12549_v27 = vld [vmem:[#allocation17_spill] sm:$0xff] }
 0xfdb   :  { %8460 = vmatprep.mubr.f32.mxu1 %v6193_v46  ;;  %vm6117_vm3 = vcmp.ge.f32.partialorder %v12542_v6, 0.0  ;;  %v6164_v16 = vmul.f32 0.5, %v12543_v41  ;;  %v6165_v60 = vmul.f32 0.5, %v12544_v23  ;;  %v6166_v50 = vmul.f32 0.5, %v12545_v37  ;;  %v12550_v46 = vld [vmem:[#allocation16_spill] sm:$0xff] }
 0xfdc   :  { %v6083_v7 = vmul.f32 %v8893_v30, %v6003_v49  ;;  %v6005_v8 = vmul.f32 %v12233_v32, %v5989_v28  ;;  %v8895_v31 = vpop.eup %8894  ;;  %v6150_v32 = vsel %vm6118_vm2, %v6102_v51, %v6134_v25 }
 0xfdd   :  { %v6196_v15 = vmul.f32 %v6180_v29, %v6164_v16  ;;  %v6182_v57 = vadd.f32 1.0, %v6150_v32  ;;  %v12558_v16 = vld [vmem:[#allocation22_spill] sm:$0xff] }
 0xfde   :  { %8461 = vmatmul.mubr.f32.gmra.mxu1 %v6194_v45  ;;  %v6099_v5 = vsub.f32 1.0, %v6083_v7  ;;  %v6085_v35 = vmul.f32 %v8895_v31, %v6005_v8  ;;  %v12553_v8 = vld [vmem:[#allocation15_spill] sm:$0xff] }
 0xfdf   :  { %v6198_v43 = vmul.f32 %v6182_v57, %v6166_v50 }
 0xfe0   :  { %v6131_v54 = vsub.f32 0.0, %v6099_v5  ;;  %v6101_v44 = vsub.f32 1.0, %v6085_v35  ;;  %v12554_v35 = vld [vmem:[#allocation10_spill] sm:$0xff] }
 0xfe2   :  { %v6147_v33 = vsel %vm6115_vm1, %v6099_v5, %v6131_v54  ;;  %v6133_v19 = vsub.f32 0.0, %v6101_v44 }
 0xfe3   :  { %v6179_v10 = vadd.f32 1.0, %v6147_v33  ;;  %v12556_v33 = vld [vmem:[#allocation20_spill] sm:$0xff] }
 0xfe4   :  { %v6149_v62 = vsel %vm6117_vm3, %v6101_v44, %v6133_v19  ;;  %v12555_v44 = vld [vmem:[#allocation21_spill] sm:$0xff] }
 0xfe5   :  { %v6195_v20 = vmul.f32 %v6179_v10, %v6163_v4  ;;  %v6181_v9 = vadd.f32 1.0, %v6149_v62  ;;  %v12557_v4 = vld [vmem:[#allocation23_spill] sm:$0xff] }
 0xfe7   :  { %8463 = vmatprep.mubr.f32.mxu1 %v6195_v20  ;;  %v6197_v11 = vmul.f32 %v6181_v9, %v6165_v60  ;;  %v12559_v20 = vld [vmem:[#allocation25_spill] sm:$0xff] }
 0xfe8   :  { %8464 = vmatmul.mubr.f32.gmra.mxu1 %v6196_v15 }
 0xfe9   :  { %8466 = vmatprep.mubr.f32.mxu1 %v6197_v11  ;;  %v12560_v11 = vld [vmem:[#allocation24_spill] sm:$0xff] }
 0xfec   :  { %8467 = vmatmul.mubr.f32.gmra.mxu1 %v6198_v43  ;;  %v12561_v43 = vld [vmem:[#allocation27_spill] sm:$0xff] }
0x108a   :  { %v8447_v18 = vpop.f32.mrf.mxu1 }
0x108b   :  { %v6294_v12 = vadd.f32 %v8447_v18, %v6864_v14 }
0x108c   :  { %v6288_v39 = vpop.f32.mrf.mxu1 }
0x108d   :  { %v6368_v17 = vadd.f32 %v6294_v12, %v12546_v59  ;;  %v6289_v3 = vadd.f32 %v6864_v14, %v6288_v39 }
0x108e   :  { %v8450_v56 = vpop.f32.mrf.mxu1 }
0x108f   :  { %6384 = vst.msk [vmem:[%s12384_s16 + $0x8] sm:$0xff] %vm69_vm0, %v6368_v17  ;;  %v6367_v52 = vadd.f32 %v6289_v3, %v12547_v13  ;;  %v6304_v48 = vadd.f32 %v8450_v56, %v6864_v14 }
0x1090   :  { %v6298_v55 = vpop.f32.mrf.mxu1 }
0x1091   :  { %6383 = vst.msk [vmem:[%s12384_s16] sm:$0xff] %vm69_vm0, %v6367_v52  ;;  %v6370_v36 = vadd.f32 %v6304_v48, %v12548_v26  ;;  %v6299_v22 = vadd.f32 %v6864_v14, %v6298_v55 }
0x1092   :  { %v8453_v2 = vpop.f32.mrf.mxu1 }
0x1093   :  { %6386 = vst.msk [vmem:[%s12384_s16 + $0x18] sm:$0xff] %vm69_vm0, %v6370_v36  ;;  %v6369_v58 = vadd.f32 %v6299_v22, %v12549_v27  ;;  %v6314_v1 = vadd.f32 %v8453_v2, %v6864_v14 }
0x1094   :  { %v6308_v42 = vpop.f32.mrf.mxu1 }
0x1095   :  { %6385 = vst.msk [vmem:[%s12384_s16 + $0x10] sm:$0xff] %vm69_vm0, %v6369_v58  ;;  %v6372_v61 = vadd.f32 %v6314_v1, %v12550_v46  ;;  %v6309_v24 = vadd.f32 %v6864_v14, %v6308_v42 }
0x1096   :  { %v8456_v30 = vpop.f32.mrf.mxu1 }
0x1097   :  { %6388 = vst.msk [vmem:[%s12384_s16 + $0x28] sm:$0xff] %vm69_vm0, %v6372_v61  ;;  %v6371_v63 = vadd.f32 %v6309_v24, %v12551_v38  ;;  %v6324_v49 = vadd.f32 %v8456_v30, %v6864_v14 }
0x1098   :  { %v6318_v28 = vpop.f32.mrf.mxu1 }
0x1099   :  { %6387 = vst.msk [vmem:[%s12384_s16 + $0x20] sm:$0xff] %vm69_vm0, %v6371_v63  ;;  %v6374_v51 = vadd.f32 %v6324_v49, %v12552_v21  ;;  %v6319_v45 = vadd.f32 %v6864_v14, %v6318_v28 }
0x109a   :  { %v8459_v7 = vpop.f32.mrf.mxu1 }
0x109b   :  { %6390 = vst.msk [vmem:[%s12384_s16 + $0x38] sm:$0xff] %vm69_vm0, %v6374_v51  ;;  %v6373_v31 = vadd.f32 %v6319_v45, %v12553_v8  ;;  %v6334_v34 = vadd.f32 %v8459_v7, %v6864_v14 }
0x109c   :  { %v6328_v5 = vpop.f32.mrf.mxu1 }
0x109d   :  { %6389 = vst.msk [vmem:[%s12384_s16 + $0x30] sm:$0xff] %vm69_vm0, %v6373_v31  ;;  %v6376_v40 = vadd.f32 %v6334_v34, %v12554_v35  ;;  %v6329_v25 = vadd.f32 %v6864_v14, %v6328_v5 }
0x109e   :  { %v8462_v54 = vpop.f32.mrf.mxu1 }
0x109f   :  { %6392 = vst.msk [vmem:[%s12384_s16 + $0x48] sm:$0xff] %vm69_vm0, %v6376_v40  ;;  %v6375_v0 = vadd.f32 %v6329_v25, %v12555_v44  ;;  %v6344_v29 = vadd.f32 %v8462_v54, %v6864_v14 }
0x10a0   :  { %v6338_v47 = vpop.f32.mrf.mxu1 }
0x10a1   :  { %6391 = vst.msk [vmem:[%s12384_s16 + $0x40] sm:$0xff] %vm69_vm0, %v6375_v0  ;;  %v6378_v19 = vadd.f32 %v6344_v29, %v12556_v33  ;;  %v6339_v53 = vadd.f32 %v6864_v14, %v6338_v47 }
0x10a3   :  { %6394 = vst.msk [vmem:[%s12384_s16 + $0x58] sm:$0xff] %vm69_vm0, %v6378_v19  ;;  %v6377_v32 = vadd.f32 %v6339_v53, %v12557_v4 }
0x10a5   :  { %6393 = vst.msk [vmem:[%s12384_s16 + $0x50] sm:$0xff] %vm69_vm0, %v6377_v32 }
0x10a8   :  { %v8465_v6 = vpop.f32.mrf.mxu1 }
0x10a9   :  { %v6354_v10 = vadd.f32 %v8465_v6, %v6864_v14 }
0x10aa   :  { %v6348_v41 = vpop.f32.mrf.mxu1 }
0x10ab   :  { %v6380_v62 = vadd.f32 %v6354_v10, %v12558_v16  ;;  %v6349_v23 = vadd.f32 %v6864_v14, %v6348_v41 }
0x10ac   :  { %v8468_v60 = vpop.f32.mrf.mxu1 }
0x10ad   :  { %6396 = vst.msk [vmem:[%s12384_s16 + $0x68] sm:$0xff] %vm69_vm0, %v6380_v62  ;;  %v6379_v9 = vadd.f32 %v6349_v23, %v12559_v20  ;;  %v6364_v15 = vadd.f32 %v8468_v60, %v6864_v14 }
0x10ae   :  { %v6358_v57 = vpop.f32.mrf.mxu1 }
0x10af   :  { %6395 = vst.msk [vmem:[%s12384_s16 + $0x60] sm:$0xff] %vm69_vm0, %v6379_v9  ;;  %v6382_v37 = vadd.f32 %v6364_v15, %v12560_v11  ;;  %v6359_v50 = vadd.f32 %v6864_v14, %v6358_v57 }
0x10b1   :  { %6398 = vst.msk [vmem:[%s12384_s16 + $0x78] sm:$0xff] %vm69_vm0, %v6382_v37  ;;  %v6381_v18 = vadd.f32 %v6359_v50, %v12561_v43 }
0x10b3   :  { %6397 = vst.msk [vmem:[%s12384_s16 + $0x70] sm:$0xff] %vm69_vm0, %v6381_v18 }

</bundles_post_ra>
